<compile_context>
chip_gen: v6e
topology: v6e:2x2x1
jax: 0.10.0
libtpu: 0.0.40
codegen_flags: <defaults>
</compile_context>

<pallas_src>
import functools

import numpy as np
import jax
import jax.numpy as jnp
from jax.experimental import pallas as pl
from jax.experimental.pallas import tpu as pltpu

_LANE = 128
_FUSE_VMEM_BUDGET = 16 << 20   # fuse the whole stack only if it fits comfortably


def _round_up(v, m):
    return (v + m - 1) // m * m


def _apply_act(y, act):
    """Mirror of get_activation_fn: known names -> fn, unknown -> identity."""
    if act == "ReLU":
        return jnp.maximum(y, 0.0)
    if act == "Tanh":
        return jnp.tanh(y)
    if act == "Sigmoid":
        return jax.nn.sigmoid(y)
    if act == "GELU":
        return jax.nn.gelu(y)
    if act == "LeakyReLU":
        return jnp.where(y > 0, y, 0.01 * y)
    # TODO(synk): other torch.nn activations fall back to identity here.
    return y


def _choose_row_tile(Ho, Wo, Wp, Cp, Cop, cin, stride, KH,
                     target_m=256, vmem_budget=20 << 20):
    """Pick TH so M = TH*Wo is large (~256+), TH*Wo % 8 == 0 (dense stores),
    and the per-step VMEM footprint stays under budget (v7x-safe)."""
    th = max(1, -(-target_m // max(Wo, 1)))
    th = min(th, max(Ho, 1))

    def _fix8(t):
        for d in range(8):
            if ((t + d) * Wo) % 8 == 0:
                return t + d
        return t

    def _step_bytes(t):
        th_in = (t - 1) * stride + KH
        band = th_in * Wp * Cp * 2
        out_blk = 2 * t * Wo * Cop * 2
        acc = t * Wo * Cop * 4
        taps = 2 * t * Wo * max(cin, 8) * 4
        return band + out_blk + acc + taps

    th = _fix8(th)
    while th > 1 and _step_bytes(th) > vmem_budget:
        smaller = _fix8(max(1, th // 2))
        if smaller >= th:
            break
        th = smaller
    return th


# --------------------------------------------------------------------------
# Tiled per-layer path: grid = (batch, output-row-block), manual band DMA.
# --------------------------------------------------------------------------
def _conv_tile_kernel(x_hbm, w_ref, scale_ref, shift_ref, o_ref, band_ref, sem,
                      *, KH, KW, TH, Wo, stride, cin, act):
    """One (batch, row-block) tile: conv + (bias / folded BN) + activation.

    x_hbm:   (N, Hp_pad, Wp, Cp)   raw HBM ref (pl.ANY), bf16
    w_ref:   (KH*KW, cin, Cop)     per-tap weights, real input channels, bf16
    scale/shift: (1, Cop)          folded BN / bias, f32
    o_ref:   (TH*Wo, Cop)          flattened lane-dense output block, bf16
    band_ref:(th_in, Wp, Cp)       VMEM scratch for the input row band (+halo)
    """
    n = pl.program_id(0)
    r = pl.program_id(1)
    th_in = (TH - 1) * stride + KH

    row0 = r * (TH * stride)
    if (TH * stride) % 8 == 0:
        row0 = pl.multiple_of(row0, 8)

    # Manual DMA of only the row band this tile needs (bounded VMEM footprint).
    # TODO(synk): double-buffer across grid steps to overlap DMA with compute.
    cp = pltpu.make_async_copy(x_hbm.at[n, pl.ds(row0, th_in)], band_ref, sem.at[0])
    cp.start()
    cp.wait()

    band = band_ref[...]                       # (th_in, Wp, Cp)
    Cop = o_ref.shape[-1]

    # KH*KW accumulating MXU dots with K = real cin (no padded-K im2col,
    # no concatenate copies).
    acc = jnp.zeros((TH * Wo, Cop), jnp.float32)
    for kh in range(KH):
        if stride == 1:
            rows = band[kh:kh + TH]
        else:
            rows = jax.lax.slice(
                band, (kh, 0, 0),
                (kh + (TH - 1) * stride + 1, band.shape[1], band.shape[2]),
                (stride, 1, 1))
        for kw in range(KW):
            if stride == 1:
                tap = rows[:, kw:kw + Wo, :cin]
            else:
                tap = jax.lax.slice(rows, (0, kw, 0),
                                    (TH, kw + (Wo - 1) * stride + 1, cin),
                                    (1, stride, 1))
            acc = acc + jnp.dot(tap.reshape(TH * Wo, cin), w_ref[kh * KW + kw],
                                preferred_element_type=jnp.float32)

    y = acc * scale_ref[...] + shift_ref[...]
    y = _apply_act(y, act)
    o_ref[...] = y.astype(o_ref.dtype)         # dense (TH*Wo, Cop) store


def _conv_layer_tiled(x, w_taps, scale, shift, *, KH, KW, stride, padding, cin, act):
    """One CNN2D layer as a tiled Pallas call.

    x:      (N, H, W, Cp) bf16, channels zero-padded to a 128 multiple.
    w_taps: (KH*KW, cin, Cop) bf16; scale/shift: (1, Cop) f32.
    Returns (N, Ho, Wo, Cop) bf16 (padded channels never read downstream).
    """
    N, H, W, Cp = x.shape
    KK, cin_w, Cop = w_taps.shape
    assert KK == KH * KW and cin_w == cin and cin <= Cp

    Hp, Wp = H + 2 * padding, W + 2 * padding
    Ho = (Hp - KH) // stride + 1
    Wo = (Wp - KW) // stride + 1

    TH = _choose_row_tile(Ho, Wo, Wp, Cp, Cop, cin, stride, KH)
    R = -(-Ho // TH)
    Ho_p = R * TH
    th_in = (TH - 1) * stride + KH
    Hp_need = (Ho_p - 1) * stride + KH
    extra = max(0, Hp_need - Hp)               # extra zero rows so TH need not divide Ho

    xp = jnp.pad(x, ((0, 0), (padding, padding + extra), (padding, padding), (0, 0)))

    kernel = functools.partial(_conv_tile_kernel, KH=KH, KW=KW, TH=TH, Wo=Wo,
                               stride=stride, cin=cin, act=act)

    w_bytes = int(np.prod(w_taps.shape)) * 2
    est = (th_in * Wp * Cp * 2 + 2 * w_bytes + 4 * Cop * 4
           + 2 * TH * Wo * Cop * 2 + 2 * TH * Wo * Cop * 4
           + 2 * TH * Wo * max(cin, 8) * 4 + (2 << 20))
    vmem_limit = int(min(max(est + (8 << 20), 32 << 20), 112 << 20))

    flops = 2 * N * R * TH * Wo * (KH * KW * cin) * Cop
    trans = N * Ho_p * Wo * Cop if act in ("Tanh", "Sigmoid", "GELU") else 0
    bytes_acc = (N * R * th_in * Wp * Cp * 2 + w_bytes + 2 * Cop * 4
                 + N * Ho_p * Wo * Cop * 2)
    cost = pl.CostEstimate(flops=int(flops), transcendentals=int(trans),
                           bytes_accessed=int(bytes_acc))

    out = pl.pallas_call(
        kernel,
        out_shape=jax.ShapeDtypeStruct((N, Ho_p * Wo, Cop), jnp.bfloat16),
        grid=(N, R),
        in_specs=[
            pl.BlockSpec(memory_space=pl.ANY),                      # raw HBM image
            pl.BlockSpec((KK, cin, Cop), lambda n, r: (0, 0, 0)),   # weights resident
            pl.BlockSpec((1, Cop), lambda n, r: (0, 0)),
            pl.BlockSpec((1, Cop), lambda n, r: (0, 0)),
        ],
        out_specs=pl.BlockSpec((None, TH * Wo, Cop), lambda n, r: (n, r, 0)),
        scratch_shapes=[
            pltpu.VMEM((th_in, Wp, Cp), jnp.bfloat16),              # row band (+halo)
            pltpu.SemaphoreType.DMA((1,)),
        ],
        compiler_params=pltpu.CompilerParams(
            dimension_semantics=("parallel", "parallel"),
            vmem_limit_bytes=vmem_limit),
        cost_estimate=cost,
    )(xp, w_taps, scale, shift)

    # Drop the Ho padding rows; keep channel padding (next layer reads [:cin]).
    return out.reshape(N, Ho_p, Wo, Cop)[:, :Ho]


# --------------------------------------------------------------------------
# Fused path: the whole layer stack in one pallas_call (intermediates in VMEM).
# --------------------------------------------------------------------------
def _fused_stack_kernel(*refs, metas):
    x_ref = refs[0]
    o_ref = refs[-1]
    params = refs[1:-1]
    n_layers = len(metas)

    x = x_ref[...]                                         # (Hp, Wp, C0) bf16
    for li, m in enumerate(metas):
        w_ref, s_ref, b_ref = params[3 * li:3 * li + 3]
        k, s, pad, cin = m["k"], m["stride"], m["pad"], m["cin"]
        if pad:
            H0, W0, C0 = x.shape
            zr = jnp.zeros((pad, W0, C0), x.dtype)
            x = jnp.concatenate([zr, x, zr], axis=0)
            zc = jnp.zeros((H0 + 2 * pad, pad, C0), x.dtype)
            x = jnp.concatenate([zc, x, zc], axis=1)
        Hp, Wp = x.shape[0], x.shape[1]
        Ho = (Hp - k) // s + 1
        Wo = (Wp - k) // s + 1
        cout = w_ref.shape[-1]

        acc = jnp.zeros((Ho * Wo, cout), jnp.float32)
        for kh in range(k):
            if s == 1:
                rows = x[kh:kh + Ho]
            else:
                rows = jax.lax.slice(x, (kh, 0, 0),
                                     (kh + (Ho - 1) * s + 1, Wp, x.shape[2]),
                                     (s, 1, 1))
            for kw in range(k):
                if s == 1:
                    tap = rows[:, kw:kw + Wo, :cin]
                else:
                    tap = jax.lax.slice(rows, (0, kw, 0),
                                        (Ho, kw + (Wo - 1) * s + 1, cin),
                                        (1, s, 1))
                acc = acc + jnp.dot(tap.reshape(Ho * Wo, cin), w_ref[kh * k + kw],
                                    preferred_element_type=jnp.float32)

        y = acc * s_ref[...] + b_ref[...]
        y = _apply_act(y, m["act"])
        if li == n_layers - 1:
            o_ref[...] = y.astype(o_ref.dtype)             # (M_last, Cop_last)
        else:
            x = y.astype(jnp.bfloat16).reshape(Ho, Wo, cout)


# --------------------------------------------------------------------------
# Model wrapper.
# --------------------------------------------------------------------------
class CNN2DPallas:
    """Pallas equivalent of CNN2D (build_model + forward), eval-mode BN."""

    def __init__(self, key, *, input_size, num_layer, unit_size, kernel_size,
                 activation_fn, padding=None, stride=None,
                 batch_norm=None, bias=None):
        self.num_layer = num_layer
        self.input_size = input_size
        self.padding = padding or [0] * num_layer
        self.stride = stride or [1] * num_layer
        self.batch_norm = batch_norm or [False] * num_layer
        self.bias = bias or [True] * num_layer

        self.layers = []
        cin = input_size
        eps = 1e-5
        for l in range(num_layer):
            cout = unit_size[l]
            k = kernel_size[l]
            key, kw_, kb_, kg_, kbt_, km_, kv_ = jax.random.split(key, 7)
            w = (jax.random.normal(kw_, (k, k, cin, cout), jnp.float32)
                 * (1.0 / np.sqrt(k * k * cin)))
            b = (jax.random.normal(kb_, (cout,), jnp.float32) * 0.1
                 if self.bias[l] else jnp.zeros((cout,), jnp.float32))
            if self.batch_norm[l]:
                gamma = jax.random.uniform(kg_, (cout,), jnp.float32, 0.5, 1.5)
                beta = jax.random.normal(kbt_, (cout,), jnp.float32) * 0.1
                r_mean = jax.random.normal(km_, (cout,), jnp.float32) * 0.1
                r_var = jax.random.uniform(kv_, (cout,), jnp.float32, 0.5, 1.5)
                scale = gamma / jnp.sqrt(r_var + eps)
                shift = (b - r_mean) * scale + beta
            else:
                scale = jnp.ones((cout,), jnp.float32)
                shift = b

            # Contraction uses REAL input channels; only the output channel dim
            # is padded to a lane multiple (dense stores). On v6e/v7x, rounding
            # large cout to 256 would additionally fill the 2x256^2 MXU width.
            cop = _round_up(cout, _LANE)
            w_taps = w.reshape(k * k, cin, cout)
            w_taps_real = w_taps.astype(jnp.bfloat16)
            w_taps_pad = (jnp.zeros((k * k, cin, cop), jnp.float32)
                          .at[:, :, :cout].set(w_taps).astype(jnp.bfloat16))
            scale_real = scale.reshape(1, cout)
            shift_real = shift.reshape(1, cout)
            scale_pad = jnp.zeros((1, cop), jnp.float32).at[0, :cout].set(scale)
            shift_pad = jnp.zeros((1, cop), jnp.float32).at[0, :cout].set(shift)

            self.layers.append(dict(
                w=w, scale=scale, shift=shift,                       # f32 reference
                w_taps_real=w_taps_real, w_taps_pad=w_taps_pad,
                scale_real=scale_real, shift_real=shift_real,
                scale_pad=scale_pad, shift_pad=shift_pad,
                k=k, cin=cin, cout=cout,
                stride=self.stride[l], padding=self.padding[l],
                act=activation_fn[l]))
            cin = cout

    # -------------------- fused whole-stack path --------------------
    def _fused_vmem_estimate(self, H, W, c0):
        def rup(c):
            return _round_up(max(int(c), 1), _LANE)
        p0 = self.layers[0]["padding"]
        h, w, cin = H + 2 * p0, W + 2 * p0, c0
        total = 2 * h * w * rup(cin) * 2
        peak = 0
        n_layers = len(self.layers)
        for li, p in enumerate(self.layers):
            k, s = p["k"], p["stride"]
            pad = 0 if li == 0 else p["padding"]
            hp, wp = h + 2 * pad, w + 2 * pad
            ho, wo = (hp - k) // s + 1, (wp - k) // s + 1
            cout = p["cout"]
            cop = rup(cout) if li == n_layers - 1 else cout
            total += 2 * (k * k * max(cin, 8) * rup(cop) * 2 + 2 * rup(cop) * 4)
            live = (2 * hp * wp * rup(cin) * 2 + ho * wo * rup(cop) * 4
                    + ho * wo * rup(cout) * 2 + ho * wo * rup(cin) * 2)
            peak = max(peak, live)
            h, w, cin = ho, wo, cout
        total += 2 * h * w * rup(self.layers[-1]["cout"]) * 2
        return int(total + peak)

    def _forward_fused(self, x_nhwc):
        N, H, W, c0 = x_nhwc.shape
        p0 = self.layers[0]["padding"]
        xp = jnp.pad(x_nhwc, ((0, 0), (p0, p0), (p0, p0), (0, 0))).astype(jnp.bfloat16)
        Hp, Wp = H + 2 * p0, W + 2 * p0

        inputs = [xp]
        in_specs = [pl.BlockSpec((None, Hp, Wp, c0), lambda n: (n, 0, 0, 0))]
        metas = []
        h, w, cin = Hp, Wp, c0
        n_layers = len(self.layers)
        for li, p in enumerate(self.layers):
            k, s = p["k"], p["stride"]
            pad = 0 if li == 0 else p["padding"]
            hp, wp = h + 2 * pad, w + 2 * pad
            ho, wo = (hp - k) // s + 1, (wp - k) // s + 1
            last = li == n_layers - 1
            w_arr = p["w_taps_pad"] if last else p["w_taps_real"]
            sc = p["scale_pad"] if last else p["scale_real"]
            sh = p["shift_pad"] if last else p["shift_real"]
            inputs += [w_arr, sc, sh]
            in_specs += [pl.BlockSpec(tuple(w_arr.shape), lambda n: (0, 0, 0)),
                         pl.BlockSpec(tuple(sc.shape), lambda n: (0, 0)),
                         pl.BlockSpec(tuple(sh.shape), lambda n: (0, 0))]
            metas.append(dict(k=k, stride=s, pad=pad, cin=cin, act=p["act"]))
            h, w, cin = ho, wo, p["cout"]

        cop_last = int(self.layers[-1]["w_taps_pad"].shape[-1])
        m_last = h * w
        kernel = functools.partial(_fused_stack_kernel, metas=tuple(metas))

        est = self._fused_vmem_estimate(H, W, c0)
        vmem_limit = int(min(max(2 * est, 32 << 20), 112 << 20))

        out = pl.pallas_call(
            kernel,
            out_shape=jax.ShapeDtypeStruct((N, m_last, cop_last), jnp.bfloat16),
            grid=(N,),
            in_specs=in_specs,
            out_specs=pl.BlockSpec((None, m_last, cop_last), lambda n: (n, 0, 0)),
            compiler_params=pltpu.CompilerParams(
                dimension_semantics=("parallel",),
                vmem_limit_bytes=vmem_limit),
        )(*inputs)

        out = out.reshape(N, h, w, cop_last)[..., : self.layers[-1]["cout"]]
        return out.astype(jnp.float32)

    # -------------------- tiled per-layer path --------------------
    def _forward_tiled(self, x_nhwc):
        N, H, W, c0 = x_nhwc.shape
        cp0 = _round_up(c0, _LANE)
        x = jnp.pad(x_nhwc, ((0, 0), (0, 0), (0, 0), (0, cp0 - c0))).astype(jnp.bfloat16)
        for p in self.layers:
            x = _conv_layer_tiled(x, p["w_taps_pad"], p["scale_pad"], p["shift_pad"],
                                  KH=p["k"], KW=p["k"], stride=p["stride"],
                                  padding=p["padding"], cin=p["cin"], act=p["act"])
        return x[..., : self.layers[-1]["cout"]].astype(jnp.float32)

    # -------------------- public forward --------------------
    def forward(self, feature, force_tiled=False, force_fused=False):
        """feature: list with one NCHW tensor (matches the torch forward)."""
        assert isinstance(feature, list), "Class of feature must be List."
        x = feature[0]                               # (N, C, H, W) f32
        x = jnp.transpose(x, (0, 2, 3, 1))           # -> NHWC
        N, H, W, c0 = x.shape
        use_fused = force_fused or (
            not force_tiled
            and self._fused_vmem_estimate(H, W, c0) <= _FUSE_VMEM_BUDGET)
        y = self._forward_fused(x) if use_fused else self._forward_tiled(x)
        return jnp.transpose(y, (0, 3, 1, 2))        # back to NCHW


def _reference_forward(model, x_nchw):
    """Pure-JAX (XLA conv, f32) reference for correctness checking."""
    x = jnp.transpose(x_nchw, (0, 2, 3, 1))
    for p in model.layers:
        pad = p["padding"]
        y = jax.lax.conv_general_dilated(
            x, p["w"], window_strides=(p["stride"], p["stride"]),
            padding=[(pad, pad), (pad, pad)],
            dimension_numbers=("NHWC", "HWIO", "NHWC"))
        y = y * p["scale"][None, None, None, :] + p["shift"][None, None, None, :]
        y = _apply_act(y, p["act"])
        x = y
    return jnp.transpose(x, (0, 3, 1, 2))


if __name__ == "__main__":
    key = jax.random.PRNGKey(0)
    key, kx = jax.random.split(key)

    # Config consistent with CNN2D(__init__/build_model):
    #   layer 1: Conv2d(4 -> 8, k=3, s=1, p=1, bias) + BatchNorm2d(8) + ReLU
    #   layer 2: Conv2d(8 -> 16, k=3, s=1, p=0, bias) + Tanh
    model = CNN2DPallas(
        key,
        input_size=4, num_layer=2,
        unit_size=[8, 16], kernel_size=[3, 3],
        activation_fn=["ReLU", "Tanh"],
        padding=[1, 0], stride=[1, 1],
        batch_norm=[True, False], bias=[True, True])

    x = jax.random.normal(kx, (2, 4, 16, 16), jnp.float32)   # NCHW, like torch

    fwd_auto = jax.jit(lambda a: model.forward([a]))                  # fused here
    fwd_tiled = jax.jit(lambda a: model.forward([a], force_tiled=True))

    out_fused = jax.block_until_ready(fwd_auto(x))
    out_tiled = jax.block_until_ready(fwd_tiled(x))

    ref = jax.block_until_ready(_reference_forward(model, x))
    assert out_fused.shape == (2, 16, 14, 14), out_fused.shape
    assert out_tiled.shape == (2, 16, 14, 14), out_tiled.shape
    # bf16 MXU inputs -> looser tolerance than a pure-f32 pipeline.
    np.testing.assert_allclose(np.asarray(out_fused), np.asarray(ref),
                               rtol=2e-2, atol=2e-2)
    np.testing.assert_allclose(np.asarray(out_tiled), np.asarray(ref),
                               rtol=2e-2, atol=2e-2)

    print("KERNEL_OK")
</pallas_src>

<mosaic_0001>
module attributes {stable_mosaic.version = 11 : i64} {
  func.func @_fused_stack_kernel(%arg0: i32, %arg1: memref<1x18x18x4xbf16, #tpu.memory_space<vmem>>, %arg2: memref<9x4x8xbf16, #tpu.memory_space<vmem>>, %arg3: memref<1x8xf32, #tpu.memory_space<vmem>>, %arg4: memref<1x8xf32, #tpu.memory_space<vmem>>, %arg5: memref<9x8x128xbf16, #tpu.memory_space<vmem>>, %arg6: memref<1x128xf32, #tpu.memory_space<vmem>>, %arg7: memref<1x128xf32, #tpu.memory_space<vmem>>, %arg8: memref<1x196x128xbf16, #tpu.memory_space<vmem>>) attributes {dimension_semantics = [#tpu.dimension_semantics<parallel>], iteration_bounds = array<i64: 2>, scalar_prefetch = 0 : i64, scratch_operands = 0 : i64, tpu.core_type = #tpu.core_type<tc>, window_params = [{transform_indices = @transform_0, window_bounds = array<i64: 1, 18, 18, 4>}, {pipeline_mode = #tpu.pipeline_mode<synchronous>, transform_indices = @transform_1, window_bounds = array<i64: 9, 4, 8>}, {pipeline_mode = #tpu.pipeline_mode<synchronous>, transform_indices = @transform_2, window_bounds = array<i64: 1, 8>}, {pipeline_mode = #tpu.pipeline_mode<synchronous>, transform_indices = @transform_3, window_bounds = array<i64: 1, 8>}, {pipeline_mode = #tpu.pipeline_mode<synchronous>, transform_indices = @transform_4, window_bounds = array<i64: 9, 8, 128>}, {pipeline_mode = #tpu.pipeline_mode<synchronous>, transform_indices = @transform_5, window_bounds = array<i64: 1, 128>}, {pipeline_mode = #tpu.pipeline_mode<synchronous>, transform_indices = @transform_6, window_bounds = array<i64: 1, 128>}, {transform_indices = @transform_7, window_bounds = array<i64: 1, 196, 128>}]} {
    %c0 = arith.constant 0 : index
    %c0_0 = arith.constant 0 : index
    %c0_1 = arith.constant 0 : index
    %c0_2 = arith.constant 0 : index
    %0 = vector.load %arg1[%c0, %c0_0, %c0_1, %c0_2] : memref<1x18x18x4xbf16, #tpu.memory_space<vmem>>, vector<1x18x18x4xbf16>
    %1 = vector.shape_cast %0 : vector<1x18x18x4xbf16> to vector<18x18x4xbf16>
    %cst = arith.constant 0.000000e+00 : f32
    %2 = vector.broadcast %cst : f32 to vector<256x8xf32>
    %3 = vector.extract_strided_slice %1 {offsets = [0, 0, 0], sizes = [16, 18, 4], strides = [1, 1, 1]} : vector<18x18x4xbf16> to vector<16x18x4xbf16>
    %4 = vector.extract_strided_slice %3 {offsets = [0, 0, 0], sizes = [16, 16, 4], strides = [1, 1, 1]} : vector<16x18x4xbf16> to vector<16x16x4xbf16>
    %5 = vector.shape_cast %4 : vector<16x16x4xbf16> to vector<256x4xbf16>
    %c0_3 = arith.constant 0 : index
    %c0_4 = arith.constant 0 : index
    %c0_5 = arith.constant 0 : index
    %6 = vector.load %arg2[%c0_3, %c0_4, %c0_5] : memref<9x4x8xbf16, #tpu.memory_space<vmem>>, vector<1x4x8xbf16>
    %7 = vector.shape_cast %6 : vector<1x4x8xbf16> to vector<4x8xbf16>
    %cst_6 = arith.constant dense<0.000000e+00> : vector<256x8xf32>
    %8 = tpu.matmul %5, %7, %cst_6 {dimension_numbers = #tpu.dot_dimension_numbers<[1], [0], [0], [1], [0, 0, 1, 1], [], []>} : vector<256x4xbf16>, vector<4x8xbf16>, vector<256x8xf32> -> vector<256x8xf32>
    %9 = arith.addf %2, %8 : vector<256x8xf32>
    %10 = vector.extract_strided_slice %3 {offsets = [0, 1, 0], sizes = [16, 16, 4], strides = [1, 1, 1]} : vector<16x18x4xbf16> to vector<16x16x4xbf16>
    %11 = vector.shape_cast %10 : vector<16x16x4xbf16> to vector<256x4xbf16>
    %c1 = arith.constant 1 : index
    %c0_7 = arith.constant 0 : index
    %c0_8 = arith.constant 0 : index
    %12 = vector.load %arg2[%c1, %c0_7, %c0_8] : memref<9x4x8xbf16, #tpu.memory_space<vmem>>, vector<1x4x8xbf16>
    %13 = vector.shape_cast %12 : vector<1x4x8xbf16> to vector<4x8xbf16>
    %cst_9 = arith.constant dense<0.000000e+00> : vector<256x8xf32>
    %14 = tpu.matmul %11, %13, %cst_9 {dimension_numbers = #tpu.dot_dimension_numbers<[1], [0], [0], [1], [0, 0, 1, 1], [], []>} : vector<256x4xbf16>, vector<4x8xbf16>, vector<256x8xf32> -> vector<256x8xf32>
    %15 = arith.addf %9, %14 : vector<256x8xf32>
    %16 = vector.extract_strided_slice %3 {offsets = [0, 2, 0], sizes = [16, 16, 4], strides = [1, 1, 1]} : vector<16x18x4xbf16> to vector<16x16x4xbf16>
    %17 = vector.shape_cast %16 : vector<16x16x4xbf16> to vector<256x4xbf16>
    %c2 = arith.constant 2 : index
    %c0_10 = arith.constant 0 : index
    %c0_11 = arith.constant 0 : index
    %18 = vector.load %arg2[%c2, %c0_10, %c0_11] : memref<9x4x8xbf16, #tpu.memory_space<vmem>>, vector<1x4x8xbf16>
    %19 = vector.shape_cast %18 : vector<1x4x8xbf16> to vector<4x8xbf16>
    %cst_12 = arith.constant dense<0.000000e+00> : vector<256x8xf32>
    %20 = tpu.matmul %17, %19, %cst_12 {dimension_numbers = #tpu.dot_dimension_numbers<[1], [0], [0], [1], [0, 0, 1, 1], [], []>} : vector<256x4xbf16>, vector<4x8xbf16>, vector<256x8xf32> -> vector<256x8xf32>
    %21 = arith.addf %15, %20 : vector<256x8xf32>
    %22 = vector.extract_strided_slice %1 {offsets = [1, 0, 0], sizes = [16, 18, 4], strides = [1, 1, 1]} : vector<18x18x4xbf16> to vector<16x18x4xbf16>
    %23 = vector.extract_strided_slice %22 {offsets = [0, 0, 0], sizes = [16, 16, 4], strides = [1, 1, 1]} : vector<16x18x4xbf16> to vector<16x16x4xbf16>
    %24 = vector.shape_cast %23 : vector<16x16x4xbf16> to vector<256x4xbf16>
    %c3 = arith.constant 3 : index
    %c0_13 = arith.constant 0 : index
    %c0_14 = arith.constant 0 : index
    %25 = vector.load %arg2[%c3, %c0_13, %c0_14] : memref<9x4x8xbf16, #tpu.memory_space<vmem>>, vector<1x4x8xbf16>
    %26 = vector.shape_cast %25 : vector<1x4x8xbf16> to vector<4x8xbf16>
    %cst_15 = arith.constant dense<0.000000e+00> : vector<256x8xf32>
    %27 = tpu.matmul %24, %26, %cst_15 {dimension_numbers = #tpu.dot_dimension_numbers<[1], [0], [0], [1], [0, 0, 1, 1], [], []>} : vector<256x4xbf16>, vector<4x8xbf16>, vector<256x8xf32> -> vector<256x8xf32>
    %28 = arith.addf %21, %27 : vector<256x8xf32>
    %29 = vector.extract_strided_slice %22 {offsets = [0, 1, 0], sizes = [16, 16, 4], strides = [1, 1, 1]} : vector<16x18x4xbf16> to vector<16x16x4xbf16>
    %30 = vector.shape_cast %29 : vector<16x16x4xbf16> to vector<256x4xbf16>
    %c4 = arith.constant 4 : index
    %c0_16 = arith.constant 0 : index
    %c0_17 = arith.constant 0 : index
    %31 = vector.load %arg2[%c4, %c0_16, %c0_17] : memref<9x4x8xbf16, #tpu.memory_space<vmem>>, vector<1x4x8xbf16>
    %32 = vector.shape_cast %31 : vector<1x4x8xbf16> to vector<4x8xbf16>
    %cst_18 = arith.constant dense<0.000000e+00> : vector<256x8xf32>
    %33 = tpu.matmul %30, %32, %cst_18 {dimension_numbers = #tpu.dot_dimension_numbers<[1], [0], [0], [1], [0, 0, 1, 1], [], []>} : vector<256x4xbf16>, vector<4x8xbf16>, vector<256x8xf32> -> vector<256x8xf32>
    %34 = arith.addf %28, %33 : vector<256x8xf32>
    %35 = vector.extract_strided_slice %22 {offsets = [0, 2, 0], sizes = [16, 16, 4], strides = [1, 1, 1]} : vector<16x18x4xbf16> to vector<16x16x4xbf16>
    %36 = vector.shape_cast %35 : vector<16x16x4xbf16> to vector<256x4xbf16>
    %c5 = arith.constant 5 : index
    %c0_19 = arith.constant 0 : index
    %c0_20 = arith.constant 0 : index
    %37 = vector.load %arg2[%c5, %c0_19, %c0_20] : memref<9x4x8xbf16, #tpu.memory_space<vmem>>, vector<1x4x8xbf16>
    %38 = vector.shape_cast %37 : vector<1x4x8xbf16> to vector<4x8xbf16>
    %cst_21 = arith.constant dense<0.000000e+00> : vector<256x8xf32>
    %39 = tpu.matmul %36, %38, %cst_21 {dimension_numbers = #tpu.dot_dimension_numbers<[1], [0], [0], [1], [0, 0, 1, 1], [], []>} : vector<256x4xbf16>, vector<4x8xbf16>, vector<256x8xf32> -> vector<256x8xf32>
    %40 = arith.addf %34, %39 : vector<256x8xf32>
    %41 = vector.extract_strided_slice %1 {offsets = [2, 0, 0], sizes = [16, 18, 4], strides = [1, 1, 1]} : vector<18x18x4xbf16> to vector<16x18x4xbf16>
    %42 = vector.extract_strided_slice %41 {offsets = [0, 0, 0], sizes = [16, 16, 4], strides = [1, 1, 1]} : vector<16x18x4xbf16> to vector<16x16x4xbf16>
    %43 = vector.shape_cast %42 : vector<16x16x4xbf16> to vector<256x4xbf16>
    %c6 = arith.constant 6 : index
    %c0_22 = arith.constant 0 : index
    %c0_23 = arith.constant 0 : index
    %44 = vector.load %arg2[%c6, %c0_22, %c0_23] : memref<9x4x8xbf16, #tpu.memory_space<vmem>>, vector<1x4x8xbf16>
    %45 = vector.shape_cast %44 : vector<1x4x8xbf16> to vector<4x8xbf16>
    %cst_24 = arith.constant dense<0.000000e+00> : vector<256x8xf32>
    %46 = tpu.matmul %43, %45, %cst_24 {dimension_numbers = #tpu.dot_dimension_numbers<[1], [0], [0], [1], [0, 0, 1, 1], [], []>} : vector<256x4xbf16>, vector<4x8xbf16>, vector<256x8xf32> -> vector<256x8xf32>
    %47 = arith.addf %40, %46 : vector<256x8xf32>
    %48 = vector.extract_strided_slice %41 {offsets = [0, 1, 0], sizes = [16, 16, 4], strides = [1, 1, 1]} : vector<16x18x4xbf16> to vector<16x16x4xbf16>
    %49 = vector.shape_cast %48 : vector<16x16x4xbf16> to vector<256x4xbf16>
    %c7 = arith.constant 7 : index
    %c0_25 = arith.constant 0 : index
    %c0_26 = arith.constant 0 : index
    %50 = vector.load %arg2[%c7, %c0_25, %c0_26] : memref<9x4x8xbf16, #tpu.memory_space<vmem>>, vector<1x4x8xbf16>
    %51 = vector.shape_cast %50 : vector<1x4x8xbf16> to vector<4x8xbf16>
    %cst_27 = arith.constant dense<0.000000e+00> : vector<256x8xf32>
    %52 = tpu.matmul %49, %51, %cst_27 {dimension_numbers = #tpu.dot_dimension_numbers<[1], [0], [0], [1], [0, 0, 1, 1], [], []>} : vector<256x4xbf16>, vector<4x8xbf16>, vector<256x8xf32> -> vector<256x8xf32>
    %53 = arith.addf %47, %52 : vector<256x8xf32>
    %54 = vector.extract_strided_slice %41 {offsets = [0, 2, 0], sizes = [16, 16, 4], strides = [1, 1, 1]} : vector<16x18x4xbf16> to vector<16x16x4xbf16>
    %55 = vector.shape_cast %54 : vector<16x16x4xbf16> to vector<256x4xbf16>
    %c8 = arith.constant 8 : index
    %c0_28 = arith.constant 0 : index
    %c0_29 = arith.constant 0 : index
    %56 = vector.load %arg2[%c8, %c0_28, %c0_29] : memref<9x4x8xbf16, #tpu.memory_space<vmem>>, vector<1x4x8xbf16>
    %57 = vector.shape_cast %56 : vector<1x4x8xbf16> to vector<4x8xbf16>
    %cst_30 = arith.constant dense<0.000000e+00> : vector<256x8xf32>
    %58 = tpu.matmul %55, %57, %cst_30 {dimension_numbers = #tpu.dot_dimension_numbers<[1], [0], [0], [1], [0, 0, 1, 1], [], []>} : vector<256x4xbf16>, vector<4x8xbf16>, vector<256x8xf32> -> vector<256x8xf32>
    %59 = arith.addf %53, %58 : vector<256x8xf32>
    %c0_31 = arith.constant 0 : index
    %c0_32 = arith.constant 0 : index
    %60 = vector.load %arg3[%c0_31, %c0_32] : memref<1x8xf32, #tpu.memory_space<vmem>>, vector<1x8xf32>
    %61 = vector.broadcast %60 : vector<1x8xf32> to vector<256x8xf32>
    %62 = arith.mulf %59, %61 : vector<256x8xf32>
    %c0_33 = arith.constant 0 : index
    %c0_34 = arith.constant 0 : index
    %63 = vector.load %arg4[%c0_33, %c0_34] : memref<1x8xf32, #tpu.memory_space<vmem>>, vector<1x8xf32>
    %64 = vector.broadcast %63 : vector<1x8xf32> to vector<256x8xf32>
    %65 = arith.addf %62, %64 : vector<256x8xf32>
    %cst_35 = arith.constant 0.000000e+00 : f32
    %66 = vector.broadcast %cst_35 : f32 to vector<256x8xf32>
    %67 = arith.maximumf %65, %66 : vector<256x8xf32>
    %68 = arith.truncf %67 : vector<256x8xf32> to vector<256x8xbf16>
    %69 = vector.shape_cast %68 : vector<256x8xbf16> to vector<16x16x8xbf16>
    %cst_36 = arith.constant 0.000000e+00 : f32
    %70 = vector.broadcast %cst_36 : f32 to vector<196x128xf32>
    %71 = vector.extract_strided_slice %69 {offsets = [0, 0, 0], sizes = [14, 16, 8], strides = [1, 1, 1]} : vector<16x16x8xbf16> to vector<14x16x8xbf16>
    %72 = vector.extract_strided_slice %71 {offsets = [0, 0, 0], sizes = [14, 14, 8], strides = [1, 1, 1]} : vector<14x16x8xbf16> to vector<14x14x8xbf16>
    %73 = vector.shape_cast %72 : vector<14x14x8xbf16> to vector<196x8xbf16>
    %c0_37 = arith.constant 0 : index
    %c0_38 = arith.constant 0 : index
    %c0_39 = arith.constant 0 : index
    %74 = vector.load %arg5[%c0_37, %c0_38, %c0_39] : memref<9x8x128xbf16, #tpu.memory_space<vmem>>, vector<1x8x128xbf16>
    %75 = vector.shape_cast %74 : vector<1x8x128xbf16> to vector<8x128xbf16>
    %cst_40 = arith.constant dense<0.000000e+00> : vector<196x128xf32>
    %76 = tpu.matmul %73, %75, %cst_40 {dimension_numbers = #tpu.dot_dimension_numbers<[1], [0], [0], [1], [0, 0, 1, 1], [], []>} : vector<196x8xbf16>, vector<8x128xbf16>, vector<196x128xf32> -> vector<196x128xf32>
    %77 = arith.addf %70, %76 : vector<196x128xf32>
    %78 = vector.extract_strided_slice %71 {offsets = [0, 1, 0], sizes = [14, 14, 8], strides = [1, 1, 1]} : vector<14x16x8xbf16> to vector<14x14x8xbf16>
    %79 = vector.shape_cast %78 : vector<14x14x8xbf16> to vector<196x8xbf16>
    %c1_41 = arith.constant 1 : index
    %c0_42 = arith.constant 0 : index
    %c0_43 = arith.constant 0 : index
    %80 = vector.load %arg5[%c1_41, %c0_42, %c0_43] : memref<9x8x128xbf16, #tpu.memory_space<vmem>>, vector<1x8x128xbf16>
    %81 = vector.shape_cast %80 : vector<1x8x128xbf16> to vector<8x128xbf16>
    %cst_44 = arith.constant dense<0.000000e+00> : vector<196x128xf32>
    %82 = tpu.matmul %79, %81, %cst_44 {dimension_numbers = #tpu.dot_dimension_numbers<[1], [0], [0], [1], [0, 0, 1, 1], [], []>} : vector<196x8xbf16>, vector<8x128xbf16>, vector<196x128xf32> -> vector<196x128xf32>
    %83 = arith.addf %77, %82 : vector<196x128xf32>
    %84 = vector.extract_strided_slice %71 {offsets = [0, 2, 0], sizes = [14, 14, 8], strides = [1, 1, 1]} : vector<14x16x8xbf16> to vector<14x14x8xbf16>
    %85 = vector.shape_cast %84 : vector<14x14x8xbf16> to vector<196x8xbf16>
    %c2_45 = arith.constant 2 : index
    %c0_46 = arith.constant 0 : index
    %c0_47 = arith.constant 0 : index
    %86 = vector.load %arg5[%c2_45, %c0_46, %c0_47] : memref<9x8x128xbf16, #tpu.memory_space<vmem>>, vector<1x8x128xbf16>
    %87 = vector.shape_cast %86 : vector<1x8x128xbf16> to vector<8x128xbf16>
    %cst_48 = arith.constant dense<0.000000e+00> : vector<196x128xf32>
    %88 = tpu.matmul %85, %87, %cst_48 {dimension_numbers = #tpu.dot_dimension_numbers<[1], [0], [0], [1], [0, 0, 1, 1], [], []>} : vector<196x8xbf16>, vector<8x128xbf16>, vector<196x128xf32> -> vector<196x128xf32>
    %89 = arith.addf %83, %88 : vector<196x128xf32>
    %90 = vector.extract_strided_slice %69 {offsets = [1, 0, 0], sizes = [14, 16, 8], strides = [1, 1, 1]} : vector<16x16x8xbf16> to vector<14x16x8xbf16>
    %91 = vector.extract_strided_slice %90 {offsets = [0, 0, 0], sizes = [14, 14, 8], strides = [1, 1, 1]} : vector<14x16x8xbf16> to vector<14x14x8xbf16>
    %92 = vector.shape_cast %91 : vector<14x14x8xbf16> to vector<196x8xbf16>
    %c3_49 = arith.constant 3 : index
    %c0_50 = arith.constant 0 : index
    %c0_51 = arith.constant 0 : index
    %93 = vector.load %arg5[%c3_49, %c0_50, %c0_51] : memref<9x8x128xbf16, #tpu.memory_space<vmem>>, vector<1x8x128xbf16>
    %94 = vector.shape_cast %93 : vector<1x8x128xbf16> to vector<8x128xbf16>
    %cst_52 = arith.constant dense<0.000000e+00> : vector<196x128xf32>
    %95 = tpu.matmul %92, %94, %cst_52 {dimension_numbers = #tpu.dot_dimension_numbers<[1], [0], [0], [1], [0, 0, 1, 1], [], []>} : vector<196x8xbf16>, vector<8x128xbf16>, vector<196x128xf32> -> vector<196x128xf32>
    %96 = arith.addf %89, %95 : vector<196x128xf32>
    %97 = vector.extract_strided_slice %90 {offsets = [0, 1, 0], sizes = [14, 14, 8], strides = [1, 1, 1]} : vector<14x16x8xbf16> to vector<14x14x8xbf16>
    %98 = vector.shape_cast %97 : vector<14x14x8xbf16> to vector<196x8xbf16>
    %c4_53 = arith.constant 4 : index
    %c0_54 = arith.constant 0 : index
    %c0_55 = arith.constant 0 : index
    %99 = vector.load %arg5[%c4_53, %c0_54, %c0_55] : memref<9x8x128xbf16, #tpu.memory_space<vmem>>, vector<1x8x128xbf16>
    %100 = vector.shape_cast %99 : vector<1x8x128xbf16> to vector<8x128xbf16>
    %cst_56 = arith.constant dense<0.000000e+00> : vector<196x128xf32>
    %101 = tpu.matmul %98, %100, %cst_56 {dimension_numbers = #tpu.dot_dimension_numbers<[1], [0], [0], [1], [0, 0, 1, 1], [], []>} : vector<196x8xbf16>, vector<8x128xbf16>, vector<196x128xf32> -> vector<196x128xf32>
    %102 = arith.addf %96, %101 : vector<196x128xf32>
    %103 = vector.extract_strided_slice %90 {offsets = [0, 2, 0], sizes = [14, 14, 8], strides = [1, 1, 1]} : vector<14x16x8xbf16> to vector<14x14x8xbf16>
    %104 = vector.shape_cast %103 : vector<14x14x8xbf16> to vector<196x8xbf16>
    %c5_57 = arith.constant 5 : index
    %c0_58 = arith.constant 0 : index
    %c0_59 = arith.constant 0 : index
    %105 = vector.load %arg5[%c5_57, %c0_58, %c0_59] : memref<9x8x128xbf16, #tpu.memory_space<vmem>>, vector<1x8x128xbf16>
    %106 = vector.shape_cast %105 : vector<1x8x128xbf16> to vector<8x128xbf16>
    %cst_60 = arith.constant dense<0.000000e+00> : vector<196x128xf32>
    %107 = tpu.matmul %104, %106, %cst_60 {dimension_numbers = #tpu.dot_dimension_numbers<[1], [0], [0], [1], [0, 0, 1, 1], [], []>} : vector<196x8xbf16>, vector<8x128xbf16>, vector<196x128xf32> -> vector<196x128xf32>
    %108 = arith.addf %102, %107 : vector<196x128xf32>
    %109 = vector.extract_strided_slice %69 {offsets = [2, 0, 0], sizes = [14, 16, 8], strides = [1, 1, 1]} : vector<16x16x8xbf16> to vector<14x16x8xbf16>
    %110 = vector.extract_strided_slice %109 {offsets = [0, 0, 0], sizes = [14, 14, 8], strides = [1, 1, 1]} : vector<14x16x8xbf16> to vector<14x14x8xbf16>
    %111 = vector.shape_cast %110 : vector<14x14x8xbf16> to vector<196x8xbf16>
    %c6_61 = arith.constant 6 : index
    %c0_62 = arith.constant 0 : index
    %c0_63 = arith.constant 0 : index
    %112 = vector.load %arg5[%c6_61, %c0_62, %c0_63] : memref<9x8x128xbf16, #tpu.memory_space<vmem>>, vector<1x8x128xbf16>
    %113 = vector.shape_cast %112 : vector<1x8x128xbf16> to vector<8x128xbf16>
    %cst_64 = arith.constant dense<0.000000e+00> : vector<196x128xf32>
    %114 = tpu.matmul %111, %113, %cst_64 {dimension_numbers = #tpu.dot_dimension_numbers<[1], [0], [0], [1], [0, 0, 1, 1], [], []>} : vector<196x8xbf16>, vector<8x128xbf16>, vector<196x128xf32> -> vector<196x128xf32>
    %115 = arith.addf %108, %114 : vector<196x128xf32>
    %116 = vector.extract_strided_slice %109 {offsets = [0, 1, 0], sizes = [14, 14, 8], strides = [1, 1, 1]} : vector<14x16x8xbf16> to vector<14x14x8xbf16>
    %117 = vector.shape_cast %116 : vector<14x14x8xbf16> to vector<196x8xbf16>
    %c7_65 = arith.constant 7 : index
    %c0_66 = arith.constant 0 : index
    %c0_67 = arith.constant 0 : index
    %118 = vector.load %arg5[%c7_65, %c0_66, %c0_67] : memref<9x8x128xbf16, #tpu.memory_space<vmem>>, vector<1x8x128xbf16>
    %119 = vector.shape_cast %118 : vector<1x8x128xbf16> to vector<8x128xbf16>
    %cst_68 = arith.constant dense<0.000000e+00> : vector<196x128xf32>
    %120 = tpu.matmul %117, %119, %cst_68 {dimension_numbers = #tpu.dot_dimension_numbers<[1], [0], [0], [1], [0, 0, 1, 1], [], []>} : vector<196x8xbf16>, vector<8x128xbf16>, vector<196x128xf32> -> vector<196x128xf32>
    %121 = arith.addf %115, %120 : vector<196x128xf32>
    %122 = vector.extract_strided_slice %109 {offsets = [0, 2, 0], sizes = [14, 14, 8], strides = [1, 1, 1]} : vector<14x16x8xbf16> to vector<14x14x8xbf16>
    %123 = vector.shape_cast %122 : vector<14x14x8xbf16> to vector<196x8xbf16>
    %c8_69 = arith.constant 8 : index
    %c0_70 = arith.constant 0 : index
    %c0_71 = arith.constant 0 : index
    %124 = vector.load %arg5[%c8_69, %c0_70, %c0_71] : memref<9x8x128xbf16, #tpu.memory_space<vmem>>, vector<1x8x128xbf16>
    %125 = vector.shape_cast %124 : vector<1x8x128xbf16> to vector<8x128xbf16>
    %cst_72 = arith.constant dense<0.000000e+00> : vector<196x128xf32>
    %126 = tpu.matmul %123, %125, %cst_72 {dimension_numbers = #tpu.dot_dimension_numbers<[1], [0], [0], [1], [0, 0, 1, 1], [], []>} : vector<196x8xbf16>, vector<8x128xbf16>, vector<196x128xf32> -> vector<196x128xf32>
    %127 = arith.addf %121, %126 : vector<196x128xf32>
    %c0_73 = arith.constant 0 : index
    %c0_74 = arith.constant 0 : index
    %128 = vector.load %arg6[%c0_73, %c0_74] : memref<1x128xf32, #tpu.memory_space<vmem>>, vector<1x128xf32>
    %129 = vector.broadcast %128 : vector<1x128xf32> to vector<196x128xf32>
    %130 = arith.mulf %127, %129 : vector<196x128xf32>
    %c0_75 = arith.constant 0 : index
    %c0_76 = arith.constant 0 : index
    %131 = vector.load %arg7[%c0_75, %c0_76] : memref<1x128xf32, #tpu.memory_space<vmem>>, vector<1x128xf32>
    %132 = vector.broadcast %131 : vector<1x128xf32> to vector<196x128xf32>
    %133 = arith.addf %130, %132 : vector<196x128xf32>
    %134 = math.tanh %133 : vector<196x128xf32>
    %135 = arith.truncf %134 : vector<196x128xf32> to vector<196x128xbf16>
    %c0_77 = arith.constant 0 : index
    %c0_78 = arith.constant 0 : index
    %c0_79 = arith.constant 0 : index
    %136 = vector.load %arg8[%c0_77, %c0_78, %c0_79] : memref<1x196x128xbf16, #tpu.memory_space<vmem>>, vector<1x196x128xbf16>
    %137 = vector.shape_cast %136 : vector<1x196x128xbf16> to vector<196x128xbf16>
    %138 = vector.shape_cast %135 : vector<196x128xbf16> to vector<1x196x128xbf16>
    tpu.vector_store %arg8[%c0_77, %c0_78, %c0_79], %138 {strides = array<i32>} : memref<1x196x128xbf16, #tpu.memory_space<vmem>>, vector<1x196x128xbf16>,
    return
  }
  func.func @transform_0(%arg0: i32) -> (i32, i32, i32, i32) {
    %c0_i32 = arith.constant 0 : i32
    %c0_i32_0 = arith.constant 0 : i32
    %c0_i32_1 = arith.constant 0 : i32
    %c0_i32_2 = arith.constant 0 : i32
    return %arg0, %c0_i32, %c0_i32_0, %c0_i32_1 : i32, i32, i32, i32
  }
  func.func @transform_1(%arg0: i32) -> (i32, i32, i32) {
    %c0_i32 = arith.constant 0 : i32
    %c0_i32_0 = arith.constant 0 : i32
    %c0_i32_1 = arith.constant 0 : i32
    %c0_i32_2 = arith.constant 0 : i32
    return %c0_i32, %c0_i32_0, %c0_i32_1 : i32, i32, i32
  }
  func.func @transform_2(%arg0: i32) -> (i32, i32) {
    %c0_i32 = arith.constant 0 : i32
    %c0_i32_0 = arith.constant 0 : i32
    %c0_i32_1 = arith.constant 0 : i32
    return %c0_i32, %c0_i32_0 : i32, i32
  }
  func.func @transform_3(%arg0: i32) -> (i32, i32) {
    %c0_i32 = arith.constant 0 : i32
    %c0_i32_0 = arith.constant 0 : i32
    %c0_i32_1 = arith.constant 0 : i32
    return %c0_i32, %c0_i32_0 : i32, i32
  }
  func.func @transform_4(%arg0: i32) -> (i32, i32, i32) {
    %c0_i32 = arith.constant 0 : i32
    %c0_i32_0 = arith.constant 0 : i32
    %c0_i32_1 = arith.constant 0 : i32
    %c0_i32_2 = arith.constant 0 : i32
    return %c0_i32, %c0_i32_0, %c0_i32_1 : i32, i32, i32
  }
  func.func @transform_5(%arg0: i32) -> (i32, i32) {
    %c0_i32 = arith.constant 0 : i32
    %c0_i32_0 = arith.constant 0 : i32
    %c0_i32_1 = arith.constant 0 : i32
    return %c0_i32, %c0_i32_0 : i32, i32
  }
  func.func @transform_6(%arg0: i32) -> (i32, i32) {
    %c0_i32 = arith.constant 0 : i32
    %c0_i32_0 = arith.constant 0 : i32
    %c0_i32_1 = arith.constant 0 : i32
    return %c0_i32, %c0_i32_0 : i32, i32
  }
  func.func @transform_7(%arg0: i32) -> (i32, i32, i32) {
    %c0_i32 = arith.constant 0 : i32
    %c0_i32_0 = arith.constant 0 : i32
    %c0_i32_1 = arith.constant 0 : i32
    return %arg0, %c0_i32, %c0_i32_0 : i32, i32, i32
  }
}

</mosaic_0001>

<bundles_post_ra>
// kernel: _lambda_.1
= control target key start
LH: loop header
LB: loop body
LE: loop exit
PB: predicated region body
PF: predicated region fallthrough
CT: control target
= control target key end

     0   :  { %s12472_s24 = smov 0   ;;  %s18001_s0 = inlined_call_operand.vmem [shape: bf16[2,18,18,4], index: 0, kind: input, shape index: {}]   ;;  %s18002_s1 = inlined_call_operand.vmem [shape: bf16[9,4,8], index: 1, kind: input, shape index: {}]   ;;  %s18003_s2 = inlined_call_operand.vmem [shape: f32[1,8], index: 2, kind: input, shape index: {}]   ;;  %s18004_s3 = inlined_call_operand.vmem [shape: f32[1,8], index: 3, kind: input, shape index: {}]   ;;  %s18005_s4 = inlined_call_operand.vmem [shape: bf16[9,8,128], index: 4, kind: input, shape index: {}]   ;;  %s18006_s5 = inlined_call_operand.vmem [shape: f32[1,128], index: 5, kind: input, shape index: {}]   ;;  %s18007_s6 = inlined_call_operand.vmem [shape: f32[1,128], index: 6, kind: input, shape index: {}]   ;;  %s18008_s7 = inlined_call_operand.vmem [shape: bf16[2,196,128], index: 7, kind: output, shape index: {}]  }
   0x1 LB: > { %s10613_s25 = sadd.s32 4294967295, %s12427_s24   ;;  %p10617_p0 = scmp.ge.s32.totalorder %s12427_s24, 1  ;;  %s12427_s24 = sphi %s12472_s24, %s17_s24  }
   0x2   : > { %p237_p1 = scmp.lt.s32.totalorder %s12427_s24, 3 }
   0x4   : > { %p238_p2 = pnand %p10617_p0, %p237_p1 }
   0x6   : > { %241 = sbr.rel (%p238_p2) target bundleno = 1412 (0x584), region = 48 }
   0xb   : > { %v10620_v0 = vld [vmem:[%s18002_s1 + $0x2] sm:$0x3]  ;;  %vm821_vm0 = vcmask 1041408   ;;  %p269_p3 = scmp.lt.s32.totalorder %s10613_s25, 1  ;;  %v334_v2 = vld [vmem:[%s18002_s1] sm:$0x3] }
   0xc   : > { %12328 = vmatprep.subr.msk.bf16.mxu0 %vm821_vm0, %v10620_v0  ;;  %v823_v1 = vsel %vm821_vm0, %v10620_v0, 0  ;;  %v12491_v3 = vsel %vm821_vm0, %v334_v2, 0  ;;  %12330 = vmatprep.subr.msk.bf16.mxu1 %vm821_vm0, %v334_v2  ;;  %v10734_v4 = vld [vmem:[%s18002_s1 + $0x6] sm:$0x3]  ;;  %vm335_vm1 = vsmask.f32 3328 }
   0xd   : > { %11535 = vmatpush3.bf16.msra.mxu0 %v823_v1  ;;  %s19325_s25 = smov (!%p269_p3, %s10613_s25), 1  ;;  %12327 = vmatpush3.bf16.msra.mxu1 %v12491_v3  ;;  %vm336_vm2 = vsmask.f32 7440  ;;  %v12509_v5 = vld [vmem:[%s18002_s1 + $0x4] sm:$0x3]  ;;  %vm772_vm3 = vcmask 31744  }
   0xe   : > { %12329 = vmatprep.subr.msk.bf16.mxu0 %vm821_vm0, %v334_v2  ;;  %s12338_s9 = smul.u32 216, %s19325_s25  ;;  %12332 = vmatprep.subr.msk.bf16.mxu1 %vm821_vm0, %v10734_v4  ;;  %v12536_v17 = vsel %vm821_vm0, %v12509_v5, 0  ;;  %vm12548_vm4 = vmor %vm335_vm1, %vm336_vm2  ;;  %v12556_v36 = vsel %vm821_vm0, %v10734_v4, 0  ;;  %vm1294_vm5 = vcmask 1042432   ;;  %vm1295_vm6 = vcmask 1046532  }
   0xf   : > { %vm12955_vm7 = vmor %vm1294_vm5, %vm1295_vm6  ;;  %vm5280_vm8 = vcmask 1043456   ;;  %vm12430_vm9 = vmmov 0   ;;  %vm3822_vm10 = vsmask.f32 256  ;;  %vm3823_vm11 = vsmask.f32 1284 }
  0x10   : > { %s12504_s12 = scalar_lea.vmem %s18001_s0, %s12338_s9  ;;  %vm3825_vm12 = vsmask.f32 2312  ;;  %vm3827_vm13 = vsmask.f32 3340  ;;  %vm3829_vm14 = vsmask.f32 4368  ;;  %vm13998_vm15 = vmor %vm3822_vm10, %vm3823_vm11 }
  0x11   : > { %v12512_v6 = vld [vmem:[%s12504_s12] sm:$0xf]  ;;  %v12515_v7 = vld [vmem:[%s12504_s12 + $0x4] sm:$0xf]  ;;  %v12518_v8 = vld [vmem:[%s12504_s12 + $0x8] sm:$0x1] }
  0x12   : > { %v339_v9 = vshrl.u32 %v12512_v6, 16  ;;  %v342_v10 = vshll.u32 %v12512_v6, 16  ;;  %v348_v11 = vshll.u32 %v12515_v7, 16  ;;  %v352_v12 = vshrl.u32 %v12515_v7, 16  ;;  %v12525_v13 = vld [vmem:[%s12504_s12 + $0xc] sm:$0xf]  ;;  %vm3826_vm1 = vmor %vm13998_vm15, %vm3825_vm12 }
  0x13   : > { %v358_v14 = vshll.u32 %v12518_v8, 16  ;;  %v12529_v15 = vld [vmem:[%s12504_s12 + $0x10] sm:$0xf]  ;;  %v12532_v16 = vld [vmem:[%s12504_s12 + $0x14] sm:$0x1]  ;;  %v363_v23 = vshrl.u32 %v12525_v13, 16 }
  0x14   : > { %v341_v18 = vrot.slane %v339_v9, 4  ;;  %v344_v19 = vrot.slane %v342_v10, 5  ;;  %v350_v20 = vrot.slane %v348_v11, 5  ;;  %v354_v21 = vrot.slane %v352_v12, 4  ;;  %v12544_v30 = vld [vmem:[%s12504_s12 + $0x18] sm:$0xf] }
  0x15   : > { %v360_v22 = vrot.slane %v358_v14, 5  ;;  %v366_v24 = vshll.u32 %v12525_v13, 16  ;;  %v372_v25 = vshll.u32 %v12529_v15, 16  ;;  %v376_v28 = vshrl.u32 %v12529_v15, 16  ;;  %v12553_v35 = vld [vmem:[%s12504_s12 + $0x1c] sm:$0xf] }
  0x16   : > { %v345_v26 = vor.u32 %v344_v19, %v341_v18  ;;  %v355_v27 = vor.u32 %v354_v21, %v350_v20  ;;  %v382_v29 = vshll.u32 %v12532_v16, 16  ;;  %v365_v32 = vrot.slane %v363_v23, 4  ;;  %v12560_v43 = vld [vmem:[%s12504_s12 + $0x20] sm:$0x1]  ;;  %v12570_v50 = vld [vmem:[%s12504_s12 + $0x24] sm:$0xf] }
  0x17   : > { %v368_v33 = vrot.slane %v366_v24, 5  ;;  %v374_v34 = vrot.slane %v372_v25, 5  ;;  %v378_v39 = vrot.slane %v376_v28, 4  ;;  %v387_v44 = vshrl.u32 %v12544_v30, 16  ;;  %v12573_v55 = vld [vmem:[%s12504_s12 + $0x28] sm:$0xf] }
  0x18   : > { %v346_v37 = vrot.slane %v345_v26, 4  ;;  %v356_v38 = vrot.slane %v355_v27, 4  ;;  %v384_v42 = vrot.slane %v382_v29, 5  ;;  %v390_v45 = vshll.u32 %v12544_v30, 16  ;;  %v12581_v62 = vld [vmem:[%s12504_s12 + $0x2c] sm:$0x1] }
  0x19   : > { %v369_v41 = vor.u32 %v368_v33, %v365_v32  ;;  %v379_v48 = vor.u32 %v378_v39, %v374_v34  ;;  %v396_v49 = vshll.u32 %v12553_v35, 16  ;;  %v389_v53 = vrot.slane %v387_v44, 4  ;;  %v12589_v10 = vld [vmem:[%s12504_s12 + $0x30] sm:$0xf]  ;;  %v12594_v19 = vld [vmem:[%s12504_s12 + $0x34] sm:$0xf] }
  0x1a   : > { %v351_v46 = vsel %vm12548_vm4, %v346_v37, %v350_v20  ;;  %v361_v47 = vsel %vm12548_vm4, %v356_v38, %v360_v22  ;;  %v392_v54 = vrot.slane %v390_v45, 5  ;;  %v400_v58 = vshrl.u32 %v12553_v35, 16  ;;  %v12603_v26 = vld [vmem:[%s12504_s12 + $0x38] sm:$0x1]  ;;  %s12339_s13 = smul.u32 100, %s19325_s25 }
  0x1b   : > { %v10621_v51 = vcombine.low %v351_v46, %v361_v47  ;;  %v370_v52 = vrot.slane %v369_v41, 4  ;;  %v380_v56 = vrot.slane %v379_v48, 4  ;;  %v398_v57 = vrot.slane %v396_v49, 5  ;;  %v12619_v47 = vld [vmem:[%s12504_s12 + $0x40] sm:$0xf] }
  0x1c   : > { %v406_v59 = vshll.u32 %v12560_v43, 16  ;;  %v393_v61 = vor.u32 %v392_v54, %v389_v53  ;;  %v411_v63 = vshrl.u32 %v12570_v50, 16  ;;  %v414_v0 = vshll.u32 %v12570_v50, 16  ;;  %v12626_v53 = vld [vmem:[%s12504_s12 + $0x44] sm:$0x1]  ;;  %s17925_s16 = scalar_lea.vmem %s18008_s7, %s12339_s13 }
  0x1d   : > { %11536 = vmatprep.mubr.msk.bf16.mxu0 %vm772_vm3, %v10621_v51  ;;  %v375_v60 = vsel %vm12548_vm4, %v370_v52, %v374_v34  ;;  %v385_v1 = vsel %vm12548_vm4, %v380_v56, %v384_v42  ;;  %v402_v2 = vrot.slane %v400_v58, 4  ;;  %v420_v9 = vshll.u32 %v12573_v55, 16  ;;  %v12611_v42 = vld [vmem:[%s12504_s12 + $0x3c] sm:$0xf] }
  0x1e   : > { %v408_v4 = vrot.slane %v406_v59, 5  ;;  %v12591_v11 = vcombine.low %v375_v60, %v385_v1  ;;  %v394_v12 = vrot.slane %v393_v61, 4  ;;  %v413_v14 = vrot.slane %v411_v63, 4 }
  0x1f   : > { %v416_v18 = vrot.slane %v414_v0, 5  ;;  %v403_v20 = vor.u32 %v402_v2, %v398_v57  ;;  %v422_v21 = vrot.slane %v420_v9, 5  ;;  %v424_v22 = vshrl.u32 %v12573_v55, 16 }
  0x20   : > { %18413 = vst [vmem:[#allocation2_spill] sm:$0xff] %v12591_v11  ;;  %v430_v23 = vshll.u32 %v12581_v62, 16  ;;  %11537 = vmatmul.mubr.msk.bf16.vlgmr.msra.gmra.mxu0 %vm772_vm3, %v12591_v11  ;;  %v399_v24 = vsel %vm12548_vm4, %v394_v12, %v398_v57  ;;  %v435_v27 = vshrl.u32 %v12589_v10, 16  ;;  %v438_v28 = vshll.u32 %v12589_v10, 16 }
  0x21   : > { %v417_v25 = vor.u32 %v416_v18, %v413_v14  ;;  %11569 = vmatpush3.bf16.msra.mxu0 %v12491_v3  ;;  %v404_v29 = vrot.slane %v403_v20, 4  ;;  %v426_v32 = vrot.slane %v424_v22, 4  ;;  %v444_v34 = vshll.u32 %v12594_v19, 16  ;;  %v12651_v20 = vld [vmem:[%s12504_s12 + $0x4c] sm:$0xf] }
  0x22   : > { %v432_v33 = vrot.slane %v430_v23, 5  ;;  %v437_v38 = vrot.slane %v435_v27, 4  ;;  %v440_v39 = vrot.slane %v438_v28, 5  ;;  %v448_v41 = vshrl.u32 %v12594_v19, 16  ;;  %12331 = vmatprep.subr.msk.bf16.mxu0 %vm821_vm0, %v12509_v5 }
  0x23   : > { %v418_v37 = vrot.slane %v417_v25, 4  ;;  %v409_v44 = vsel %vm12548_vm4, %v404_v29, %v408_v4  ;;  %v427_v3 = vor.u32 %v426_v32, %v422_v21  ;;  %v446_v45 = vrot.slane %v444_v34, 5  ;;  %v12644_v4 = vld [vmem:[%s12504_s12 + $0x48] sm:$0xf]  ;;  %v12658_v25 = vld [vmem:[%s12504_s12 + $0x50] sm:$0x1] }
  0x24   : > { %v454_v46 = vshll.u32 %v12603_v26, 16  ;;  %v12621_v48 = vcombine.low %v399_v24, %v409_v44  ;;  %v441_v51 = vor.u32 %v440_v39, %v437_v38  ;;  %v450_v52 = vrot.slane %v448_v41, 4  ;;  %v12673_v39 = vld [vmem:[%s12504_s12 + $0x54] sm:$0xf] }
  0x25   : > { %v423_v49 = vsel %vm12548_vm4, %v418_v37, %v422_v21  ;;  %v428_v5 = vrot.slane %v427_v3, 4  ;;  %v12630_v56 = vcombine.low %v12589_v10, %v12594_v19  ;;  %v459_v57 = vshrl.u32 %v12611_v42, 16 }
  0x26   : > { %18414 = vst [vmem:[#allocation3_spill] sm:$0xff] %v12621_v48  ;;  %v456_v54 = vrot.slane %v454_v46, 5  ;;  %11540 = vmatprep.mubr.msk.bf16.mxu0 %vm772_vm3, %v12621_v48  ;;  %v442_v58 = vrot.slane %v441_v51, 4  ;;  %v451_v59 = vor.u32 %v450_v52, %v446_v45  ;;  %v462_v60 = vshll.u32 %v12611_v42, 16  ;;  %v12677_v46 = vld [vmem:[%s12504_s12 + $0x58] sm:$0xf] }
  0x27   : > { %v468_v61 = vshll.u32 %v12619_v47, 16  ;;  %v433_v63 = vsel %vm12548_vm4, %v428_v5, %v432_v33  ;;  %11578 = vmatprep.mubr.msk.bf16.mxu1 %vm772_vm3, %v12630_v56  ;;  %v461_v0 = vrot.slane %v459_v57, 4  ;;  %v472_v1 = vshrl.u32 %v12619_v47, 16 }
  0x28   : > { %v478_v2 = vshll.u32 %v12626_v53, 16  ;;  %v12646_v9 = vcombine.low %v423_v49, %v433_v63  ;;  %v447_v12 = vsel %vm12548_vm4, %v442_v58, %v446_v45  ;;  %v452_v14 = vrot.slane %v451_v59, 4  ;;  %v12689_v59 = vld [vmem:[%s12504_s12 + $0x5c] sm:$0x1] }
  0x29   : > { %v464_v18 = vrot.slane %v462_v60, 5  ;;  %v470_v21 = vrot.slane %v468_v61, 5  ;;  %v474_v22 = vrot.slane %v472_v1, 4  ;;  %v12655_v24 = vcombine.low %v12611_v42, %v12619_v47  ;;  %v12699_v1 = vld [vmem:[%s12504_s12 + $0x60] sm:$0xf] }
  0x2a   : > { %18415 = vst [vmem:[#allocation4_spill] sm:$0xff] %v12646_v9  ;;  %v480_v23 = vrot.slane %v478_v2, 5  ;;  %11541 = vmatmul.mubr.msk.bf16.gmra.mxu0 %vm772_vm3, %v12646_v9  ;;  %v457_v27 = vsel %vm12548_vm4, %v452_v14, %v456_v54  ;;  %v483_v29 = vshrl.u32 %v12644_v4, 16  ;;  %v486_v32 = vshll.u32 %v12644_v4, 16  ;;  %v12796_v9 = vld [vmem:[%s12504_s12 + $0x88] sm:$0xf] }
  0x2b   : > { %v465_v28 = vor.u32 %v464_v18, %v461_v0  ;;  %v12666_v33 = vcombine.low %v447_v12, %v457_v27  ;;  %v475_v34 = vor.u32 %v474_v22, %v470_v21  ;;  %11579 = vmatmul.mubr.msk.bf16.vlgmr.msra.gmra.mxu1 %vm772_vm3, %v12655_v24  ;;  %v492_v37 = vshll.u32 %v12651_v20, 16  ;;  %18426 = vst [vmem:[#allocation15_spill] sm:$0xff] %v12796_v9 }
  0x2c   : > { %v496_v38 = vshrl.u32 %v12651_v20, 16  ;;  %v485_v44 = vrot.slane %v483_v29, 4  ;;  %v488_v3 = vrot.slane %v486_v32, 5  ;;  %v502_v45 = vshll.u32 %v12658_v25, 16  ;;  %11637 = vmatpush3.bf16.msra.mxu1 %v12556_v36 }
  0x2d   : > { %18416 = vst [vmem:[#allocation5_spill] sm:$0xff] %v12666_v33  ;;  %v466_v41 = vrot.slane %v465_v28, 4  ;;  %11544 = vmatprep.mubr.msk.bf16.mxu0 %vm772_vm3, %v12666_v33  ;;  %v476_v49 = vrot.slane %v475_v34, 4  ;;  %v494_v51 = vrot.slane %v492_v37, 5  ;;  %v12684_v5 = vcombine.low %v12644_v4, %v12651_v20  ;;  %v12706_v28 = vld [vmem:[%s12504_s12 + $0x64] sm:$0xf] }
  0x2e   : > { %v498_v52 = vrot.slane %v496_v38, 4  ;;  %v489_v57 = vor.u32 %v488_v3, %v485_v44  ;;  %v504_v58 = vrot.slane %v502_v45, 5  ;;  %v507_v36 = vshrl.u32 %v12673_v39, 16  ;;  %v12717_v37 = vld [vmem:[%s12504_s12 + $0x68] sm:$0x1] }
  0x2f   : > { %18417 = vst [vmem:[#allocation6_spill] sm:$0xff] %v12684_v5  ;;  %v471_v54 = vsel %vm12548_vm4, %v466_v41, %v470_v21  ;;  %v481_v60 = vsel %vm12548_vm4, %v476_v49, %v480_v23  ;;  %11582 = vmatprep.mubr.msk.bf16.mxu1 %vm772_vm3, %v12684_v5  ;;  %v510_v63 = vshll.u32 %v12673_v39, 16  ;;  %v516_v0 = vshll.u32 %v12677_v46, 16  ;;  %v12724_v49 = vld [vmem:[%s12504_s12 + $0x6c] sm:$0xf] }
  0x30   : > { %v499_v61 = vor.u32 %v498_v52, %v494_v51  ;;  %v12701_v2 = vcombine.low %v471_v54, %v481_v60  ;;  %v490_v12 = vrot.slane %v489_v57, 4  ;;  %v509_v14 = vrot.slane %v507_v36, 4 }
  0x31   : > { %v520_v18 = vshrl.u32 %v12677_v46, 16  ;;  %v512_v22 = vrot.slane %v510_v63, 5  ;;  %v518_v23 = vrot.slane %v516_v0, 5  ;;  %v526_v27 = vshll.u32 %v12689_v59, 16  ;;  %v12741_v0 = vld [vmem:[%s12504_s12 + $0x70] sm:$0xf] }
  0x32   : > { %18418 = vst [vmem:[#allocation7_spill] sm:$0xff] %v12701_v2  ;;  %v500_v21 = vrot.slane %v499_v61, 4  ;;  %11545 = vmatmul.mubr.msk.bf16.gmra.mxu0 %vm772_vm3, %v12701_v2  ;;  %v495_v29 = vsel %vm12548_vm4, %v490_v12, %v494_v51  ;;  %v12714_v34 = vcombine.low %v12673_v39, %v12677_v46  ;;  %v531_v38 = vshrl.u32 %v12699_v1, 16  ;;  %v12729_v51 = vld [vmem:[%s18002_s1 + $0xa] sm:$0x3] }
  0x33   : > { %v522_v32 = vrot.slane %v520_v18, 4  ;;  %v513_v44 = vor.u32 %v512_v22, %v509_v14  ;;  %v528_v3 = vrot.slane %v526_v27, 5  ;;  %v534_v45 = vshll.u32 %v12699_v1, 16  ;;  %18420 = vst [vmem:[#allocation9_spill] sm:$0xff] %v12729_v51  ;;  %12334 = vmatprep.subr.msk.bf16.mxu1 %vm821_vm0, %v12729_v51 }
  0x34   : > { %18419 = vst [vmem:[#allocation8_spill] sm:$0xff] %v12714_v34  ;;  %v505_v41 = vsel %vm12548_vm4, %v500_v21, %v504_v58  ;;  %11583 = vmatmul.mubr.msk.bf16.gmra.mxu1 %vm772_vm3, %v12714_v34  ;;  %v533_v57 = vrot.slane %v531_v38, 4  ;;  %v540_v58 = vshll.u32 %v12706_v28, 16  ;;  %v544_v61 = vshrl.u32 %v12706_v28, 16  ;;  %v12753_v38 = vld [vmem:[%s12504_s12 + $0x74] sm:$0x1] }
  0x35   : > { %v12731_v52 = vcombine.low %v495_v29, %v505_v41  ;;  %v523_v54 = vor.u32 %v522_v32, %v518_v23  ;;  %v514_v36 = vrot.slane %v513_v44, 4  ;;  %v536_v60 = vrot.slane %v534_v45, 5 }
  0x36   : > { %v550_v63 = vshll.u32 %v12717_v37, 16  ;;  %v542_v14 = vrot.slane %v540_v58, 5  ;;  %v12747_v18 = vcombine.low %v12699_v1, %v12706_v28  ;;  %v555_v21 = vshrl.u32 %v12724_v49, 16  ;;  %v12762_v58 = vld [vmem:[%s12504_s12 + $0x78] sm:$0xf] }
  0x37   : > { %18421 = vst [vmem:[#allocation10_spill] sm:$0xff] %v12731_v52  ;;  %11548 = vmatprep.mubr.msk.bf16.mxu0 %vm772_vm3, %v12731_v52  ;;  %v524_v12 = vrot.slane %v523_v54, 4  ;;  %v519_v22 = vsel %vm12548_vm4, %v514_v36, %v518_v23  ;;  %v537_v27 = vor.u32 %v536_v60, %v533_v57  ;;  %v546_v29 = vrot.slane %v544_v61, 4  ;;  %v12768_v60 = vld [vmem:[%s12504_s12 + $0x7c] sm:$0xf] }
  0x38   : > { %18422 = vst [vmem:[#allocation11_spill] sm:$0xff] %v12747_v18  ;;  %v552_v32 = vrot.slane %v550_v63, 5  ;;  %11586 = vmatprep.mubr.msk.bf16.mxu1 %vm772_vm3, %v12747_v18  ;;  %v557_v44 = vrot.slane %v555_v21, 4  ;;  %v558_v45 = vshll.u32 %v12724_v49, 16  ;;  %v564_v54 = vshll.u32 %v12741_v0, 16 }
  0x39   : > { %v529_v41 = vsel %vm12548_vm4, %v524_v12, %v528_v3  ;;  %v538_v23 = vrot.slane %v537_v27, 4  ;;  %v547_v57 = vor.u32 %v546_v29, %v542_v14  ;;  %v568_v36 = vshrl.u32 %v12741_v0, 16 }
  0x3a   : > { %v12764_v40 = vcombine.low %v519_v22, %v529_v41  ;;  %v560_v3 = vrot.slane %v558_v45, 5  ;;  %v566_v61 = vrot.slane %v564_v54, 5  ;;  %v574_v63 = vshll.u32 %v12753_v38, 16  ;;  %v12783_v54 = vld [vmem:[%s12504_s12 + $0x80] sm:$0x1] }
  0x3b   : > { %v12773_v12 = vcombine.low %v12724_v49, %v12741_v0  ;;  %v543_v21 = vsel %vm12548_vm4, %v538_v23, %v542_v14  ;;  %v548_v22 = vrot.slane %v547_v57, 4  ;;  %v570_v27 = vrot.slane %v568_v36, 4  ;;  %v12791_v36 = vld [vmem:[%s12504_s12 + $0x84] sm:$0xf] }
  0x3c   : > { %18423 = vst [vmem:[#allocation12_spill] sm:$0xff] %v12764_v40  ;;  %11549 = vmatmul.mubr.msk.bf16.gmra.mxu0 %vm772_vm3, %v12764_v40  ;;  %v579_v29 = vshrl.u32 %v12762_v58, 16  ;;  %v561_v41 = vor.u32 %v560_v3, %v557_v44  ;;  %v576_v45 = vrot.slane %v574_v63, 5  ;;  %v582_v52 = vshll.u32 %v12762_v58, 16 }
  0x3d   : > { %18424 = vst [vmem:[#allocation13_spill] sm:$0xff] %v12773_v12  ;;  %11587 = vmatmul.mubr.msk.bf16.gmra.mxu1 %vm772_vm3, %v12773_v12  ;;  %v588_v2 = vshll.u32 %v12768_v60, 16  ;;  %v553_v40 = vsel %vm12548_vm4, %v548_v22, %v552_v32  ;;  %v571_v14 = vor.u32 %v570_v27, %v566_v61  ;;  %v592_v57 = vshrl.u32 %v12768_v60, 16 }
  0x3e   : > { %v581_v23 = vrot.slane %v579_v29, 4  ;;  %v12793_v44 = vcombine.low %v543_v21, %v553_v40  ;;  %v562_v3 = vrot.slane %v561_v41, 4  ;;  %v584_v63 = vrot.slane %v582_v52, 5  ;;  %v12808_v52 = vld [vmem:[%s12504_s12 + $0x8c] sm:$0x1] }
  0x3f   : > { %v590_v33 = vrot.slane %v588_v2, 5  ;;  %v572_v48 = vrot.slane %v571_v14, 4  ;;  %v594_v11 = vrot.slane %v592_v57, 4  ;;  %v598_v12 = vshll.u32 %v12783_v54, 16  ;;  %18428 = vst [vmem:[#allocation17_spill] sm:$0xff] %v12808_v52 }
  0x40   : > { %18425 = vst [vmem:[#allocation14_spill] sm:$0xff] %v12793_v44  ;;  %v12801_v32 = vcombine.low %v12762_v58, %v12768_v60  ;;  %11552 = vmatprep.mubr.msk.bf16.mxu0 %vm772_vm3, %v12793_v44  ;;  %v567_v40 = vsel %vm12548_vm4, %v562_v3, %v566_v61  ;;  %v585_v21 = vor.u32 %v584_v63, %v581_v23  ;;  %v603_v2 = vshrl.u32 %v12791_v36, 16  ;;  %v12818_v61 = vld [vmem:[%s12504_s12 + $0x90] sm:$0xf] }
  0x41   : > { %v606_v22 = vshll.u32 %v12791_v36, 16  ;;  %v577_v27 = vsel %vm12548_vm4, %v572_v48, %v576_v45  ;;  %v595_v29 = vor.u32 %v594_v11, %v590_v33  ;;  %v600_v41 = vrot.slane %v598_v12, 5  ;;  %18429 = vst [vmem:[#allocation18_spill] sm:$0xff] %v12818_v61  ;;  %v12825_v12 = vld [vmem:[%s12504_s12 + $0x94] sm:$0xf] }
  0x42   : > { %18427 = vst [vmem:[#allocation16_spill] sm:$0xff] %v12801_v32  ;;  %11590 = vmatprep.mubr.msk.bf16.mxu1 %vm772_vm3, %v12801_v32  ;;  %v612_v14 = vshll.u32 %v12796_v9, 16  ;;  %v12820_v23 = vcombine.low %v567_v40, %v577_v27  ;;  %v586_v57 = vrot.slane %v585_v21, 4  ;;  %v605_v3 = vrot.slane %v603_v2, 4  ;;  %18431 = vst [vmem:[#allocation20_spill] sm:$0xff] %v12825_v12 }
  0x43   : > { %v608_v63 = vrot.slane %v606_v22, 5  ;;  %v596_v44 = vrot.slane %v595_v29, 4  ;;  %v616_v48 = vshrl.u32 %v12796_v9, 16  ;;  %v622_v11 = vshll.u32 %v12808_v52, 16  ;;  %v12836_v2 = vld [vmem:[%s12504_s12 + $0x98] sm:$0x1] }
  0x44   : > { %18430 = vst [vmem:[#allocation19_spill] sm:$0xff] %v12820_v23  ;;  %v614_v18 = vrot.slane %v612_v14, 5  ;;  %11553 = vmatmul.mubr.msk.bf16.gmra.mxu0 %vm772_vm3, %v12820_v23  ;;  %v591_v45 = vsel %vm12548_vm4, %v586_v57, %v590_v33  ;;  %v12833_v21 = vcombine.low %v12791_v36, %v12796_v9  ;;  %18433 = vst [vmem:[#allocation22_spill] sm:$0xff] %v12836_v2  ;;  %v627_v22 = vshrl.u32 %v12818_v61, 16  ;;  %v12843_v32 = vld [vmem:[%s12504_s12 + $0x9c] sm:$0xf] }
  0x45   : > { %v609_v40 = vor.u32 %v608_v63, %v605_v3  ;;  %v601_v27 = vsel %vm12548_vm4, %v596_v44, %v600_v41  ;;  %v618_v29 = vrot.slane %v616_v48, 4  ;;  %v624_v14 = vrot.slane %v622_v11, 5  ;;  %v12853_v48 = vld [vmem:[%s12504_s12 + $0xa0] sm:$0xf]  ;;  %v12884_v52 = vld [vmem:[%s12504_s12 + $0xb0] sm:$0x1] }
  0x46   : > { %18432 = vst [vmem:[#allocation21_spill] sm:$0xff] %v12833_v21  ;;  %v630_v23 = vshll.u32 %v12818_v61, 16  ;;  %v12845_v33 = vcombine.low %v591_v45, %v601_v27  ;;  %11591 = vmatmul.mubr.msk.bf16.gmra.mxu1 %vm772_vm3, %v12833_v21  ;;  %v629_v3 = vrot.slane %v627_v22, 4  ;;  %v636_v63 = vshll.u32 %v12825_v12, 16  ;;  %18435 = vst [vmem:[#allocation24_spill] sm:$0xff] %v12853_v48 }
  0x47   : > { %v610_v57 = vrot.slane %v609_v40, 4  ;;  %v619_v51 = vor.u32 %v618_v29, %v614_v18  ;;  %v640_v44 = vshrl.u32 %v12825_v12, 16  ;;  %v646_v41 = vshll.u32 %v12836_v2, 16  ;;  %v12864_v22 = vld [vmem:[%s12504_s12 + $0xa4] sm:$0x1]  ;;  %18439 = vst [vmem:[#allocation28_spill] sm:$0xff] %v12884_v52 }
  0x48   : > { %18434 = vst [vmem:[#allocation23_spill] sm:$0xff] %v12845_v33  ;;  %v632_v34 = vrot.slane %v630_v23, 5  ;;  %11556 = vmatprep.mubr.msk.bf16.mxu0 %vm772_vm3, %v12845_v33  ;;  %v638_v45 = vrot.slane %v636_v63, 5  ;;  %v12861_v40 = vcombine.low %v12818_v61, %v12825_v12  ;;  %18437 = vst [vmem:[#allocation26_spill] sm:$0xff] %v12864_v22  ;;  %v651_v23 = vshrl.u32 %v12843_v32, 16 }
  0x49   : > { %v615_v11 = vsel %vm12548_vm4, %v610_v57, %v614_v18  ;;  %v620_v27 = vrot.slane %v619_v51, 4  ;;  %v642_v21 = vrot.slane %v640_v44, 4  ;;  %v648_v5 = vrot.slane %v646_v41, 5  ;;  %v12876_v51 = vld [vmem:[%s12504_s12 + $0xa8] sm:$0xf] }
  0x4a   : > { %18436 = vst [vmem:[#allocation25_spill] sm:$0xff] %v12861_v40  ;;  %v633_v29 = vor.u32 %v632_v34, %v629_v3  ;;  %11594 = vmatprep.mubr.msk.bf16.mxu1 %vm772_vm3, %v12861_v40  ;;  %v653_v18 = vrot.slane %v651_v23, 4  ;;  %v654_v57 = vshll.u32 %v12843_v32, 16  ;;  %v660_v63 = vshll.u32 %v12853_v48, 16  ;;  %v12879_v3 = vld [vmem:[%s12504_s12 + $0xac] sm:$0xf] }
  0x4b   : > { %v664_v33 = vshrl.u32 %v12853_v48, 16  ;;  %v625_v2 = vsel %vm12548_vm4, %v620_v27, %v624_v14  ;;  %v643_v61 = vor.u32 %v642_v21, %v638_v45  ;;  %v670_v34 = vshll.u32 %v12864_v22, 16 }
  0x4c   : > { %v634_v12 = vrot.slane %v633_v29, 4  ;;  %v12881_v44 = vcombine.low %v615_v11, %v625_v2  ;;  %v656_v41 = vrot.slane %v654_v57, 5  ;;  %v662_v23 = vrot.slane %v660_v63, 5  ;;  %v12904_v63 = vld [vmem:[%s12504_s12 + $0xb4] sm:$0xf] }
  0x4d   : > { %v666_v40 = vrot.slane %v664_v33, 4  ;;  %v644_v14 = vrot.slane %v643_v61, 4  ;;  %v672_v27 = vrot.slane %v670_v34, 5  ;;  %v12890_v21 = vcombine.low %v12843_v32, %v12853_v48 }
  0x4e   : > { %18438 = vst [vmem:[#allocation27_spill] sm:$0xff] %v12881_v44  ;;  %v639_v9 = vsel %vm12548_vm4, %v634_v12, %v638_v45  ;;  %11557 = vmatmul.mubr.msk.bf16.gmra.mxu0 %vm772_vm3, %v12881_v44  ;;  %v657_v2 = vor.u32 %v656_v41, %v653_v18  ;;  %v675_v11 = vshrl.u32 %v12876_v51, 16  ;;  %v678_v29 = vshll.u32 %v12876_v51, 16  ;;  %v12909_v44 = vld [vmem:[%s12504_s12 + $0xb8] sm:$0xf] }
  0x4f   : > { %18440 = vst [vmem:[#allocation29_spill] sm:$0xff] %v12890_v21  ;;  %v667_v33 = vor.u32 %v666_v40, %v662_v23  ;;  %v649_v61 = vsel %vm12548_vm4, %v644_v14, %v648_v5  ;;  %11595 = vmatmul.mubr.msk.bf16.gmra.mxu1 %vm772_vm3, %v12890_v21  ;;  %v684_v12 = vshll.u32 %v12879_v3, 16  ;;  %v688_v45 = vshrl.u32 %v12879_v3, 16  ;;  %v12912_v21 = vld [vmem:[%s12504_s12 + $0xbc] sm:$0x1] }
  0x50   : > { %v694_v57 = vshll.u32 %v12884_v52, 16  ;;  %v12906_v40 = vcombine.low %v639_v9, %v649_v61  ;;  %v658_v18 = vrot.slane %v657_v2, 4  ;;  %v677_v41 = vrot.slane %v675_v11, 4 }
  0x51   : > { %v668_v34 = vrot.slane %v667_v33, 4  ;;  %v680_v22 = vrot.slane %v678_v29, 5  ;;  %v686_v5 = vrot.slane %v684_v12, 5  ;;  %v690_v14 = vrot.slane %v688_v45, 4 }
  0x52   : > { %18441 = vst [vmem:[#allocation30_spill] sm:$0xff] %v12906_v40  ;;  %v696_v48 = vrot.slane %v694_v57, 5  ;;  %11560 = vmatprep.mubr.msk.bf16.mxu0 %vm772_vm3, %v12906_v40  ;;  %v663_v52 = vsel %vm12548_vm4, %v658_v18, %v662_v23  ;;  %v12922_v2 = vcombine.low %v12876_v51, %v12879_v3  ;;  %v699_v33 = vshrl.u32 %v12904_v63, 16 }
  0x53   : > { %v673_v9 = vsel %vm12548_vm4, %v668_v34, %v672_v27  ;;  %v681_v29 = vor.u32 %v680_v22, %v677_v41  ;;  %v691_v61 = vor.u32 %v690_v14, %v686_v5  ;;  %v702_v12 = vshll.u32 %v12904_v63, 16 }
  0x54   : > { %18442 = vst [vmem:[#allocation31_spill] sm:$0xff] %v12922_v2  ;;  %v12925_v11 = vcombine.low %v663_v52, %v673_v9  ;;  %11598 = vmatprep.mubr.msk.bf16.mxu1 %vm772_vm3, %v12922_v2  ;;  %v701_v45 = vrot.slane %v699_v33, 4  ;;  %v708_v23 = vshll.u32 %v12909_v44, 16  ;;  %v712_v27 = vshrl.u32 %v12909_v44, 16 }
  0x55   : > { %v718_v57 = vshll.u32 %v12912_v21, 16  ;;  %v682_v18 = vrot.slane %v681_v29, 4  ;;  %v692_v34 = vrot.slane %v691_v61, 4  ;;  %v704_v40 = vrot.slane %v702_v12, 5 }
  0x56   : > { %18443 = vst [vmem:[#allocation32_spill] sm:$0xff] %v12925_v11  ;;  %v12935_v52 = vcombine.low %v12904_v63, %v12909_v44  ;;  %v1302_v22 = vrot.slane %v12518_v8, 5  ;;  %11561 = vmatmul.mubr.msk.bf16.gmra.mxu0 %vm772_vm3, %v12925_v11  ;;  %v710_v41 = vrot.slane %v708_v23, 5  ;;  %v714_v14 = vrot.slane %v712_v27, 4 }
  0x57   : > { %v12942_v9 = vcombine.low %v12525_v13, %v12529_v15  ;;  %v1309_v33 = vrot.slane %v12532_v16, 5  ;;  %v687_v29 = vsel %vm12548_vm4, %v682_v18, %v686_v5  ;;  %v697_v61 = vsel %vm12548_vm4, %v692_v34, %v696_v48 }
  0x58   : > { %18444 = vst [vmem:[#allocation33_spill] sm:$0xff] %v12935_v52  ;;  %v705_v12 = vor.u32 %v704_v40, %v701_v45  ;;  %11599 = vmatmul.mubr.msk.bf16.gmra.mxu1 %vm772_vm3, %v12935_v52  ;;  %v12951_v8 = vcombine.low %v687_v29, %v697_v61  ;;  %v715_v23 = vor.u32 %v714_v14, %v710_v41  ;;  %v720_v27 = vrot.slane %v718_v57, 5  ;;  %v12973_v14 = vld [vmem:[%s18002_s1 + $0x8] sm:$0x3] }
  0x59   : > { %v18446_v11 = vmov 0  ;;  %v10685_v16 = vrot.slane %v12512_v6, 9  ;;  %11638 = vmatprep.mubr.msk.bf16.mxu1 %vm772_vm3, %v12942_v9  ;;  %v1299_v40 = vrot.slane %v12515_v7, 5  ;;  %v10686_v5 = vrot.slane %v12525_v13, 9 }
  0x5a   : > { %18445 = vst [vmem:[#allocation34_spill] sm:$0xff] %v12951_v8  ;;  %v18447_v11 = vsel %vm12955_vm7, 4294967295, %v18446_v11  ;;  %v706_v48 = vrot.slane %v705_v12, 4  ;;  %v18449_v45 = vrot.slane %v12529_v15, 5  ;;  %11564 = vmatprep.mubr.msk.bf16.mxu0 %vm772_vm3, %v12951_v8  ;;  %v716_v57 = vrot.slane %v715_v23, 4 }
  0x5b   : > { %18448 = vst [vmem:[#allocation35_spill] sm:$0xff] %v18447_v11  ;;  %v10653_v34 = vcombine.low %v12512_v6, %v12515_v7  ;;  %v10687_v29 = vrot.slane %v12544_v30, 9  ;;  %v1313_v61 = vrot.slane %v12553_v35, 5  ;;  %v1301_v12 = vrot.slane %v1299_v40, 4 }
  0x5c   : > { %v1308_v18 = vrot.slane %v18449_v45, 4  ;;  %v711_v13 = vsel %vm12548_vm4, %v706_v48, %v710_v41  ;;  %v1307_v23 = vsel %vm12955_vm7, %v10686_v5, %v18449_v45  ;;  %v1316_v6 = vrot.slane %v12560_v43, 5 }
  0x5d   : > { %v721_v7 = vsel %vm12548_vm4, %v716_v57, %v720_v27  ;;  %v12988_v8 = vsel %vm12955_vm7, %v10685_v16, %v1299_v40  ;;  %v1315_v2 = vrot.slane %v1313_v61, 4  ;;  %v12996_v15 = vcombine.low %v12544_v30, %v12553_v35 }
  0x5e   : > { %v1310_v52 = vsel %vm12955_vm7, %v1308_v18, %v1309_v33  ;;  %v12992_v41 = vcombine.low %v711_v13, %v721_v7  ;;  %v13000_v43 = vsel %vm12955_vm7, %v1301_v12, %v1302_v22  ;;  %v13004_v27 = vsel %vm821_vm0, %v12973_v14, 0 }
  0x5f   : > { %v13008_v16 = vcombine.low %v12570_v50, %v12573_v55  ;;  %v13010_v33 = vcombine.low %v1307_v23, %v1310_v52  ;;  %v1314_v48 = vsel %vm12955_vm7, %v10687_v29, %v1313_v61  ;;  %v10688_v30 = vrot.slane %v12570_v50, 9 }
  0x60   : > { %11565 = vmatmul.mubr.msk.bf16.gmra.mxu0 %vm772_vm3, %v12992_v41  ;;  %v10702_v35 = vcombine.low %v12988_v8, %v13000_v43  ;;  %11639 = vmatmul.mubr.msk.bf16.vlgmr.msra.gmra.mxu1 %vm772_vm3, %v12996_v15  ;;  %v10689_v22 = vrot.slane %v12589_v10, 9  ;;  %v1327_v40 = vrot.slane %v12594_v19, 5  ;;  %v1330_v52 = vrot.slane %v12603_v26, 5  ;;  %v18459_v8 = vld [vmem:[#allocation28_spill] sm:$0xff] }
  0x61   : > { %11570 = vmatprep.mubr.msk.bf16.mxu0 %vm772_vm3, %v10653_v34  ;;  %v1317_v5 = vsel %vm12955_vm7, %v1315_v2, %v1316_v6  ;;  %v1320_v18 = vrot.slane %v12573_v55, 5  ;;  %11642 = vmatprep.mubr.msk.bf16.mxu1 %vm772_vm3, %v13008_v16  ;;  %v10690_v57 = vrot.slane %v12611_v42, 9  ;;  %v1334_v29 = vrot.slane %v12619_v47, 5 }
  0x62   : > { %v1328_v10 = vsel %vm12955_vm7, %v10689_v22, %v1327_v40  ;;  %v1329_v19 = vrot.slane %v1327_v40, 4  ;;  %v1337_v26 = vrot.slane %v12626_v53, 5  ;;  %v10691_v34 = vrot.slane %v12644_v4, 9 }
  0x63   : > { %v1323_v61 = vrot.slane %v12581_v62, 5  ;;  %v1335_v2 = vsel %vm12955_vm7, %v10690_v57, %v1334_v29  ;;  %v1336_v13 = vrot.slane %v1334_v29, 4  ;;  %v1341_v12 = vrot.slane %v12651_v20, 5 }
  0x64   : > { %v13040_v45 = vcombine.low %v1314_v48, %v1317_v5  ;;  %v1331_v42 = vsel %vm12955_vm7, %v1329_v19, %v1330_v52  ;;  %v1344_v47 = vrot.slane %v12658_v25, 5  ;;  %v10692_v23 = vrot.slane %v12673_v39, 9 }
  0x65   : > { %v13046_v53 = vcombine.low %v1328_v10, %v1331_v42  ;;  %v1338_v4 = vsel %vm12955_vm7, %v1336_v13, %v1337_v26  ;;  %v1342_v6 = vsel %vm12955_vm7, %v10691_v34, %v1341_v12  ;;  %v1343_v7 = vrot.slane %v1341_v12, 4 }
  0x66   : > { %v13052_v22 = vcombine.low %v1335_v2, %v1338_v4  ;;  %v1348_v20 = vrot.slane %v12677_v46, 5  ;;  %v1351_v48 = vrot.slane %v12689_v59, 5  ;;  %v10693_v40 = vrot.slane %v12699_v1, 9  ;;  %v18452_v4 = vld [vmem:[#allocation18_spill] sm:$0xff] }
  0x67   : > { %v1345_v25 = vsel %vm12955_vm7, %v1343_v7, %v1344_v47  ;;  %v1355_v39 = vrot.slane %v12706_v28, 5  ;;  %v1358_v52 = vrot.slane %v12717_v37, 5  ;;  %v10694_v5 = vrot.slane %v12724_v49, 9  ;;  %v18451_v47 = vld [vmem:[#allocation17_spill] sm:$0xff] }
  0x68   : > { %11571 = vmatmul.mubr.msk.bf16.vlgmr.msra.gmra.mxu0 %vm772_vm3, %v12942_v9  ;;  %11643 = vmatmul.mubr.msk.bf16.gmra.mxu1 %vm772_vm3, %v12630_v56  ;;  %v13066_v46 = vcombine.low %v1342_v6, %v1345_v25  ;;  %v1349_v59 = vsel %vm12955_vm7, %v10692_v23, %v1348_v20  ;;  %v1350_v1 = vrot.slane %v1348_v20, 4  ;;  %v1362_v57 = vrot.slane %v12741_v0, 5  ;;  %v18454_v20 = vld [vmem:[#allocation22_spill] sm:$0xff] }
  0x69   : > { %11603 = vmatpush3.bf16.msra.mxu0 %v12536_v17  ;;  %11574 = vmatprep.mubr.msk.bf16.mxu0 %vm772_vm3, %v12996_v15  ;;  %v1356_v28 = vsel %vm12955_vm7, %v10693_v40, %v1355_v39  ;;  %v1357_v37 = vrot.slane %v1355_v39, 4  ;;  %v1365_v49 = vrot.slane %v12753_v38, 5  ;;  %v10695_v9 = vrot.slane %v12762_v58, 9 }
  0x6a   : > { %12333 = vmatprep.subr.msk.bf16.mxu0 %vm821_vm0, %v12973_v14  ;;  %11646 = vmatprep.mubr.msk.bf16.mxu1 %vm772_vm3, %v12655_v24  ;;  %v1352_v17 = vsel %vm12955_vm7, %v1350_v1, %v1351_v48  ;;  %v1363_v0 = vsel %vm12955_vm7, %v10694_v5, %v1362_v57  ;;  %v1364_v29 = vrot.slane %v1362_v57, 4  ;;  %v1369_v10 = vrot.slane %v12768_v60, 5  ;;  %v18450_v60 = vld [vmem:[#allocation15_spill] sm:$0xff]  ;;  %v18455_v5 = vld [vmem:[#allocation24_spill] sm:$0xff]  ;;  %v18456_v1 = vld [vmem:[#allocation6_spill] sm:$0xff] }
  0x6b   : > { %v13087_v19 = vcombine.low %v1349_v59, %v1352_v17  ;;  %v1359_v38 = vsel %vm12955_vm7, %v1357_v37, %v1358_v52  ;;  %v1372_v58 = vrot.slane %v12783_v54, 5  ;;  %v10696_v14 = vrot.slane %v12791_v36, 9  ;;  %v18453_v36 = vld [vmem:[#allocation20_spill] sm:$0xff]  ;;  %v18457_v37 = vld [vmem:[#allocation26_spill] sm:$0xff] }
  0x6c   : > { %v13093_v26 = vcombine.low %v1356_v28, %v1359_v38  ;;  %v1366_v34 = vsel %vm12955_vm7, %v1364_v29, %v1365_v49  ;;  %v1370_v2 = vsel %vm12955_vm7, %v10695_v9, %v1369_v10  ;;  %v1371_v13 = vrot.slane %v1369_v10, 4  ;;  %v18458_v9 = vld [vmem:[#allocation8_spill] sm:$0xff] }
  0x6d   : > { %v13099_v12 = vcombine.low %v1363_v0, %v1366_v34  ;;  %v1376_v42 = vrot.slane %v18450_v60, 5  ;;  %v1379_v23 = vrot.slane %v18451_v47, 5  ;;  %v10697_v6 = vrot.slane %v18452_v4, 9  ;;  %v13155_v47 = vld [vmem:[%s12504_s12 + $0xc4] sm:$0xf] }
  0x6e   : > { %v1373_v54 = vsel %vm12955_vm7, %v1371_v13, %v1372_v58  ;;  %v1383_v7 = vrot.slane %v18453_v36, 5  ;;  %v1386_v48 = vrot.slane %v18454_v20, 5  ;;  %v10698_v40 = vrot.slane %v12843_v32, 9  ;;  %v13163_v36 = vld [vmem:[%s12504_s12 + $0xc8] sm:$0x1] }
  0x6f   : > { %v13109_v25 = vcombine.low %v1370_v2, %v1373_v54  ;;  %v1377_v39 = vsel %vm12955_vm7, %v10696_v14, %v1376_v42  ;;  %v1378_v52 = vrot.slane %v1376_v42, 4  ;;  %v1390_v59 = vrot.slane %v18455_v5, 5 }
  0x70   : > { %11575 = vmatmul.mubr.msk.bf16.gmra.mxu0 %vm772_vm3, %v13008_v16  ;;  %11647 = vmatmul.mubr.msk.bf16.gmra.mxu1 %vm772_vm3, %v18456_v1  ;;  %v1384_v57 = vsel %vm12955_vm7, %v10697_v6, %v1383_v7  ;;  %v1385_v28 = vrot.slane %v1383_v7, 4  ;;  %v1393_v32 = vrot.slane %v18457_v37, 5  ;;  %v10699_v49 = vrot.slane %v12876_v51, 9 }
  0x71   : > { %11604 = vmatprep.mubr.msk.bf16.mxu0 %vm772_vm3, %v10702_v35  ;;  %11650 = vmatprep.mubr.msk.bf16.mxu1 %vm772_vm3, %v18458_v9  ;;  %v1380_v17 = vsel %vm12955_vm7, %v1378_v52, %v1379_v23  ;;  %v1391_v0 = vsel %vm12955_vm7, %v10698_v40, %v1390_v59  ;;  %v1392_v29 = vrot.slane %v1390_v59, 4  ;;  %v1397_v10 = vrot.slane %v12879_v3, 5  ;;  %v13146_v3 = vld [vmem:[%s12504_s12 + $0xc0] sm:$0xf]  ;;  %v10789_v40 = vld [vmem:[%s18002_s1 + $0xc] sm:$0x3] }
  0x72   : > { %v13133_v38 = vcombine.low %v1377_v39, %v1380_v17  ;;  %v1387_v51 = vsel %vm12955_vm7, %v1385_v28, %v1386_v48  ;;  %v1400_v43 = vrot.slane %v18459_v8, 5  ;;  %v10700_v35 = vrot.slane %v12904_v63, 9  ;;  %v18465_v17 = vld [vmem:[#allocation13_spill] sm:$0xff]  ;;  %v18466_v8 = vld [vmem:[#allocation16_spill] sm:$0xff] }
  0x73   : > { %v13139_v58 = vcombine.low %v1384_v57, %v1387_v51  ;;  %v1394_v14 = vsel %vm12955_vm7, %v1392_v29, %v1393_v32  ;;  %v1398_v34 = vsel %vm12955_vm7, %v10699_v49, %v1397_v10  ;;  %v1399_v2 = vrot.slane %v1397_v10, 4  ;;  %v18463_v57 = vld [vmem:[#allocation11_spill] sm:$0xff] }
  0x74   : > { %v1322_v13 = vrot.slane %v1320_v18, 4  ;;  %v13150_v60 = vcombine.low %v1391_v0, %v1394_v14  ;;  %v1404_v42 = vrot.slane %v12909_v44, 5  ;;  %v1407_v63 = vrot.slane %v12912_v21, 5  ;;  %v18462_v21 = vld [vmem:[#allocation9_spill] sm:$0xff]  ;;  %v10807_v49 = vld [vmem:[%s18002_s1 + $0xe] sm:$0x3] }
  0x75   : > { %v1401_v23 = vsel %vm12955_vm7, %v1399_v2, %v1400_v43  ;;  %v1910_v4 = vshrl.u32 %v13146_v3, 16  ;;  %v1913_v6 = vshll.u32 %v13146_v3, 16  ;;  %v1923_v54 = vshrl.u32 %v13155_v47, 16  ;;  %v18468_v14 = vld [vmem:[#allocation25_spill] sm:$0xff]  ;;  %v18470_v2 = vld [vmem:[#allocation31_spill] sm:$0xff] }
  0x76   : > { %18460 = vst [vmem:[#allocation15_spill] sm:$0xff] %v13150_v60  ;;  %v13165_v7 = vcombine.low %v1398_v34, %v1401_v23  ;;  %v1405_v44 = vsel %vm12955_vm7, %v10700_v35, %v1404_v42  ;;  %v1406_v20 = vrot.slane %v1404_v42, 4  ;;  %v2154_v48 = vsel %vm821_vm0, %v18462_v21, 0  ;;  %v18467_v35 = vld [vmem:[#allocation21_spill] sm:$0xff]  ;;  %v18477_v21 = vld [vmem:[#allocation10_spill] sm:$0xff] }
  0x77   : > { %11705 = vmatpush3.bf16.msra.mxu1 %v2154_v48  ;;  %v1912_v39 = vrot.slane %v1910_v4, 4  ;;  %v1915_v52 = vrot.slane %v1913_v6, 5  ;;  %v1919_v5 = vshll.u32 %v13155_v47, 16  ;;  %v1321_v59 = vsel %vm12955_vm7, %v10688_v30, %v1320_v18  ;;  %v18469_v34 = vld [vmem:[#allocation29_spill] sm:$0xff]  ;;  %v10826_v4 = vld [vmem:[%s18002_s1 + $0x10] sm:$0x3] }
  0x78   : > { %18461 = vst [vmem:[#allocation17_spill] sm:$0xff] %v13165_v7  ;;  %11605 = vmatmul.mubr.msk.bf16.vlgmr.msra.gmra.mxu0 %vm772_vm3, %v13010_v33  ;;  %11651 = vmatmul.mubr.msk.bf16.gmra.mxu1 %vm772_vm3, %v18463_v57  ;;  %v1408_v28 = vsel %vm12955_vm7, %v1406_v20, %v1407_v63  ;;  %v1925_v37 = vrot.slane %v1923_v54, 4  ;;  %v1929_v32 = vshll.u32 %v13163_v36, 16  ;;  %v1324_v50 = vsel %vm12955_vm7, %v1322_v13, %v1323_v61  ;;  %v18471_v13 = vld [vmem:[#allocation33_spill] sm:$0xff]  ;;  %v18473_v6 = vld [vmem:[#allocation3_spill] sm:$0xff]  ;;  %v18474_v54 = vld [vmem:[#allocation4_spill] sm:$0xff] }
  0x79   : > { %11671 = vmatpush3.bf16.msra.mxu0 %v13004_v27  ;;  %11608 = vmatprep.mubr.msk.bf16.mxu0 %vm772_vm3, %v13040_v45  ;;  %v13198_v55 = vcombine.low %v1405_v44, %v1408_v28  ;;  %v1916_v30 = vor.u32 %v1915_v52, %v1912_v39  ;;  %v1921_v18 = vrot.slane %v1919_v5, 5  ;;  %v13204_v10 = vcombine.low %v1321_v59, %v1324_v50  ;;  %v18475_v44 = vld [vmem:[#allocation5_spill] sm:$0xff]  ;;  %v18476_v20 = vld [vmem:[#allocation7_spill] sm:$0xff]  ;;  %v18478_v48 = vld [vmem:[#allocation12_spill] sm:$0xff] }
  0x7a   : > { %11654 = vmatprep.mubr.msk.bf16.mxu1 %vm772_vm3, %v18465_v17  ;;  %12335 = vmatprep.subr.msk.bf16.mxu0 %vm821_vm0, %v10789_v40  ;;  %v1931_v27 = vrot.slane %v1929_v32, 5  ;;  %v13238_v42 = vcombine.low %v13146_v3, %v13155_v47  ;;  %v2588_v63 = vsel %vm821_vm0, %v10807_v49, 0  ;;  %v2360_v23 = vsel %vm821_vm0, %v10789_v40, 0  ;;  %v18479_v59 = vld [vmem:[#allocation14_spill] sm:$0xff]  ;;  %v18480_v28 = vld [vmem:[#allocation19_spill] sm:$0xff]  ;;  %v18485_v50 = vld [vmem:[#allocation32_spill] sm:$0xff] }
  0x7b   : > { %18464 = vst [vmem:[#allocation18_spill] sm:$0xff] %v13198_v55  ;;  %v1917_v0 = vrot.slane %v1916_v30, 4  ;;  %v1926_v29 = vor.u32 %v1925_v37, %v1921_v18  ;;  %12336 = vmatprep.subr.msk.bf16.mxu1 %vm821_vm0, %v10807_v49  ;;  %v2140_v40 = vrot.slane %v13155_v47, 5  ;;  %v10770_v39 = vrot.slane %v13146_v3, 9  ;;  %v18483_v32 = vld [vmem:[#allocation27_spill] sm:$0xff]  ;;  %v18484_v49 = vld [vmem:[#allocation30_spill] sm:$0xff] }
  0x7c   : > { %v2143_v5 = vrot.slane %v13163_v36, 5  ;;  %v18482_v36 = vld [vmem:[#allocation23_spill] sm:$0xff]  ;;  %vm3833_vm2 = vsmask.f32 6424  ;;  %vm5240_vm11 = vcmask 64512  }
  0x7d   : > { %v1922_v62 = vsel %vm12548_vm4, %v1917_v0, %v1921_v18  ;;  %v1927_v61 = vrot.slane %v1926_v29, 4  ;;  %v2142_v52 = vrot.slane %v2140_v40, 4  ;;  %v2141_v47 = vsel %vm12955_vm7, %v10770_v39, %v2140_v40 }
  0x7e   : > { %v2800_v39 = vsel %vm821_vm0, %v10826_v4, 0 }
  0x7f   : > { %v1932_v51 = vsel %vm12548_vm4, %v1927_v61, %v1931_v27  ;;  %v2144_v3 = vsel %vm12955_vm7, %v2142_v52, %v2143_v5  ;;  %v18486_v27 = vld [vmem:[#allocation34_spill] sm:$0xff] }
  0x80   : > { %11609 = vmatmul.mubr.msk.bf16.gmra.mxu0 %vm772_vm3, %v13204_v10  ;;  %11655 = vmatmul.mubr.msk.bf16.gmra.mxu1 %vm772_vm3, %v18466_v8  ;;  %v13214_v43 = vcombine.low %v1922_v62, %v1932_v51  ;;  %v13317_v37 = vcombine.low %v2141_v47, %v2144_v3 }
  0x81   : > { %11612 = vmatprep.mubr.msk.bf16.mxu0 %vm772_vm3, %v13046_v53  ;;  %11658 = vmatprep.mubr.msk.bf16.mxu1 %vm772_vm3, %v18467_v35 }
  0x82   : > { %18481 = vst [vmem:[#allocation20_spill] sm:$0xff] %v13317_v37 }
  0x88   : > { %11613 = vmatmul.mubr.msk.bf16.gmra.mxu0 %vm772_vm3, %v13052_v22  ;;  %11659 = vmatmul.mubr.msk.bf16.gmra.mxu1 %vm772_vm3, %v18468_v14 }
  0x89   : > { %11616 = vmatprep.mubr.msk.bf16.mxu0 %vm772_vm3, %v13066_v46  ;;  %11662 = vmatprep.mubr.msk.bf16.mxu1 %vm772_vm3, %v18469_v34 }
  0x90   : > { %11617 = vmatmul.mubr.msk.bf16.gmra.mxu0 %vm772_vm3, %v13087_v19  ;;  %11663 = vmatmul.mubr.msk.bf16.gmra.mxu1 %vm772_vm3, %v18470_v2 }
  0x91   : > { %11620 = vmatprep.mubr.msk.bf16.mxu0 %vm772_vm3, %v13093_v26  ;;  %11666 = vmatprep.mubr.msk.bf16.mxu1 %vm772_vm3, %v18471_v13 }
  0x98   : > { %11621 = vmatmul.mubr.msk.bf16.gmra.mxu0 %vm772_vm3, %v13099_v12  ;;  %11667 = vmatmul.mubr.msk.bf16.gmra.mxu1 %vm772_vm3, %v13238_v42 }
  0x99   : > { %11624 = vmatprep.mubr.msk.bf16.mxu0 %vm772_vm3, %v13109_v25  ;;  %11706 = vmatprep.mubr.msk.bf16.mxu1 %vm772_vm3, %v13010_v33  ;;  %v18472_v33 = vld [vmem:[#allocation2_spill] sm:$0xff] }
  0xa0   : > { %11625 = vmatmul.mubr.msk.bf16.gmra.mxu0 %vm772_vm3, %v13133_v38  ;;  %11707 = vmatmul.mubr.msk.bf16.vlgmr.msra.gmra.mxu1 %vm772_vm3, %v13040_v45 }
  0xa1   : > { %11628 = vmatprep.mubr.msk.bf16.mxu0 %vm772_vm3, %v13139_v58  ;;  %11710 = vmatprep.mubr.msk.bf16.mxu1 %vm772_vm3, %v13204_v10 }
  0xa2   : > { %11773 = vmatpush3.bf16.msra.mxu1 %v2588_v63 }
  0xa8   : > { %11629 = vmatmul.mubr.msk.bf16.gmra.mxu0 %vm772_vm3, %v13150_v60  ;;  %11711 = vmatmul.mubr.msk.bf16.gmra.mxu1 %vm772_vm3, %v13046_v53 }
  0xa9   : > { %11632 = vmatprep.mubr.msk.bf16.mxu0 %vm772_vm3, %v13165_v7  ;;  %11714 = vmatprep.mubr.msk.bf16.mxu1 %vm772_vm3, %v13052_v22 }
  0xb0   : > { %11633 = vmatmul.mubr.msk.bf16.gmra.mxu0 %vm772_vm3, %v13198_v55  ;;  %11715 = vmatmul.mubr.msk.bf16.gmra.mxu1 %vm772_vm3, %v13066_v46 }
  0xb1   : > { %11672 = vmatprep.mubr.msk.bf16.mxu0 %vm772_vm3, %v18472_v33  ;;  %11718 = vmatprep.mubr.msk.bf16.mxu1 %vm772_vm3, %v13087_v19 }
  0xb8   : > { %11673 = vmatmul.mubr.msk.bf16.vlgmr.msra.gmra.mxu0 %vm772_vm3, %v18473_v6  ;;  %11719 = vmatmul.mubr.msk.bf16.gmra.mxu1 %vm772_vm3, %v13093_v26 }
  0xb9   : > { %11739 = vmatpush3.bf16.msra.mxu0 %v2360_v23  ;;  %11676 = vmatprep.mubr.msk.bf16.mxu0 %vm772_vm3, %v18474_v54 }
  0xba   : > { %11722 = vmatprep.mubr.msk.bf16.mxu1 %vm772_vm3, %v13099_v12  ;;  %12337 = vmatprep.subr.msk.bf16.mxu0 %vm821_vm0, %v10826_v4  ;;  %vm3831_vm0 = vsmask.f32 5396 }
  0xc0   : > { %11677 = vmatmul.mubr.msk.bf16.gmra.mxu0 %vm772_vm3, %v18475_v44  ;;  %11723 = vmatmul.mubr.msk.bf16.gmra.mxu1 %vm772_vm3, %v13109_v25 }
  0xc1   : > { %11680 = vmatprep.mubr.msk.bf16.mxu0 %vm772_vm3, %v18476_v20  ;;  %11726 = vmatprep.mubr.msk.bf16.mxu1 %vm772_vm3, %v13133_v38 }
  0xc8   : > { %11681 = vmatmul.mubr.msk.bf16.gmra.mxu0 %vm772_vm3, %v18477_v21  ;;  %11727 = vmatmul.mubr.msk.bf16.gmra.mxu1 %vm772_vm3, %v13139_v58 }
  0xc9   : > { %11684 = vmatprep.mubr.msk.bf16.mxu0 %vm772_vm3, %v18478_v48  ;;  %11730 = vmatprep.mubr.msk.bf16.mxu1 %vm772_vm3, %v13150_v60 }
  0xd0   : > { %11685 = vmatmul.mubr.msk.bf16.gmra.mxu0 %vm772_vm3, %v18479_v59  ;;  %11731 = vmatmul.mubr.msk.bf16.gmra.mxu1 %vm772_vm3, %v13165_v7 }
  0xd1   : > { %11688 = vmatprep.mubr.msk.bf16.mxu0 %vm772_vm3, %v18480_v28  ;;  %11734 = vmatprep.mubr.msk.bf16.mxu1 %vm772_vm3, %v13198_v55  ;;  %v13415_v55 = vld [vmem:[%s12504_s12 + $0xd4] sm:$0x1] }
  0xd8   : > { %11689 = vmatmul.mubr.msk.bf16.gmra.mxu0 %vm772_vm3, %v18482_v36  ;;  %11735 = vmatmul.mubr.msk.bf16.gmra.mxu1 %vm772_vm3, %v13317_v37 }
  0xd9   : > { %11692 = vmatprep.mubr.msk.bf16.mxu0 %vm772_vm3, %v18483_v32  ;;  %11774 = vmatprep.mubr.msk.bf16.mxu1 %vm772_vm3, %v18473_v6 }
  0xe0   : > { %11693 = vmatmul.mubr.msk.bf16.gmra.mxu0 %vm772_vm3, %v18484_v49  ;;  %11775 = vmatmul.mubr.msk.bf16.vlgmr.msra.gmra.mxu1 %vm772_vm3, %v18474_v54  ;;  %v13333_v30 = vpop.f32.mrf.mxu0 }
  0xe1   : > { %11696 = vmatprep.mubr.msk.bf16.mxu0 %vm772_vm3, %v18485_v50  ;;  %11778 = vmatprep.mubr.msk.bf16.mxu1 %vm772_vm3, %v18475_v44 }
  0xe2   : > { %v13337_v18 = vpop.f32.mrf.mxu0 }
  0xe4   : > { %v13339_v0 = vpop.f32.mrf.mxu0 }
  0xe6   : > { %v13341_v29 = vpop.f32.mrf.mxu0 }
  0xe8   : > { %11697 = vmatmul.mubr.msk.bf16.gmra.mxu0 %vm772_vm3, %v18486_v27  ;;  %11779 = vmatmul.mubr.msk.bf16.gmra.mxu1 %vm772_vm3, %v18476_v20 }
  0xe9   : > { %11700 = vmatprep.mubr.msk.bf16.mxu0 %vm772_vm3, %v12992_v41  ;;  %11782 = vmatprep.mubr.msk.bf16.mxu1 %vm772_vm3, %v18477_v21 }
  0xea   : > { %v13351_v62 = vpop.f32.mrf.mxu0 }
  0xeb   : > { %v11580_v61 = vpop.f32.mrf.mxu1 }
  0xec   : > { %v13353_v51 = vpop.f32.mrf.mxu0 }
  0xed   : > { %v1183_v63 = vpop.f32.mrf.mxu1 }
  0xee   : > { %v13355_v33 = vpop.f32.mrf.mxu0 }
  0xef   : > { %v11581_v23 = vpop.f32.mrf.mxu1 }
  0xf0   : > { %11701 = vmatmul.mubr.msk.bf16.gmra.mxu0 %vm772_vm3, %v13214_v43  ;;  %11783 = vmatmul.mubr.msk.bf16.gmra.mxu1 %vm772_vm3, %v18478_v48  ;;  %v13361_v6 = vpop.f32.mrf.mxu0 }
  0xf1   : > { %11740 = vmatprep.mubr.msk.bf16.mxu0 %vm772_vm3, %v12996_v15  ;;  %11786 = vmatprep.mubr.msk.bf16.mxu1 %vm772_vm3, %v18479_v59  ;;  %v1186_v54 = vpop.f32.mrf.mxu1 }
  0xf2   : > { %v11546_v44 = vpop.f32.mrf.mxu0 }
  0xf3   : > { %v13367_v20 = vadd.f32 %v11580_v61, %v11546_v44 }
  0xf4   : > { %v891_v21 = vpop.f32.mrf.mxu0  ;;  %v11584_v40 = vpop.f32.mrf.mxu1 }
  0xf5   : > { %v13370_v52 = vadd.f32 %v1183_v63, %v891_v21 }
  0xf6   : > { %v11547_v48 = vpop.f32.mrf.mxu0  ;;  %v1199_v5 = vpop.f32.mrf.mxu1 }
  0xf7   : > { %v13374_v15 = vadd.f32 %v11581_v23, %v11547_v48  ;;  %v13387_v23 = vld [vmem:[%s12504_s12 + $0xcc] sm:$0xf] }
  0xf8   : > { %11741 = vmatmul.mubr.msk.bf16.vlgmr.msra.gmra.mxu0 %vm772_vm3, %v13008_v16  ;;  %11787 = vmatmul.mubr.msk.bf16.gmra.mxu1 %vm772_vm3, %v18480_v28  ;;  %v894_v59 = vpop.f32.mrf.mxu0  ;;  %v11585_v4 = vpop.f32.mrf.mxu1  ;;  %v13390_v28 = vld [vmem:[%s12504_s12 + $0xd0] sm:$0xf]  ;;  %v2559_v48 = vshll.u32 %v13387_v23, 16 }
  0xf9   : > { %11807 = vmatpush3.bf16.msra.mxu0 %v2800_v39  ;;  %11744 = vmatprep.mubr.msk.bf16.mxu0 %vm772_vm3, %v12630_v56  ;;  %v13380_v47 = vadd.f32 %v1186_v54, %v894_v59 }
  0xfa   : > { %11790 = vmatprep.mubr.msk.bf16.mxu1 %vm772_vm3, %v18482_v36  ;;  %v1202_v3 = vpop.f32.mrf.mxu1  ;;  %v2556_v36 = vshrl.u32 %v13387_v23, 16 }
  0xfc   : > { %v11550_v61 = vpop.f32.mrf.mxu0 }
  0xfd   : > { %v13384_v63 = vadd.f32 %v11584_v40, %v11550_v61  ;;  %v11588_v16 = vpop.f32.mrf.mxu1 }
  0xfe   : > { %v907_v44 = vpop.f32.mrf.mxu0 }
  0xff   : > { %v13392_v21 = vadd.f32 %v1199_v5, %v907_v44  ;;  %v1215_v39 = vpop.f32.mrf.mxu1  ;;  %v2565_v5 = vshll.u32 %v13390_v28, 16  ;;  %v2558_v44 = vrot.slane %v2556_v36, 4 }
 0x100   : > { %11745 = vmatmul.mubr.msk.bf16.gmra.mxu0 %vm772_vm3, %v12655_v24  ;;  %v11551_v56 = vpop.f32.mrf.mxu0  ;;  %11791 = vmatmul.mubr.msk.bf16.gmra.mxu1 %vm772_vm3, %v18483_v32  ;;  %v2569_v24 = vshrl.u32 %v13390_v28, 16 }
 0x101   : > { %v13399_v54 = vadd.f32 %v11585_v4, %v11551_v56  ;;  %11748 = vmatprep.mubr.msk.bf16.mxu0 %vm772_vm3, %v18456_v1  ;;  %v11589_v40 = vpop.f32.mrf.mxu1  ;;  %11794 = vmatprep.mubr.msk.bf16.mxu1 %vm772_vm3, %v18484_v49  ;;  %v2561_v56 = vrot.slane %v2559_v48, 5  ;;  %v2567_v11 = vrot.slane %v2565_v5, 5 }
 0x102   : > { %v910_v59 = vpop.f32.mrf.mxu0  ;;  %v2571_v1 = vrot.slane %v2569_v24, 4  ;;  %v2575_v24 = vshll.u32 %v13415_v55, 16 }
 0x103   : > { %v13408_v32 = vadd.f32 %v1202_v3, %v910_v59  ;;  %v13410_v61 = vpop.f32.mrf.mxu1 }
 0x104   : > { %18487 = vst [vmem:[#allocation22_spill] sm:$0xff] %v13410_v61  ;;  %v11554_v4 = vpop.f32.mrf.mxu0  ;;  %v2572_v48 = vor.u32 %v2571_v1, %v2567_v11 }
 0x105   : > { %v13412_v37 = vadd.f32 %v11588_v16, %v11554_v4  ;;  %v2562_v16 = vor.u32 %v2561_v56, %v2558_v44 }
 0x106   : > { %v923_v49 = vpop.f32.mrf.mxu0  ;;  %v11592_v7 = vpop.f32.mrf.mxu1  ;;  %v2573_v4 = vrot.slane %v2572_v48, 4 }
 0x107   : > { %v13419_v60 = vadd.f32 %v1215_v39, %v923_v49  ;;  %v2577_v49 = vrot.slane %v2575_v24, 5 }
 0x108   : > { %11749 = vmatmul.mubr.msk.bf16.gmra.mxu0 %vm772_vm3, %v18458_v9  ;;  %11795 = vmatmul.mubr.msk.bf16.gmra.mxu1 %vm772_vm3, %v18485_v50  ;;  %v11555_v3 = vpop.f32.mrf.mxu0  ;;  %v1231_v36 = vpop.f32.mrf.mxu1  ;;  %v2563_v50 = vrot.slane %v2562_v16, 4 }
 0x109   : > { %11752 = vmatprep.mubr.msk.bf16.mxu0 %vm772_vm3, %v18463_v57  ;;  %11798 = vmatprep.mubr.msk.bf16.mxu1 %vm772_vm3, %v18486_v27  ;;  %v13428_v5 = vadd.f32 %v11589_v40, %v11555_v3 }
 0x10a   : > { %v13430_v9 = vpop.f32.mrf.mxu0  ;;  %v11593_v39 = vpop.f32.mrf.mxu1  ;;  %v2568_v44 = vsel %vm12548_vm4, %v2563_v50, %v2567_v11 }
 0x10b   : > { %18488 = vst [vmem:[#allocation24_spill] sm:$0xff] %v13430_v9 }
 0x10c   : > { %v13432_v59 = vpop.f32.mrf.mxu1 }
 0x10d   : > { %18489 = vst [vmem:[#allocation6_spill] sm:$0xff] %v13432_v59 }
 0x10e   : > { %v11558_v61 = vpop.f32.mrf.mxu0 }
 0x10f   : > { %v13434_v57 = vadd.f32 %v11592_v7, %v11558_v61  ;;  %v11596_v27 = vpop.f32.mrf.mxu1  ;;  %v2578_v7 = vsel %vm12548_vm4, %v2573_v4, %v2577_v49  ;;  %vm3835_vm4 = vsmask.f32 7452 }
 0x110   : > { %11753 = vmatmul.mubr.msk.bf16.gmra.mxu0 %vm772_vm3, %v18465_v17  ;;  %11799 = vmatmul.mubr.msk.bf16.gmra.mxu1 %vm772_vm3, %v12992_v41  ;;  %v939_v40 = vpop.f32.mrf.mxu0  ;;  %v10808_v3 = vcombine.low %v2568_v44, %v2578_v7 }
 0x111   : > { %11756 = vmatprep.mubr.msk.bf16.mxu0 %vm772_vm3, %v18466_v8  ;;  %11802 = vmatprep.mubr.msk.bf16.mxu1 %vm772_vm3, %v13214_v43  ;;  %v13448_v61 = vadd.f32 %v1231_v36, %v939_v40  ;;  %v1247_v17 = vpop.f32.mrf.mxu1 }
 0x112   : > { %v11559_v56 = vpop.f32.mrf.mxu0 }
 0x113   : > { %v13450_v1 = vadd.f32 %v11593_v39, %v11559_v56  ;;  %v11597_v41 = vpop.f32.mrf.mxu1 }
 0x114   : > { %v13452_v16 = vpop.f32.mrf.mxu0 }
 0x115   : > { %18490 = vst [vmem:[#allocation26_spill] sm:$0xff] %v13452_v16  ;;  %v13454_v8 = vpop.f32.mrf.mxu1 }
 0x116   : > { %18491 = vst [vmem:[#allocation8_spill] sm:$0xff] %v13454_v8  ;;  %v11562_v48 = vpop.f32.mrf.mxu0 }
 0x117   : > { %v13456_v43 = vadd.f32 %v11596_v27, %v11562_v48 }
 0x118   : > { %11757 = vmatmul.mubr.msk.bf16.gmra.mxu0 %vm772_vm3, %v18467_v35  ;;  %v11600_v31 = vpop.f32.mrf.mxu1  ;;  %11803 = vmatmul.mubr.msk.bf16.gmra.mxu1 %vm772_vm3, %v10808_v3  ;;  %v955_v11 = vpop.f32.mrf.mxu0 }
 0x119   : > { %18492 = vst [vmem:[#allocation28_spill] sm:$0xff] %v13456_v43  ;;  %11760 = vmatprep.mubr.msk.bf16.mxu0 %vm772_vm3, %v18468_v14  ;;  %v13463_v36 = vadd.f32 %v1247_v17, %v955_v11 }
 0x11a   : > { %v1263_v24 = vpop.f32.mrf.mxu1  ;;  %v11563_v39 = vpop.f32.mrf.mxu0 }
 0x11b   : > { %18493 = vst [vmem:[#allocation9_spill] sm:$0xff] %v13463_v36  ;;  %v13465_v50 = vadd.f32 %v11597_v41, %v11563_v39 }
 0x11c   : > { %v11601_v4 = vpop.f32.mrf.mxu1  ;;  %v13467_v49 = vpop.f32.mrf.mxu0 }
 0x11d   : > { %18494 = vst [vmem:[#allocation11_spill] sm:$0xff] %v13465_v50  ;;  %18495 = vst [vmem:[#allocation13_spill] sm:$0xff] %v13467_v49 }
 0x11e   : > { %v13469_v27 = vpop.f32.mrf.mxu1 }
 0x11f   : > { %18496 = vst [vmem:[#allocation16_spill] sm:$0xff] %v13469_v27 }
 0x120   : > { %v11566_v40 = vpop.f32.mrf.mxu0  ;;  %11761 = vmatmul.mubr.msk.bf16.gmra.mxu0 %vm772_vm3, %v18469_v34  ;;  %v11640_v35 = vpop.f32.mrf.mxu1 }
 0x121   : > { %v13473_v44 = vadd.f32 %v11600_v31, %v11566_v40  ;;  %11764 = vmatprep.mubr.msk.bf16.mxu0 %vm772_vm3, %v18470_v2  ;;  %v10790_v40 = vcombine.low %v13387_v23, %v13390_v28 }
 0x122   : > { %v971_v14 = vpop.f32.mrf.mxu0  ;;  %v1750_v7 = vpop.f32.mrf.mxu1 }
 0x123   : > { %18497 = vst [vmem:[#allocation21_spill] sm:$0xff] %v13473_v44  ;;  %v13477_v17 = vadd.f32 %v1263_v24, %v971_v14 }
 0x124   : > { %v11567_v56 = vpop.f32.mrf.mxu0  ;;  %v11641_v41 = vpop.f32.mrf.mxu1 }
 0x125   : > { %18498 = vst [vmem:[#allocation25_spill] sm:$0xff] %v13477_v17  ;;  %v13479_v3 = vadd.f32 %v11601_v4, %v11567_v56 }
 0x126   : > { %v13481_v48 = vpop.f32.mrf.mxu0  ;;  %v13483_v11 = vpop.f32.mrf.mxu1 }
 0x127   : > { %18499 = vst [vmem:[#allocation29_spill] sm:$0xff] %v13479_v3  ;;  %18500 = vst [vmem:[#allocation31_spill] sm:$0xff] %v13481_v48 }
 0x128   : > { %18501 = vst [vmem:[#allocation33_spill] sm:$0xff] %v13483_v11  ;;  %v11572_v39 = vpop.f32.mrf.mxu0  ;;  %11765 = vmatmul.mubr.msk.bf16.gmra.mxu0 %vm772_vm3, %v18471_v13  ;;  %v11644_v34 = vpop.f32.mrf.mxu1 }
 0x129   : > { %11768 = vmatprep.mubr.msk.bf16.mxu0 %vm772_vm3, %v13238_v42  ;;  %v1160_v9 = vadd.f32 %v11572_v39, %v13333_v30 }
 0x12a   : > { %v1151_v2 = vpop.f32.mrf.mxu0  ;;  %v1766_v31 = vpop.f32.mrf.mxu1 }
 0x12c   : > { %v11573_v24 = vpop.f32.mrf.mxu0  ;;  %v11645_v4 = vpop.f32.mrf.mxu1 }
 0x12d   : > { %v1163_v44 = vadd.f32 %v11573_v24, %v13339_v0 }
 0x12e   : > { %v1154_v14 = vpop.f32.mrf.mxu0  ;;  %v13491_v56 = vpop.f32.mrf.mxu1 }
 0x12f   : > { %18502 = vst [vmem:[#allocation2_spill] sm:$0xff] %v13491_v56 }
 0x130   : > { %v11576_v27 = vpop.f32.mrf.mxu0  ;;  %11769 = vmatmul.mubr.msk.bf16.gmra.mxu0 %vm772_vm3, %v10790_v40  ;;  %v11648_v48 = vpop.f32.mrf.mxu1  ;;  %v1152_v40 = vadd.f32 %v1151_v2, %v13337_v18 }
 0x131   : > { %11808 = vmatprep.mubr.msk.bf16.mxu0 %vm772_vm3, %v13040_v45 }
 0x132   : > { %v1167_v13 = vpop.f32.mrf.mxu0  ;;  %v1782_v8 = vpop.f32.mrf.mxu1 }
 0x134   : > { %v11577_v42 = vpop.f32.mrf.mxu0  ;;  %v11649_v49 = vpop.f32.mrf.mxu1 }
 0x136   : > { %v1170_v59 = vpop.f32.mrf.mxu0  ;;  %v13496_v16 = vpop.f32.mrf.mxu1 }
 0x137   : > { %18503 = vst [vmem:[#allocation3_spill] sm:$0xff] %v13496_v16  ;;  %v1171_v24 = vadd.f32 %v1170_v59, %v13361_v6 }
 0x138   : > { %v11606_v11 = vpop.f32.mrf.mxu0  ;;  %11809 = vmatmul.mubr.msk.bf16.vlgmr.msra.gmra.mxu0 %vm772_vm3, %v13204_v10  ;;  %v13501_v56 = vpop.f32.mrf.mxu1  ;;  %v1155_v10 = vadd.f32 %v1154_v14, %v13341_v29 }
 0x139   : > { %v1673_v3 = vadd.f32 %v11606_v11, %v1160_v9  ;;  %11812 = vmatprep.mubr.msk.bf16.mxu0 %vm772_vm3, %v13046_v53  ;;  %v1176_v53 = vadd.f32 %v11576_v27, %v13351_v62 }
 0x13a   : > { %v1544_v45 = vpop.f32.mrf.mxu0  ;;  %v13506_v17 = vpop.f32.mrf.mxu1 }
 0x13b   : > { %v1671_v16 = vadd.f32 %v1544_v45, %v1152_v40  ;;  %v13509_v50 = vadd.f32 %v11640_v35, %v1673_v3  ;;  %v1168_v3 = vadd.f32 %v1167_v13, %v13353_v51 }
 0x13c   : > { %v11607_v30 = vpop.f32.mrf.mxu0  ;;  %v11653_v39 = vpop.f32.mrf.mxu1 }
 0x13d   : > { %v1674_v36 = vadd.f32 %v11607_v30, %v1163_v44  ;;  %v13512_v43 = vadd.f32 %v1750_v7, %v1671_v16  ;;  %v1179_v7 = vadd.f32 %v11577_v42, %v13355_v33 }
 0x13e   : > { %v1547_v18 = vpop.f32.mrf.mxu0  ;;  %v13514_v9 = vpop.f32.mrf.mxu1 }
 0x13f   : > { %v13517_v11 = vadd.f32 %v1547_v18, %v1155_v10  ;;  %v13519_v2 = vadd.f32 %v11641_v41, %v1674_v36 }
 0x140   : > { %v11610_v0 = vpop.f32.mrf.mxu0  ;;  %11813 = vmatmul.mubr.msk.bf16.gmra.mxu0 %vm772_vm3, %v13052_v22  ;;  %v11656_v35 = vpop.f32.mrf.mxu1 }
 0x141   : > { %v1677_v29 = vadd.f32 %v11610_v0, %v1176_v53  ;;  %11816 = vmatprep.mubr.msk.bf16.mxu0 %vm772_vm3, %v13066_v46 }
 0x142   : > { %v1560_v16 = vpop.f32.mrf.mxu0  ;;  %v1814_v44 = vpop.f32.mrf.mxu1 }
 0x143   : > { %v1675_v62 = vadd.f32 %v1560_v16, %v1168_v3  ;;  %v13527_v27 = vadd.f32 %v11644_v34, %v1677_v29 }
 0x144   : > { %v11611_v36 = vpop.f32.mrf.mxu0  ;;  %v11657_v41 = vpop.f32.mrf.mxu1 }
 0x145   : > { %v1678_v14 = vadd.f32 %v11611_v36, %v1179_v7  ;;  %v13530_v22 = vadd.f32 %v1766_v31, %v1675_v62 }
 0x146   : > { %v1563_v40 = vpop.f32.mrf.mxu0  ;;  %v13532_v51 = vpop.f32.mrf.mxu1 }
 0x147   : > { %v13534_v13 = vadd.f32 %v1563_v40, %v1171_v24  ;;  %v13536_v46 = vadd.f32 %v11645_v4, %v1678_v14 }
 0x148   : > { %v11614_v45 = vpop.f32.mrf.mxu0  ;;  %11817 = vmatmul.mubr.msk.bf16.gmra.mxu0 %vm772_vm3, %v13087_v19  ;;  %v13540_v33 = vpop.f32.mrf.mxu1 }
 0x149   : > { %v1681_v34 = vadd.f32 %v11614_v45, %v13367_v20  ;;  %11820 = vmatprep.mubr.msk.bf16.mxu0 %vm772_vm3, %v13093_v26 }
 0x14a   : > { %v1576_v6 = vpop.f32.mrf.mxu0  ;;  %v13545_v59 = vpop.f32.mrf.mxu1 }
 0x14b   : > { %v1679_v31 = vadd.f32 %v1576_v6, %v13370_v52  ;;  %v13548_v42 = vadd.f32 %v11648_v48, %v1681_v34  ;;  %v18071_v34 = vmov 0.0  }
 0x14c   : > { %v11615_v4 = vpop.f32.mrf.mxu0  ;;  %v13550_v30 = vpop.f32.mrf.mxu1  ;;  %11840 = vmatprep.subr.bf16.mxu1 %v18071_v34  ;;  %11894 = vmatprep.subr.bf16.mxu0 %v18071_v34 }
 0x14d   : > { %v1682_v10 = vadd.f32 %v11615_v4, %v13374_v15  ;;  %v13553_v19 = vadd.f32 %v1782_v8, %v1679_v31  ;;  %v18505_v4 = vld [vmem:[#allocation17_spill] sm:$0xff] }
 0x14e   : > { %v1579_v18 = vpop.f32.mrf.mxu0  ;;  %v13555_v53 = vpop.f32.mrf.mxu1 }
 0x14f   : > { %v13558_v20 = vadd.f32 %v1579_v18, %v13380_v47  ;;  %v13560_v26 = vadd.f32 %v11649_v49, %v1682_v10 }
 0x150   : > { %v11618_v0 = vpop.f32.mrf.mxu0  ;;  %11821 = vmatmul.mubr.msk.bf16.gmra.mxu0 %vm772_vm3, %v13099_v12  ;;  %v13564_v52 = vpop.f32.mrf.mxu1 }
 0x151   : > { %v1685_v48 = vadd.f32 %v11618_v0, %v13384_v63  ;;  %11824 = vmatprep.mubr.msk.bf16.mxu0 %vm772_vm3, %v13109_v25 }
 0x152   : > { %v1592_v15 = vpop.f32.mrf.mxu0  ;;  %v13569_v8 = vpop.f32.mrf.mxu1 }
 0x153   : > { %v1683_v3 = vadd.f32 %v1592_v15, %v13392_v21  ;;  %v13573_v47 = vadd.f32 %v13501_v56, %v1685_v48 }
 0x154   : > { %v11619_v49 = vpop.f32.mrf.mxu0  ;;  %v13575_v29 = vpop.f32.mrf.mxu1 }
 0x155   : > { %v1686_v12 = vadd.f32 %v11619_v49, %v13399_v54  ;;  %v13579_v16 = vadd.f32 %v13506_v17, %v1683_v3  ;;  %v10825_v3 = vrot.slane %v13387_v23, 9 }
 0x156   : > { %v1595_v63 = vpop.f32.mrf.mxu0  ;;  %v13581_v7 = vpop.f32.mrf.mxu1 }
 0x157   : > { %v13584_v25 = vadd.f32 %v1595_v63, %v13408_v32  ;;  %v13586_v62 = vadd.f32 %v11653_v39, %v1686_v12  ;;  %v2789_v63 = vrot.slane %v13415_v55, 5 }
 0x158   : > { %v11622_v21 = vpop.f32.mrf.mxu0  ;;  %11825 = vmatmul.mubr.msk.bf16.gmra.mxu0 %vm772_vm3, %v13133_v38  ;;  %v13590_v56 = vpop.f32.mrf.mxu1 }
 0x159   : > { %v1689_v36 = vadd.f32 %v11622_v21, %v13412_v37  ;;  %11828 = vmatprep.mubr.msk.bf16.mxu0 %vm772_vm3, %v13139_v58 }
 0x15a   : > { %v1608_v54 = vpop.f32.mrf.mxu0  ;;  %v13595_v17 = vpop.f32.mrf.mxu1 }
 0x15b   : > { %v1687_v24 = vadd.f32 %v1608_v54, %v13419_v60  ;;  %v13598_v32 = vadd.f32 %v11656_v35, %v1689_v36  ;;  %v10958_v60 = vld [vmem:[%s18005_s4 + $0x4] sm:$0xf] }
 0x15c   : > { %v11623_v39 = vpop.f32.mrf.mxu0  ;;  %v13600_v14 = vpop.f32.mrf.mxu1  ;;  %v5282_v6 = vsel %vm5280_vm8, %v10958_v60, 0  ;;  %v18506_v54 = vld [vmem:[#allocation18_spill] sm:$0xff] }
 0x15d   : > { %v1690_v40 = vadd.f32 %v11623_v39, %v13428_v5  ;;  %v13603_v38 = vadd.f32 %v1814_v44, %v1687_v24  ;;  %v18504_v5 = vld [vmem:[#allocation15_spill] sm:$0xff]  ;;  %11841 = vmatpush3.bf16.msra.mxu1 %v5282_v6  ;;  %v18507_v24 = vld [vmem:[#allocation28_spill] sm:$0xff] }
 0x15e   : > { %v13605_v45 = vpop.f32.mrf.mxu0  ;;  %v13607_v37 = vpop.f32.mrf.mxu1  ;;  %11948 = vmatprep.subr.bf16.mxu1 %v18071_v34  ;;  %v18508_v39 = vld [vmem:[#allocation20_spill] sm:$0xff] }
 0x15f   : > { %v13611_v58 = vadd.f32 %v11657_v41, %v1690_v40  ;;  %v2786_v41 = vrot.slane %v13390_v28, 5 }
 0x160   : > { %v11626_v35 = vpop.f32.mrf.mxu0  ;;  %11829 = vmatmul.mubr.msk.bf16.gmra.mxu0 %vm772_vm3, %v18504_v5  ;;  %v11708_v44 = vpop.f32.mrf.mxu1 }
 0x161   : > { %v1693_v31 = vadd.f32 %v11626_v35, %v13434_v57  ;;  %11832 = vmatprep.mubr.msk.bf16.mxu0 %vm772_vm3, %v18505_v4  ;;  %v2788_v28 = vrot.slane %v2786_v41, 4  ;;  %v2787_v55 = vsel %vm12955_vm7, %v10825_v3, %v2786_v41 }
 0x162   : > { %v1624_v10 = vpop.f32.mrf.mxu0  ;;  %v2190_v18 = vpop.f32.mrf.mxu1 }
 0x163   : > { %v1691_v0 = vadd.f32 %v1624_v10, %v13448_v61  ;;  %v13626_v48 = vadd.f32 %v13540_v33, %v1693_v31  ;;  %v2790_v40 = vsel %vm12955_vm7, %v2788_v28, %v2789_v63  ;;  %v18513_v63 = vld [vmem:[#allocation21_spill] sm:$0xff] }
 0x164   : > { %v11627_v15 = vpop.f32.mrf.mxu0  ;;  %v11709_v49 = vpop.f32.mrf.mxu1  ;;  %v10827_v4 = vcombine.low %v2787_v55, %v2790_v40 }
 0x165   : > { %v1694_v57 = vadd.f32 %v11627_v15, %v13450_v1  ;;  %v13631_v12 = vadd.f32 %v13545_v59, %v1691_v0  ;;  %v18511_v0 = vld [vmem:[#allocation11_spill] sm:$0xff] }
 0x166   : > { %v13634_v21 = vpop.f32.mrf.mxu0  ;;  %v13636_v36 = vpop.f32.mrf.mxu1 }
 0x167   : > { %v13639_v61 = vadd.f32 %v13550_v30, %v1694_v57  ;;  %v18510_v30 = vld [vmem:[#allocation9_spill] sm:$0xff] }
 0x168   : > { %v11630_v33 = vpop.f32.mrf.mxu0  ;;  %11833 = vmatmul.mubr.msk.bf16.gmra.mxu0 %vm772_vm3, %v18506_v54  ;;  %v11712_v23 = vpop.f32.mrf.mxu1 }
 0x169   : > { %v1697_v1 = vadd.f32 %v11630_v33, %v18507_v24  ;;  %11836 = vmatprep.mubr.msk.bf16.mxu0 %vm772_vm3, %v18508_v39  ;;  %v18514_v39 = vld [vmem:[#allocation25_spill] sm:$0xff] }
 0x16a   : > { %v1640_v60 = vpop.f32.mrf.mxu0  ;;  %v2206_v35 = vpop.f32.mrf.mxu1 }
 0x16b   : > { %v1695_v5 = vadd.f32 %v1640_v60, %v18510_v30  ;;  %v13652_v6 = vadd.f32 %v13564_v52, %v1697_v1  ;;  %v18515_v60 = vld [vmem:[#allocation29_spill] sm:$0xff] }
 0x16c   : > { %v11631_v31 = vpop.f32.mrf.mxu0  ;;  %v11713_v10 = vpop.f32.mrf.mxu1 }
 0x16d   : > { %v1698_v15 = vadd.f32 %v11631_v31, %v18511_v0  ;;  %v13656_v57 = vadd.f32 %v13569_v8, %v1695_v5 }
 0x16e   : > { %v13658_v33 = vpop.f32.mrf.mxu0  ;;  %v13660_v41 = vpop.f32.mrf.mxu1 }
 0x16f   : > { %18512 = vst [vmem:[#allocation4_spill] sm:$0xff] %v13660_v41  ;;  %v13663_v3 = vadd.f32 %v13575_v29, %v1698_v15 }
 0x170   : > { %v11634_v28 = vpop.f32.mrf.mxu0  ;;  %11837 = vmatmul.mubr.msk.bf16.gmra.mxu0 %vm772_vm3, %v10827_v4  ;;  %v11716_v52 = vpop.f32.mrf.mxu1  ;;  %vm14051_vm3 = vmor %vm3826_vm1, %vm3827_vm13 }
 0x171   : > { %v1701_v54 = vadd.f32 %v11634_v28, %v18513_v63  ;;  %vm3830_vm5 = vmor %vm14051_vm3, %vm3829_vm14 }
 0x172   : > { %v1656_v24 = vpop.f32.mrf.mxu0  ;;  %v2222_v1 = vpop.f32.mrf.mxu1  ;;  %vm14111_vm6 = vmor %vm3830_vm5, %vm3831_vm0 }
 0x173   : > { %v1699_v59 = vadd.f32 %v1656_v24, %v18514_v39  ;;  %v13669_v8 = vadd.f32 %v13590_v56, %v1701_v54  ;;  %vm14151_vm7 = vmor %vm14111_vm6, %vm3833_vm2 }
 0x174   : > { %v11635_v55 = vpop.f32.mrf.mxu0  ;;  %v11717_v40 = vpop.f32.mrf.mxu1  ;;  %vm14186_vm10 = vmor %vm14151_vm7, %vm3835_vm4 }
 0x175   : > { %v1702_v30 = vadd.f32 %v11635_v55, %v18515_v60  ;;  %v13673_v29 = vadd.f32 %v13595_v17, %v1699_v59 }
 0x176   : > { %v13675_v5 = vpop.f32.mrf.mxu0  ;;  %v13677_v31 = vpop.f32.mrf.mxu1 }
 0x177   : > { %18516 = vst [vmem:[#allocation5_spill] sm:$0xff] %v13677_v31  ;;  %v13680_v4 = vadd.f32 %v13600_v14, %v1702_v30 }
 0x178   : > { %v11674_v0 = vpop.f32.mrf.mxu0  ;;  %v11720_v15 = vpop.f32.mrf.mxu1 }
 0x179   : > { %v2107_v28 = vadd.f32 %v11674_v0, %v13509_v50 }
 0x17a   : > { %v1978_v56 = vpop.f32.mrf.mxu0  ;;  %v2238_v63 = vpop.f32.mrf.mxu1 }
 0x17b   : > { %v2105_v54 = vadd.f32 %v1978_v56, %v13512_v43  ;;  %v13684_v24 = vadd.f32 %v11708_v44, %v2107_v28 }
 0x17c   : > { %v11675_v39 = vpop.f32.mrf.mxu0  ;;  %v11721_v17 = vpop.f32.mrf.mxu1 }
 0x17d   : > { %v2108_v59 = vadd.f32 %v11675_v39, %v13519_v2  ;;  %v13687_v55 = vadd.f32 %v2190_v18, %v2105_v54 }
 0x17e   : > { %v13689_v60 = vpop.f32.mrf.mxu0  ;;  %v13691_v14 = vpop.f32.mrf.mxu1 }
 0x17f   : > { %18517 = vst [vmem:[#allocation7_spill] sm:$0xff] %v13691_v14  ;;  %v13693_v30 = vadd.f32 %v11709_v49, %v2108_v59 }
 0x180   : > { %v11678_v34 = vpop.f32.mrf.mxu0  ;;  %v11724_v50 = vpop.f32.mrf.mxu1 }
 0x181   : > { %v2111_v0 = vadd.f32 %v11678_v34, %v13527_v27 }
 0x182   : > { %v1994_v31 = vpop.f32.mrf.mxu0  ;;  %v2254_v43 = vpop.f32.mrf.mxu1 }
 0x183   : > { %v2109_v44 = vadd.f32 %v1994_v31, %v13530_v22  ;;  %v13697_v28 = vadd.f32 %v11712_v23, %v2111_v0 }
 0x184   : > { %v11679_v56 = vpop.f32.mrf.mxu0  ;;  %v11725_v2 = vpop.f32.mrf.mxu1 }
 0x185   : > { %v2112_v18 = vadd.f32 %v11679_v56, %v13536_v46  ;;  %v13700_v54 = vadd.f32 %v2206_v35, %v2109_v44 }
 0x186   : > { %v13702_v39 = vpop.f32.mrf.mxu0  ;;  %v13704_v49 = vpop.f32.mrf.mxu1 }
 0x187   : > { %18518 = vst [vmem:[#allocation10_spill] sm:$0xff] %v13702_v39  ;;  %18519 = vst [vmem:[#allocation12_spill] sm:$0xff] %v13704_v49  ;;  %v13706_v59 = vadd.f32 %v11713_v10, %v2112_v18 }
 0x188   : > { %v11682_v14 = vpop.f32.mrf.mxu0  ;;  %v11728_v27 = vpop.f32.mrf.mxu1 }
 0x189   : > { %v2115_v34 = vadd.f32 %v11682_v14, %v13548_v42 }
 0x18a   : > { %v2010_v41 = vpop.f32.mrf.mxu0  ;;  %v2270_v22 = vpop.f32.mrf.mxu1 }
 0x18b   : > { %v2113_v23 = vadd.f32 %v2010_v41, %v13553_v19  ;;  %v13710_v31 = vadd.f32 %v11716_v52, %v2115_v34 }
 0x18c   : > { %v11683_v0 = vpop.f32.mrf.mxu0  ;;  %v11729_v46 = vpop.f32.mrf.mxu1 }
 0x18d   : > { %v2116_v35 = vadd.f32 %v11683_v0, %v13560_v26  ;;  %v13713_v44 = vadd.f32 %v2222_v1, %v2113_v23 }
 0x18e   : > { %v13715_v56 = vpop.f32.mrf.mxu0  ;;  %v13717_v10 = vpop.f32.mrf.mxu1 }
 0x18f   : > { %18520 = vst [vmem:[#allocation14_spill] sm:$0xff] %v13715_v56  ;;  %18521 = vst [vmem:[#allocation19_spill] sm:$0xff] %v13717_v10  ;;  %v13719_v18 = vadd.f32 %v11717_v40, %v2116_v35 }
 0x190   : > { %v11686_v49 = vpop.f32.mrf.mxu0  ;;  %v11732_v42 = vpop.f32.mrf.mxu1 }
 0x191   : > { %v2119_v14 = vadd.f32 %v11686_v49, %v13573_v47 }
 0x192   : > { %v2026_v39 = vpop.f32.mrf.mxu0  ;;  %v2286_v19 = vpop.f32.mrf.mxu1 }
 0x193   : > { %v2117_v41 = vadd.f32 %v2026_v39, %v13579_v16  ;;  %v13723_v52 = vadd.f32 %v11720_v15, %v2119_v14 }
 0x194   : > { %v11687_v34 = vpop.f32.mrf.mxu0  ;;  %v11733_v26 = vpop.f32.mrf.mxu1 }
 0x195   : > { %v2120_v1 = vadd.f32 %v11687_v34, %v13586_v62  ;;  %v13726_v23 = vadd.f32 %v2238_v63, %v2117_v41 }
 0x196   : > { %v13728_v0 = vpop.f32.mrf.mxu0  ;;  %v13730_v40 = vpop.f32.mrf.mxu1 }
 0x197   : > { %18522 = vst [vmem:[#allocation23_spill] sm:$0xff] %v13730_v40  ;;  %v13732_v35 = vadd.f32 %v11721_v17, %v2120_v1 }
 0x198   : > { %v11690_v10 = vpop.f32.mrf.mxu0  ;;  %v11736_v47 = vpop.f32.mrf.mxu1 }
 0x199   : > { %v2123_v49 = vadd.f32 %v11690_v10, %v13598_v32 }
 0x19a   : > { %v2042_v56 = vpop.f32.mrf.mxu0  ;;  %v2302_v16 = vpop.f32.mrf.mxu1 }
 0x19b   : > { %v2121_v15 = vadd.f32 %v2042_v56, %v13603_v38  ;;  %v13736_v39 = vadd.f32 %v11724_v50, %v2123_v49 }
 0x19c   : > { %v11691_v14 = vpop.f32.mrf.mxu0  ;;  %v11737_v62 = vpop.f32.mrf.mxu1 }
 0x19d   : > { %v2124_v63 = vadd.f32 %v11691_v14, %v13611_v58  ;;  %v13739_v41 = vadd.f32 %v2254_v43, %v2121_v15 }
 0x19e   : > { %v13741_v34 = vpop.f32.mrf.mxu0  ;;  %v13743_v17 = vpop.f32.mrf.mxu1 }
 0x19f   : > { %18523 = vst [vmem:[#allocation27_spill] sm:$0xff] %v13743_v17  ;;  %v13745_v1 = vadd.f32 %v11725_v2, %v2124_v63 }
 0x1a0   : > { %v11694_v40 = vpop.f32.mrf.mxu0  ;;  %v13747_v32 = vpop.f32.mrf.mxu1 }
 0x1a1   : > { %v2127_v10 = vadd.f32 %v11694_v40, %v13626_v48 }
 0x1a2   : > { %v2058_v38 = vpop.f32.mrf.mxu0  ;;  %v13750_v50 = vpop.f32.mrf.mxu1 }
 0x1a3   : > { %v2125_v56 = vadd.f32 %v2058_v38, %v13631_v12  ;;  %v13753_v49 = vadd.f32 %v11728_v27, %v2127_v10 }
 0x1a4   : > { %v11695_v58 = vpop.f32.mrf.mxu0  ;;  %v13755_v43 = vpop.f32.mrf.mxu1 }
 0x1a5   : > { %v2128_v15 = vadd.f32 %v11695_v58, %v13639_v61  ;;  %v13758_v14 = vadd.f32 %v2270_v22, %v2125_v56  ;;  %v3807_v61 = vld [vmem:[%s18005_s4] sm:$0xf] }
 0x1a6   : > { %v13760_v2 = vpop.f32.mrf.mxu0  ;;  %v13762_v63 = vpop.f32.mrf.mxu1  ;;  %v6063_v56 = vsel %vm5280_vm8, %v3807_v61, 0 }
 0x1a7   : > { %18524 = vst [vmem:[#allocation30_spill] sm:$0xff] %v13760_v2  ;;  %v13764_v17 = vadd.f32 %v11729_v46, %v2128_v15  ;;  %11895 = vmatpush3.bf16.msra.mxu0 %v6063_v56 }
 0x1a8   : > { %v11698_v48 = vpop.f32.mrf.mxu0  ;;  %v13766_v40 = vpop.f32.mrf.mxu1 }
 0x1a9   : > { %18525 = vst [vmem:[#allocation32_spill] sm:$0xff] %v13766_v40  ;;  %v2131_v12 = vadd.f32 %v11698_v48, %v13652_v6  ;;  %v18527_v48 = vmov 0.0  }
 0x1aa   : > { %v2074_v27 = vpop.f32.mrf.mxu0  ;;  %v13769_v10 = vpop.f32.mrf.mxu1  ;;  %12002 = vmatprep.subr.bf16.mxu0 %v18527_v48  ;;  %11896 = vmatprep.mubr.msk.bf16.mxu0 %vm12430_vm9, %v18527_v48 }
 0x1ab   : > { %18526 = vst [vmem:[#allocation34_spill] sm:$0xff] %v13769_v10  ;;  %v2129_v22 = vadd.f32 %v2074_v27, %v13656_v57  ;;  %v13775_v38 = vadd.f32 %v11732_v42, %v2131_v12  ;;  %11842 = vmatprep.mubr.msk.bf16.mxu1 %vm12430_vm9, %v18527_v48 }
 0x1ac   : > { %v11699_v46 = vpop.f32.mrf.mxu0  ;;  %v13778_v58 = vpop.f32.mrf.mxu1 }
 0x1ad   : > { %v2132_v15 = vadd.f32 %v11699_v46, %v13663_v3  ;;  %v13781_v6 = vadd.f32 %v2286_v19, %v2129_v22 }
 0x1ae   : > { %v13784_v10 = vpop.f32.mrf.mxu0  ;;  %v13786_v40 = vpop.f32.mrf.mxu1 }
 0x1af   : > { %v13788_v2 = vadd.f32 %v11733_v26, %v2132_v15 }
 0x1b0   : > { %v11702_v57 = vpop.f32.mrf.mxu0  ;;  %v13794_v42 = vpop.f32.mrf.mxu1 }
 0x1b1   : > { %18528 = vst [vmem:[#allocation15_spill] sm:$0xff] %v13794_v42  ;;  %v2135_v3 = vadd.f32 %v11702_v57, %v13669_v8 }
 0x1b2   : > { %v2090_v19 = vpop.f32.mrf.mxu0  ;;  %v13797_v12 = vpop.f32.mrf.mxu1 }
 0x1b3   : > { %v2133_v27 = vadd.f32 %v2090_v19, %v13673_v29  ;;  %v13800_v61 = vadd.f32 %v11736_v47, %v2135_v3 }
 0x1b4   : > { %v11703_v26 = vpop.f32.mrf.mxu0  ;;  %v13802_v22 = vpop.f32.mrf.mxu1 }
 0x1b5   : > { %18529 = vst [vmem:[#allocation17_spill] sm:$0xff] %v13802_v22  ;;  %v2136_v56 = vadd.f32 %v11703_v26, %v13680_v4  ;;  %v13805_v46 = vadd.f32 %v2302_v16, %v2133_v27 }
 0x1b6   : > { %v13807_v15 = vpop.f32.mrf.mxu0  ;;  %v13809_v48 = vpop.f32.mrf.mxu1 }
 0x1b7   : > { %18530 = vst [vmem:[#allocation18_spill] sm:$0xff] %v13809_v48  ;;  %v13811_v42 = vadd.f32 %v11737_v62, %v2136_v56 }
 0x1b8   : > { %v11742_v8 = vpop.f32.mrf.mxu0  ;;  %v13813_v57 = vpop.f32.mrf.mxu1 }
 0x1b9   : > { %18531 = vst [vmem:[#allocation28_spill] sm:$0xff] %v13813_v57  ;;  %v13816_v29 = vadd.f32 %v11742_v8, %v13684_v24 }
 0x1ba   : > { %v2396_v47 = vpop.f32.mrf.mxu0  ;;  %v13818_v3 = vpop.f32.mrf.mxu1 }
 0x1bb   : > { %18532 = vst [vmem:[#allocation20_spill] sm:$0xff] %v13818_v3  ;;  %v13821_v19 = vadd.f32 %v2396_v47, %v13687_v55 }
 0x1bc   : > { %v11743_v4 = vpop.f32.mrf.mxu0  ;;  %v13823_v16 = vpop.f32.mrf.mxu1 }
 0x1bd   : > { %18533 = vst [vmem:[#allocation35_spill] sm:$0xff] %v13823_v16  ;;  %v13826_v27 = vadd.f32 %v11743_v4, %v13693_v30 }
 0x1be   : > { %v13828_v62 = vpop.f32.mrf.mxu0  ;;  %v13830_v26 = vpop.f32.mrf.mxu1 }
 0x1bf   : > { %18534 = vst [vmem:[#allocation9_spill] sm:$0xff] %v13830_v26 }
 0x1c0   : > { %v11746_v56 = vpop.f32.mrf.mxu0  ;;  %v13832_v57 = vpop.f32.mrf.mxu1 }
 0x1c1   : > { %18535 = vst [vmem:[#allocation11_spill] sm:$0xff] %v13832_v57  ;;  %v13835_v24 = vadd.f32 %v11746_v56, %v13697_v28 }
 0x1c2   : > { %v2412_v8 = vpop.f32.mrf.mxu0  ;;  %v13837_v3 = vpop.f32.mrf.mxu1 }
 0x1c3   : > { %18536 = vst [vmem:[#allocation21_spill] sm:$0xff] %v13837_v3  ;;  %v13840_v55 = vadd.f32 %v2412_v8, %v13700_v54 }
 0x1c4   : > { %v11747_v47 = vpop.f32.mrf.mxu0  ;;  %v13842_v16 = vpop.f32.mrf.mxu1 }
 0x1c5   : > { %18537 = vst [vmem:[#allocation25_spill] sm:$0xff] %v13842_v16  ;;  %v13845_v30 = vadd.f32 %v11747_v47, %v13706_v59 }
 0x1c6   : > { %v13847_v4 = vpop.f32.mrf.mxu0  ;;  %v13849_v48 = vpop.f32.mrf.mxu1 }
 0x1c7   : > { %18538 = vst [vmem:[#allocation29_spill] sm:$0xff] %v13849_v48 }
 0x1c8   : > { %v11750_v26 = vpop.f32.mrf.mxu0  ;;  %v13857_v8 = vpop.f32.mrf.mxu1 }
 0x1c9   : > { %v13852_v28 = vadd.f32 %v11750_v26, %v13710_v31  ;;  %18539 = vst [vmem:[#allocation36_spill] sm:$0xff] %v13857_v8 }
 0x1ca   : > { %v2428_v56 = vpop.f32.mrf.mxu0  ;;  %v13864_v57 = vpop.f32.mrf.mxu1 }
 0x1cb   : > { %v13855_v3 = vadd.f32 %v2428_v56, %v13713_v44  ;;  %18540 = vst [vmem:[#allocation37_spill] sm:$0xff] %v13864_v57 }
 0x1cc   : > { %v11751_v54 = vpop.f32.mrf.mxu0  ;;  %v13872_v56 = vpop.f32.mrf.mxu1 }
 0x1cd   : > { %v13860_v16 = vadd.f32 %v11751_v54, %v13719_v18  ;;  %18541 = vst [vmem:[#allocation38_spill] sm:$0xff] %v13872_v56 }
 0x1ce   : > { %v13862_v59 = vpop.f32.mrf.mxu0  ;;  %v13879_v22 = vpop.f32.mrf.mxu1 }
 0x1cf   : > { %18543 = vst [vmem:[#allocation40_spill] sm:$0xff] %v13879_v22 }
 0x1d0   : > { %v11754_v47 = vpop.f32.mrf.mxu0 }
 0x1d1   : > { %v13867_v48 = vadd.f32 %v11754_v47, %v13723_v52 }
 0x1d2   : > { %v2444_v31 = vpop.f32.mrf.mxu0 }
 0x1d3   : > { %v13870_v26 = vadd.f32 %v2444_v31, %v13726_v23  ;;  %v13887_v31 = vpop.f32.mrf.mxu1 }
 0x1d4   : > { %v11755_v44 = vpop.f32.mrf.mxu0  ;;  %18546 = vst [vmem:[#allocation43_spill] sm:$0xff] %v13887_v31 }
 0x1d5   : > { %v13875_v8 = vadd.f32 %v11755_v44, %v13732_v35 }
 0x1d6   : > { %v13877_v18 = vpop.f32.mrf.mxu0 }
 0x1d7   : > { %18542 = vst [vmem:[#allocation39_spill] sm:$0xff] %v13875_v8  ;;  %v13894_v8 = vpop.f32.mrf.mxu1 }
 0x1d8   : > { %v11758_v54 = vpop.f32.mrf.mxu0  ;;  %18549 = vst [vmem:[#allocation46_spill] sm:$0xff] %v13894_v8 }
 0x1d9   : > { %v13882_v57 = vadd.f32 %v11758_v54, %v13736_v39 }
 0x1da   : > { %v2460_v52 = vpop.f32.mrf.mxu0 }
 0x1db   : > { %18544 = vst [vmem:[#allocation41_spill] sm:$0xff] %v13882_v57  ;;  %v13885_v47 = vadd.f32 %v2460_v52, %v13739_v41  ;;  %v13902_v52 = vpop.f32.mrf.mxu1  ;;  %v18569_v57 = vld [vmem:[#allocation31_spill] sm:$0xff] }
 0x1dc   : > { %v11759_v23 = vpop.f32.mrf.mxu0  ;;  %18552 = vst [vmem:[#allocation49_spill] sm:$0xff] %v13902_v52 }
 0x1dd   : > { %18545 = vst [vmem:[#allocation42_spill] sm:$0xff] %v13885_v47  ;;  %v13890_v56 = vadd.f32 %v11759_v23, %v13745_v1  ;;  %v3139_v47 = vlaneseq }
 0x1de   : > { %v13892_v35 = vpop.f32.mrf.mxu0 }
 0x1df   : > { %18547 = vst [vmem:[#allocation44_spill] sm:$0xff] %v13890_v56  ;;  %18548 = vst [vmem:[#allocation45_spill] sm:$0xff] %v13892_v35  ;;  %v13909_v56 = vpop.f32.mrf.mxu1 }
 0x1e0   : > { %v11762_v44 = vpop.f32.mrf.mxu0  ;;  %18555 = vst [vmem:[#allocation52_spill] sm:$0xff] %v13909_v56 }
 0x1e1   : > { %v13897_v22 = vadd.f32 %v11762_v44, %v13753_v49 }
 0x1e2   : > { %v2476_v39 = vpop.f32.mrf.mxu0 }
 0x1e3   : > { %18550 = vst [vmem:[#allocation47_spill] sm:$0xff] %v13897_v22  ;;  %v13900_v54 = vadd.f32 %v2476_v39, %v13758_v14  ;;  %v11804_v39 = vpop.f32.mrf.mxu1  ;;  %v18568_v22 = vld [vmem:[#allocation8_spill] sm:$0xff] }
 0x1e4   : > { %v11763_v41 = vpop.f32.mrf.mxu0 }
 0x1e5   : > { %18551 = vst [vmem:[#allocation48_spill] sm:$0xff] %v13900_v54  ;;  %v13905_v31 = vadd.f32 %v11763_v41, %v13764_v17  ;;  %v13922_v41 = vpop.f32.mrf.mxu1 }
 0x1e6   : > { %v13907_v1 = vpop.f32.mrf.mxu0  ;;  %18560 = vst [vmem:[#allocation57_spill] sm:$0xff] %v13922_v41  ;;  %v18567_v41 = vld [vmem:[#allocation13_spill] sm:$0xff] }
 0x1e7   : > { %18553 = vst [vmem:[#allocation50_spill] sm:$0xff] %v13905_v31  ;;  %18554 = vst [vmem:[#allocation51_spill] sm:$0xff] %v13907_v1  ;;  %v18561_v31 = vld [vmem:[#allocation33_spill] sm:$0xff]  ;;  %v18563_v1 = vld [vmem:[#allocation22_spill] sm:$0xff]  ;;  %v1251_v35 = vadd.f32 %v18568_v22, %v18567_v41 }
 0x1e8   : > { %v11766_v23 = vpop.f32.mrf.mxu0  ;;  %v1878_v56 = vadd.f32 %v18561_v31, %v13517_v11  ;;  %v11805_v31 = vpop.f32.mrf.mxu1 }
 0x1e9   : > { %v13912_v8 = vadd.f32 %v11766_v23, %v13775_v38 }
 0x1ea   : > { %v2492_v49 = vpop.f32.mrf.mxu0 }
 0x1eb   : > { %18556 = vst [vmem:[#allocation53_spill] sm:$0xff] %v13912_v8  ;;  %v13915_v44 = vadd.f32 %v2492_v49, %v13781_v6  ;;  %v18562_v8 = vld [vmem:[#allocation24_spill] sm:$0xff]  ;;  %v2106_v49 = vadd.f32 %v13689_v60, %v1878_v56 }
 0x1ec   : > { %v11767_v14 = vpop.f32.mrf.mxu0  ;;  %v1219_v6 = vadd.f32 %v18563_v1, %v18562_v8  ;;  %v18570_v8 = vld [vmem:[#allocation16_spill] sm:$0xff] }
 0x1ed   : > { %18557 = vst [vmem:[#allocation54_spill] sm:$0xff] %v13915_v44  ;;  %v13918_v54 = vadd.f32 %v11767_v14, %v13788_v2  ;;  %v18565_v14 = vld [vmem:[#allocation26_spill] sm:$0xff]  ;;  %v1267_v1 = vadd.f32 %v18570_v8, %v18569_v57  ;;  %v2318_v41 = vadd.f32 %v13636_v36, %v2106_v49  ;;  %v2751_v36 = vadd.f32 %v13750_v50, %v13821_v19 }
 0x1ee   : > { %v13920_v52 = vpop.f32.mrf.mxu0  ;;  %v18572_v57 = vld [vmem:[#allocation2_spill] sm:$0xff] }
 0x1ef   : > { %18558 = vst [vmem:[#allocation55_spill] sm:$0xff] %v13918_v54  ;;  %18559 = vst [vmem:[#allocation56_spill] sm:$0xff] %v13920_v52  ;;  %v18566_v54 = vld [vmem:[#allocation6_spill] sm:$0xff]  ;;  %v1700_v22 = vadd.f32 %v13675_v5, %v1267_v1  ;;  %v18573_v5 = vld [vmem:[#allocation3_spill] sm:$0xff] }
 0x1f0   : > { %v11770_v17 = vpop.f32.mrf.mxu0  ;;  %v1235_v52 = vadd.f32 %v18566_v54, %v18565_v14  ;;  %v18576_v8 = vld [vmem:[#allocation30_spill] sm:$0xff] }
 0x1f1   : > { %v2553_v38 = vadd.f32 %v11770_v17, %v13800_v61  ;;  %v12431_v61 = vmov 1966171168  }
 0x1f2   : > { %v2508_v23 = vpop.f32.mrf.mxu0  ;;  %v3137_v17 = vunpack.c.l.s4 %v12431_v61  ;;  %v1692_v56 = vadd.f32 %v13634_v21, %v1235_v52 }
 0x1f3   : > { %v13931_v44 = vadd.f32 %v2508_v23, %v13805_v46  ;;  %v13933_v2 = vadd.f32 %v11804_v39, %v2553_v38  ;;  %v1688_v46 = vadd.f32 %v13605_v45, %v1219_v6  ;;  %v1696_v39 = vadd.f32 %v13658_v33, %v1251_v35  ;;  %v13958_v45 = vld [vmem:[%s18003_s2] ss:$0 sm:$0xff] }
 0x1f4   : > { %v11771_v11 = vpop.f32.mrf.mxu0  ;;  %v2753_v38 = vadd.f32 %v13747_v32, %v13816_v29  ;;  %v3138_v21 = vunpack.c.0.s8 %v3137_v17  ;;  %v3140_v33 = vshrl.u32 %v3139_v47, 7  ;;  %v1886_v35 = vadd.f32 %v18573_v5, %v13558_v20 }
 0x1f5   : > { %18564 = vst [vmem:[#allocation33_spill] sm:$0xff] %v13933_v2  ;;  %v2554_v60 = vadd.f32 %v11771_v11, %v13811_v42  ;;  %v1882_v42 = vadd.f32 %v18572_v57, %v13534_v13  ;;  %v2524_v32 = vadd.f32 %v13828_v62, %v2318_v41  ;;  %v1890_v13 = vadd.f32 %v13514_v9, %v13584_v25  ;;  %v18574_v62 = vld [vmem:[#allocation10_spill] sm:$0xff]  ;;  %v18577_v41 = vld [vmem:[#allocation4_spill] sm:$0xff]  ;;  %v18578_v57 = vld [vmem:[#allocation5_spill] sm:$0xff] }
 0x1f6   : > { %v13945_v54 = vpop.f32.mrf.mxu0  ;;  %v1894_v52 = vadd.f32 %v13532_v51, %v1688_v46  ;;  %v1898_v6 = vadd.f32 %v13555_v53, %v1692_v56  ;;  %v1902_v49 = vadd.f32 %v13581_v7, %v1696_v39  ;;  %v1906_v47 = vadd.f32 %v13607_v37, %v1700_v22  ;;  %v13978_v9 = vld [vmem:[%s18004_s3] ss:$0 sm:$0xff] }
 0x1f7   : > { %v13951_v23 = vadd.f32 %v11805_v31, %v2554_v60  ;;  %v2754_v20 = vadd.f32 %v13755_v43, %v13826_v27  ;;  %v2110_v31 = vadd.f32 %v18574_v62, %v1882_v42  ;;  %v13980_v53 = vsub.s32 %v3138_v21, %v3140_v33  ;;  %v18575_v7 = vld [vmem:[#allocation14_spill] sm:$0xff]  ;;  %v18581_v33 = vld [vmem:[#allocation7_spill] sm:$0xff]  ;;  %v18586_v62 = vld [vmem:[#allocation32_spill] sm:$0xff] }
 0x1f8   : > { %v11810_v14 = vpop.f32.mrf.mxu0  ;;  %v2114_v25 = vadd.f32 %v18575_v7, %v1886_v35  ;;  %v2752_v37 = vadd.f32 %v13762_v63, %v2524_v32  ;;  %v2118_v61 = vadd.f32 %v13728_v0, %v1890_v13  ;;  %v2122_v17 = vadd.f32 %v13741_v34, %v1894_v52  ;;  %v18584_v52 = vld [vmem:[#allocation23_spill] sm:$0xff] }
 0x1f9   : > { %18571 = vst [vmem:[#allocation24_spill] sm:$0xff] %v13951_v23  ;;  %v2965_v29 = vadd.f32 %v11810_v14, %v2753_v38  ;;  %v2126_v1 = vadd.f32 %v18576_v8, %v1898_v6  ;;  %v2130_v46 = vadd.f32 %v13784_v10, %v1902_v49  ;;  %v2322_v63 = vadd.f32 %v18577_v41, %v2110_v31  ;;  %v18587_v31 = vld [vmem:[#allocation34_spill] sm:$0xff]  ;;  %v18599_v10 = vld [vmem:[#allocation11_spill] sm:$0xff] }
 0x1fa   : > { %v2836_v11 = vpop.f32.mrf.mxu0  ;;  %v2134_v38 = vadd.f32 %v13807_v15, %v1906_v47  ;;  %v2326_v34 = vadd.f32 %v18578_v57, %v2114_v25  ;;  %v2330_v5 = vadd.f32 %v18581_v33, %v2118_v61  ;;  %v18582_v15 = vld [vmem:[#allocation12_spill] sm:$0xff]  ;;  %v18596_v57 = vld [vmem:[#allocation35_spill] sm:$0xff]  ;;  %v18600_v33 = vld [vmem:[#allocation42_spill] sm:$0xff] }
 0x1fb   : > { %v3004_v50 = vmul.f32 %v13958_v45, %v2965_v29  ;;  %v2963_v19 = vadd.f32 %v2836_v11, %v2751_v36  ;;  %v2334_v35 = vadd.f32 %v18582_v15, %v2122_v17  ;;  %v18583_v36 = vld [vmem:[#allocation19_spill] sm:$0xff]  ;;  %v2528_v29 = vadd.f32 %v13847_v4, %v2322_v63 }
 0x1fc   : > { %v11811_v51 = vpop.f32.mrf.mxu0  ;;  %v14006_v32 = vadd.f32 %v18583_v36, %v2126_v1  ;;  %v14010_v6 = vadd.f32 %v18584_v52, %v2130_v46  ;;  %v2757_v4 = vadd.f32 %v18586_v62, %v13835_v24  ;;  %v2532_v7 = vadd.f32 %v13862_v59, %v2326_v34 }
 0x1fd   : > { %v3002_v43 = vmul.f32 %v13958_v45, %v2963_v19  ;;  %v2966_v27 = vadd.f32 %v11811_v51, %v2754_v20  ;;  %v3043_v56 = vadd.f32 %v13978_v9, %v3004_v50  ;;  %v10992_v20 = vld [vmem:[%s18005_s4 + $0x8] sm:$0xf]  ;;  %v2755_v51 = vadd.f32 %v18587_v31, %v13840_v55 }
 0x1fe   : > { %v2839_v60 = vpop.f32.mrf.mxu0  ;;  %v18585_v50 = vld [vmem:[#allocation27_spill] sm:$0xff]  ;;  %v2758_v24 = vadd.f32 %v13778_v58, %v13845_v30  ;;  %v14034_v17 = vadd.f32 %v13786_v40, %v2528_v29  ;;  %v14043_v1 = vsel %vm5280_vm8, %v10992_v20, 0  ;;  %v18604_v20 = vld [vmem:[#allocation25_spill] sm:$0xff] }
 0x1ff   : > { %v3005_v39 = vmul.f32 %v13958_v45, %v2966_v27  ;;  %v2964_v22 = vadd.f32 %v2839_v60, %v2752_v37  ;;  %v3041_v42 = vadd.f32 %v13978_v9, %v3002_v43  ;;  %v3075_v49 = vmax.f32 %v3043_v56, 0.0  ;;  %v18588_v55 = vld [vmem:[#allocation15_spill] sm:$0xff]  ;;  %v18592_v56 = vld [vmem:[#allocation18_spill] sm:$0xff] }
 0x200   : > { %v11814_v0 = vpop.f32.mrf.mxu0  ;;  %v14019_v19 = vadd.f32 %v18585_v50, %v2134_v38  ;;  %v2536_v37 = vadd.f32 %v13877_v18, %v2330_v5  ;;  %v14038_v59 = vadd.f32 %v18588_v55, %v13852_v28  ;;  %v14047_v18 = vadd.f32 %v13797_v12, %v13855_v3  ;;  %v18591_v28 = vld [vmem:[#allocation17_spill] sm:$0xff]  ;;  %v18594_v3 = vld [vmem:[#allocation20_spill] sm:$0xff]  ;;  %v18595_v38 = vld [vmem:[#allocation39_spill] sm:$0xff] }
 0x201   : > { %v3044_v14 = vadd.f32 %v13978_v9, %v3005_v39  ;;  %v3003_v21 = vmul.f32 %v13958_v45, %v2964_v22  ;;  %v3073_v43 = vmax.f32 %v3041_v42, 0.0  ;;  %v14057_v46 = vadd.f32 %v18591_v28, %v13860_v16  ;;  %v18593_v22 = vld [vmem:[#allocation28_spill] sm:$0xff]  ;;  %v18597_v16 = vld [vmem:[#allocation9_spill] sm:$0xff]  ;;  %v18612_v28 = vld [vmem:[#allocation47_spill] sm:$0xff] }
 0x202   : > { %v2852_v13 = vpop.f32.mrf.mxu0  ;;  %v14060_v39 = vadd.f32 %v18592_v56, %v2532_v7  ;;  %v14064_v12 = vadd.f32 %v18593_v22, %v13867_v48  ;;  %v14068_v41 = vadd.f32 %v18594_v3, %v13870_v26  ;;  %v14074_v34 = vadd.f32 %v18596_v57, %v18595_v38  ;;  %v18601_v5 = vld [vmem:[#allocation21_spill] sm:$0xff]  ;;  %v18613_v56 = vld [vmem:[#allocation36_spill] sm:$0xff] }
 0x203   : > { %v14012_v11 = vmax.f32 %v3044_v14, 0.0  ;;  %v3042_v47 = vadd.f32 %v13978_v9, %v3003_v21  ;;  %v14077_v42 = vadd.f32 %v18597_v16, %v2536_v37  ;;  %v18598_v14 = vld [vmem:[#allocation41_spill] sm:$0xff]  ;;  %v14085_v15 = vadd.f32 %v18601_v5, %v18600_v33  ;;  %v18617_v57 = vld [vmem:[#allocation48_spill] sm:$0xff] }
 0x204   : > { %v11815_v25 = vpop.f32.mrf.mxu0  ;;  %v14081_v21 = vadd.f32 %v18599_v10, %v18598_v14  ;;  %v18602_v26 = vld [vmem:[#allocation45_spill] sm:$0xff]  ;;  %v14134_v22 = vadd.f32 %v18613_v56, %v18612_v28  ;;  %v18627_v28 = vmov 0 }
 0x205   : > { %v3106_v27 = vpack.c.bf16 %v14012_v11, %v3075_v49  ;;  %v3074_v61 = vmax.f32 %v3042_v47, 0.0  ;;  %v2540_v36 = vadd.f32 %v18602_v26, %v2334_v35  ;;  %v18603_v47 = vld [vmem:[#allocation44_spill] sm:$0xff]  ;;  %v2969_v35 = vadd.f32 %v11814_v0, %v2757_v4  ;;  %v18618_v16 = vld [vmem:[#allocation37_spill] sm:$0xff]  ;;  %v18636_v26 = vld [vmem:[#allocation55_spill] sm:$0xff] }
 0x206   : > { %v14040_v8 = vpop.f32.mrf.mxu0  ;;  %v14097_v50 = vadd.f32 %v18604_v20, %v18603_v47  ;;  %v10847_v7 = vpack.c.bf16 %v14012_v11, %v14012_v11  ;;  %v2970_v4 = vadd.f32 %v11815_v25, %v2758_v24  ;;  %v18608_v11 = vld [vmem:[#allocation29_spill] sm:$0xff]  ;;  %v18614_v25 = vld [vmem:[#allocation51_spill] sm:$0xff]  ;;  %v14146_v14 = vadd.f32 %v18618_v16, %v18617_v57 }
 0x207   : > { %v3190_v60 = vrot.slane %v3106_v27, %v13980_v53  ;;  %v3105_v40 = vpack.c.bf16 %v3074_v61, %v3073_v43  ;;  %v10846_v30 = vpack.c.bf16 %v3074_v61, %v3074_v61  ;;  %v2967_v27 = vadd.f32 %v2852_v13, %v2755_v51  ;;  %v18624_v61 = vld [vmem:[#allocation38_spill] sm:$0xff] }
 0x208   : > { %v14070_v63 = vpop.f32.mrf.mxu0  ;;  %v2544_v24 = vadd.f32 %v18614_v25, %v14006_v32  ;;  %v3197_v5 = vrot.slane %v10847_v7, %v13980_v53  ;;  %v18628_v28 = vsel %vm14186_vm10, 4294967295, %v18627_v28 }
 0x209   : > { %v3198_v48 = vcombine.high %v3190_v60, %v3190_v60  ;;  %v3142_v29 = vrot.slane %v3105_v40, %v13980_v53  ;;  %v3149_v52 = vrot.slane %v10846_v30, %v13980_v53  ;;  %v14100_v62 = vrot.slane %v3190_v60, %v13980_v53  ;;  %18629 = vst [vmem:[#allocation3_spill] sm:$0xff] %v18628_v28 }
 0x20a   : > { %v14093_v49 = vpop.f32.mrf.mxu0  ;;  %v14120_v40 = vadd.f32 %v18608_v11, %v2540_v36  ;;  %v3006_v33 = vmul.f32 %v13958_v45, %v2967_v27  ;;  %v18623_v27 = vld [vmem:[#allocation50_spill] sm:$0xff] }
 0x20b   : > { %v14103_v31 = vrot.slane %v3198_v48, %v13980_v53  ;;  %v3150_v37 = vcombine.high %v3142_v29, %v3142_v29  ;;  %v14108_v43 = vrot.slane %v3142_v29, %v13980_v53  ;;  %v3151_v0 = vcombine.high %v3149_v52, %v3149_v52 }
 0x20c   : > { %v11819_v58 = vpop.f32.mrf.mxu0  ;;  %v14123_v30 = vrot.slane %v3149_v52, %v13980_v53  ;;  %v3008_v48 = vmul.f32 %v13958_v45, %v2969_v35  ;;  %v3009_v29 = vmul.f32 %v13958_v45, %v2970_v4  ;;  %v14174_v7 = vadd.f32 %v18624_v61, %v18623_v27  ;;  %v18633_v27 = vld [vmem:[#allocation43_spill] sm:$0xff] }
 0x20d   : > { %18605 = vst [vmem:[#allocation22_spill] sm:$0xff] %v14103_v31  ;;  %v10993_v55 = vcombine.high %v14100_v62, %v14103_v31  ;;  %v7060_v60 = vcombine.low %v14100_v62, %v14103_v31  ;;  %v14126_v13 = vrot.slane %v3150_v37, %v13980_v53  ;;  %v14130_v51 = vcombine.high %v14108_v43, %v14108_v43 }
 0x20e   : > { %18609 = vst [vmem:[#allocation26_spill] sm:$0xff] %v14123_v30  ;;  %v14165_v36 = vrot.slane %v3151_v0, %v13980_v53  ;;  %v2871_v52 = vpop.f32.mrf.mxu0  ;;  %v3867_v35 = vshll.u32 %v14123_v30, 16  ;;  %v18626_v0 = vld [vmem:[#allocation56_spill] sm:$0xff]  ;;  %v2552_v4 = vadd.f32 %v13945_v54, %v14019_v19  ;;  %v14192_v56 = vcombine.high %v14123_v30, %v14123_v30  ;;  %v2739_v19 = vpop.f32.mrf.mxu1 }
 0x20f   : > { %18610 = vst [vmem:[#allocation6_spill] sm:$0xff] %v14126_v13  ;;  %18611 = vst [vmem:[#allocation13_spill] sm:$0xff] %v14130_v51  ;;  %v14139_v3 = vrot.slane %v10993_v55, %v13980_v53  ;;  %v14142_v38 = vrot.slane %v7060_v60, %v13980_v53  ;;  %v14157_v32 = vcombine.high %v14126_v13, %v14126_v13  ;;  %v3854_v47 = vshrl.u32 %v14130_v51, 16  ;;  %v18625_v55 = vld [vmem:[#allocation40_spill] sm:$0xff] }
 0x210   : > { %18622 = vst [vmem:[#allocation2_spill] sm:$0xff] %v14165_v36  ;;  %v14177_v60 = vadd.f32 %v18625_v55, %v2544_v24  ;;  %v2548_v11 = vadd.f32 %v18626_v0, %v14010_v6  ;;  %18630 = vst [vmem:[#allocation10_spill] sm:$0xff] %v14192_v56  ;;  %v3047_v54 = vadd.f32 %v13978_v9, %v3008_v48  ;;  %v3878_v23 = vshrl.u32 %v14165_v36, 16 }
 0x211   : > { %18615 = vst [vmem:[#allocation8_spill] sm:$0xff] %v14139_v3  ;;  %18616 = vst [vmem:[#allocation31_spill] sm:$0xff] %v14142_v38  ;;  %v3859_v20 = vshll.u32 %v14157_v32, 16  ;;  %v3862_v37 = vshrl.u32 %v14157_v32, 16  ;;  %v14205_v24 = vcombine.high %v14165_v36, %v14165_v36  ;;  %v3045_v16 = vadd.f32 %v13978_v9, %v3006_v33  ;;  %v18637_v3 = vld [vmem:[#allocation49_spill] sm:$0xff]  ;;  %v18638_v33 = vld [vmem:[#allocation52_spill] sm:$0xff] }
 0x212   : > { %18621 = vst [vmem:[#allocation16_spill] sm:$0xff] %v14157_v32  ;;  %v3048_v10 = vadd.f32 %v13978_v9, %v3009_v29  ;;  %v3199_v55 = vcombine.high %v3197_v5, %v3197_v5  ;;  %v2968_v0 = vadd.f32 %v14040_v8, %v14034_v17  ;;  %v14223_v57 = vadd.f32 %v18637_v3, %v18636_v26 }
 0x213   : > { %v14196_v25 = vsel %vm14186_vm10, %v3854_v47, %v3859_v20  ;;  %v14200_v6 = vsel %vm14186_vm10, %v3862_v37, %v3867_v35  ;;  %18631 = vst [vmem:[#allocation14_spill] sm:$0xff] %v14205_v24  ;;  %v11822_v47 = vpop.f32.mrf.mxu0  ;;  %v18632_v20 = vld [vmem:[#allocation53_spill] sm:$0xff]  ;;  %v18634_v37 = vld [vmem:[#allocation54_spill] sm:$0xff]  ;;  %v14226_v38 = vadd.f32 %v18638_v33, %v2548_v11  ;;  %v3079_v8 = vmax.f32 %v3047_v54, 0.0 }
 0x214   : > { %v14213_v61 = vadd.f32 %v18633_v27, %v18632_v20  ;;  %v18635_v35 = vld [vmem:[#allocation46_spill] sm:$0xff]  ;;  %v18640_v27 = vld [vmem:[#allocation57_spill] sm:$0xff]  ;;  %v14241_v3 = vrot.slane %v3197_v5, %v13980_v53  ;;  %v3077_v11 = vmax.f32 %v3045_v16, 0.0  ;;  %v3080_v33 = vmax.f32 %v3048_v10, 0.0 }
 0x215   : > { %v14217_v48 = vadd.f32 %v18635_v35, %v18634_v37  ;;  %18639 = vst [vmem:[#allocation30_spill] sm:$0xff] %v14226_v38  ;;  %v14234_v37 = vadd.f32 %v18640_v27, %v13931_v44  ;;  %v14236_v35 = vadd.f32 %v2739_v19, %v2552_v4  ;;  %v2884_v29 = vpop.f32.mrf.mxu0  ;;  %v14246_v20 = vrot.slane %v3199_v55, %v13980_v53 }
 0x216   : > { %18643 = vst [vmem:[#allocation7_spill] sm:$0xff] %v14241_v3  ;;  %v3900_v44 = vshll.u32 %v14103_v31, 16  ;;  %v3007_v4 = vmul.f32 %v13958_v45, %v2968_v0  ;;  %v2973_v19 = vadd.f32 %v14070_v63, %v14038_v59  ;;  %v3843_v54 = vshll.u32 %v14126_v13, 16 }
 0x217   : > { %18641 = vst [vmem:[#allocation4_spill] sm:$0xff] %v14234_v37  ;;  %18642 = vst [vmem:[#allocation5_spill] sm:$0xff] %v14236_v35  ;;  %v3108_v5 = vpack.c.bf16 %v3080_v33, %v3079_v8  ;;  %v2971_v27 = vadd.f32 %v14093_v49, %v14047_v18  ;;  %v2974_v16 = vadd.f32 %v11819_v58, %v14057_v46  ;;  %v3895_v10 = vshrl.u32 %v14100_v62, 16  ;;  %v11823_v32 = vpop.f32.mrf.mxu0 }
 0x218   : > { %18644 = vst [vmem:[#allocation12_spill] sm:$0xff] %v14246_v20  ;;  %v3046_v55 = vadd.f32 %v13978_v9, %v3007_v4  ;;  %v3012_v26 = vmul.f32 %v13958_v45, %v2973_v19  ;;  %v2972_v17 = vadd.f32 %v2871_v52, %v14060_v39  ;;  %v3838_v0 = vshrl.u32 %v14108_v43, 16 }
 0x219   : > { %v3846_v59 = vshrl.u32 %v14126_v13, 16  ;;  %v3851_v63 = vshll.u32 %v14130_v51, 16  ;;  %v3010_v8 = vmul.f32 %v13958_v45, %v2971_v27  ;;  %v14266_v18 = vcombine.high %v14100_v62, %v14100_v62 }
 0x21a   : > { %v3875_v46 = vshll.u32 %v14165_v36, 16  ;;  %v3078_v49 = vmax.f32 %v3046_v55, 0.0  ;;  %v3013_v58 = vmul.f32 %v13958_v45, %v2974_v16  ;;  %v14272_v39 = vcombine.high %v14241_v3, %v14241_v3 }
 0x21b   : > { %v14276_v52 = vsel %vm14186_vm10, %v3895_v10, %v3900_v44  ;;  %v3845_v4 = vsel %vm14186_vm10, %v3838_v0, %v3843_v54  ;;  %v3011_v19 = vmul.f32 %v13958_v45, %v2972_v17  ;;  %v3870_v27 = vshrl.u32 %v14123_v30, 16  ;;  %v2887_v10 = vpop.f32.mrf.mxu0 }
 0x21c   : > { %18645 = vst [vmem:[#allocation19_spill] sm:$0xff] %v14272_v39  ;;  %v10849_v51 = vpack.c.bf16 %v3080_v33, %v3080_v33  ;;  %v3107_v35 = vpack.c.bf16 %v3078_v49, %v3077_v11  ;;  %v3051_v55 = vadd.f32 %v13978_v9, %v3012_v26  ;;  %v3853_v16 = vsel %vm14186_vm10, %v3846_v59, %v3851_v63 }
 0x21d   : > { %v3883_v37 = vshll.u32 %v14192_v56, 16  ;;  %v3049_v44 = vadd.f32 %v13978_v9, %v3010_v8  ;;  %v14290_v54 = vsel %vm14186_vm10, %v3870_v27, %v3875_v46  ;;  %v3052_v11 = vadd.f32 %v13978_v9, %v3013_v58  ;;  %v11826_v38 = vpop.f32.mrf.mxu0 }
 0x21e   : > { %v3238_v17 = vrot.slane %v3107_v35, %v13980_v53  ;;  %v2977_v26 = vadd.f32 %v11822_v47, %v14064_v12  ;;  %v5420_v33 = vcombine.low %v14108_v43, %v14126_v13  ;;  %v10972_v0 = vcombine.high %v14108_v43, %v14126_v13 }
 0x21f   : > { %v3286_v59 = vrot.slane %v3108_v5, %v13980_v53  ;;  %v3050_v63 = vadd.f32 %v13978_v9, %v3011_v19  ;;  %v3293_v8 = vrot.slane %v10849_v51, %v13980_v53  ;;  %v3083_v35 = vmax.f32 %v3051_v55, 0.0 }
 0x220   : > { %v14303_v46 = vrot.slane %v3238_v17, %v13980_v53  ;;  %v2978_v58 = vadd.f32 %v11823_v32, %v14074_v34  ;;  %v3081_v27 = vmax.f32 %v3049_v44, 0.0  ;;  %v3084_v12 = vmax.f32 %v3052_v11, 0.0 }
 0x221   : > { %v14306_v47 = vmax.f32 %v3050_v63, 0.0  ;;  %v2975_v2 = vadd.f32 %v2884_v29, %v14068_v41  ;;  %v14311_v43 = vsel %vm14186_vm10, %v3878_v23, %v3883_v37  ;;  %v4637_v5 = vcombine.low %v3845_v4, %v3853_v16 }
 0x222   : > { %v10848_v19 = vpack.c.bf16 %v3078_v49, %v3078_v49  ;;  %v3016_v51 = vmul.f32 %v13958_v45, %v2977_v26  ;;  %v5422_v55 = vcombine.low %v14123_v30, %v14165_v36  ;;  %v3110_v32 = vpack.c.bf16 %v3084_v12, %v3083_v35  ;;  %v2900_v26 = vpop.f32.mrf.mxu0 }
 0x223   : > { %v3109_v44 = vpack.c.bf16 %v14306_v47, %v3081_v27  ;;  %v5430_v41 = vrot.slane %v5420_v33, %v13980_v53  ;;  %v5437_v29 = vrot.slane %v10972_v0, %v13980_v53  ;;  %v3017_v23 = vmul.f32 %v13958_v45, %v2978_v58 }
 0x224   : > { %v2976_v37 = vadd.f32 %v2887_v10, %v14077_v42  ;;  %v3294_v49 = vcombine.high %v3286_v59, %v3286_v59  ;;  %v3295_v4 = vcombine.high %v3293_v8, %v3293_v8  ;;  %v14324_v16 = vrot.slane %v3286_v59, %v13980_v53 }
 0x225   : > { %v3014_v11 = vmul.f32 %v13958_v45, %v2975_v2  ;;  %v3245_v33 = vrot.slane %v10848_v19, %v13980_v53  ;;  %v3055_v0 = vadd.f32 %v13978_v9, %v3016_v51  ;;  %v14334_v42 = vrot.slane %v4637_v5, %v13980_v53 }
 0x226   : > { %18646 = vst [vmem:[#allocation23_spill] sm:$0xff] %v14324_v16  ;;  %v3056_v10 = vadd.f32 %v13978_v9, %v3017_v23  ;;  %v3015_v59 = vmul.f32 %v13958_v45, %v2976_v37  ;;  %v5444_v2 = vrot.slane %v5422_v55, %v13980_v53  ;;  %v5452_v27 = vcombine.low %v5430_v41, %v5437_v29  ;;  %v11827_v37 = vpop.f32.mrf.mxu0 }
 0x227   : > { %v14340_v34 = vrot.slane %v3293_v8, %v13980_v53  ;;  %v3246_v63 = vcombine.high %v3238_v17, %v3238_v17  ;;  %v14343_v19 = vrot.slane %v3294_v49, %v13980_v53  ;;  %v14346_v51 = vrot.slane %v3295_v4, %v13980_v53 }
 0x228   : > { %v14350_v5 = vcombine.high %v14324_v16, %v14324_v16  ;;  %v3053_v23 = vadd.f32 %v13978_v9, %v3014_v11  ;;  %v3247_v41 = vcombine.high %v3245_v33, %v3245_v33  ;;  %v14355_v8 = vrot.slane %v3245_v33, %v13980_v53 }
 0x229   : > { %18647 = vst [vmem:[#allocation27_spill] sm:$0xff] %v14340_v34  ;;  %18648 = vst [vmem:[#allocation32_spill] sm:$0xff] %v14343_v19  ;;  %v3087_v17 = vmax.f32 %v3055_v0, 0.0  ;;  %v10851_v29 = vpack.c.bf16 %v3084_v12, %v3084_v12  ;;  %v3088_v49 = vmax.f32 %v3056_v10, 0.0  ;;  %v3054_v58 = vadd.f32 %v13978_v9, %v3015_v59 }
 0x22a   : > { %18649 = vst [vmem:[#allocation34_spill] sm:$0xff] %v14355_v8  ;;  %v2981_v4 = vadd.f32 %v11826_v38, %v14081_v21  ;;  %v14360_v35 = vrot.slane %v3246_v63, %v13980_v53  ;;  %v10850_v11 = vpack.c.bf16 %v14306_v47, %v14306_v47  ;;  %v5423_v55 = vcombine.low %v14192_v56, %v14100_v62  ;;  %v2903_v47 = vpop.f32.mrf.mxu0 }
 0x22b   : > { %v2982_v33 = vadd.f32 %v11827_v37, %v14097_v50  ;;  %v3085_v36 = vmax.f32 %v3053_v23, 0.0  ;;  %v3112_v0 = vpack.c.bf16 %v3088_v49, %v3087_v17  ;;  %v3086_v12 = vmax.f32 %v3054_v58, 0.0 }
 0x22c   : > { %v3020_v10 = vmul.f32 %v13958_v45, %v2981_v4  ;;  %v3382_v59 = vrot.slane %v3110_v32, %v13980_v53  ;;  %v5451_v21 = vrot.slane %v5423_v55, %v13980_v53  ;;  %v2979_v38 = vadd.f32 %v2900_v26, %v14085_v15 }
 0x22d   : > { %v3021_v63 = vmul.f32 %v13958_v45, %v2982_v33  ;;  %v14373_v13 = vrot.slane %v3247_v41, %v13980_v53  ;;  %v3389_v62 = vrot.slane %v10851_v29, %v13980_v53  ;;  %v3334_v50 = vrot.slane %v3109_v44, %v13980_v53 }
 0x22e   : > { %v3111_v23 = vpack.c.bf16 %v3086_v12, %v3085_v36  ;;  %v14379_v58 = vcombine.high %v14303_v46, %v14303_v46  ;;  %v3341_v37 = vrot.slane %v10850_v11, %v13980_v53  ;;  %v5453_v15 = vcombine.low %v5444_v2, %v5451_v21 }
 0x22f   : > { %18650 = vst [vmem:[#allocation15_spill] sm:$0xff] %v14373_v13  ;;  %v3059_v26 = vadd.f32 %v13978_v9, %v3020_v10  ;;  %v5460_v55 = vrot.slane %v5452_v27, %v13980_v53  ;;  %v3060_v41 = vadd.f32 %v13978_v9, %v3021_v63  ;;  %v2980_v17 = vadd.f32 %v2903_v47, %v14120_v40  ;;  %v11830_v47 = vpop.f32.mrf.mxu0 }
 0x230   : > { %v3390_v29 = vcombine.high %v3382_v59, %v3382_v59  ;;  %v10853_v44 = vpack.c.bf16 %v3088_v49, %v3088_v49  ;;  %v5467_v36 = vrot.slane %v5453_v15, %v13980_v53  ;;  %v3018_v4 = vmul.f32 %v13958_v45, %v2979_v38 }
 0x231   : > { %v3391_v33 = vcombine.high %v3389_v62, %v3389_v62  ;;  %v14390_v32 = vrot.slane %v3382_v59, %v13980_v53  ;;  %v14393_v2 = vrot.slane %v3389_v62, %v13980_v53  ;;  %v3342_v11 = vcombine.high %v3334_v50, %v3334_v50 }
 0x232   : > { %v3343_v10 = vcombine.high %v3341_v37, %v3341_v37  ;;  %v14396_v27 = vrot.slane %v3334_v50, %v13980_v53  ;;  %v14399_v40 = vrot.slane %v3341_v37, %v13980_v53  ;;  %v3478_v49 = vrot.slane %v3112_v0, %v13980_v53 }
 0x233   : > { %18651 = vst [vmem:[#allocation17_spill] sm:$0xff] %v14390_v32  ;;  %18652 = vst [vmem:[#allocation18_spill] sm:$0xff] %v14393_v2  ;;  %v3091_v21 = vmax.f32 %v3059_v26, 0.0  ;;  %v5468_v63 = vcombine.low %v5460_v55, %v5467_v36  ;;  %v14402_v38 = vmax.f32 %v3060_v41, 0.0  ;;  %v3019_v59 = vmul.f32 %v13958_v45, %v2980_v17 }
 0x234   : > { %18653 = vst [vmem:[#allocation28_spill] sm:$0xff] %v14396_v27  ;;  %18654 = vst [vmem:[#allocation20_spill] sm:$0xff] %v14399_v40  ;;  %v14406_v62 = vrot.slane %v3390_v29, %v13980_v53  ;;  %v3485_v15 = vrot.slane %v10853_v44, %v13980_v53  ;;  %v10852_v30 = vpack.c.bf16 %v3086_v12, %v3086_v12  ;;  %v18657_v17 = vshll.u32 %v14205_v24, 16  ;;  %v2916_v24 = vpop.f32.mrf.mxu0 }
 0x235   : > { %v3057_v50 = vadd.f32 %v13978_v9, %v3018_v4  ;;  %v14411_v37 = vrot.slane %v3391_v33, %v13980_v53  ;;  %v14415_v0 = vcombine.high %v14390_v32, %v14390_v32  ;;  %11897 = vmatmul.mubr.msk.bf16.vlgmr.msra.gmra.mxu0 %vm5240_vm11, %v5468_v63  ;;  %v3114_v26 = vpack.c.bf16 %v14402_v38, %v3091_v21 }
 0x236   : > { %v3058_v55 = vadd.f32 %v13978_v9, %v3019_v59  ;;  %v14422_v41 = vcombine.high %v14393_v2, %v14393_v2  ;;  %v3430_v12 = vrot.slane %v3111_v23, %v13980_v53  ;;  %v18658_v29 = vshrl.u32 %v14192_v56, 16 }
 0x237   : > { %18655 = vst [vmem:[#allocation39_spill] sm:$0xff] %v14411_v37  ;;  %v18659_v36 = vcombine.low %v14196_v25, %v14200_v6  ;;  %v18660_v33 = vmov 0.0   ;;  %v3486_v63 = vcombine.high %v3478_v49, %v3478_v49  ;;  %v3487_v56 = vcombine.high %v3485_v15, %v3485_v15 }
 0x238   : > { %18656 = vst [vmem:[#allocation35_spill] sm:$0xff] %v14422_v41  ;;  %v3893_v44 = vsel %vm14186_vm10, %v18658_v29, %v18657_v17  ;;  %11900 = vmatprep.mubr.msk.bf16.mxu0 %vm12430_vm9, %v18660_v33  ;;  %v14438_v59 = vmax.f32 %v3058_v55, 0.0  ;;  %v3437_v41 = vrot.slane %v10852_v30, %v13980_v53  ;;  %v3089_v17 = vmax.f32 %v3057_v50, 0.0 }
 0x239   : > { %v4654_v4 = vrot.slane %v18659_v36, %v13980_v53  ;;  %v4640_v23 = vcombine.low %v3893_v44, %v14276_v52  ;;  %v14444_v25 = vrot.slane %v3342_v11, %v13980_v53  ;;  %v14447_v6 = vrot.slane %v3343_v10, %v13980_v53 }
 0x23a   : > { %v14450_v36 = vrot.slane %v3478_v49, %v13980_v53  ;;  %v14454_v55 = vcombine.high %v14103_v31, %v14103_v31  ;;  %v3438_v44 = vcombine.high %v3430_v12, %v3430_v12  ;;  %v14457_v21 = vpack.c.bf16 %v14438_v59, %v3089_v17  ;;  %v11831_v17 = vpop.f32.mrf.mxu0 }
 0x23b   : > { %v4669_v29 = vcombine.low %v14334_v42, %v4654_v4  ;;  %18661 = vst [vmem:[#allocation9_spill] sm:$0xff] %v14444_v25  ;;  %18662 = vst [vmem:[#allocation41_spill] sm:$0xff] %v14447_v6  ;;  %v18663_v30 = vcombine.low %v14290_v54, %v14311_v43  ;;  %v4668_v11 = vrot.slane %v4640_v23, %v13980_v53 }
 0x23c   : > { %v14466_v10 = vcombine.high %v14396_v27, %v14396_v27  ;;  %v14470_v50 = vrot.slane %v3485_v15, %v13980_v53  ;;  %v2985_v4 = vadd.f32 %v11830_v47, %v14134_v22  ;;  %v14474_v37 = vrot.slane %v3486_v63, %v13980_v53 }
 0x23d   : > { %v4661_v42 = vrot.slane %v18663_v30, %v13980_v53  ;;  %v14477_v54 = vrot.slane %v3487_v56, %v13980_v53  ;;  %v3439_v43 = vcombine.high %v3437_v41, %v3437_v41  ;;  %v4677_v30 = vrot.slane %v4669_v29, %v13980_v53 }
 0x23e   : > { %18664 = vst [vmem:[#allocation11_spill] sm:$0xff] %v14470_v50  ;;  %18665 = vst [vmem:[#allocation42_spill] sm:$0xff] %v14474_v37  ;;  %v5469_v2 = vcombine.low %v14103_v31, %v14266_v18  ;;  %v5470_v15 = vcombine.low %v14454_v55, %v14241_v3  ;;  %v5471_v22 = vcombine.low %v14246_v20, %v14272_v39 }
 0x23f   : > { %18666 = vst [vmem:[#allocation21_spill] sm:$0xff] %v14477_v54  ;;  %v4670_v23 = vcombine.low %v4661_v42, %v4668_v11  ;;  %v14488_v47 = vcombine.high %v14450_v36, %v14450_v36  ;;  %v14491_v56 = vrot.slane %v3430_v12, %v13980_v53  ;;  %v14494_v63 = vrot.slane %v3437_v41, %v13980_v53 }
 0x240   : > { %v14497_v29 = vrot.slane %v3438_v44, %v13980_v53  ;;  %v10855_v42 = vpack.c.bf16 %v14402_v38, %v14402_v38  ;;  %v3024_v49 = vmul.f32 %v13958_v45, %v2985_v4  ;;  %v5472_v54 = vcombine.low %v14303_v46, %v14360_v35 }
 0x241   : > { %18667 = vst [vmem:[#allocation45_spill] sm:$0xff] %v14488_v47  ;;  %18668 = vst [vmem:[#allocation44_spill] sm:$0xff] %v14491_v56  ;;  %v4684_v11 = vrot.slane %v4670_v23, %v13980_v53  ;;  %v2919_v47 = vpop.f32.mrf.mxu0  ;;  %v14506_v12 = vrot.slane %v3439_v43, %v13980_v53  ;;  %v3574_v41 = vrot.slane %v3114_v26, %v13980_v53 }
 0x242   : > { %18669 = vst [vmem:[#allocation25_spill] sm:$0xff] %v14494_v63  ;;  %18670 = vst [vmem:[#allocation29_spill] sm:$0xff] %v14497_v29  ;;  %v14511_v44 = vcombine.high %v14246_v20, %v14246_v20  ;;  %v5479_v37 = vrot.slane %v5469_v2, %v13980_v53  ;;  %v5486_v23 = vrot.slane %v5470_v15, %v13980_v53 }
 0x243   : > { %18671 = vst [vmem:[#allocation47_spill] sm:$0xff] %v14506_v12  ;;  %v4685_v38 = vcombine.low %v4677_v30, %v4684_v11  ;;  %v5493_v4 = vrot.slane %v5471_v22, %v13980_v53  ;;  %v14517_v50 = vrot.slane %v5472_v54, %v13980_v53  ;;  %v2983_v12 = vadd.f32 %v2916_v24, %v14146_v14 }
 0x244   : > { %v8478_v43 = vcombine.low %v14511_v44, %v14360_v35  ;;  %v2986_v26 = vadd.f32 %v11831_v17, %v14174_v7  ;;  %v2984_v29 = vadd.f32 %v2919_v47, %v14177_v60  ;;  %v3581_v32 = vrot.slane %v10855_v42, %v13980_v53 }
 0x245   : > { %18672 = vst [vmem:[#allocation36_spill] sm:$0xff] %v14517_v50  ;;  %11843 = vmatmul.mubr.msk.bf16.vlgmr.msra.gmra.mxu1 %vm5240_vm11, %v4685_v38  ;;  %v3063_v2 = vadd.f32 %v13978_v9, %v3024_v49  ;;  %v5501_v30 = vcombine.low %v5479_v37, %v5486_v23  ;;  %v5502_v15 = vcombine.low %v5493_v4, %v14517_v50  ;;  %v3948_v54 = vshll.u32 %v14511_v44, 16 }
 0x246   : > { %11949 = vmatpush3.bf16.msra.mxu1 %v14043_v1  ;;  %v8485_v22 = vrot.slane %v8478_v43, %v13980_v53  ;;  %v3022_v14 = vmul.f32 %v13958_v45, %v2983_v12  ;;  %v3025_v7 = vmul.f32 %v13958_v45, %v2986_v26  ;;  %11846 = vmatprep.mubr.msk.bf16.mxu1 %vm12430_vm9, %v18660_v33 }
 0x247   : > { %v14537_v60 = vcombine.high %v14491_v56, %v14491_v56  ;;  %v14540_v24 = vrot.slane %v5501_v30, %v13980_v53  ;;  %v5516_v37 = vrot.slane %v5502_v15, %v13980_v53  ;;  %v3023_v1 = vmul.f32 %v13958_v45, %v2984_v29  ;;  %12056 = vmatprep.subr.bf16.mxu1 %v18660_v33 }
 0x248   : > { %v3582_v49 = vcombine.high %v3574_v41, %v3574_v41  ;;  %v8486_v17 = vcombine.low %v5493_v4, %v8485_v22  ;;  %v3061_v47 = vadd.f32 %v13978_v9, %v3022_v14  ;;  %v3064_v42 = vadd.f32 %v13978_v9, %v3025_v7 }
 0x249   : > { %18673 = vst [vmem:[#allocation51_spill] sm:$0xff] %v14540_v24  ;;  %v3583_v11 = vcombine.high %v3581_v32, %v3581_v32  ;;  %v14548_v12 = vrot.slane %v3574_v41, %v13980_v53  ;;  %v5517_v38 = vcombine.low %v14540_v24, %v5516_v37  ;;  %v3062_v23 = vadd.f32 %v13978_v9, %v3023_v1 }
 0x24a   : > { %v14554_v43 = vcombine.high %v14494_v63, %v14494_v63  ;;  %v3095_v29 = vmax.f32 %v3063_v2, 0.0  ;;  %v14557_v26 = vrot.slane %v8486_v17, %v13980_v53  ;;  %v14559_v4 = vmax.f32 %v3064_v42, 0.0 }
 0x24b   : > { %18674 = vst [vmem:[#allocation48_spill] sm:$0xff] %v14548_v12  ;;  %v10854_v41 = vpack.c.bf16 %v14438_v59, %v14438_v59  ;;  %11901 = vmatmul.mubr.msk.bf16.gmra.mxu0 %vm5240_vm11, %v5517_v38  ;;  %v3093_v15 = vmax.f32 %v3061_v47, 0.0  ;;  %v14565_v22 = vmax.f32 %v3062_v23, 0.0  ;;  %v14568_v14 = vrot.slane %v3581_v32, %v13980_v53 }
 0x24c   : > { %18675 = vst [vmem:[#allocation37_spill] sm:$0xff] %v14554_v43  ;;  %18676 = vst [vmem:[#allocation50_spill] sm:$0xff] %v14557_v26  ;;  %v14571_v2 = vrot.slane %v3582_v49, %v13980_v53  ;;  %v14576_v37 = vpack.c.bf16 %v14559_v4, %v3095_v29  ;;  %11904 = vmatprep.mubr.msk.bf16.mxu0 %vm12430_vm9, %v18660_v33  ;;  %v14581_v59 = vrot.slane %v3583_v11, %v13980_v53 }
 0x24d   : > { %18677 = vst [vmem:[#allocation38_spill] sm:$0xff] %v14568_v14  ;;  %v14585_v1 = vcombine.high %v14548_v12, %v14548_v12  ;;  %v14589_v32 = vrot.slane %v14457_v21, %v13980_v53  ;;  %v14592_v49 = vpack.c.bf16 %v14565_v22, %v3093_v15  ;;  %v3903_v17 = vshrl.u32 %v14103_v31, 16 }
 0x24e   : > { %18678 = vst [vmem:[#allocation40_spill] sm:$0xff] %v14571_v2  ;;  %18679 = vst [vmem:[#allocation56_spill] sm:$0xff] %v14581_v59  ;;  %v3908_v47 = vshll.u32 %v14266_v18, 16  ;;  %v3916_v42 = vshll.u32 %v14454_v55, 16  ;;  %v3919_v11 = vshrl.u32 %v14454_v55, 16  ;;  %v14599_v38 = vrot.slane %v10854_v41, %v13980_v53  ;;  %v11834_v59 = vpop.f32.mrf.mxu0 }
 0x24f   : > { %18680 = vst [vmem:[#allocation53_spill] sm:$0xff] %v14585_v1  ;;  %v3932_v23 = vshll.u32 %v14246_v20, 16  ;;  %v3935_v29 = vshrl.u32 %v14246_v20, 16  ;;  %v3940_v21 = vshll.u32 %v14272_v39, 16  ;;  %v3911_v15 = vshrl.u32 %v14266_v18, 16 }
 0x250   : > { %v3924_v7 = vshll.u32 %v14241_v3, 16  ;;  %v3957_v30 = vshll.u32 %v14360_v35, 16  ;;  %v14610_v55 = vcombine.high %v14568_v14, %v14568_v14  ;;  %v3534_v26 = vcombine.high %v14589_v32, %v14589_v32 }
 0x251   : > { %v3927_v24 = vshrl.u32 %v14241_v3, 16  ;;  %v3910_v18 = vsel %vm14186_vm10, %v3903_v17, %v3908_v47  ;;  %v3918_v31 = vsel %vm14186_vm10, %v3911_v15, %v3916_v42  ;;  %v3943_v20 = vshrl.u32 %v14272_v39, 16 }
 0x252   : > { %18681 = vst [vmem:[#allocation43_spill] sm:$0xff] %v14610_v55  ;;  %v3926_v44 = vsel %vm14186_vm10, %v3919_v11, %v3924_v7  ;;  %v3535_v41 = vcombine.high %v14599_v38, %v14599_v38  ;;  %v14627_v55 = vrot.slane %v14589_v32, %v13980_v53  ;;  %v3942_v17 = vsel %vm14186_vm10, %v3935_v29, %v3940_v21  ;;  %v2932_v21 = vpop.f32.mrf.mxu0 }
 0x253   : > { %v3934_v3 = vsel %vm14186_vm10, %v3927_v24, %v3932_v23  ;;  %v3950_v47 = vsel %vm14186_vm10, %v3943_v20, %v3948_v54  ;;  %v18683_v7 = vshrl.u32 %v14303_v46, 16  ;;  %v3960_v11 = vshrl.u32 %v14360_v35, 16 }
 0x254   : > { %18682 = vst [vmem:[#allocation54_spill] sm:$0xff] %v14627_v55  ;;  %v3965_v15 = vshll.u32 %v14379_v58, 16  ;;  %v4686_v32 = vcombine.low %v3910_v18, %v3918_v31  ;;  %v4687_v39 = vcombine.low %v3926_v44, %v3934_v3  ;;  %v4688_v14 = vcombine.low %v3942_v17, %v3950_v47 }
 0x255   : > { %v3959_v42 = vsel %vm14186_vm10, %v18683_v7, %v3957_v30  ;;  %v7670_v24 = vcombine.low %v14276_v52, %v3910_v18  ;;  %v7671_v29 = vcombine.low %v3918_v31, %v3926_v44  ;;  %v7672_v20 = vcombine.low %v3934_v3, %v3942_v17 }
 0x256   : > { %v14644_v23 = vsel %vm14186_vm10, %v3960_v11, %v3965_v15  ;;  %v7673_v54 = vcombine.low %v3950_v47, %v3959_v42  ;;  %v4696_v30 = vrot.slane %v4686_v32, %v13980_v53  ;;  %v4703_v7 = vrot.slane %v4687_v39, %v13980_v53  ;;  %v11835_v11 = vpop.f32.mrf.mxu0 }
 0x257   : > { %18684 = vst [vmem:[#allocation46_spill] sm:$0xff] %v14644_v23  ;;  %v4689_v1 = vcombine.low %v3959_v42, %v14644_v23  ;;  %v4710_v2 = vrot.slane %v4688_v14, %v13980_v53  ;;  %v14651_v12 = vrot.slane %v7670_v24, %v13980_v53  ;;  %v14654_v52 = vrot.slane %v7671_v29, %v13980_v53 }
 0x258   : > { %v14657_v18 = vrot.slane %v7672_v20, %v13980_v53  ;;  %v14660_v31 = vrot.slane %v7673_v54, %v13980_v53  ;;  %v4718_v44 = vcombine.low %v4696_v30, %v4703_v7  ;;  %v2989_v39 = vadd.f32 %v11834_v59, %v14213_v61 }
 0x259   : > { %18685 = vst [vmem:[#allocation55_spill] sm:$0xff] %v14651_v12  ;;  %18686 = vst [vmem:[#allocation49_spill] sm:$0xff] %v14654_v52  ;;  %v14663_v3 = vrot.slane %v4689_v1, %v13980_v53  ;;  %v14668_v14 = vcombine.high %v14355_v8, %v14355_v8  ;;  %v10973_v42 = vcombine.high %v14303_v46, %v14360_v35 }
 0x25a   : > { %18687 = vst [vmem:[#allocation52_spill] sm:$0xff] %v14657_v18  ;;  %18688 = vst [vmem:[#allocation57_spill] sm:$0xff] %v14660_v31  ;;  %v5519_v1 = vcombine.low %v14355_v8, %v14373_v13  ;;  %v14680_v61 = vrot.slane %v14599_v38, %v13980_v53  ;;  %v3028_v15 = vmul.f32 %v13958_v45, %v2989_v39  ;;  %v4025_v18 = vshrl.u32 %v14350_v5, 16 }
 0x25b   : > { %18689 = vst [vmem:[#allocation58_spill] sm:$0xff] %v14663_v3  ;;  %18690 = vst [vmem:[#allocation59_spill] sm:$0xff] %v14668_v14  ;;  %v4719_v59 = vcombine.low %v4710_v2, %v14663_v3  ;;  %v5520_v32 = vcombine.low %v14668_v14, %v14324_v16  ;;  %v5521_v24 = vcombine.low %v14343_v19, %v14350_v5 }
 0x25c   : > { %v14689_v29 = vrot.slane %v10973_v42, %v13980_v53  ;;  %v14692_v20 = vrot.slane %v5519_v1, %v13980_v53  ;;  %v2987_v54 = vadd.f32 %v2932_v21, %v14217_v48  ;;  %v4726_v38 = vrot.slane %v4718_v44, %v13980_v53  ;;  %v2935_v21 = vpop.f32.mrf.mxu0 }
 0x25d   : > { %v4733_v2 = vrot.slane %v4719_v59, %v13980_v53  ;;  %v14698_v30 = vrot.slane %v5520_v32, %v13980_v53  ;;  %v2990_v7 = vadd.f32 %v11835_v11, %v14223_v57  ;;  %v14702_v39 = vrot.slane %v3534_v26, %v13980_v53 }
 0x25e   : > { %18691 = vst [vmem:[#allocation60_spill] sm:$0xff] %v14689_v29  ;;  %18692 = vst [vmem:[#allocation61_spill] sm:$0xff] %v14692_v20  ;;  %v14705_v42 = vrot.slane %v5521_v24, %v13980_v53  ;;  %v5550_v1 = vcombine.low %v14689_v29, %v14692_v20  ;;  %v3067_v59 = vadd.f32 %v13978_v9, %v3028_v15  ;;  %v11838_v23 = vpop.f32.mrf.mxu0  ;;  %v4000_v20 = vshrl.u32 %v14668_v14, 16 }
 0x25f   : > { %18693 = vst [vmem:[#allocation62_spill] sm:$0xff] %v14698_v30  ;;  %18694 = vst [vmem:[#allocation63_spill] sm:$0xff] %v14702_v39  ;;  %v4734_v44 = vcombine.low %v4726_v38, %v4733_v2  ;;  %v3029_v57 = vmul.f32 %v13958_v45, %v2990_v7  ;;  %v10857_v26 = vpack.c.bf16 %v14559_v4, %v14559_v4  ;;  %v18698_v2 = vld [vmem:[#allocation30_spill] sm:$0xff] }
 0x260   : > { %18695 = vst [vmem:[#allocation64_spill] sm:$0xff] %v14705_v42  ;;  %v5551_v11 = vcombine.low %v14698_v30, %v14705_v42  ;;  %v14720_v24 = vrot.slane %v5550_v1, %v13980_v53  ;;  %v3026_v48 = vmul.f32 %v13958_v45, %v2987_v54  ;;  %v14724_v38 = vrot.slane %v3535_v41, %v13980_v53 }
 0x261   : > { %11847 = vmatmul.mubr.msk.bf16.gmra.mxu1 %vm5240_vm11, %v4734_v44  ;;  %v3068_v15 = vadd.f32 %v13978_v9, %v3029_v57  ;;  %v2988_v7 = vadd.f32 %v2935_v21, %v18698_v2  ;;  %v14731_v4 = vcombine.high %v14360_v35, %v14360_v35  ;;  %v14735_v32 = vcombine.high %v14627_v55, %v14627_v55 }
 0x262   : > { %18696 = vst [vmem:[#allocation65_spill] sm:$0xff] %v14720_v24  ;;  %18697 = vst [vmem:[#allocation66_spill] sm:$0xff] %v14724_v38  ;;  %v10856_v41 = vpack.c.bf16 %v14565_v22, %v14565_v22  ;;  %v5565_v54 = vrot.slane %v5551_v11, %v13980_v53  ;;  %11850 = vmatprep.mubr.msk.bf16.mxu1 %vm12430_vm9, %v18660_v33  ;;  %v3670_v21 = vrot.slane %v14576_v37, %v13980_v53 }
 0x263   : > { %18699 = vst [vmem:[#allocation30_spill] sm:$0xff] %v14731_v4  ;;  %v3099_v44 = vmax.f32 %v3067_v59, 0.0  ;;  %v14745_v57 = vmax.f32 %v3068_v15, 0.0  ;;  %v3027_v2 = vmul.f32 %v13958_v45, %v2988_v7  ;;  %v3677_v47 = vrot.slane %v10857_v26, %v13980_v53 }
 0x264   : > { %v5566_v17 = vcombine.low %v14720_v24, %v5565_v54  ;;  %v3065_v1 = vadd.f32 %v13978_v9, %v3026_v48  ;;  %v14753_v22 = vcombine.high %v14373_v13, %v14373_v13  ;;  %v3973_v59 = vshll.u32 %v14731_v4, 16 }
 0x265   : > { %v14756_v11 = vpack.c.bf16 %v14745_v57, %v3099_v44  ;;  %v3066_v37 = vadd.f32 %v13978_v9, %v3027_v2  ;;  %v3976_v15 = vshrl.u32 %v14731_v4, 16  ;;  %v3622_v45 = vrot.slane %v14592_v49, %v13980_v53 }
 0x266   : > { %18700 = vst [vmem:[#allocation67_spill] sm:$0xff] %v14753_v22  ;;  %11905 = vmatmul.mubr.msk.bf16.gmra.mxu0 %vm5240_vm11, %v5566_v17  ;;  %v3989_v48 = vshll.u32 %v14373_v13, 16  ;;  %v3992_v26 = vshrl.u32 %v14373_v13, 16  ;;  %v3997_v7 = vshll.u32 %v14668_v14, 16  ;;  %v14768_v54 = vrot.slane %v10856_v41, %v13980_v53  ;;  %v18724_v14 = vld [vmem:[#allocation5_spill] sm:$0xff] }
 0x267   : > { %v14770_v44 = vmax.f32 %v3066_v37, 0.0  ;;  %v3968_v9 = vshrl.u32 %v14379_v58, 16  ;;  %v3981_v2 = vshll.u32 %v14355_v8, 16  ;;  %11908 = vmatprep.mubr.msk.bf16.mxu0 %vm12430_vm9, %v18660_v33  ;;  %v3678_v49 = vcombine.high %v3670_v21, %v3670_v21 }
 0x268   : > { %v3097_v17 = vmax.f32 %v3065_v1, 0.0  ;;  %v3984_v24 = vshrl.u32 %v14355_v8, 16  ;;  %v4005_v42 = vshll.u32 %v14753_v22, 16  ;;  %v14780_v41 = vcombine.high %v14343_v19, %v14343_v19 }
 0x269   : > { %v14784_v37 = vsel %vm14186_vm10, %v3968_v9, %v3973_v59  ;;  %v14788_v30 = vsel %vm14186_vm10, %v3976_v15, %v3981_v2  ;;  %v14800_v50 = vsel %vm14186_vm10, %v3992_v26, %v3997_v7  ;;  %v4014_v59 = vshll.u32 %v14343_v19, 16  ;;  %v2948_v7 = vpop.f32.mrf.mxu0 }
 0x26a   : > { %18701 = vst [vmem:[#allocation68_spill] sm:$0xff] %v14784_v37  ;;  %18702 = vst [vmem:[#allocation69_spill] sm:$0xff] %v14788_v30  ;;  %v14792_v1 = vpack.c.bf16 %v14770_v44, %v3097_v17  ;;  %v14796_v29 = vsel %vm14186_vm10, %v3984_v24, %v3989_v48  ;;  %v3679_v9 = vcombine.high %v3677_v47, %v3677_v47  ;;  %v4017_v48 = vshrl.u32 %v14343_v19, 16  ;;  %v18722_v19 = vld [vmem:[#allocation4_spill] sm:$0xff] }
 0x26b   : > { %18703 = vst [vmem:[#allocation70_spill] sm:$0xff] %v14796_v29  ;;  %18704 = vst [vmem:[#allocation71_spill] sm:$0xff] %v14800_v50  ;;  %v14804_v31 = vrot.slane %v3670_v21, %v13980_v53  ;;  %v14807_v15 = vrot.slane %v3677_v47, %v13980_v53  ;;  %v3630_v2 = vcombine.high %v3622_v45, %v3622_v45  ;;  %v4022_v26 = vshll.u32 %v14350_v5, 16 }
 0x26c   : > { %v3631_v17 = vcombine.high %v14768_v54, %v14768_v54  ;;  %v14813_v24 = vsel %vm14186_vm10, %v4000_v20, %v4005_v42  ;;  %v4030_v21 = vshll.u32 %v14780_v41, 16  ;;  %v4735_v47 = vcombine.low %v14784_v37, %v14788_v30 }
 0x26d   : > { %18705 = vst [vmem:[#allocation72_spill] sm:$0xff] %v14807_v15  ;;  %18706 = vst [vmem:[#allocation73_spill] sm:$0xff] %v14813_v24  ;;  %v4736_v52 = vcombine.low %v14796_v29, %v14800_v50  ;;  %v14824_v12 = vrot.slane %v3678_v49, %v13980_v53  ;;  %v14827_v20 = vrot.slane %v3622_v45, %v13980_v53  ;;  %v18707_v5 = vshrl.u32 %v14324_v16, 16 }
 0x26e   : > { %v14831_v42 = vrot.slane %v14768_v54, %v13980_v53  ;;  %v14840_v30 = vrot.slane %v3679_v9, %v13980_v53  ;;  %v14844_v49 = vsel %vm14186_vm10, %v4025_v18, %v4030_v21  ;;  %v14849_v50 = vrot.slane %v4735_v47, %v13980_v53  ;;  %v11839_v18 = vpop.f32.mrf.mxu0 }
 0x26f   : > { %v14837_v22 = vsel %vm14186_vm10, %v18707_v5, %v4014_v59  ;;  %18709 = vst [vmem:[#allocation75_spill] sm:$0xff] %v14844_v49  ;;  %v14853_v54 = vcombine.high %v14804_v31, %v14804_v31  ;;  %v10859_v9 = vpack.c.bf16 %v14745_v57, %v14745_v57  ;;  %v14860_v5 = vsel %vm14186_vm10, %v4017_v48, %v4022_v26 }
 0x270   : > { %18708 = vst [vmem:[#allocation74_spill] sm:$0xff] %v14837_v22  ;;  %v4737_v45 = vcombine.low %v14813_v24, %v14837_v22  ;;  %18710 = vst [vmem:[#allocation76_spill] sm:$0xff] %v14849_v50  ;;  %v4738_v21 = vcombine.low %v14860_v5, %v14844_v49  ;;  %v14865_v47 = vrot.slane %v4736_v52, %v13980_v53  ;;  %v18714_v24 = vld [vmem:[#allocation33_spill] sm:$0xff]  ;;  %v2951_v37 = vpop.f32.mrf.mxu0 }
 0x271   : > { %18711 = vst [vmem:[#allocation77_spill] sm:$0xff] %v14860_v5  ;;  %v2993_v29 = vadd.f32 %v11838_v23, %v18714_v24  ;;  %v14875_v57 = vcombine.high %v14340_v34, %v14340_v34  ;;  %v5567_v48 = vcombine.low %v14780_v41, %v14340_v34  ;;  %v5569_v26 = vcombine.low %v14396_v27, %v14444_v25  ;;  %v12419_v24 = vld [vmem:[%s18003_s2] ss:$0 sm:$0xff] }
 0x272   : > { %18712 = vst [vmem:[#allocation78_spill] sm:$0xff] %v14865_v47  ;;  %v14868_v22 = vrot.slane %v4737_v45, %v13980_v53  ;;  %v14882_v52 = vrot.slane %v3630_v2, %v13980_v53  ;;  %v14885_v45 = vrot.slane %v4738_v21, %v13980_v53  ;;  %v4767_v59 = vcombine.low %v14849_v50, %v14865_v47 }
 0x273   : > { %18715 = vst [vmem:[#allocation33_spill] sm:$0xff] %v14875_v57  ;;  %v3032_v49 = vmul.f32 %v12419_v24, %v2993_v29  ;;  %v5568_v5 = vcombine.low %v14346_v51, %v14875_v57  ;;  %v10974_v2 = vcombine.high %v14396_v27, %v14444_v25  ;;  %v14899_v21 = vrot.slane %v5567_v48, %v13980_v53 }
 0x274   : > { %18713 = vst [vmem:[#allocation79_spill] sm:$0xff] %v14868_v22  ;;  %18716 = vst [vmem:[#allocation80_spill] sm:$0xff] %v14882_v52  ;;  %v3766_v50 = vrot.slane %v14756_v11, %v13980_v53  ;;  %v4768_v23 = vcombine.low %v14868_v22, %v14885_v45  ;;  %v4775_v47 = vrot.slane %v4767_v59, %v13980_v53  ;;  %v18723_v22 = vld [vmem:[#allocation24_spill] sm:$0xff] }
 0x275   : > { %18717 = vst [vmem:[#allocation81_spill] sm:$0xff] %v14885_v45  ;;  %18718 = vst [vmem:[#allocation82_spill] sm:$0xff] %v14899_v21  ;;  %v14907_v29 = vrot.slane %v5569_v26, %v13980_v53  ;;  %v3773_v3 = vrot.slane %v10859_v9, %v13980_v53  ;;  %v14911_v16 = vrot.slane %v5568_v5, %v13980_v53  ;;  %v12420_v9 = vld [vmem:[%s18004_s3] ss:$0 sm:$0xff] }
 0x276   : > { %v14914_v48 = vrot.slane %v10974_v2, %v13980_v53  ;;  %v2991_v13 = vadd.f32 %v2948_v7, %v18722_v19  ;;  %v10858_v11 = vpack.c.bf16 %v14770_v44, %v14770_v44  ;;  %v4782_v45 = vrot.slane %v4768_v23, %v13980_v53 }
 0x277   : > { %18719 = vst [vmem:[#allocation83_spill] sm:$0xff] %v14907_v29  ;;  %18720 = vst [vmem:[#allocation84_spill] sm:$0xff] %v14911_v16  ;;  %v2994_v59 = vadd.f32 %v11839_v18, %v18723_v22  ;;  %v2992_v26 = vadd.f32 %v2951_v37, %v18724_v14  ;;  %v3071_v5 = vadd.f32 %v12420_v9, %v3032_v49 }
 0x278   : > { %18721 = vst [vmem:[#allocation85_spill] sm:$0xff] %v14914_v48  ;;  %v5599_v2 = vcombine.low %v14899_v21, %v14911_v16  ;;  %v5600_v19 = vcombine.low %v14907_v29, %v14914_v48  ;;  %v3030_v7 = vmul.f32 %v12419_v24, %v2991_v13  ;;  %v14930_v44 = vrot.slane %v3631_v17, %v13980_v53 }
 0x279   : > { %v4783_v23 = vcombine.low %v4775_v47, %v4782_v45  ;;  %v3033_v4 = vmul.f32 %v12419_v24, %v2994_v59  ;;  %v3031_v22 = vmul.f32 %v12419_v24, %v2992_v26  ;;  %v3774_v18 = vcombine.high %v3766_v50, %v3766_v50 }
 0x27a   : > { %v14933_v14 = vrot.slane %v5599_v2, %v13980_v53  ;;  %v5614_v37 = vrot.slane %v5600_v19, %v13980_v53  ;;  %v3069_v49 = vadd.f32 %v12420_v9, %v3030_v7  ;;  %v3775_v8 = vcombine.high %v3773_v3, %v3773_v3 }
 0x27b   : > { %v14937_v21 = vrot.slane %v3766_v50, %v13980_v53  ;;  %11851 = vmatmul.mubr.msk.bf16.gmra.mxu1 %vm5240_vm11, %v4783_v23  ;;  %v3072_v13 = vadd.f32 %v12420_v9, %v3033_v4  ;;  %v3070_v16 = vadd.f32 %v12420_v9, %v3031_v22  ;;  %v3718_v17 = vrot.slane %v14792_v1, %v13980_v53 }
 0x27c   : > { %18725 = vst [vmem:[#allocation4_spill] sm:$0xff] %v14933_v14  ;;  %v3725_v47 = vrot.slane %v10858_v11, %v13980_v53  ;;  %v3103_v45 = vmax.f32 %v3071_v5, 0.0  ;;  %v5615_v24 = vcombine.low %v14933_v14, %v5614_v37  ;;  %11854 = vmatprep.mubr.msk.bf16.mxu1 %vm12430_vm9, %v18660_v33  ;;  %v3101_v59 = vmax.f32 %v3069_v49, 0.0 }
 0x27d   : > { %18726 = vst [vmem:[#allocation24_spill] sm:$0xff] %v14937_v21  ;;  %v14946_v26 = vmax.f32 %v3072_v13, 0.0  ;;  %v14948_v50 = vmax.f32 %v3070_v16, 0.0  ;;  %v14952_v4 = vcombine.high %v14346_v51, %v14346_v51  ;;  %v14956_v1 = vcombine.high %v14827_v20, %v14827_v20 }
 0x27e   : > { %v14960_v9 = vrot.slane %v3773_v3, %v13980_v53  ;;  %v14963_v5 = vrot.slane %v3774_v18, %v13980_v53  ;;  %11909 = vmatmul.mubr.msk.bf16.gmra.mxu0 %vm5240_vm11, %v5615_v24  ;;  %v14967_v16 = vrot.slane %v3775_v8, %v13980_v53  ;;  %v14977_v7 = vcombine.high %v14444_v25, %v14444_v25 }
 0x27f   : > { %18727 = vst [vmem:[#allocation5_spill] sm:$0xff] %v14946_v26  ;;  %18728 = vst [vmem:[#allocation86_spill] sm:$0xff] %v14948_v50  ;;  %v14970_v2 = vpack.c.bf16 %v14946_v26, %v3103_v45  ;;  %v14973_v19 = vpack.c.bf16 %v14948_v50, %v3101_v59  ;;  %11912 = vmatprep.mubr.msk.bf16.mxu0 %vm12430_vm9, %v18660_v33  ;;  %v14983_v3 = vcombine.high %v14937_v21, %v14937_v21 }
 0x280   : > { %18729 = vst [vmem:[#allocation87_spill] sm:$0xff] %v14952_v4  ;;  %18730 = vst [vmem:[#allocation88_spill] sm:$0xff] %v14960_v9  ;;  %v3726_v23 = vcombine.high %v3718_v17, %v3718_v17  ;;  %v4033_v22 = vshrl.u32 %v14780_v41, 16  ;;  %v3727_v18 = vcombine.high %v3725_v47, %v3725_v47  ;;  %v14988_v37 = vrot.slane %v3718_v17, %v13980_v53 }
 0x281   : > { %18731 = vst [vmem:[#allocation89_spill] sm:$0xff] %v14963_v5  ;;  %18732 = vst [vmem:[#allocation90_spill] sm:$0xff] %v14967_v16  ;;  %v4062_v49 = vshll.u32 %v14952_v4, 16  ;;  %v4071_v13 = vshll.u32 %v14444_v25, 16  ;;  %v4038_v45 = vshll.u32 %v14340_v34, 16  ;;  %v4046_v24 = vshll.u32 %v14346_v51, 16 }
 0x282   : > { %18733 = vst [vmem:[#allocation91_spill] sm:$0xff] %v14970_v2  ;;  %18734 = vst [vmem:[#allocation92_spill] sm:$0xff] %v14973_v19  ;;  %v4074_v59 = vshrl.u32 %v14444_v25, 16  ;;  %v4079_v11 = vshll.u32 %v14466_v10, 16  ;;  %v4049_v8 = vshrl.u32 %v14346_v51, 16  ;;  %v4054_v41 = vshll.u32 %v14875_v57, 16 }
 0x283   : > { %18735 = vst [vmem:[#allocation93_spill] sm:$0xff] %v14977_v7  ;;  %v4057_v29 = vshrl.u32 %v14875_v57, 16  ;;  %v4087_v17 = vshll.u32 %v14977_v7, 16  ;;  %v15001_v14 = vrot.slane %v3725_v47, %v13980_v53  ;;  %v15004_v48 = vrot.slane %v3726_v23, %v13980_v53 }
 0x284   : > { %v15008_v4 = vsel %vm14186_vm10, %v4033_v22, %v4038_v45  ;;  %v4041_v2 = vshrl.u32 %v14340_v34, 16  ;;  %v18738_v50 = vshrl.u32 %v14396_v27, 16  ;;  %v4082_v47 = vshrl.u32 %v14466_v10, 16 }
 0x285   : > { %18736 = vst [vmem:[#allocation94_spill] sm:$0xff] %v15008_v4  ;;  %v15013_v26 = vsel %vm14186_vm10, %v4057_v29, %v4062_v49  ;;  %v4090_v23 = vshrl.u32 %v14977_v7, 16  ;;  %v15024_v57 = vrot.slane %v3727_v18, %v13980_v53  ;;  %v15028_v22 = vcombine.high %v14988_v37, %v14988_v37 }
 0x286   : > { %18737 = vst [vmem:[#allocation95_spill] sm:$0xff] %v15013_v26  ;;  %v15019_v19 = vsel %vm14186_vm10, %v18738_v50, %v4071_v13  ;;  %v15033_v49 = vsel %vm14186_vm10, %v4074_v59, %v4079_v11  ;;  %v15037_v50 = vsel %vm14186_vm10, %v4041_v2, %v4046_v24  ;;  %v15041_v13 = vsel %vm14186_vm10, %v4049_v8, %v4054_v41 }
 0x287   : > { %18739 = vst [vmem:[#allocation96_spill] sm:$0xff] %v15019_v19  ;;  %18740 = vst [vmem:[#allocation97_spill] sm:$0xff] %v15024_v57  ;;  %v15045_v18 = vsel %vm14186_vm10, %v4082_v47, %v4087_v17  ;;  %v4095_v45 = vshll.u32 %v14399_v40, 16  ;;  %v4784_v29 = vcombine.low %v15008_v4, %v15037_v50  ;;  %v4785_v11 = vcombine.low %v15041_v13, %v15013_v26 }
 0x288   : > { %18741 = vst [vmem:[#allocation98_spill] sm:$0xff] %v15033_v49  ;;  %18742 = vst [vmem:[#allocation99_spill] sm:$0xff] %v15037_v50  ;;  %v4786_v2 = vcombine.low %v15019_v19, %v15033_v49  ;;  %v15056_v24 = vcombine.high %v14399_v40, %v14399_v40  ;;  %v3422_v59 = vcombine.high %v14406_v62, %v14406_v62  ;;  %v18751_v50 = vld [vmem:[#allocation18_spill] sm:$0xff] }
 0x289   : > { %18743 = vst [vmem:[#allocation100_spill] sm:$0xff] %v15041_v13  ;;  %18744 = vst [vmem:[#allocation101_spill] sm:$0xff] %v15045_v18  ;;  %v15060_v8 = vsel %vm14186_vm10, %v4090_v23, %v4095_v45  ;;  %v5616_v41 = vcombine.low %v14399_v40, %v14447_v6  ;;  %v5618_v17 = vcombine.low %v14406_v62, %v14415_v0  ;;  %v18750_v45 = vld [vmem:[#allocation17_spill] sm:$0xff] }
 0x28a   : > { %18745 = vst [vmem:[#allocation102_spill] sm:$0xff] %v15056_v24  ;;  %18746 = vst [vmem:[#allocation103_spill] sm:$0xff] %v15060_v8  ;;  %v4787_v47 = vcombine.low %v15045_v18, %v15060_v8  ;;  %v15071_v26 = vrot.slane %v4784_v29, %v13980_v53  ;;  %v15074_v19 = vrot.slane %v4785_v11, %v13980_v53  ;;  %v4098_v8 = vshrl.u32 %v14399_v40, 16 }
 0x28b   : > { %v15077_v23 = vrot.slane %v4786_v2, %v13980_v53  ;;  %v5617_v49 = vcombine.low %v15056_v24, %v18750_v45  ;;  %v5619_v13 = vcombine.low %v3422_v59, %v18751_v50  ;;  %v15083_v4 = vrot.slane %v5616_v41, %v13980_v53 }
 0x28c   : > { %18747 = vst [vmem:[#allocation104_spill] sm:$0xff] %v15071_v26  ;;  %18748 = vst [vmem:[#allocation105_spill] sm:$0xff] %v15074_v19  ;;  %v15086_v7 = vrot.slane %v5618_v17, %v13980_v53  ;;  %v15089_v29 = vrot.slane %v4787_v47, %v13980_v53  ;;  %v4816_v11 = vcombine.low %v15071_v26, %v15074_v19  ;;  %v4103_v17 = vshll.u32 %v14447_v6, 16 }
 0x28d   : > { %18749 = vst [vmem:[#allocation106_spill] sm:$0xff] %v15077_v23  ;;  %18752 = vst [vmem:[#allocation17_spill] sm:$0xff] %v15083_v4  ;;  %v15095_v2 = vcombine.high %v14447_v6, %v14447_v6  ;;  %v15099_v18 = vrot.slane %v5617_v49, %v13980_v53  ;;  %v15102_v41 = vrot.slane %v5619_v13, %v13980_v53  ;;  %v4106_v47 = vshrl.u32 %v14447_v6, 16 }
 0x28e   : > { %18753 = vst [vmem:[#allocation107_spill] sm:$0xff] %v15086_v7  ;;  %18754 = vst [vmem:[#allocation108_spill] sm:$0xff] %v15089_v29  ;;  %v4817_v27 = vcombine.low %v15077_v23, %v15089_v29  ;;  %v4824_v26 = vrot.slane %v4816_v11, %v13980_v53  ;;  %v4111_v19 = vshll.u32 %v15056_v24, 16  ;;  %v4114_v34 = vshrl.u32 %v15056_v24, 16 }
 0x28f   : > { %18755 = vst [vmem:[#allocation109_spill] sm:$0xff] %v15095_v2  ;;  %18756 = vst [vmem:[#allocation110_spill] sm:$0xff] %v15099_v18  ;;  %v5648_v49 = vcombine.low %v15083_v4, %v15099_v18  ;;  %v5649_v13 = vcombine.low %v15086_v7, %v15102_v41  ;;  %v15117_v40 = vsel %vm14186_vm10, %v4098_v8, %v4103_v17  ;;  %v4119_v6 = vshll.u32 %v15095_v2, 16 }
 0x290   : > { %18757 = vst [vmem:[#allocation111_spill] sm:$0xff] %v15102_v41  ;;  %18758 = vst [vmem:[#allocation112_spill] sm:$0xff] %v15117_v40  ;;  %v4831_v29 = vrot.slane %v4817_v27, %v13980_v53  ;;  %v15123_v11 = vsel %vm14186_vm10, %v4106_v47, %v4111_v19  ;;  %v4128_v23 = vshll.u32 %v14406_v62, 16  ;;  %v4131_v24 = vshrl.u32 %v14406_v62, 16 }
 0x291   : > { %18759 = vst [vmem:[#allocation113_spill] sm:$0xff] %v15123_v11  ;;  %v5656_v18 = vrot.slane %v5648_v49, %v13980_v53  ;;  %v15129_v41 = vrot.slane %v5649_v13, %v13980_v53  ;;  %v15133_v8 = vsel %vm14186_vm10, %v4114_v34, %v4119_v6  ;;  %v4136_v17 = vshll.u32 %v14415_v0, 16 }
 0x292   : > { %18761 = vst [vmem:[#allocation115_spill] sm:$0xff] %v15133_v8  ;;  %v4832_v27 = vcombine.low %v4824_v26, %v4831_v29  ;;  %v18762_v7 = vshrl.u32 %v18750_v45, 16  ;;  %v4139_v47 = vshrl.u32 %v14415_v0, 16  ;;  %v4144_v4 = vshll.u32 %v3422_v59, 16 }
 0x293   : > { %18760 = vst [vmem:[#allocation114_spill] sm:$0xff] %v15129_v41  ;;  %v5664_v49 = vcombine.low %v5656_v18, %v15129_v41  ;;  %v15146_v13 = vsel %vm14186_vm10, %v4131_v24, %v4136_v17  ;;  %v4147_v34 = vshrl.u32 %v3422_v59, 16  ;;  %v4152_v6 = vshll.u32 %v18751_v50, 16 }
 0x294   : > { %v15140_v19 = vsel %vm14186_vm10, %v18762_v7, %v4128_v23  ;;  %18764 = vst [vmem:[#allocation117_spill] sm:$0xff] %v15146_v13  ;;  %11855 = vmatmul.mubr.msk.bf16.gmra.mxu1 %vm5240_vm11, %v4832_v27  ;;  %v15152_v26 = vsel %vm14186_vm10, %v4139_v47, %v4144_v4  ;;  %v4155_v7 = vshrl.u32 %v18751_v50, 16  ;;  %v18766_v23 = vld [vmem:[#allocation39_spill] sm:$0xff]  ;;  %v4833_v18 = vcombine.low %v15117_v40, %v15123_v11 }
 0x295   : > { %18763 = vst [vmem:[#allocation116_spill] sm:$0xff] %v15140_v19  ;;  %18765 = vst [vmem:[#allocation118_spill] sm:$0xff] %v15152_v26  ;;  %v4160_v0 = vshll.u32 %v18766_v23, 16  ;;  %11913 = vmatmul.mubr.msk.bf16.gmra.mxu0 %vm5240_vm11, %v5664_v49  ;;  %11858 = vmatprep.mubr.msk.bf16.mxu1 %vm12430_vm9, %v18660_v33  ;;  %v15163_v24 = vsel %vm14186_vm10, %v4147_v34, %v4152_v6  ;;  %v4834_v4 = vcombine.low %v15133_v8, %v15140_v19  ;;  %v18770_v47 = vld [vmem:[#allocation35_spill] sm:$0xff]  ;;  %v18771_v34 = vld [vmem:[#allocation29_spill] sm:$0xff] }
 0x296   : > { %18767 = vst [vmem:[#allocation119_spill] sm:$0xff] %v15163_v24  ;;  %v4835_v59 = vcombine.low %v15146_v13, %v15152_v26  ;;  %v4163_v29 = vshrl.u32 %v18766_v23, 16  ;;  %v15175_v27 = vrot.slane %v4833_v18, %v13980_v53  ;;  %11916 = vmatprep.mubr.msk.bf16.mxu0 %vm12430_vm9, %v18660_v33  ;;  %v5665_v49 = vcombine.low %v18766_v23, %v18770_v47  ;;  %v18774_v18 = vld [vmem:[#allocation47_spill] sm:$0xff] }
 0x297   : > { %v15172_v17 = vsel %vm14186_vm10, %v4155_v7, %v4160_v0  ;;  %v5666_v6 = vcombine.low %v14491_v56, %v18771_v34  ;;  %v15186_v19 = vrot.slane %v4834_v4, %v13980_v53  ;;  %v10975_v0 = vcombine.high %v14491_v56, %v18771_v34 }
 0x298   : > { %18768 = vst [vmem:[#allocation120_spill] sm:$0xff] %v15172_v17  ;;  %18769 = vst [vmem:[#allocation121_spill] sm:$0xff] %v15175_v27  ;;  %v4836_v41 = vcombine.low %v15163_v24, %v15172_v17  ;;  %v15189_v7 = vrot.slane %v4835_v59, %v13980_v53  ;;  %v5668_v13 = vcombine.low %v14494_v63, %v18774_v18  ;;  %v4168_v40 = vshll.u32 %v18770_v47, 16 }
 0x299   : > { %18772 = vst [vmem:[#allocation122_spill] sm:$0xff] %v15186_v19  ;;  %v15196_v26 = vrot.slane %v5665_v49, %v13980_v53  ;;  %v15199_v11 = vrot.slane %v5666_v6, %v13980_v53  ;;  %v15203_v17 = vcombine.high %v18771_v34, %v18771_v34  ;;  %v4865_v59 = vcombine.low %v15175_v27, %v15186_v19 }
 0x29a   : > { %18773 = vst [vmem:[#allocation123_spill] sm:$0xff] %v15189_v7  ;;  %v15206_v4 = vrot.slane %v4836_v41, %v13980_v53  ;;  %v15211_v24 = vrot.slane %v10975_v0, %v13980_v53  ;;  %v15215_v49 = vcombine.high %v18766_v23, %v18766_v23  ;;  %v15218_v6 = vrot.slane %v5668_v13, %v13980_v53 }
 0x29b   : > { %18775 = vst [vmem:[#allocation124_spill] sm:$0xff] %v15196_v26  ;;  %18776 = vst [vmem:[#allocation125_spill] sm:$0xff] %v15199_v11  ;;  %v5697_v8 = vcombine.low %v15196_v26, %v15199_v11  ;;  %v4171_v41 = vshrl.u32 %v18770_v47, 16  ;;  %v4873_v0 = vrot.slane %v4865_v59, %v13980_v53  ;;  %v4185_v2 = vshll.u32 %v18771_v34, 16 }
 0x29c   : > { %18777 = vst [vmem:[#allocation126_spill] sm:$0xff] %v15206_v4  ;;  %18778 = vst [vmem:[#allocation127_spill] sm:$0xff] %v15211_v24  ;;  %v4866_v19 = vcombine.low %v15189_v7, %v15206_v4  ;;  %v4176_v27 = vshll.u32 %v15215_v49, 16  ;;  %v5698_v13 = vcombine.low %v15211_v24, %v15218_v6  ;;  %v15234_v11 = vsel %vm14186_vm10, %v4163_v29, %v4168_v40 }
 0x29d   : > { %18779 = vst [vmem:[#allocation128_spill] sm:$0xff] %v15215_v49  ;;  %18780 = vst [vmem:[#allocation129_spill] sm:$0xff] %v15218_v6  ;;  %v5705_v50 = vrot.slane %v5697_v8, %v13980_v53  ;;  %v4188_v26 = vshrl.u32 %v18771_v34, 16  ;;  %v18783_v4 = vshrl.u32 %v14491_v56, 16  ;;  %v4193_v8 = vshll.u32 %v14537_v60, 16 }
 0x29e   : > { %18781 = vst [vmem:[#allocation130_spill] sm:$0xff] %v15234_v11  ;;  %v4880_v23 = vrot.slane %v4866_v19, %v13980_v53  ;;  %v15240_v59 = vsel %vm14186_vm10, %v4171_v41, %v4176_v27  ;;  %v15250_v6 = vrot.slane %v5698_v13, %v13980_v53  ;;  %v4196_v40 = vshrl.u32 %v14537_v60, 16 }
 0x29f   : > { %18782 = vst [vmem:[#allocation131_spill] sm:$0xff] %v15240_v59  ;;  %v15246_v7 = vsel %vm14186_vm10, %v18783_v4, %v4185_v2  ;;  %v4201_v29 = vshll.u32 %v15203_v17, 16  ;;  %v4204_v19 = vshrl.u32 %v15203_v17, 16  ;;  %v15257_v27 = vsel %vm14186_vm10, %v4188_v26, %v4193_v8 }
 0x2a0   : > { %18784 = vst [vmem:[#allocation132_spill] sm:$0xff] %v15246_v7  ;;  %18785 = vst [vmem:[#allocation133_spill] sm:$0xff] %v15250_v6  ;;  %v4881_v24 = vcombine.low %v4873_v0, %v4880_v23  ;;  %v4209_v41 = vshll.u32 %v14494_v63, 16  ;;  %v4212_v2 = vshrl.u32 %v14494_v63, 16  ;;  %v5713_v4 = vcombine.low %v5705_v50, %v15250_v6 }
 0x2a1   : > { %18786 = vst [vmem:[#allocation134_spill] sm:$0xff] %v15257_v27  ;;  %v15264_v13 = vsel %vm14186_vm10, %v4196_v40, %v4201_v29  ;;  %v4217_v49 = vshll.u32 %v18774_v18, 16  ;;  %v4220_v47 = vshrl.u32 %v18774_v18, 16  ;;  %v4225_v23 = vshll.u32 %v14554_v43, 16  ;;  %v18790_v40 = vld [vmem:[#allocation11_spill] sm:$0xff] }
 0x2a2   : > { %18787 = vst [vmem:[#allocation135_spill] sm:$0xff] %v15264_v13  ;;  %11859 = vmatmul.mubr.msk.bf16.gmra.mxu1 %vm5240_vm11, %v4881_v24  ;;  %v15271_v26 = vsel %vm14186_vm10, %v4204_v19, %v4209_v41  ;;  %v4882_v0 = vcombine.low %v15234_v11, %v15240_v59  ;;  %v4883_v50 = vcombine.low %v15246_v7, %v15257_v27  ;;  %v4228_v19 = vshrl.u32 %v14554_v43, 16 }
 0x2a3   : > { %18788 = vst [vmem:[#allocation136_spill] sm:$0xff] %v15271_v26  ;;  %11917 = vmatmul.mubr.msk.bf16.gmra.mxu0 %vm5240_vm11, %v5713_v4  ;;  %11862 = vmatprep.mubr.msk.bf16.mxu1 %vm12430_vm9, %v18660_v33  ;;  %v15283_v24 = vsel %vm14186_vm10, %v4212_v2, %v4217_v49  ;;  %v4884_v8 = vcombine.low %v15264_v13, %v15271_v26  ;;  %v18795_v49 = vld [vmem:[#allocation42_spill] sm:$0xff]  ;;  %v18798_v26 = vld [vmem:[#allocation21_spill] sm:$0xff] }
 0x2a4   : > { %18789 = vst [vmem:[#allocation137_spill] sm:$0xff] %v15283_v24  ;;  %v15289_v29 = vcombine.high %v18790_v40, %v18790_v40  ;;  %v15294_v41 = vsel %vm14186_vm10, %v4220_v47, %v4225_v23  ;;  %v15297_v4 = vrot.slane %v4882_v0, %v13980_v53  ;;  %v15300_v6 = vrot.slane %v4883_v50, %v13980_v53  ;;  %v18797_v23 = vld [vmem:[#allocation45_spill] sm:$0xff] }
 0x2a5   : > { %18792 = vst [vmem:[#allocation138_spill] sm:$0xff] %v15294_v41  ;;  %11920 = vmatprep.mubr.msk.bf16.mxu0 %vm12430_vm9, %v18660_v33  ;;  %v3518_v2 = vcombine.high %v18795_v49, %v18795_v49  ;;  %v4885_v11 = vcombine.low %v15283_v24, %v15294_v41  ;;  %v15309_v59 = vrot.slane %v4884_v8, %v13980_v53  ;;  %v4242_v56 = vshll.u32 %v18795_v49, 16 }
 0x2a6   : > { %18791 = vst [vmem:[#allocation11_spill] sm:$0xff] %v15289_v29  ;;  %18793 = vst [vmem:[#allocation139_spill] sm:$0xff] %v15297_v4  ;;  %v5714_v47 = vcombine.low %v14554_v43, %v14450_v36  ;;  %v5715_v0 = vcombine.low %v18795_v49, %v18797_v23  ;;  %v4914_v50 = vcombine.low %v15297_v4, %v15300_v6  ;;  %v4245_v34 = vshrl.u32 %v18795_v49, 16 }
 0x2a7   : > { %18794 = vst [vmem:[#allocation140_spill] sm:$0xff] %v15300_v6  ;;  %18796 = vst [vmem:[#allocation141_spill] sm:$0xff] %v15309_v59  ;;  %v5716_v7 = vcombine.low %v3518_v2, %v18790_v40  ;;  %v5717_v27 = vcombine.low %v18798_v26, %v15289_v29  ;;  %v15322_v41 = vcombine.high %v18774_v18, %v18774_v18  ;;  %v4258_v49 = vshll.u32 %v3518_v2, 16 }
 0x2a8   : > { %v15325_v8 = vrot.slane %v4885_v11, %v13980_v53  ;;  %v15328_v24 = vrot.slane %v5714_v47, %v13980_v53  ;;  %v15331_v13 = vrot.slane %v5715_v0, %v13980_v53  ;;  %v15335_v4 = vcombine.high %v18798_v26, %v18798_v26 }
 0x2a9   : > { %18799 = vst [vmem:[#allocation45_spill] sm:$0xff] %v15322_v41  ;;  %v4922_v6 = vrot.slane %v4914_v50, %v13980_v53  ;;  %v15339_v43 = vrot.slane %v5716_v7, %v13980_v53  ;;  %v15342_v18 = vrot.slane %v5717_v27, %v13980_v53  ;;  %v4233_v11 = vshll.u32 %v15322_v41, 16 }
 0x2aa   : > { %18800 = vst [vmem:[#allocation21_spill] sm:$0xff] %v15325_v8  ;;  %18801 = vst [vmem:[#allocation142_spill] sm:$0xff] %v15328_v24  ;;  %v4915_v47 = vcombine.low %v15309_v59, %v15325_v8  ;;  %v5746_v0 = vcombine.low %v15328_v24, %v15331_v13  ;;  %v4250_v27 = vshll.u32 %v18797_v23, 16  ;;  %v4253_v41 = vshrl.u32 %v18797_v23, 16 }
 0x2ab   : > { %18802 = vst [vmem:[#allocation143_spill] sm:$0xff] %v15331_v13  ;;  %18803 = vst [vmem:[#allocation144_spill] sm:$0xff] %v15335_v4  ;;  %v5747_v50 = vcombine.low %v15339_v43, %v15342_v18  ;;  %v15355_v7 = vsel %vm14186_vm10, %v4228_v19, %v4233_v11  ;;  %v18807_v24 = vshrl.u32 %v14450_v36, 16  ;;  %v4261_v11 = vshrl.u32 %v3518_v2, 16 }
 0x2ac   : > { %18804 = vst [vmem:[#allocation145_spill] sm:$0xff] %v15339_v43  ;;  %18805 = vst [vmem:[#allocation146_spill] sm:$0xff] %v15342_v18  ;;  %v4929_v8 = vrot.slane %v4915_v47, %v13980_v53  ;;  %v5754_v59 = vrot.slane %v5746_v0, %v13980_v53  ;;  %v15372_v19 = vsel %vm14186_vm10, %v4245_v34, %v4250_v27  ;;  %v4266_v23 = vshll.u32 %v18790_v40, 16 }
 0x2ad   : > { %18806 = vst [vmem:[#allocation147_spill] sm:$0xff] %v15355_v7  ;;  %v15365_v13 = vsel %vm14186_vm10, %v18807_v24, %v4242_v56  ;;  %v15368_v18 = vrot.slane %v5747_v50, %v13980_v53  ;;  %18810 = vst [vmem:[#allocation150_spill] sm:$0xff] %v15372_v19  ;;  %v15377_v0 = vsel %vm14186_vm10, %v4253_v41, %v4258_v49  ;;  %v4269_v43 = vshrl.u32 %v18790_v40, 16 }
 0x2ae   : > { %18808 = vst [vmem:[#allocation148_spill] sm:$0xff] %v15365_v13  ;;  %v4930_v47 = vcombine.low %v4922_v6, %v4929_v8  ;;  %18811 = vst [vmem:[#allocation151_spill] sm:$0xff] %v15377_v0  ;;  %v4274_v56 = vshll.u32 %v18798_v26, 16  ;;  %v15384_v50 = vsel %vm14186_vm10, %v4261_v11, %v4266_v23  ;;  %v4277_v34 = vshrl.u32 %v18798_v26, 16 }
 0x2af   : > { %18809 = vst [vmem:[#allocation149_spill] sm:$0xff] %v15368_v18  ;;  %v5762_v24 = vcombine.low %v5754_v59, %v15368_v18  ;;  %18812 = vst [vmem:[#allocation152_spill] sm:$0xff] %v15384_v50  ;;  %v4282_v2 = vshll.u32 %v15289_v29, 16  ;;  %v4285_v41 = vshrl.u32 %v15289_v29, 16  ;;  %v4290_v49 = vshll.u32 %v15335_v4, 16  ;;  %v18820_v18 = vld [vmem:[#allocation48_spill] sm:$0xff] }
 0x2b0   : > { %11863 = vmatmul.mubr.msk.bf16.gmra.mxu1 %vm5240_vm11, %v4930_v47  ;;  %v15391_v6 = vsel %vm14186_vm10, %v4269_v43, %v4274_v56  ;;  %v4931_v59 = vcombine.low %v15355_v7, %v15365_v13  ;;  %v4932_v43 = vcombine.low %v15372_v19, %v15377_v0  ;;  %v4299_v11 = vshll.u32 %v14702_v39, 16 }
 0x2b1   : > { %18813 = vst [vmem:[#allocation153_spill] sm:$0xff] %v15391_v6  ;;  %11921 = vmatmul.mubr.msk.bf16.gmra.mxu0 %vm5240_vm11, %v5762_v24  ;;  %11866 = vmatprep.mubr.msk.bf16.mxu1 %vm12430_vm9, %v18660_v33  ;;  %v15402_v8 = vsel %vm14186_vm10, %v4277_v34, %v4282_v2  ;;  %v4933_v27 = vcombine.low %v15384_v50, %v15391_v6  ;;  %v18827_v13 = vshrl.u32 %v14627_v55, 16  ;;  %v4307_v19 = vshll.u32 %v14735_v32, 16 }
 0x2b2   : > { %18814 = vst [vmem:[#allocation154_spill] sm:$0xff] %v15402_v8  ;;  %v15411_v23 = vsel %vm14186_vm10, %v4285_v41, %v4290_v49  ;;  %v15414_v47 = vrot.slane %v4931_v59, %v13980_v53  ;;  %11924 = vmatprep.mubr.msk.bf16.mxu0 %vm12430_vm9, %v18660_v33  ;;  %v15420_v56 = vcombine.high %v14680_v61, %v14680_v61  ;;  %v4310_v7 = vshrl.u32 %v14735_v32, 16 }
 0x2b3   : > { %18815 = vst [vmem:[#allocation155_spill] sm:$0xff] %v15411_v23  ;;  %v5763_v24 = vcombine.low %v14627_v55, %v14702_v39  ;;  %v4934_v34 = vcombine.low %v15402_v8, %v15411_v23  ;;  %v15427_v2 = vrot.slane %v4932_v43, %v13980_v53  ;;  %v15430_v41 = vrot.slane %v4933_v27, %v13980_v53 }
 0x2b4   : > { %18816 = vst [vmem:[#allocation156_spill] sm:$0xff] %v15414_v47  ;;  %18817 = vst [vmem:[#allocation157_spill] sm:$0xff] %v15420_v56  ;;  %v10976_v49 = vcombine.high %v14627_v55, %v14702_v39  ;;  %v5765_v59 = vcombine.low %v14680_v61, %v14724_v38  ;;  %v5766_v6 = vcombine.low %v15420_v56, %v18820_v18 }
 0x2b5   : > { %18818 = vst [vmem:[#allocation158_spill] sm:$0xff] %v15427_v2  ;;  %18819 = vst [vmem:[#allocation159_spill] sm:$0xff] %v15430_v41  ;;  %v15439_v0 = vrot.slane %v5763_v24, %v13980_v53  ;;  %v15443_v23 = vcombine.high %v14702_v39, %v14702_v39  ;;  %v15446_v43 = vrot.slane %v4934_v34, %v13980_v53 }
 0x2b6   : > { %v4963_v27 = vcombine.low %v15414_v47, %v15427_v2  ;;  %v15451_v8 = vrot.slane %v10976_v49, %v13980_v53  ;;  %v15455_v50 = vcombine.high %v14724_v38, %v14724_v38  ;;  %v15458_v24 = vrot.slane %v5765_v59, %v13980_v53 }
 0x2b7   : > { %18821 = vst [vmem:[#allocation160_spill] sm:$0xff] %v15439_v0  ;;  %18822 = vst [vmem:[#allocation161_spill] sm:$0xff] %v15446_v43  ;;  %v15461_v4 = vrot.slane %v5766_v6, %v13980_v53  ;;  %v15467_v34 = vsel %vm14186_vm10, %v18827_v13, %v4299_v11  ;;  %v4302_v2 = vshrl.u32 %v14702_v39, 16  ;;  %v4964_v49 = vcombine.low %v15430_v41, %v15446_v43 }
 0x2b8   : > { %18823 = vst [vmem:[#allocation162_spill] sm:$0xff] %v15451_v8  ;;  %18824 = vst [vmem:[#allocation163_spill] sm:$0xff] %v15455_v50  ;;  %v4971_v47 = vrot.slane %v4963_v27, %v13980_v53  ;;  %v5795_v59 = vcombine.low %v15439_v0, %v15451_v8  ;;  %v4315_v13 = vshll.u32 %v15443_v23, 16  ;;  %v4318_v11 = vshrl.u32 %v15443_v23, 16 }
 0x2b9   : > { %18825 = vst [vmem:[#allocation164_spill] sm:$0xff] %v15458_v24  ;;  %18826 = vst [vmem:[#allocation165_spill] sm:$0xff] %v15461_v4  ;;  %v5796_v6 = vcombine.low %v15458_v24, %v15461_v4  ;;  %v4978_v29 = vrot.slane %v4964_v49, %v13980_v53  ;;  %v15485_v27 = vsel %vm14186_vm10, %v4302_v2, %v4307_v19  ;;  %v4323_v0 = vshll.u32 %v14680_v61, 16 }
 0x2ba   : > { %18828 = vst [vmem:[#allocation166_spill] sm:$0xff] %v15467_v34  ;;  %v5803_v43 = vrot.slane %v5795_v59, %v13980_v53  ;;  %18829 = vst [vmem:[#allocation167_spill] sm:$0xff] %v15485_v27  ;;  %v15491_v4 = vsel %vm14186_vm10, %v4310_v7, %v4315_v13  ;;  %v4326_v24 = vshrl.u32 %v14680_v61, 16  ;;  %v4331_v8 = vshll.u32 %v14724_v38, 16 }
 0x2bb   : > { %v5810_v41 = vrot.slane %v5796_v6, %v13980_v53  ;;  %18830 = vst [vmem:[#allocation168_spill] sm:$0xff] %v15491_v4  ;;  %v4979_v55 = vcombine.low %v4971_v47, %v4978_v29  ;;  %v15497_v49 = vsel %vm14186_vm10, %v4318_v11, %v4323_v0  ;;  %v4334_v19 = vshrl.u32 %v14724_v38, 16  ;;  %v18834_v0 = vld [vmem:[#allocation40_spill] sm:$0xff] }
 0x2bc   : > { %18831 = vst [vmem:[#allocation169_spill] sm:$0xff] %v15497_v49  ;;  %v4339_v2 = vshll.u32 %v15420_v56, 16  ;;  %v15503_v6 = vsel %vm14186_vm10, %v4326_v24, %v4331_v8  ;;  %v4342_v7 = vshrl.u32 %v15420_v56, 16  ;;  %v4347_v13 = vshll.u32 %v15455_v50, 16 }
 0x2bd   : > { %v5811_v59 = vcombine.low %v5803_v43, %v5810_v41  ;;  %18832 = vst [vmem:[#allocation170_spill] sm:$0xff] %v15503_v6  ;;  %11867 = vmatmul.mubr.msk.bf16.gmra.mxu1 %vm5240_vm11, %v4979_v55  ;;  %v4356_v47 = vshll.u32 %v18834_v0, 16  ;;  %v4980_v11 = vcombine.low %v15467_v34, %v15485_v27  ;;  %v4981_v41 = vcombine.low %v15491_v4, %v15497_v49  ;;  %v18843_v27 = vld [vmem:[#allocation43_spill] sm:$0xff] }
 0x2be   : > { %v15510_v29 = vsel %vm14186_vm10, %v4334_v19, %v4339_v2  ;;  %11870 = vmatprep.mubr.msk.bf16.mxu1 %vm12430_vm9, %v18660_v33  ;;  %v15522_v55 = vsel %vm14186_vm10, %v4342_v7, %v4347_v13  ;;  %v3614_v43 = vcombine.high %v18834_v0, %v18834_v0  ;;  %v4359_v24 = vshrl.u32 %v18834_v0, 16  ;;  %v18840_v13 = vld [vmem:[#allocation53_spill] sm:$0xff] }
 0x2bf   : > { %18833 = vst [vmem:[#allocation171_spill] sm:$0xff] %v15510_v29  ;;  %11925 = vmatmul.mubr.msk.bf16.gmra.mxu0 %vm5240_vm11, %v5811_v59  ;;  %18835 = vst [vmem:[#allocation172_spill] sm:$0xff] %v15522_v55  ;;  %v4982_v8 = vcombine.low %v15503_v6, %v15510_v29  ;;  %v18836_v19 = vshrl.u32 %v18820_v18, 16  ;;  %v15536_v59 = vrot.slane %v4980_v11, %v13980_v53  ;;  %v18844_v11 = vld [vmem:[#allocation56_spill] sm:$0xff] }
 0x2c0   : > { %v15539_v7 = vrot.slane %v4981_v41, %v13980_v53  ;;  %11928 = vmatprep.mubr.msk.bf16.mxu0 %vm12430_vm9, %v18660_v33  ;;  %v5812_v29 = vcombine.low %v18834_v0, %v18840_v13  ;;  %v5814_v4 = vcombine.low %v18844_v11, %v18843_v27  ;;  %v5815_v34 = vcombine.low %v14827_v20, %v14882_v52 }
 0x2c1   : > { %v15533_v2 = vsel %vm14186_vm10, %v18836_v19, %v4356_v47  ;;  %18838 = vst [vmem:[#allocation174_spill] sm:$0xff] %v15536_v59  ;;  %v15548_v6 = vrot.slane %v4982_v8, %v13980_v53  ;;  %v18842_v47 = vld [vmem:[#allocation38_spill] sm:$0xff]  ;;  %v4367_v0 = vshrl.u32 %v18840_v13, 16  ;;  %v4372_v38 = vshll.u32 %v3614_v43, 16 }
 0x2c2   : > { %18837 = vst [vmem:[#allocation173_spill] sm:$0xff] %v15533_v2  ;;  %18839 = vst [vmem:[#allocation175_spill] sm:$0xff] %v15539_v7  ;;  %v4983_v49 = vcombine.low %v15522_v55, %v15533_v2  ;;  %v5813_v19 = vcombine.low %v3614_v43, %v18842_v47  ;;  %v5012_v41 = vcombine.low %v15536_v59, %v15539_v7  ;;  %v4364_v59 = vshll.u32 %v18840_v13, 16 }
 0x2c3   : > { %18841 = vst [vmem:[#allocation53_spill] sm:$0xff] %v15548_v6  ;;  %v15558_v50 = vrot.slane %v5812_v29, %v13980_v53  ;;  %v15562_v2 = vcombine.high %v18844_v11, %v18844_v11  ;;  %v15571_v18 = vrot.slane %v5814_v4, %v13980_v53  ;;  %v15576_v29 = vrot.slane %v5815_v34, %v13980_v53 }
 0x2c4   : > { %v15565_v8 = vrot.slane %v4983_v49, %v13980_v53  ;;  %v15568_v55 = vrot.slane %v5813_v19, %v13980_v53  ;;  %v5020_v7 = vrot.slane %v5012_v41, %v13980_v53  ;;  %v15585_v4 = vsel %vm14186_vm10, %v4359_v24, %v4364_v59 }
 0x2c5   : > { %18845 = vst [vmem:[#allocation38_spill] sm:$0xff] %v15558_v50  ;;  %18846 = vst [vmem:[#allocation43_spill] sm:$0xff] %v15562_v2  ;;  %v4375_v56 = vshrl.u32 %v3614_v43, 16  ;;  %v5845_v41 = vcombine.low %v15571_v18, %v15576_v29  ;;  %v15591_v34 = vsel %vm14186_vm10, %v4367_v0, %v4372_v38  ;;  %v4380_v13 = vshll.u32 %v18842_v47, 16 }
 0x2c6   : > { %18847 = vst [vmem:[#allocation56_spill] sm:$0xff] %v15565_v8  ;;  %18848 = vst [vmem:[#allocation176_spill] sm:$0xff] %v15568_v55  ;;  %v5013_v49 = vcombine.low %v15548_v6, %v15565_v8  ;;  %v5844_v19 = vcombine.low %v15558_v50, %v15568_v55  ;;  %v4383_v39 = vshrl.u32 %v18842_v47, 16  ;;  %v4388_v24 = vshll.u32 %v18844_v11, 16 }
 0x2c7   : > { %18849 = vst [vmem:[#allocation177_spill] sm:$0xff] %v15571_v18  ;;  %18850 = vst [vmem:[#allocation178_spill] sm:$0xff] %v15576_v29  ;;  %v4391_v43 = vshrl.u32 %v18844_v11, 16  ;;  %v5859_v59 = vrot.slane %v5845_v41, %v13980_v53  ;;  %v15604_v29 = vsel %vm14186_vm10, %v4375_v56, %v4380_v13  ;;  %v4396_v38 = vshll.u32 %v18843_v27, 16 }
 0x2c8   : > { %18851 = vst [vmem:[#allocation179_spill] sm:$0xff] %v15585_v4  ;;  %18852 = vst [vmem:[#allocation180_spill] sm:$0xff] %v15591_v34  ;;  %v5027_v8 = vrot.slane %v5013_v49, %v13980_v53  ;;  %v15597_v55 = vrot.slane %v5844_v19, %v13980_v53  ;;  %v4399_v0 = vshrl.u32 %v18843_v27, 16  ;;  %v15610_v49 = vsel %vm14186_vm10, %v4383_v39, %v4388_v24 }
 0x2c9   : > { %18854 = vst [vmem:[#allocation182_spill] sm:$0xff] %v15604_v29  ;;  %18855 = vst [vmem:[#allocation183_spill] sm:$0xff] %v15610_v49  ;;  %v4404_v19 = vshll.u32 %v15562_v2, 16  ;;  %v4413_v6 = vshll.u32 %v14882_v52, 16  ;;  %v15617_v41 = vsel %vm14186_vm10, %v4391_v43, %v4396_v38  ;;  %v4416_v56 = vshrl.u32 %v14882_v52, 16 }
 0x2ca   : > { %18853 = vst [vmem:[#allocation181_spill] sm:$0xff] %v15597_v55  ;;  %v5028_v50 = vcombine.low %v5020_v7, %v5027_v8  ;;  %v5860_v18 = vcombine.low %v15597_v55, %v5859_v59  ;;  %18856 = vst [vmem:[#allocation184_spill] sm:$0xff] %v15617_v41  ;;  %v4421_v13 = vshll.u32 %v14956_v1, 16  ;;  %v18858_v7 = vshrl.u32 %v14827_v20, 16 }
 0x2cb   : > { %v15624_v39 = vsel %vm14186_vm10, %v4399_v0, %v4404_v19  ;;  %v5029_v24 = vcombine.low %v15585_v4, %v15591_v34  ;;  %v5030_v43 = vcombine.low %v15604_v29, %v15610_v49  ;;  %v4424_v38 = vshrl.u32 %v14956_v1, 16 }
 0x2cc   : > { %11871 = vmatmul.mubr.msk.bf16.gmra.mxu1 %vm5240_vm11, %v5028_v50  ;;  %18857 = vst [vmem:[#allocation185_spill] sm:$0xff] %v15624_v39  ;;  %v15630_v8 = vsel %vm14186_vm10, %v18858_v7, %v4413_v6  ;;  %11929 = vmatmul.mubr.msk.bf16.gmra.mxu0 %vm5240_vm11, %v5860_v18  ;;  %v15641_v50 = vsel %vm14186_vm10, %v4416_v56, %v4421_v13 }
 0x2cd   : > { %18859 = vst [vmem:[#allocation186_spill] sm:$0xff] %v15630_v8  ;;  %11874 = vmatprep.mubr.msk.bf16.mxu1 %vm12430_vm9, %v18660_v33  ;;  %18860 = vst [vmem:[#allocation187_spill] sm:$0xff] %v15641_v50  ;;  %v5031_v59 = vcombine.low %v15617_v41, %v15624_v39  ;;  %v15647_v6 = vcombine.high %v14831_v42, %v14831_v42  ;;  %v5032_v0 = vcombine.low %v15630_v8, %v15641_v50 }
 0x2ce   : > { %v15653_v18 = vrot.slane %v5029_v24, %v13980_v53  ;;  %v15656_v19 = vrot.slane %v5030_v43, %v13980_v53  ;;  %11932 = vmatprep.mubr.msk.bf16.mxu0 %vm12430_vm9, %v18660_v33  ;;  %v10977_v56 = vcombine.high %v14827_v20, %v14882_v52  ;;  %v5862_v7 = vcombine.low %v14831_v42, %v14930_v44 }
 0x2cf   : > { %v15663_v13 = vrot.slane %v5031_v59, %v13980_v53  ;;  %v5863_v50 = vcombine.low %v15647_v6, %v14804_v31  ;;  %v5864_v24 = vcombine.low %v14824_v12, %v14853_v54  ;;  %v15672_v43 = vrot.slane %v5032_v0, %v13980_v53 }
 0x2d0   : > { %18861 = vst [vmem:[#allocation188_spill] sm:$0xff] %v15653_v18  ;;  %18862 = vst [vmem:[#allocation189_spill] sm:$0xff] %v15656_v19  ;;  %v5061_v55 = vcombine.low %v15653_v18, %v15656_v19  ;;  %v15677_v4 = vrot.slane %v10977_v56, %v13980_v53  ;;  %v15681_v59 = vcombine.high %v14882_v52, %v14882_v52  ;;  %v4437_v39 = vshll.u32 %v14831_v42, 16 }
 0x2d1   : > { %18863 = vst [vmem:[#allocation190_spill] sm:$0xff] %v15663_v13  ;;  %18864 = vst [vmem:[#allocation191_spill] sm:$0xff] %v15672_v43  ;;  %v15684_v34 = vrot.slane %v5862_v7, %v13980_v53  ;;  %v15687_v29 = vrot.slane %v5863_v50, %v13980_v53  ;;  %v15690_v49 = vrot.slane %v5864_v24, %v13980_v53  ;;  %v4445_v8 = vshll.u32 %v14930_v44, 16 }
 0x2d2   : > { %18865 = vst [vmem:[#allocation192_spill] sm:$0xff] %v15677_v4  ;;  %v15694_v0 = vcombine.high %v14824_v12, %v14824_v12  ;;  %v5062_v56 = vcombine.low %v15663_v13, %v15672_v43  ;;  %v5069_v19 = vrot.slane %v5061_v55, %v13980_v53  ;;  %v15701_v18 = vcombine.high %v14930_v44, %v14930_v44 }
 0x2d3   : > { %18866 = vst [vmem:[#allocation193_spill] sm:$0xff] %v15684_v34  ;;  %18867 = vst [vmem:[#allocation194_spill] sm:$0xff] %v15687_v29  ;;  %v4429_v7 = vshll.u32 %v15681_v59, 16  ;;  %v5893_v50 = vcombine.low %v15677_v4, %v15684_v34  ;;  %v5894_v24 = vcombine.low %v15687_v29, %v15690_v49  ;;  %v4432_v41 = vshrl.u32 %v15681_v59, 16 }
 0x2d4   : > { %18868 = vst [vmem:[#allocation195_spill] sm:$0xff] %v15690_v49  ;;  %18869 = vst [vmem:[#allocation196_spill] sm:$0xff] %v15701_v18  ;;  %v5076_v43 = vrot.slane %v5062_v56, %v13980_v53  ;;  %v4440_v13 = vshrl.u32 %v14831_v42, 16  ;;  %v4448_v4 = vshrl.u32 %v14930_v44, 16  ;;  %v4456_v49 = vshrl.u32 %v15647_v6, 16 }
 0x2d5   : > { %v15713_v55 = vsel %vm14186_vm10, %v4424_v38, %v4429_v7  ;;  %v15718_v2 = vrot.slane %v5893_v50, %v13980_v53  ;;  %v5908_v34 = vrot.slane %v5894_v24, %v13980_v53  ;;  %v15723_v29 = vsel %vm14186_vm10, %v4432_v41, %v4437_v39 }
 0x2d6   : > { %18870 = vst [vmem:[#allocation197_spill] sm:$0xff] %v15713_v55  ;;  %18872 = vst [vmem:[#allocation199_spill] sm:$0xff] %v15723_v29  ;;  %v5077_v56 = vcombine.low %v5069_v19, %v5076_v43  ;;  %v15728_v38 = vsel %vm14186_vm10, %v4440_v13, %v4445_v8  ;;  %v4453_v7 = vshll.u32 %v15647_v6, 16  ;;  %v4461_v52 = vshll.u32 %v15701_v18, 16 }
 0x2d7   : > { %18871 = vst [vmem:[#allocation198_spill] sm:$0xff] %v15718_v2  ;;  %18873 = vst [vmem:[#allocation200_spill] sm:$0xff] %v15728_v38  ;;  %v5909_v50 = vcombine.low %v15718_v2, %v5908_v34  ;;  %v4470_v24 = vshll.u32 %v14824_v12, 16  ;;  %v4473_v41 = vshrl.u32 %v14824_v12, 16  ;;  %v4478_v8 = vshll.u32 %v14853_v54, 16 }
 0x2d8   : > { %11875 = vmatmul.mubr.msk.bf16.gmra.mxu1 %vm5240_vm11, %v5077_v56  ;;  %v15739_v39 = vsel %vm14186_vm10, %v4448_v4, %v4453_v7  ;;  %v4481_v19 = vshrl.u32 %v14853_v54, 16  ;;  %v4486_v13 = vshll.u32 %v15694_v0, 16  ;;  %v15749_v34 = vsel %vm14186_vm10, %v4456_v49, %v4461_v52 }
 0x2d9   : > { %18874 = vst [vmem:[#allocation201_spill] sm:$0xff] %v15739_v39  ;;  %11933 = vmatmul.mubr.msk.bf16.gmra.mxu0 %vm5240_vm11, %v5909_v50  ;;  %11878 = vmatprep.mubr.msk.bf16.mxu1 %vm12430_vm9, %v18660_v33  ;;  %18875 = vst [vmem:[#allocation202_spill] sm:$0xff] %v15749_v34  ;;  %v18876_v43 = vshrl.u32 %v14804_v31, 16  ;;  %v5078_v54 = vcombine.low %v15713_v55, %v15723_v29  ;;  %v4489_v56 = vshrl.u32 %v15694_v0, 16  ;;  %v4494_v29 = vshll.u32 %v14807_v15, 16 }
 0x2da   : > { %v15762_v7 = vsel %vm14186_vm10, %v4473_v41, %v4478_v8  ;;  %v15766_v50 = vsel %vm14186_vm10, %v4481_v19, %v4486_v13  ;;  %v5079_v52 = vcombine.low %v15728_v38, %v15739_v39  ;;  %11936 = vmatprep.mubr.msk.bf16.mxu0 %vm12430_vm9, %v18660_v33  ;;  %v15781_v41 = vcombine.high %v14807_v15, %v14807_v15 }
 0x2db   : > { %v15755_v4 = vsel %vm14186_vm10, %v18876_v43, %v4470_v24  ;;  %18878 = vst [vmem:[#allocation204_spill] sm:$0xff] %v15762_v7  ;;  %18879 = vst [vmem:[#allocation205_spill] sm:$0xff] %v15766_v50  ;;  %v5081_v24 = vcombine.low %v15762_v7, %v15766_v50  ;;  %v15777_v43 = vrot.slane %v5078_v54, %v13980_v53  ;;  %v4505_v38 = vshrl.u32 %v14840_v30, 16 }
 0x2dc   : > { %18877 = vst [vmem:[#allocation203_spill] sm:$0xff] %v15755_v4  ;;  %v5080_v49 = vcombine.low %v15749_v34, %v15755_v4  ;;  %v5910_v8 = vcombine.low %v15694_v0, %v14807_v15  ;;  %v15786_v19 = vrot.slane %v5079_v52, %v13980_v53  ;;  %v5912_v2 = vcombine.low %v14988_v37, %v15004_v48 }
 0x2dd   : > { %18880 = vst [vmem:[#allocation206_spill] sm:$0xff] %v15777_v43  ;;  %v10978_v54 = vcombine.high %v14988_v37, %v15004_v48  ;;  %v15796_v50 = vrot.slane %v5081_v24, %v13980_v53  ;;  %v5911_v4 = vcombine.low %v14840_v30, %v15781_v41  ;;  %v15805_v52 = vcombine.high %v15004_v48, %v15004_v48 }
 0x2de   : > { %18881 = vst [vmem:[#allocation207_spill] sm:$0xff] %v15786_v19  ;;  %v15789_v13 = vrot.slane %v5080_v49, %v13980_v53  ;;  %v15801_v0 = vrot.slane %v5910_v8, %v13980_v53  ;;  %v5110_v49 = vcombine.low %v15777_v43, %v15786_v19  ;;  %v15810_v7 = vrot.slane %v5912_v2, %v13980_v53 }
 0x2df   : > { %18883 = vst [vmem:[#allocation209_spill] sm:$0xff] %v15796_v50  ;;  %v15813_v39 = vrot.slane %v10978_v54, %v13980_v53  ;;  %v15817_v24 = vcombine.high %v14840_v30, %v14840_v30  ;;  %v15822_v34 = vrot.slane %v5911_v4, %v13980_v53  ;;  %v4497_v19 = vshrl.u32 %v14807_v15, 16 }
 0x2e0   : > { %18882 = vst [vmem:[#allocation208_spill] sm:$0xff] %v15789_v13  ;;  %18884 = vst [vmem:[#allocation210_spill] sm:$0xff] %v15801_v0  ;;  %v5111_v8 = vcombine.low %v15789_v13, %v15796_v50  ;;  %v5118_v2 = vrot.slane %v5110_v49, %v13980_v53  ;;  %v4502_v43 = vshll.u32 %v14840_v30, 16  ;;  %v15836_v4 = vsel %vm14186_vm10, %v4489_v56, %v4494_v29 }
 0x2e1   : > { %18885 = vst [vmem:[#allocation211_spill] sm:$0xff] %v15810_v7  ;;  %18886 = vst [vmem:[#allocation212_spill] sm:$0xff] %v15813_v39  ;;  %v5943_v54 = vcombine.low %v15810_v7, %v15813_v39  ;;  %v5942_v50 = vcombine.low %v15801_v0, %v15822_v34  ;;  %v4510_v13 = vshll.u32 %v15781_v41, 16  ;;  %v4513_v39 = vshrl.u32 %v15781_v41, 16 }
 0x2e2   : > { %18887 = vst [vmem:[#allocation213_spill] sm:$0xff] %v15817_v24  ;;  %18888 = vst [vmem:[#allocation214_spill] sm:$0xff] %v15822_v34  ;;  %v5125_v55 = vrot.slane %v5111_v8, %v13980_v53  ;;  %v15842_v7 = vsel %vm14186_vm10, %v4497_v19, %v4502_v43  ;;  %v4518_v18 = vshll.u32 %v15817_v24, 16  ;;  %v4527_v56 = vshll.u32 %v15004_v48, 16 }
 0x2e3   : > { %18889 = vst [vmem:[#allocation215_spill] sm:$0xff] %v15836_v4  ;;  %v5957_v49 = vrot.slane %v5943_v54, %v13980_v53  ;;  %18890 = vst [vmem:[#allocation216_spill] sm:$0xff] %v15842_v7  ;;  %v15847_v15 = vrot.slane %v5942_v50, %v13980_v53  ;;  %v15851_v29 = vsel %vm14186_vm10, %v4505_v38, %v4510_v13  ;;  %v4530_v43 = vshrl.u32 %v15004_v48, 16 }
 0x2e4   : > { %v5126_v8 = vcombine.low %v5118_v2, %v5125_v55  ;;  %18892 = vst [vmem:[#allocation218_spill] sm:$0xff] %v15851_v29  ;;  %v15856_v54 = vsel %vm14186_vm10, %v4513_v39, %v4518_v18  ;;  %v4535_v19 = vshll.u32 %v15028_v22, 16  ;;  %v4538_v0 = vshrl.u32 %v15028_v22, 16 }
 0x2e5   : > { %18891 = vst [vmem:[#allocation217_spill] sm:$0xff] %v15847_v15  ;;  %18893 = vst [vmem:[#allocation219_spill] sm:$0xff] %v15856_v54  ;;  %v5958_v55 = vcombine.low %v15847_v15, %v5957_v49  ;;  %v18894_v50 = vshrl.u32 %v14988_v37, 16  ;;  %v4543_v13 = vshll.u32 %v15805_v52, 16  ;;  %v4546_v18 = vshrl.u32 %v15805_v52, 16 }
 0x2e6   : > { %11879 = vmatmul.mubr.msk.bf16.gmra.mxu1 %vm5240_vm11, %v5126_v8  ;;  %v15875_v39 = vsel %vm14186_vm10, %v4530_v43, %v4535_v19  ;;  %v4551_v2 = vshll.u32 %v15001_v14, 16  ;;  %v5127_v49 = vcombine.low %v15836_v4, %v15842_v7  ;;  %v5128_v8 = vcombine.low %v15851_v29, %v15856_v54 }
 0x2e7   : > { %v15867_v38 = vsel %vm14186_vm10, %v18894_v50, %v4527_v56  ;;  %11882 = vmatprep.mubr.msk.bf16.mxu1 %vm12430_vm9, %v18660_v33  ;;  %18896 = vst [vmem:[#allocation221_spill] sm:$0xff] %v15875_v39  ;;  %11937 = vmatmul.mubr.msk.bf16.gmra.mxu0 %vm5240_vm11, %v5958_v55  ;;  %v15885_v56 = vsel %vm14186_vm10, %v4538_v0, %v4543_v13  ;;  %v4559_v4 = vshll.u32 %v15024_v57, 16 }
 0x2e8   : > { %18895 = vst [vmem:[#allocation220_spill] sm:$0xff] %v15867_v38  ;;  %18897 = vst [vmem:[#allocation222_spill] sm:$0xff] %v15885_v56  ;;  %v5129_v50 = vcombine.low %v15867_v38, %v15875_v39  ;;  %v15891_v43 = vcombine.high %v15001_v14, %v15001_v14  ;;  %v3806_v19 = vcombine.high %v14963_v5, %v14963_v5  ;;  %11940 = vmatprep.mubr.msk.bf16.mxu0 %vm12430_vm9, %v18660_v33 }
 0x2e9   : > { %v15897_v34 = vsel %vm14186_vm10, %v4546_v18, %v4551_v2  ;;  %v15900_v55 = vrot.slane %v5127_v49, %v13980_v53  ;;  %v15903_v0 = vrot.slane %v5128_v8, %v13980_v53  ;;  %v5959_v13 = vcombine.low %v15001_v14, %v15024_v57 }
 0x2ea   : > { %18898 = vst [vmem:[#allocation223_spill] sm:$0xff] %v15897_v34  ;;  %v5130_v15 = vcombine.low %v15885_v56, %v15897_v34  ;;  %v15912_v7 = vrot.slane %v5129_v50, %v13980_v53  ;;  %v5960_v18 = vcombine.low %v15891_v43, %v14937_v21  ;;  %v5961_v2 = vcombine.low %v14963_v5, %v14983_v3 }
 0x2eb   : > { %18899 = vst [vmem:[#allocation224_spill] sm:$0xff] %v15900_v55  ;;  %18900 = vst [vmem:[#allocation225_spill] sm:$0xff] %v15903_v0  ;;  %v5159_v49 = vcombine.low %v15900_v55, %v15903_v0  ;;  %v5962_v8 = vcombine.low %v3806_v19, %v14960_v9  ;;  %v15922_v29 = vrot.slane %v5959_v13, %v13980_v53  ;;  %v4554_v55 = vshrl.u32 %v15001_v14, 16 }
 0x2ec   : > { %18901 = vst [vmem:[#allocation226_spill] sm:$0xff] %v15912_v7  ;;  %v15926_v34 = vcombine.high %v15024_v57, %v15024_v57  ;;  %v15929_v50 = vrot.slane %v5130_v15, %v13980_v53  ;;  %v15932_v54 = vrot.slane %v5960_v18, %v13980_v53  ;;  %v15935_v38 = vrot.slane %v5961_v2, %v13980_v53 }
 0x2ed   : > { %18902 = vst [vmem:[#allocation227_spill] sm:$0xff] %v15922_v29  ;;  %v5167_v0 = vrot.slane %v5159_v49, %v13980_v53  ;;  %v15940_v13 = vrot.slane %v5962_v8, %v13980_v53  ;;  %v4562_v39 = vshrl.u32 %v15024_v57, 16  ;;  %v4567_v2 = vshll.u32 %v15891_v43, 16 }
 0x2ee   : > { %18903 = vst [vmem:[#allocation228_spill] sm:$0xff] %v15926_v34  ;;  %18904 = vst [vmem:[#allocation229_spill] sm:$0xff] %v15929_v50  ;;  %v5160_v15 = vcombine.low %v15912_v7, %v15929_v50  ;;  %v5991_v18 = vcombine.low %v15922_v29, %v15932_v54  ;;  %v4570_v56 = vshrl.u32 %v15891_v43, 16  ;;  %v15954_v8 = vsel %vm14186_vm10, %v4554_v55, %v4559_v4 }
 0x2ef   : > { %18905 = vst [vmem:[#allocation230_spill] sm:$0xff] %v15932_v54  ;;  %18906 = vst [vmem:[#allocation231_spill] sm:$0xff] %v15935_v38  ;;  %v5992_v49 = vcombine.low %v15935_v38, %v15940_v13  ;;  %v4575_v24 = vshll.u32 %v15926_v34, 16  ;;  %v4584_v57 = vshll.u32 %v14963_v5, 16  ;;  %v15962_v54 = vsel %vm14186_vm10, %v4562_v39, %v4567_v2 }
 0x2f0   : > { %18907 = vst [vmem:[#allocation232_spill] sm:$0xff] %v15940_v13  ;;  %18908 = vst [vmem:[#allocation233_spill] sm:$0xff] %v15954_v8  ;;  %v5174_v50 = vrot.slane %v5160_v15, %v13980_v53  ;;  %v5999_v7 = vrot.slane %v5991_v18, %v13980_v53  ;;  %v4587_v29 = vshrl.u32 %v14963_v5, 16  ;;  %v18912_v55 = vshrl.u32 %v14937_v21, 16 }
 0x2f1   : > { %18909 = vst [vmem:[#allocation234_spill] sm:$0xff] %v15962_v54  ;;  %v15966_v13 = vrot.slane %v5992_v49, %v13980_v53  ;;  %v15970_v4 = vsel %vm14186_vm10, %v4570_v56, %v4575_v24  ;;  %v4592_v18 = vshll.u32 %v14983_v3, 16  ;;  %v4595_v39 = vshrl.u32 %v14983_v3, 16 }
 0x2f2   : > { %18911 = vst [vmem:[#allocation236_spill] sm:$0xff] %v15970_v4  ;;  %v15976_v15 = vsel %vm14186_vm10, %v18912_v55, %v4584_v57  ;;  %v5175_v38 = vcombine.low %v5167_v0, %v5174_v50  ;;  %v4600_v2 = vshll.u32 %v3806_v19, 16  ;;  %v4603_v34 = vshrl.u32 %v3806_v19, 16 }
 0x2f3   : > { %18910 = vst [vmem:[#allocation235_spill] sm:$0xff] %v15966_v13  ;;  %18913 = vst [vmem:[#allocation237_spill] sm:$0xff] %v15976_v15  ;;  %v6007_v49 = vcombine.low %v5999_v7, %v15966_v13  ;;  %v15983_v5 = vsel %vm14186_vm10, %v4587_v29, %v4592_v18  ;;  %v4608_v24 = vshll.u32 %v14960_v9, 16  ;;  %v4611_v56 = vshrl.u32 %v14960_v9, 16 }
 0x2f4   : > { %18914 = vst [vmem:[#allocation238_spill] sm:$0xff] %v15983_v5  ;;  %11883 = vmatmul.mubr.msk.bf16.gmra.mxu1 %vm5240_vm11, %v5175_v38  ;;  %v15990_v57 = vsel %vm14186_vm10, %v4595_v39, %v4600_v2  ;;  %v4616_v3 = vshll.u32 %v14967_v16, 16  ;;  %v5176_v19 = vcombine.low %v15954_v8, %v15962_v54  ;;  %v5177_v7 = vcombine.low %v15970_v4, %v15976_v15 }
 0x2f5   : > { %18915 = vst [vmem:[#allocation239_spill] sm:$0xff] %v15990_v57  ;;  %11941 = vmatmul.mubr.msk.bf16.gmra.mxu0 %vm5240_vm11, %v6007_v49  ;;  %11886 = vmatprep.mubr.msk.bf16.mxu1 %vm12430_vm9, %v18660_v33  ;;  %v16002_v29 = vsel %vm14186_vm10, %v4603_v34, %v4608_v24  ;;  %v5178_v38 = vcombine.low %v15983_v5, %v15990_v57  ;;  %v4619_v50 = vshrl.u32 %v14967_v16, 16  ;;  %v18925_v57 = vld [vmem:[#allocation26_spill] sm:$0xff] }
 0x2f6   : > { %18916 = vst [vmem:[#allocation240_spill] sm:$0xff] %v16002_v29  ;;  %v16008_v0 = vcombine.high %v14960_v9, %v14960_v9  ;;  %v16013_v55 = vsel %vm14186_vm10, %v4611_v56, %v4616_v3  ;;  %v16016_v18 = vrot.slane %v5176_v19, %v13980_v53  ;;  %v16019_v39 = vrot.slane %v5177_v7, %v13980_v53  ;;  %v11021_v3 = vld [vmem:[%s18005_s4 + $0xc] sm:$0xf]  ;;  %v18922_v19 = vld [vmem:[#allocation12_spill] sm:$0xff] }
 0x2f7   : > { %18917 = vst [vmem:[#allocation241_spill] sm:$0xff] %v16013_v55  ;;  %11944 = vmatprep.mubr.msk.bf16.mxu0 %vm12430_vm9, %v18660_v33  ;;  %v16025_v34 = vcombine.high %v14967_v16, %v14967_v16  ;;  %v5179_v2 = vcombine.low %v16002_v29, %v16013_v55  ;;  %v16030_v49 = vrot.slane %v5178_v38, %v13980_v53  ;;  %v18923_v7 = vld [vmem:[#allocation7_spill] sm:$0xff]  ;;  %v18924_v38 = vld [vmem:[#allocation16_spill] sm:$0xff] }
 0x2f8   : > { %18918 = vst [vmem:[#allocation242_spill] sm:$0xff] %v16016_v18  ;;  %18919 = vst [vmem:[#allocation243_spill] sm:$0xff] %v16019_v39  ;;  %v6008_v24 = vcombine.low %v14967_v16, %v16008_v0  ;;  %v4624_v56 = vshll.u32 %v16008_v0, 16  ;;  %v6253_v13 = vcombine.low %v18923_v7, %v18922_v19  ;;  %v5208_v15 = vcombine.low %v16016_v18, %v16019_v39  ;;  %v18930_v16 = vld [vmem:[#allocation19_spill] sm:$0xff] }
 0x2f9   : > { %18920 = vst [vmem:[#allocation244_spill] sm:$0xff] %v16025_v34  ;;  %18921 = vst [vmem:[#allocation245_spill] sm:$0xff] %v16030_v49  ;;  %v4632_v5 = vshll.u32 %v16025_v34, 16  ;;  %v18926_v29 = vcombine.low %v18924_v38, %v18925_v57  ;;  %v16048_v4 = vrot.slane %v5179_v2, %v13980_v53  ;;  %v18931_v39 = vcombine.low %v18930_v16, %v14303_v46  ;;  %v18932_v2 = vld [vmem:[#allocation6_spill] sm:$0xff] }
 0x2fa   : > { %v16051_v8 = vrot.slane %v6008_v24, %v13980_v53  ;;  %v16055_v9 = vsel %vm14186_vm10, %v4619_v50, %v4624_v56  ;;  %v4627_v34 = vshrl.u32 %v16008_v0, 16  ;;  %v18933_v24 = vld [vmem:[#allocation13_spill] sm:$0xff]  ;;  %v5216_v56 = vrot.slane %v5208_v15, %v13980_v53  ;;  %v18935_v16 = vld [vmem:[#allocation2_spill] sm:$0xff] }
 0x2fb   : > { %v6220_v54 = vrot.slane %v18926_v29, %v13980_v53  ;;  %18927 = vst [vmem:[#allocation12_spill] sm:$0xff] %v16048_v4  ;;  %18929 = vst [vmem:[#allocation16_spill] sm:$0xff] %v16055_v9  ;;  %v7075_v18 = vrot.slane %v18931_v39, %v13980_v53  ;;  %v7447_v29 = vsel %vm5280_vm8, %v11021_v3, 0  ;;  %v18934_v38 = vcombine.low %v18932_v2, %v18933_v24  ;;  %v18936_v39 = vld [vmem:[#allocation10_spill] sm:$0xff] }
 0x2fc   : > { %18928 = vst [vmem:[#allocation7_spill] sm:$0xff] %v16051_v8  ;;  %v5209_v50 = vcombine.low %v16030_v49, %v16048_v4  ;;  %v6022_v46 = vrot.slane %v16051_v8, %v13980_v53  ;;  %12003 = vmatpush3.bf16.msra.mxu0 %v7447_v29  ;;  %v18937_v57 = vcombine.low %v18935_v16, %v18936_v39  ;;  %v18939_v24 = vld [vmem:[#allocation14_spill] sm:$0xff]  ;;  %v16089_v49 = vpop.f32.mrf.mxu0 }
 0x2fd   : > { %v6213_v21 = vrot.slane %v18934_v38, %v13980_v53  ;;  %v16080_v3 = vsel %vm14186_vm10, %v4627_v34, %v4632_v5  ;;  %v16083_v2 = vrot.slane %v6253_v13, %v13980_v53  ;;  %v18940_v38 = vld [vmem:[#allocation22_spill] sm:$0xff]  ;;  %12110 = vmatprep.subr.bf16.mxu0 %v18660_v33  ;;  %v6255_v34 = vcombine.low %v14360_v35, %v14379_v58 }
 0x2fe   : > { %v6227_v55 = vrot.slane %v18937_v57, %v13980_v53  ;;  %18938 = vst [vmem:[#allocation26_spill] sm:$0xff] %v16080_v3  ;;  %v18941_v15 = vcombine.low %v18939_v24, %v18940_v38  ;;  %v5223_v29 = vrot.slane %v5209_v50, %v13980_v53  ;;  %11945 = vmatmul.mubr.msk.bf16.gmra.mxu0 %vm5240_vm11, %v6022_v46  ;;  %v18942_v16 = vld [vmem:[#allocation34_spill] sm:$0xff]  ;;  %v11898_v38 = vpop.f32.mrf.mxu0 }
 0x2ff   : > { %v6235_v57 = vcombine.low %v6213_v21, %v6220_v54  ;;  %12004 = vmatprep.mubr.msk.bf16.mxu0 %vm12430_vm9, %v18660_v33  ;;  %v7077_v5 = vcombine.low %v16083_v2, %v7075_v18  ;;  %v18943_v39 = vld [vmem:[#allocation30_spill] sm:$0xff]  ;;  %v5225_v50 = vcombine.low %v16055_v9, %v16080_v3  ;;  %v18944_v21 = vld [vmem:[#allocation59_spill] sm:$0xff] }
 0x300   : > { %v6234_v4 = vrot.slane %v18941_v15, %v13980_v53  ;;  %v6301_v24 = vcombine.low %v18943_v39, %v18942_v16  ;;  %v5224_v15 = vcombine.low %v5216_v56, %v5223_v29  ;;  %v18945_v54 = vld [vmem:[#allocation15_spill] sm:$0xff]  ;;  %v18949_v39 = vld [vmem:[#allocation32_spill] sm:$0xff]  ;;  %v16116_v38 = vpop.f32.mrf.mxu0  ;;  %v18962_v16 = vld [vmem:[#allocation41_spill] sm:$0xff] }
 0x301   : > { %v16104_v46 = vrot.slane %v6235_v57, %v13980_v53  ;;  %v6302_v8 = vcombine.low %v18945_v54, %v18944_v21  ;;  %v18946_v18 = vld [vmem:[#allocation31_spill] sm:$0xff]  ;;  %v7091_v35 = vrot.slane %v7077_v5, %v13980_v53  ;;  %v16120_v57 = vrot.slane %v6255_v34, %v13980_v53 }
 0x302   : > { %v6236_v13 = vcombine.low %v6227_v55, %v6234_v4  ;;  %v18947_v4 = vld [vmem:[#allocation8_spill] sm:$0xff]  ;;  %v18950_v56 = vld [vmem:[#allocation67_spill] sm:$0xff]  ;;  %11887 = vmatmul.mubr.msk.bf16.gmra.mxu1 %vm5240_vm11, %v5224_v15  ;;  %v16123_v21 = vrot.slane %v6301_v24, %v13980_v53  ;;  %v11899_v34 = vpop.f32.mrf.mxu0  ;;  %v16137_v9 = vrot.slane %v5225_v50, %v13980_v53 }
 0x303   : > { %v18948_v55 = vcombine.low %v18946_v18, %v18947_v4  ;;  %v6303_v29 = vcombine.low %v18950_v56, %v18949_v39  ;;  %v16126_v18 = vrot.slane %v6302_v8, %v13980_v53  ;;  %v18951_v5 = vld [vmem:[#allocation23_spill] sm:$0xff]  ;;  %11890 = vmatprep.mubr.msk.bf16.mxu1 %vm12430_vm9, %v18660_v33  ;;  %v18957_v34 = vld [vmem:[#allocation33_spill] sm:$0xff] }
 0x304   : > { %v6250_v58 = vrot.slane %v6236_v13, %v13980_v53  ;;  %18952 = vst [vmem:[#allocation19_spill] sm:$0xff] %v16137_v9  ;;  %v7101_v8 = vcombine.low %v16120_v57, %v16123_v21  ;;  %v10995_v50 = vcombine.high %v18951_v5, %v18949_v39 }
 0x305   : > { %v7084_v28 = vrot.slane %v18948_v55, %v13980_v53  ;;  %v7093_v55 = vcombine.low %v18951_v5, %v18949_v39  ;;  %v16134_v15 = vrot.slane %v6303_v29, %v13980_v53  ;;  %v10994_v5 = vcombine.high %v18923_v7, %v18922_v19  ;;  %v18959_v7 = vld [vmem:[#allocation20_spill] sm:$0xff] }
 0x306   : > { %v6251_v56 = vcombine.low %v16104_v46, %v6250_v58  ;;  %v18954_v58 = vld [vmem:[#allocation27_spill] sm:$0xff] }
 0x307   : > { %v7092_v13 = vcombine.low %v7084_v28, %v7091_v35  ;;  %v7100_v24 = vrot.slane %v7093_v55, %v13980_v53  ;;  %v9977_v3 = vcombine.low %v16126_v18, %v16134_v15  ;;  %v6352_v28 = vcombine.low %v14444_v25, %v14466_v10  ;;  %v18956_v10 = vld [vmem:[#allocation28_spill] sm:$0xff] }
 0x308   : > { %v16149_v35 = vrot.slane %v7101_v8, %v13980_v53  ;;  %v6350_v29 = vcombine.low %v18954_v58, %v14346_v51  ;;  %v16174_v25 = vrot.slane %v10995_v50, %v13980_v53  ;;  %v11042_v50 = vld [vmem:[%s18005_s4 + $0x10] sm:$0xf] }
 0x309   : > { %12005 = vmatmul.mubr.msk.bf16.vlgmr.msra.gmra.mxu0 %vm5240_vm11, %v7092_v13  ;;  %v7102_v46 = vcombine.low %v16126_v18, %v7100_v24  ;;  %v16158_v55 = vrot.slane %v9977_v3, %v13980_v53  ;;  %v7118_v13 = vcombine.low %v18957_v34, %v18956_v10  ;;  %v5239_v24 = vrot.slane %v16137_v9, %v13980_v53  ;;  %v18961_v9 = vld [vmem:[#allocation102_spill] sm:$0xff] }
 0x30a   : > { %18953 = vst [vmem:[#allocation6_spill] sm:$0xff] %v16149_v35  ;;  %12008 = vmatprep.mubr.msk.bf16.mxu0 %vm12430_vm9, %v18660_v33  ;;  %v16165_v8 = vrot.slane %v6352_v28, %v13980_v53  ;;  %v16177_v10 = vrot.slane %v6350_v29, %v13980_v53  ;;  %v16182_v28 = vpop.f32.mrf.mxu1  ;;  %v6276_v29 = vrot.slane %v10994_v5, %v13980_v53 }
 0x30b   : > { %18955 = vst [vmem:[#allocation13_spill] sm:$0xff] %v16158_v55  ;;  %11891 = vmatmul.mubr.msk.bf16.gmra.mxu1 %vm5240_vm11, %v5239_v24  ;;  %v7116_v3 = vrot.slane %v7102_v46, %v13980_v53  ;;  %v7125_v34 = vrot.slane %v7118_v13, %v13980_v53  ;;  %v18960_v24 = vld [vmem:[#allocation93_spill] sm:$0xff] }
 0x30c   : > { %18958 = vst [vmem:[#allocation2_spill] sm:$0xff] %v16165_v8  ;;  %11950 = vmatprep.mubr.msk.bf16.mxu1 %vm12430_vm9, %v18660_v33  ;;  %v6353_v46 = vcombine.low %v18960_v24, %v18959_v7  ;;  %v11844_v55 = vpop.f32.mrf.mxu1  ;;  %v7126_v13 = vcombine.low %v16174_v25, %v16177_v10  ;;  %v7143_v24 = vcombine.low %v18750_v45, %v14406_v62 }
 0x30d   : > { %v7117_v39 = vcombine.low %v16149_v35, %v7116_v3  ;;  %v7127_v19 = vcombine.low %v7125_v34, %v16165_v8  ;;  %v6399_v3 = vcombine.low %v18962_v16, %v18961_v9  ;;  %v10997_v34 = vcombine.high %v18750_v45, %v14406_v62  ;;  %v11056_v9 = vld [vmem:[%s18005_s4 + $0x14] sm:$0xf]  ;;  %v16216_v16 = vpop.f32.mrf.mxu0 }
 0x30e   : > { %v16203_v35 = vpop.f32.mrf.mxu1  ;;  %v8313_v55 = vsel %vm5280_vm8, %v11042_v50, 0  ;;  %v16209_v7 = vrot.slane %v6353_v46, %v13980_v53  ;;  %v6284_v45 = vcombine.low %v18947_v4, %v16083_v2  ;;  %v16220_v50 = vrot.slane %v7126_v13, %v13980_v53 }
 0x30f   : > { %v7141_v5 = vrot.slane %v7127_v19, %v13980_v53  ;;  %v16226_v19 = vrot.slane %v10997_v34, %v13980_v53  ;;  %v7150_v46 = vrot.slane %v7143_v24, %v13980_v53  ;;  %v11902_v2 = vpop.f32.mrf.mxu0  ;;  %v6450_v13 = vcombine.low %v15203_v17, %v14494_v63  ;;  %v18970_v63 = vld [vmem:[#allocation18_spill] sm:$0xff] }
 0x310   : > { %v11845_v54 = vpop.f32.mrf.mxu1  ;;  %18963 = vst [vmem:[#allocation10_spill] sm:$0xff] %v16220_v50  ;;  %v6292_v34 = vrot.slane %v6284_v45, %v13980_v53  ;;  %v6333_v17 = vcombine.low %v16123_v21, %v16126_v18  ;;  %v10996_v21 = vcombine.high %v18954_v58, %v14346_v51 }
 0x311   : > { %12009 = vmatmul.mubr.msk.bf16.gmra.mxu0 %vm5240_vm11, %v7117_v39  ;;  %v6285_v39 = vcombine.low %v6276_v29, %v16120_v57  ;;  %v16223_v57 = vrot.slane %v6399_v3, %v13980_v53  ;;  %18964 = vst [vmem:[#allocation14_spill] sm:$0xff] %v16226_v19  ;;  %v8777_v54 = vsel %vm5280_vm8, %v11056_v9, 0  ;;  %v16238_v3 = vpop.f32.mrf.mxu0  ;;  %v7152_v24 = vcombine.low %v7150_v46, %v16226_v19  ;;  %v18967_v9 = vld [vmem:[#allocation35_spill] sm:$0xff] }
 0x312   : > { %12012 = vmatprep.mubr.msk.bf16.mxu0 %vm12430_vm9, %v18660_v33  ;;  %12111 = vmatpush3.bf16.msra.mxu0 %v8777_v54  ;;  %v6334_v54 = vcombine.low %v16134_v15, %v16174_v25  ;;  %v18969_v46 = vld [vmem:[#allocation39_spill] sm:$0xff] }
 0x313   : > { %11951 = vmatmul.mubr.msk.bf16.vlgmr.msra.gmra.mxu1 %vm5240_vm11, %v6251_v56  ;;  %v6299_v4 = vrot.slane %v6285_v39, %v13980_v53  ;;  %v7142_v56 = vcombine.low %v16220_v50, %v7141_v5  ;;  %v7151_v29 = vcombine.low %v16209_v7, %v16223_v57  ;;  %v18966_v5 = vld [vmem:[#allocation44_spill] sm:$0xff]  ;;  %v11903_v45 = vpop.f32.mrf.mxu0  ;;  %12218 = vmatprep.subr.bf16.mxu0 %v18660_v33 }
 0x314   : > { %12057 = vmatpush3.bf16.msra.mxu1 %v8313_v55  ;;  %11954 = vmatprep.mubr.msk.bf16.mxu1 %vm12430_vm9, %v18660_v33  ;;  %v18965_v55 = vld [vmem:[#allocation29_spill] sm:$0xff]  ;;  %v7168_v2 = vcombine.low %v18967_v9, %v18966_v5  ;;  %v7166_v25 = vrot.slane %v7152_v24, %v13980_v53  ;;  %v18975_v9 = vld [vmem:[#allocation42_spill] sm:$0xff] }
 0x315   : > { %12164 = vmatprep.subr.bf16.mxu1 %v18660_v33  ;;  %v6449_v39 = vcombine.low %v18965_v55, %v14537_v60  ;;  %v6300_v50 = vcombine.low %v6292_v34, %v6299_v4  ;;  %v6402_v60 = vcombine.low %v18970_v63, %v18969_v46  ;;  %v16260_v55 = vrot.slane %v6450_v13, %v13980_v53  ;;  %v18973_v34 = vld [vmem:[#allocation47_spill] sm:$0xff]  ;;  %v18976_v45 = vld [vmem:[#allocation109_spill] sm:$0xff] }
 0x316   : > { %v7175_v15 = vrot.slane %v7168_v2, %v13980_v53  ;;  %v6341_v4 = vrot.slane %v6333_v17, %v13980_v53  ;;  %v10999_v2 = vcombine.high %v14450_v36, %v18975_v9  ;;  %v6499_v17 = vcombine.low %v18790_v40, %v18798_v26 }
 0x317   : > { %v16268_v18 = vrot.slane %v6449_v39, %v13980_v53  ;;  %v16277_v51 = vrot.slane %v6402_v60, %v13980_v53  ;;  %v16284_v39 = vrot.slane %v10996_v21, %v13980_v53  ;;  %v6400_v60 = vcombine.low %v18976_v45, %v14406_v62  ;;  %v18981_v45 = vld [vmem:[#allocation157_spill] sm:$0xff] }
 0x318   : > { %v16314_v62 = vrot.slane %v6499_v17, %v13980_v53  ;;  %v18980_v17 = vld [vmem:[#allocation63_spill] sm:$0xff] }
 0x319   : > { %12013 = vmatmul.mubr.msk.bf16.gmra.mxu0 %vm5240_vm11, %v7142_v56  ;;  %v16255_v56 = vrot.slane %v7151_v29, %v13980_v53  ;;  %v6348_v29 = vrot.slane %v6334_v54, %v13980_v53  ;;  %18971 = vst [vmem:[#allocation30_spill] sm:$0xff] %v16277_v51  ;;  %v7177_v58 = vcombine.low %v16268_v18, %v16260_v55  ;;  %18974 = vst [vmem:[#allocation59_spill] sm:$0xff] %v16284_v39 }
 0x31a   : > { %12016 = vmatprep.mubr.msk.bf16.mxu0 %vm12430_vm9, %v18660_v33  ;;  %v7176_v5 = vcombine.low %v16277_v51, %v7175_v15  ;;  %v7193_v54 = vcombine.low %v14450_v36, %v18975_v9 }
 0x31b   : > { %18968 = vst [vmem:[#allocation22_spill] sm:$0xff] %v16255_v56  ;;  %11955 = vmatmul.mubr.msk.bf16.gmra.mxu1 %vm5240_vm11, %v6300_v50  ;;  %v7167_v13 = vcombine.low %v16255_v56, %v7166_v25  ;;  %v18972_v50 = vld [vmem:[#allocation37_spill] sm:$0xff]  ;;  %v6349_v21 = vcombine.low %v6341_v4, %v6348_v29  ;;  %v6383_v25 = vcombine.low %v16165_v8, %v16209_v7 }
 0x31c   : > { %11958 = vmatprep.mubr.msk.bf16.mxu1 %vm12430_vm9, %v18660_v33  ;;  %v6451_v24 = vcombine.low %v18973_v34, %v18972_v50  ;;  %v16301_v15 = vrot.slane %v7177_v58, %v13980_v53  ;;  %v6382_v50 = vcombine.low %v16177_v10, %v16284_v39  ;;  %v7184_v36 = vrot.slane %v7176_v5, %v13980_v53 }
 0x31d   : > { %v16311_v56 = vrot.slane %v10999_v2, %v13980_v53  ;;  %v7200_v7 = vrot.slane %v7193_v54, %v13980_v53  ;;  %v16320_v4 = vrot.slane %v6400_v60, %v13980_v53  ;;  %v6397_v10 = vrot.slane %v6383_v25, %v13980_v53  ;;  %v18982_v60 = vld [vmem:[#allocation66_spill] sm:$0xff] }
 0x31e   : > { %18977 = vst [vmem:[#allocation31_spill] sm:$0xff] %v16301_v15  ;;  %v7192_v29 = vcombine.low %v7184_v36, %v16301_v15  ;;  %v6390_v5 = vrot.slane %v6382_v50, %v13980_v53  ;;  %v6546_v54 = vcombine.low %v18980_v17, %v14735_v32  ;;  %v18984_v15 = vld [vmem:[#allocation11_spill] sm:$0xff] }
 0x31f   : > { %18979 = vst [vmem:[#allocation32_spill] sm:$0xff] %v16320_v4  ;;  %v7202_v2 = vcombine.low %v16311_v56, %v16314_v62  ;;  %v6431_v25 = vcombine.low %v16223_v57, %v16320_v4 }
 0x320   : > { %v6398_v50 = vcombine.low %v6390_v5, %v6397_v10  ;;  %v16354_v4 = vrot.slane %v6546_v54, %v13980_v53  ;;  %v7244_v54 = vcombine.low %v18843_v27, %v14827_v20  ;;  %v18990_v27 = vld [vmem:[#allocation45_spill] sm:$0xff] }
 0x321   : > { %12017 = vmatmul.mubr.msk.bf16.gmra.mxu0 %vm5240_vm11, %v7167_v13  ;;  %v16304_v13 = vrot.slane %v6451_v24, %v13980_v53  ;;  %v6547_v24 = vcombine.low %v15443_v23, %v14680_v61  ;;  %v16339_v23 = vpop.f32.mrf.mxu1  ;;  %v16351_v57 = vrot.slane %v7202_v2, %v13980_v53 }
 0x322   : > { %12020 = vmatprep.mubr.msk.bf16.mxu0 %vm12430_vm9, %v18660_v33  ;;  %18986 = vst [vmem:[#allocation23_spill] sm:$0xff] %v16354_v4 }
 0x323   : > { %18978 = vst [vmem:[#allocation8_spill] sm:$0xff] %v16304_v13  ;;  %11959 = vmatmul.mubr.msk.bf16.gmra.mxu1 %vm5240_vm11, %v6349_v21  ;;  %v7201_v58 = vcombine.low %v16304_v13, %v7200_v7  ;;  %v6548_v21 = vcombine.low %v18982_v60, %v18981_v45  ;;  %v16343_v7 = vrot.slane %v6547_v24, %v13980_v53  ;;  %v11848_v39 = vpop.f32.mrf.mxu1  ;;  %18985 = vst [vmem:[#allocation67_spill] sm:$0xff] %v16351_v57 }
 0x324   : > { %11962 = vmatprep.mubr.msk.bf16.mxu1 %vm12430_vm9, %v18660_v33  ;;  %v6432_v45 = vcombine.low %v16226_v19, %v16277_v51  ;;  %v7258_v19 = vrot.slane %v7244_v54, %v13980_v53 }
 0x325   : > { %v7209_v36 = vrot.slane %v7201_v58, %v13980_v53  ;;  %v16357_v10 = vrot.slane %v6548_v21, %v13980_v53  ;;  %v10998_v58 = vcombine.high %v18970_v63, %v18969_v46  ;;  %v5329_v39 = vpop.f32.mrf.mxu1  ;;  %v18987_v46 = vld [vmem:[#allocation40_spill] sm:$0xff] }
 0x326   : > { %v16370_v21 = vpop.f32.mrf.mxu0 }
 0x327   : > { %v7217_v24 = vcombine.low %v7209_v36, %v16351_v57  ;;  %v7227_v2 = vcombine.low %v16343_v7, %v16357_v10  ;;  %v16382_v20 = vrot.slane %v10998_v58, %v13980_v53  ;;  %v11000_v58 = vcombine.high %v18790_v40, %v18798_v26 }
 0x328   : > { %v11906_v51 = vpop.f32.mrf.mxu0 }
 0x329   : > { %12021 = vmatmul.mubr.msk.bf16.gmra.mxu0 %vm5240_vm11, %v7192_v29  ;;  %v18983_v29 = vld [vmem:[#allocation54_spill] sm:$0xff]  ;;  %18989 = vst [vmem:[#allocation27_spill] sm:$0xff] %v16382_v20  ;;  %v6480_v51 = vcombine.low %v16382_v20, %v16268_v18 }
 0x32a   : > { %12024 = vmatprep.mubr.msk.bf16.mxu0 %vm12430_vm9, %v18660_v33  ;;  %v7218_v32 = vcombine.low %v18984_v15, %v18983_v29  ;;  %v6439_v15 = vrot.slane %v6431_v25, %v13980_v53  ;;  %v11849_v29 = vpop.f32.mrf.mxu1  ;;  %v18988_v25 = vld [vmem:[#allocation48_spill] sm:$0xff] }
 0x32b   : > { %11963 = vmatmul.mubr.msk.bf16.gmra.mxu1 %vm5240_vm11, %v6398_v50  ;;  %v6446_v50 = vrot.slane %v6432_v45, %v13980_v53  ;;  %v11001_v36 = vcombine.high %v18988_v25, %v18987_v46  ;;  %v7243_v57 = vcombine.low %v18988_v25, %v18987_v46  ;;  %v6497_v45 = vcombine.low %v18990_v27, %v18975_v9  ;;  %v16394_v25 = vpop.f32.mrf.mxu0 }
 0x32c   : > { %11966 = vmatprep.mubr.msk.bf16.mxu1 %vm12430_vm9, %v18660_v33  ;;  %v7225_v5 = vrot.slane %v7218_v32, %v13980_v53  ;;  %v6596_v32 = vcombine.low %v18842_v47, %v18844_v11  ;;  %v16391_v29 = vrot.slane %v7227_v2, %v13980_v53 }
 0x32d   : > { %v7251_v2 = vrot.slane %v7243_v57, %v13980_v53  ;;  %v11907_v54 = vpop.f32.mrf.mxu0  ;;  %v16412_v18 = vrot.slane %v6497_v45, %v13980_v53  ;;  %v16424_v57 = vadd.f32 %v16089_v49, %v16182_v28  ;;  %v18996_v45 = vld [vmem:[#allocation80_spill] sm:$0xff]  ;;  %v18997_v49 = vld [vmem:[#allocation163_spill] sm:$0xff] }
 0x32e   : > { %v7226_v63 = vcombine.low %v7225_v5, %v16354_v4  ;;  %v6481_v5 = vcombine.low %v16260_v55, %v16304_v13  ;;  %18991 = vst [vmem:[#allocation28_spill] sm:$0xff] %v16391_v29  ;;  %v16406_v55 = vrot.slane %v6596_v32, %v13980_v53  ;;  %v6488_v32 = vrot.slane %v6480_v51, %v13980_v53 }
 0x32f   : > { %18994 = vst [vmem:[#allocation102_spill] sm:$0xff] %v16412_v18  ;;  %v6549_v28 = vcombine.low %v18997_v49, %v18987_v46  ;;  %v16455_v46 = vadd.f32 %v16216_v16, %v16339_v23  ;;  %v19005_v23 = vld [vmem:[#allocation49_spill] sm:$0xff]  ;;  %v6695_v49 = vcombine.low %v15004_v48, %v15028_v22  ;;  %v6578_v22 = vcombine.low %v16354_v4, %v16343_v7 }
 0x330   : > { %v7234_v9 = vrot.slane %v7226_v63, %v13980_v53  ;;  %18993 = vst [vmem:[#allocation93_spill] sm:$0xff] %v16406_v55  ;;  %v6495_v26 = vrot.slane %v6481_v5, %v13980_v53  ;;  %v6644_v63 = vcombine.low %v15681_v59, %v14831_v42  ;;  %v6529_v59 = vcombine.low %v16412_v18, %v16311_v56 }
 0x331   : > { %12025 = vmatmul.mubr.msk.bf16.gmra.mxu0 %vm5240_vm11, %v7217_v24  ;;  %v6447_v24 = vcombine.low %v6439_v15, %v6446_v50  ;;  %v16403_v15 = vrot.slane %v11001_v36, %v13980_v53  ;;  %v7260_v50 = vcombine.low %v16406_v55, %v7258_v19  ;;  %v16420_v36 = vrot.slane %v11000_v58, %v13980_v53 }
 0x332   : > { %12028 = vmatprep.mubr.msk.bf16.mxu0 %vm12430_vm9, %v18660_v33  ;;  %v7242_v40 = vcombine.low %v7234_v9, %v16391_v29  ;;  %v6645_v19 = vcombine.low %v14930_v44, %v15647_v6  ;;  %v6496_v5 = vcombine.low %v6488_v32, %v6495_v26  ;;  %v16441_v58 = vrot.slane %v6644_v63, %v13980_v53  ;;  %v18998_v6 = vld [vmem:[#allocation92_spill] sm:$0xff]  ;;  %v19061_v29 = vld [vmem:[#allocation9_spill] sm:$0xff] }
 0x333   : > { %11967 = vmatmul.mubr.msk.bf16.gmra.mxu1 %vm5240_vm11, %v6447_v24  ;;  %18992 = vst [vmem:[#allocation33_spill] sm:$0xff] %v16403_v15  ;;  %18995 = vst [vmem:[#allocation44_spill] sm:$0xff] %v16420_v36  ;;  %v7259_v27 = vcombine.low %v7251_v2, %v16403_v15  ;;  %v6598_v24 = vcombine.low %v18996_v45, %v14956_v1  ;;  %v7274_v51 = vrot.slane %v7260_v50, %v13980_v53  ;;  %v19007_v32 = vld [vmem:[#allocation52_spill] sm:$0xff] }
 0x334   : > { %11970 = vmatprep.mubr.msk.bf16.mxu1 %vm12430_vm9, %v18660_v33  ;;  %v7276_v1 = vcombine.low %v14804_v31, %v14824_v12  ;;  %v7017_v9 = vrot.slane %v18998_v6, %v13980_v53  ;;  %v6530_v56 = vcombine.low %v16314_v62, %v16420_v36  ;;  %v16451_v2 = vadd.f32 %v16116_v38, %v16203_v35  ;;  %v19004_v35 = vld [vmem:[#allocation55_spill] sm:$0xff] }
 0x335   : > { %19000 = vst [vmem:[#allocation39_spill] sm:$0xff] %v16455_v46  ;;  %v7267_v54 = vrot.slane %v7259_v27, %v13980_v53  ;;  %v16460_v26 = vrot.slane %v6598_v24, %v13980_v53  ;;  %v16466_v62 = vadd.f32 %v16238_v3, %v5329_v39  ;;  %v6537_v38 = vrot.slane %v6529_v59, %v13980_v53  ;;  %v19008_v27 = vld [vmem:[#allocation57_spill] sm:$0xff]  ;;  %v19115_v46 = vld [vmem:[#allocation138_spill] sm:$0xff] }
 0x336   : > { %18999 = vst [vmem:[#allocation35_spill] sm:$0xff] %v16451_v2  ;;  %v16472_v16 = vrot.slane %v6549_v28, %v13980_v53  ;;  %v19006_v50 = vcombine.low %v19004_v35, %v19005_v23  ;;  %v19009_v24 = vcombine.low %v19007_v32, %v19008_v27  ;;  %v11003_v28 = vcombine.high %v14804_v31, %v14824_v12  ;;  %v19013_v27 = vld [vmem:[#allocation86_spill] sm:$0xff]  ;;  %v19020_v35 = vld [vmem:[#allocation196_spill] sm:$0xff] }
 0x337   : > { %19002 = vst [vmem:[#allocation37_spill] sm:$0xff] %v16466_v62  ;;  %v7275_v39 = vcombine.low %v7267_v54, %v7274_v51  ;;  %v7284_v59 = vcombine.low %v16460_v26, %v16441_v58  ;;  %v6544_v23 = vrot.slane %v6530_v56, %v13980_v53  ;;  %v7025_v54 = vcombine.high %v7017_v9, %v7017_v9 }
 0x338   : > { %19003 = vst [vmem:[#allocation47_spill] sm:$0xff] %v16472_v16  ;;  %v16478_v63 = vrot.slane %v19006_v50, %v13980_v53  ;;  %v16484_v3 = vrot.slane %v19009_v24, %v13980_v53  ;;  %v6579_v31 = vcombine.low %v16357_v10, %v16472_v16  ;;  %v16512_v32 = vrot.slane %v6695_v49, %v13980_v53 }
 0x339   : > { %12029 = vmatmul.mubr.msk.bf16.gmra.mxu0 %vm5240_vm11, %v7242_v40  ;;  %v16463_v40 = vrot.slane %v6645_v19, %v13980_v53  ;;  %v7283_v19 = vrot.slane %v7276_v1, %v13980_v53  ;;  %v7301_v1 = vcombine.low %v15781_v41, %v14988_v37  ;;  %v6545_v50 = vcombine.low %v6537_v38, %v6544_v23 }
 0x33a   : > { %12032 = vmatprep.mubr.msk.bf16.mxu0 %vm12430_vm9, %v18660_v33  ;;  %v16509_v56 = vrot.slane %v7284_v59, %v13980_v53  ;;  %19012 = vst [vmem:[#allocation109_spill] sm:$0xff] %v16512_v32  ;;  %v11020_v37 = vpack.c.bf16 %v19013_v27, %v19013_v27  ;;  %v11002_v41 = vcombine.high %v18842_v47, %v18844_v11  ;;  %v19017_v27 = vld [vmem:[#allocation89_spill] sm:$0xff] }
 0x33b   : > { %11971 = vmatmul.mubr.msk.bf16.gmra.mxu1 %vm5240_vm11, %v6496_v5  ;;  %19001 = vst [vmem:[#allocation18_spill] sm:$0xff] %v16463_v40  ;;  %v19010_v5 = vld [vmem:[#allocation72_spill] sm:$0xff]  ;;  %v7285_v51 = vcombine.low %v16463_v40, %v7283_v19  ;;  %v16519_v7 = vrot.slane %v11003_v28, %v13980_v53  ;;  %v5334_v24 = vpop.f32.mrf.mxu1  ;;  %v6586_v47 = vrot.slane %v6578_v22, %v13980_v53 }
 0x33c   : > { %11974 = vmatprep.mubr.msk.bf16.mxu1 %vm12430_vm9, %v18660_v33  ;;  %v6693_v6 = vcombine.low %v19010_v5, %v14840_v30  ;;  %19011 = vst [vmem:[#allocation42_spill] sm:$0xff] %v16509_v56  ;;  %v16528_v19 = vadd.f32 %v16370_v21, %v5334_v24  ;;  %v6593_v11 = vrot.slane %v6579_v31, %v13980_v53  ;;  %v19018_v24 = vld [vmem:[#allocation24_spill] sm:$0xff] }
 0x33d   : > { %v7299_v38 = vrot.slane %v7285_v51, %v13980_v53  ;;  %v11852_v59 = vpop.f32.mrf.mxu1  ;;  %v16535_v49 = vrot.slane %v7025_v54, %v13980_v53  ;;  %v6696_v23 = vcombine.low %v15805_v52, %v15001_v14  ;;  %v16544_v51 = vrot.slane %v11020_v37, %v13980_v53 }
 0x33e   : > { %v16522_v10 = vrot.slane %v6693_v6, %v13980_v53  ;;  %19014 = vst [vmem:[#allocation63_spill] sm:$0xff] %v16528_v19  ;;  %v16541_v21 = vpop.f32.mrf.mxu0  ;;  %v16550_v22 = vrot.slane %v11002_v41, %v13980_v53  ;;  %v7326_v37 = vcombine.low %v19018_v24, %v19017_v27 }
 0x33f   : > { %v7300_v28 = vcombine.low %v16509_v56, %v7299_v38  ;;  %v5337_v54 = vpop.f32.mrf.mxu1  ;;  %v11005_v38 = vcombine.high %v19018_v24, %v19017_v27  ;;  %v6646_v56 = vcombine.low %v19020_v35, %v14824_v12  ;;  %v6724_v16 = vrot.slane %v6696_v23, %v13980_v53 }
 0x340   : > { %19015 = vst [vmem:[#allocation157_spill] sm:$0xff] %v16550_v22  ;;  %v7309_v31 = vcombine.low %v16519_v7, %v16522_v10  ;;  %v11910_v41 = vpop.f32.mrf.mxu0  ;;  %v6628_v59 = vcombine.low %v16550_v22, %v16460_v26  ;;  %v16580_v26 = vrot.slane %v16544_v51, %v13980_v53  ;;  %v19060_v22 = vld [vmem:[#allocation64_spill] sm:$0xff] }
 0x341   : > { %12033 = vmatmul.mubr.msk.bf16.gmra.mxu0 %vm5240_vm11, %v7275_v39  ;;  %v7308_v39 = vrot.slane %v7301_v1, %v13980_v53  ;;  %v16547_v1 = vrot.slane %v7017_v9, %v13980_v53  ;;  %v16562_v9 = vadd.f32 %v16394_v25, %v5337_v54  ;;  %v16574_v25 = vcombine.high %v16535_v49, %v16535_v49 }
 0x342   : > { %12036 = vmatprep.mubr.msk.bf16.mxu0 %vm12430_vm9, %v18660_v33  ;;  %v16576_v54 = vpop.f32.mrf.mxu0  ;;  %v16592_v35 = vrot.slane %v11005_v38, %v13980_v53 }
 0x343   : > { %11975 = vmatmul.mubr.msk.bf16.gmra.mxu1 %vm5240_vm11, %v6545_v50  ;;  %v7310_v6 = vcombine.low %v7308_v39, %v16512_v32  ;;  %v19016_v50 = vld [vmem:[#allocation97_spill] sm:$0xff]  ;;  %19019 = vst [vmem:[#allocation66_spill] sm:$0xff] %v16562_v9  ;;  %v6594_v39 = vcombine.low %v6586_v47, %v6593_v11  ;;  %v6627_v47 = vcombine.low %v16403_v15, %v16406_v55 }
 0x344   : > { %11978 = vmatprep.mubr.msk.bf16.mxu1 %vm12430_vm9, %v18660_v33  ;;  %v6742_v52 = vcombine.low %v19016_v50, %v15891_v43  ;;  %v16585_v11 = vrot.slane %v7309_v31, %v13980_v53  ;;  %19022 = vst [vmem:[#allocation11_spill] sm:$0xff] %v16592_v35  ;;  %v16597_v23 = vcombine.high %v16547_v1, %v16547_v1  ;;  %v11911_v24 = vpop.f32.mrf.mxu0 }
 0x345   : > { %v7324_v43 = vrot.slane %v7310_v6, %v13980_v53  ;;  %v7333_v6 = vrot.slane %v7326_v37, %v13980_v53  ;;  %v6642_v31 = vrot.slane %v6628_v59, %v13980_v53  ;;  %v7353_v37 = vcombine.low %v16574_v25, %v16580_v26 }
 0x346   : > { %19021 = vst [vmem:[#allocation54_spill] sm:$0xff] %v16585_v11  ;;  %v16589_v12 = vrot.slane %v6742_v52, %v13980_v53  ;;  %v16604_v52 = vrot.slane %v6646_v56, %v13980_v53  ;;  %v7351_v24 = vcombine.low %v16008_v0, %v16547_v1  ;;  %v7352_v59 = vcombine.low %v16535_v49, %v16597_v23 }
 0x347   : > { %v7325_v41 = vcombine.low %v16585_v11, %v7324_v43  ;;  %v6676_v56 = vcombine.low %v16441_v58, %v16463_v40  ;;  %v19026_v11 = vld [vmem:[#allocation88_spill] sm:$0xff]  ;;  %v7374_v0 = vrot.slane %v7353_v37, %v13980_v53  ;;  %v11004_v58 = vcombine.high %v19010_v5, %v14840_v30 }
 0x348   : > { %19023 = vst [vmem:[#allocation40_spill] sm:$0xff] %v16604_v52  ;;  %v7334_v38 = vcombine.low %v6724_v16, %v16589_v12  ;;  %v7367_v40 = vrot.slane %v7352_v59, %v13980_v53  ;;  %v6726_v59 = vcombine.low %v16512_v32, %v6724_v16 }
 0x349   : > { %12037 = vmatmul.mubr.msk.bf16.gmra.mxu0 %vm5240_vm11, %v7300_v28  ;;  %v11853_v28 = vpop.f32.mrf.mxu1  ;;  %v16646_v5 = vrot.slane %v11004_v58, %v13980_v53 }
 0x34a   : > { %12040 = vmatprep.mubr.msk.bf16.mxu0 %vm12430_vm9, %v18660_v33  ;;  %v7335_v28 = vcombine.low %v7333_v6, %v16592_v35  ;;  %v19025_v6 = vld [vmem:[#allocation90_spill] sm:$0xff]  ;;  %v7376_v30 = vcombine.low %v7367_v40, %v7374_v0  ;;  %v19030_v40 = vld [vmem:[#allocation228_spill] sm:$0xff]  ;;  %v16662_v0 = vcombine.high %v16580_v26, %v16580_v26 }
 0x34b   : > { %11979 = vmatmul.mubr.msk.bf16.gmra.mxu1 %vm5240_vm11, %v6594_v39  ;;  %v6635_v39 = vrot.slane %v6627_v47, %v13980_v53  ;;  %v6677_v47 = vcombine.low %v16604_v52, %v16519_v7  ;;  %v6745_v55 = vcombine.low %v19026_v11, %v19025_v6  ;;  %v7026_v7 = vcombine.high %v16544_v51, %v16544_v51 }
 0x34c   : > { %11982 = vmatprep.mubr.msk.bf16.mxu1 %vm12430_vm9, %v18660_v33  ;;  %19028 = vst [vmem:[#allocation80_spill] sm:$0xff] %v16646_v5 }
 0x34d   : > { %v6643_v43 = vcombine.low %v6635_v39, %v6642_v31  ;;  %v7349_v31 = vrot.slane %v7335_v28, %v13980_v53  ;;  %v7360_v39 = vrot.slane %v7351_v24, %v13980_v53  ;;  %v6691_v37 = vrot.slane %v6677_v47, %v13980_v53 }
 0x34e   : > { %v16642_v28 = vrot.slane %v6745_v55, %v13980_v53  ;;  %v16650_v24 = vrot.slane %v7026_v7, %v13980_v53  ;;  %v16656_v55 = vrot.slane %v7376_v30, %v13980_v53  ;;  %v6743_v47 = vcombine.low %v19030_v40, %v19017_v27 }
 0x34f   : > { %v6740_v27 = vrot.slane %v6726_v59, %v13980_v53 }
 0x350   : > { %19027 = vst [vmem:[#allocation45_spill] sm:$0xff] %v16642_v28  ;;  %v7375_v51 = vcombine.low %v16642_v28, %v7360_v39  ;;  %19029 = vst [vmem:[#allocation163_spill] sm:$0xff] %v16656_v55 }
 0x351   : > { %12041 = vmatmul.mubr.msk.bf16.gmra.mxu0 %vm5240_vm11, %v7325_v41  ;;  %v16623_v41 = vrot.slane %v7334_v38, %v13980_v53  ;;  %v6684_v38 = vrot.slane %v6676_v56, %v13980_v53 }
 0x352   : > { %12044 = vmatprep.mubr.msk.bf16.mxu0 %vm12430_vm9, %v18660_v33  ;;  %v7383_v16 = vrot.slane %v7375_v51, %v13980_v53 }
 0x353   : > { %19024 = vst [vmem:[#allocation48_spill] sm:$0xff] %v16623_v41  ;;  %11983 = vmatmul.mubr.msk.bf16.gmra.mxu1 %vm5240_vm11, %v6643_v43  ;;  %v7350_v43 = vcombine.low %v16623_v41, %v7349_v31  ;;  %v6692_v56 = vcombine.low %v6684_v38, %v6691_v37  ;;  %v6725_v31 = vcombine.low %v16522_v10, %v16646_v5  ;;  %v19041_v41 = vld [vmem:[#allocation5_spill] sm:$0xff] }
 0x354   : > { %11986 = vmatprep.mubr.msk.bf16.mxu1 %vm12430_vm9, %v18660_v33  ;;  %v5342_v58 = vpop.f32.mrf.mxu1  ;;  %v7391_v38 = vcombine.low %v7383_v16, %v16656_v55  ;;  %v16676_v37 = vrot.slane %v6743_v47, %v13980_v53  ;;  %v7392_v10 = vcombine.low %v16650_v24, %v16662_v0 }
 0x355   : > { %v16671_v39 = vadd.f32 %v16541_v21, %v5342_v58  ;;  %v6131_v7 = vpop.f32.mrf.mxu0  ;;  %v6733_v51 = vrot.slane %v6725_v31, %v13980_v53  ;;  %v6775_v31 = vcombine.low %v16592_v35, %v16642_v28  ;;  %v19043_v35 = vld [vmem:[#allocation62_spill] sm:$0xff] }
 0x356   : > { %19032 = vst [vmem:[#allocation55_spill] sm:$0xff] %v16676_v37  ;;  %v6774_v47 = vcombine.low %v16589_v12, %v16676_v37  ;;  %v16690_v16 = vrot.slane %v7392_v10, %v13980_v53  ;;  %v19035_v12 = vld [vmem:[#allocation34_spill] sm:$0xff]  ;;  %v7617_v10 = vshll.u32 %v16535_v49, 16  ;;  %v19042_v37 = vld [vmem:[#allocation61_spill] sm:$0xff] }
 0x357   : > { %19031 = vst [vmem:[#allocation92_spill] sm:$0xff] %v16671_v39  ;;  %v11914_v30 = vpop.f32.mrf.mxu0  ;;  %v6741_v40 = vcombine.low %v6733_v51, %v6740_v27  ;;  %v6789_v51 = vrot.slane %v6775_v31, %v13980_v53  ;;  %v19038_v31 = vld [vmem:[#allocation60_spill] sm:$0xff]  ;;  %v19044_v5 = vcombine.low %v19042_v37, %v19043_v35  ;;  %v11079_v35 = vld [vmem:[%s18005_s4 + $0x18] sm:$0xf]  ;;  %v19051_v37 = vld [vmem:[#allocation78_spill] sm:$0xff] }
 0x358   : > { %v7406_v27 = vrot.slane %v16690_v16, %v13980_v53  ;;  %v19080_v39 = vld [vmem:[#allocation85_spill] sm:$0xff] }
 0x359   : > { %12045 = vmatmul.mubr.msk.bf16.gmra.mxu0 %vm5240_vm11, %v7350_v43  ;;  %v11856_v43 = vpop.f32.mrf.mxu1  ;;  %v6134_v59 = vpop.f32.mrf.mxu0 }
 0x35a   : > { %12048 = vmatprep.mubr.msk.bf16.mxu0 %vm12430_vm9, %v18660_v33 }
 0x35b   : > { %11987 = vmatmul.mubr.msk.bf16.gmra.mxu1 %vm5240_vm11, %v6692_v56  ;;  %v5345_v56 = vpop.f32.mrf.mxu1  ;;  %v11915_v43 = vpop.f32.mrf.mxu0 }
 0x35c   : > { %11990 = vmatprep.mubr.msk.bf16.mxu1 %vm12430_vm9, %v18660_v33  ;;  %v16685_v21 = vadd.f32 %v16576_v54, %v5345_v56  ;;  %v6782_v54 = vrot.slane %v6774_v47, %v13980_v53  ;;  %v11006_v56 = vcombine.high %v19026_v11, %v19025_v6  ;;  %v7612_v47 = vshrl.u32 %v16547_v1, 16 }
 0x35d   : > { %v11857_v58 = vpop.f32.mrf.mxu1  ;;  %v11078_v11 = vpack.c.bf16 %v19041_v41, %v19041_v41 }
 0x35e   : > { %19033 = vst [vmem:[#allocation49_spill] sm:$0xff] %v16685_v21  ;;  %v6790_v58 = vcombine.low %v6782_v54, %v6789_v51  ;;  %v16725_v54 = vrot.slane %v19044_v5, %v13980_v53  ;;  %v16739_v41 = vrot.slane %v11006_v56, %v13980_v53  ;;  %v19056_v56 = vld [vmem:[#allocation68_spill] sm:$0xff] }
 0x35f   : > { %v16770_v4 = vrot.slane %v11078_v11, %v13980_v53  ;;  %v19070_v11 = vld [vmem:[#allocation77_spill] sm:$0xff] }
 0x360   : > { %19045 = vst [vmem:[#allocation72_spill] sm:$0xff] %v16725_v54  ;;  %19050 = vst [vmem:[#allocation86_spill] sm:$0xff] %v16739_v41 }
 0x361   : > { %12049 = vmatmul.mubr.msk.bf16.gmra.mxu0 %vm5240_vm11, %v7391_v38  ;;  %v19034_v38 = vld [vmem:[#allocation15_spill] sm:$0xff] }
 0x362   : > { %12052 = vmatprep.mubr.msk.bf16.mxu0 %vm12430_vm9, %v18660_v33  ;;  %v11057_v30 = vcombine.high %v19035_v12, %v19034_v38  ;;  %v19037_v12 = vld [vmem:[#allocation36_spill] sm:$0xff] }
 0x363   : > { %11991 = vmatmul.mubr.msk.bf16.gmra.mxu1 %vm5240_vm11, %v6741_v40  ;;  %v5350_v40 = vpop.f32.mrf.mxu1  ;;  %v6139_v38 = vpop.f32.mrf.mxu0  ;;  %v19039_v28 = vcombine.low %v19037_v12, %v19038_v31  ;;  %v19052_v12 = vld [vmem:[#allocation79_spill] sm:$0xff] }
 0x364   : > { %11994 = vmatprep.mubr.msk.bf16.mxu1 %vm12430_vm9, %v18660_v33  ;;  %v8502_v43 = vrot.slane %v11057_v30, %v13980_v53  ;;  %v16711_v55 = vadd.f32 %v6131_v7, %v5350_v40  ;;  %v19046_v7 = vld [vmem:[#allocation58_spill] sm:$0xff]  ;;  %v19047_v30 = vld [vmem:[#allocation76_spill] sm:$0xff]  ;;  %v19053_v31 = vcombine.low %v19051_v37, %v19052_v12  ;;  %v19062_v37 = vld [vmem:[#allocation87_spill] sm:$0xff] }
 0x365   : > { %v11860_v6 = vpop.f32.mrf.mxu1  ;;  %v19048_v51 = vcombine.low %v19046_v7, %v19047_v30  ;;  %v11918_v5 = vpop.f32.mrf.mxu0  ;;  %v19055_v7 = vld [vmem:[#allocation91_spill] sm:$0xff]  ;;  %v19058_v30 = vld [vmem:[#allocation70_spill] sm:$0xff]  ;;  %v8512_v12 = vcombine.low %v19062_v37, %v19061_v29 }
 0x366   : > { %19036 = vst [vmem:[#allocation52_spill] sm:$0xff] %v16711_v55  ;;  %v16748_v6 = vrot.slane %v19053_v31, %v13980_v53  ;;  %v8503_v15 = vcombine.low %v8502_v43, %v19060_v22  ;;  %v19065_v43 = vld [vmem:[#allocation73_spill] sm:$0xff]  ;;  %v19068_v37 = vld [vmem:[#allocation50_spill] sm:$0xff] }
 0x367   : > { %v16731_v40 = vrot.slane %v19048_v51, %v13980_v53  ;;  %v19059_v51 = vld [vmem:[#allocation69_spill] sm:$0xff]  ;;  %v5353_v5 = vpop.f32.mrf.mxu1  ;;  %v16765_v36 = vpop.f32.mrf.mxu0 }
 0x368   : > { %19054 = vst [vmem:[#allocation97_spill] sm:$0xff] %v16748_v6  ;;  %v7720_v52 = vcombine.low %v19059_v51, %v19058_v30  ;;  %v16763_v31 = vadd.f32 %v6134_v59, %v5353_v5  ;;  %v16775_v30 = vsel %vm5280_vm8, %v11079_v35, 0  ;;  %v19066_v51 = vld [vmem:[#allocation71_spill] sm:$0xff]  ;;  %v6805_v59 = vrot.slane %v16739_v41, %v13980_v53  ;;  %v19072_v41 = vld [vmem:[#allocation94_spill] sm:$0xff]  ;;  %v19079_v55 = vld [vmem:[#allocation65_spill] sm:$0xff] }
 0x369   : > { %12053 = vmatmul.mubr.msk.bf16.gmra.mxu0 %vm5240_vm11, %v7406_v27  ;;  %v16717_v27 = vrot.slane %v19039_v28, %v13980_v53  ;;  %v16735_v28 = vsel %vm14186_vm10, %v7612_v47, %v7617_v10  ;;  %v16752_v10 = vrot.slane %v19055_v7, %v13980_v53  ;;  %v19057_v47 = vld [vmem:[#allocation46_spill] sm:$0xff]  ;;  %v7721_v13 = vcombine.low %v19066_v51, %v19065_v43  ;;  %v11861_v29 = vpop.f32.mrf.mxu1  ;;  %v19067_v5 = vld [vmem:[#allocation51_spill] sm:$0xff]  ;;  %v11919_v8 = vpop.f32.mrf.mxu0 }
 0x36a   : > { %12112 = vmatprep.mubr.msk.bf16.mxu0 %vm12430_vm9, %v18660_v33  ;;  %19063 = vst [vmem:[#allocation89_spill] sm:$0xff] %v16763_v31  ;;  %v19069_v18 = vcombine.low %v19067_v5, %v19068_v37  ;;  %v19071_v7 = vld [vmem:[#allocation74_spill] sm:$0xff]  ;;  %v7625_v35 = vshll.u32 %v16597_v23, 16  ;;  %v16795_v51 = vrot.slane %v7720_v52, %v13980_v53  ;;  %v7628_v29 = vshrl.u32 %v16597_v23, 16 }
 0x36b   : > { %19040 = vst [vmem:[#allocation57_spill] sm:$0xff] %v16717_v27  ;;  %11995 = vmatmul.mubr.msk.bf16.gmra.mxu1 %vm5240_vm11, %v6790_v58  ;;  %v7719_v58 = vcombine.low %v19057_v47, %v19056_v56  ;;  %v19064_v56 = vld [vmem:[#allocation26_spill] sm:$0xff]  ;;  %v7722_v20 = vcombine.low %v19071_v7, %v19070_v11  ;;  %v8510_v7 = vrot.slane %v8503_v15, %v13980_v53  ;;  %v7636_v5 = vshrl.u32 %v16574_v25, 16  ;;  %v19106_v27 = vld [vmem:[#allocation25_spill] sm:$0xff] }
 0x36c   : > { %11998 = vmatprep.mubr.msk.bf16.mxu1 %vm12430_vm9, %v18660_v33  ;;  %v8210_v47 = vcombine.low %v19064_v56, %v16735_v28  ;;  %v7620_v56 = vshrl.u32 %v16535_v49, 16  ;;  %v8519_v8 = vrot.slane %v8512_v12, %v13980_v53  ;;  %v7641_v37 = vshll.u32 %v16580_v26, 16  ;;  %v19074_v12 = vld [vmem:[#allocation41_spill] sm:$0xff] }
 0x36d   : > { %v16792_v43 = vrot.slane %v7719_v58, %v13980_v53  ;;  %v7743_v11 = vrot.slane %v7721_v13, %v13980_v53  ;;  %v19073_v58 = vld [vmem:[#allocation75_spill] sm:$0xff]  ;;  %v7649_v13 = vshll.u32 %v16650_v24, 16  ;;  %v8511_v21 = vcombine.low %v19079_v55, %v8510_v7 }
 0x36e   : > { %v7768_v31 = vcombine.low %v19073_v58, %v19072_v41  ;;  %v16808_v52 = vsel %vm14186_vm10, %v7620_v56, %v7625_v35  ;;  %v16817_v15 = vsel %vm14186_vm10, %v7636_v5, %v7641_v37  ;;  %v19075_v56 = vld [vmem:[#allocation20_spill] sm:$0xff]  ;;  %v8226_v5 = vrot.slane %v8210_v47, %v13980_v53  ;;  %v19084_v37 = vld [vmem:[#allocation101_spill] sm:$0xff] }
 0x36f   : > { %v11058_v35 = vcombine.high %v19075_v56, %v19074_v12  ;;  %v8520_v9 = vcombine.low %v8519_v8, %v19080_v39  ;;  %v7652_v12 = vshrl.u32 %v16650_v24, 16  ;;  %v11100_v56 = vld [vmem:[%s18005_s4 + $0x1c] sm:$0xf]  ;;  %v19085_v39 = vld [vmem:[#allocation98_spill] sm:$0xff] }
 0x370   : > { %v5358_v19 = vpop.f32.mrf.mxu1  ;;  %v7771_v62 = vcombine.low %v19085_v39, %v19084_v37 }
 0x371   : > { %12113 = vmatmul.mubr.msk.bf16.vlgmr.msra.gmra.mxu0 %vm5240_vm11, %v19069_v18  ;;  %v7633_v18 = vshll.u32 %v16574_v25, 16  ;;  %v7644_v25 = vshrl.u32 %v16580_v26, 16  ;;  %v16846_v47 = vpop.f32.mrf.mxu0 }
 0x372   : > { %12116 = vmatprep.mubr.msk.bf16.mxu0 %vm12430_vm9, %v18660_v33 }
 0x373   : > { %v16812_v23 = vsel %vm14186_vm10, %v7628_v29, %v7633_v18  ;;  %11999 = vmatmul.mubr.msk.bf16.gmra.mxu1 %vm5240_vm11, %v6805_v59  ;;  %v19076_v29 = vld [vmem:[#allocation241_spill] sm:$0xff]  ;;  %v19077_v59 = vld [vmem:[#allocation16_spill] sm:$0xff]  ;;  %v16838_v22 = vsel %vm14186_vm10, %v7644_v25, %v7649_v13  ;;  %v7750_v25 = vrot.slane %v7722_v20, %v13980_v53 }
 0x374   : > { %v8211_v41 = vcombine.low %v16808_v52, %v16812_v23  ;;  %12058 = vmatprep.mubr.msk.bf16.mxu1 %vm12430_vm9, %v18660_v33  ;;  %v19078_v18 = vcombine.low %v19076_v29, %v19077_v59  ;;  %v16844_v29 = vadd.f32 %v6139_v38, %v5358_v19  ;;  %v8212_v55 = vcombine.low %v16817_v15, %v16838_v22  ;;  %v19082_v13 = vld [vmem:[#allocation100_spill] sm:$0xff]  ;;  %v19083_v59 = vld [vmem:[#allocation99_spill] sm:$0xff]  ;;  %v11864_v19 = vpop.f32.mrf.mxu1 }
 0x375   : > { %v7657_v38 = vshll.u32 %v16662_v0, 16 }
 0x376   : > { %v8219_v58 = vrot.slane %v19078_v18, %v13980_v53  ;;  %19081 = vst [vmem:[#allocation24_spill] sm:$0xff] %v16844_v29  ;;  %v8233_v7 = vrot.slane %v8211_v41, %v13980_v53  ;;  %v7769_v18 = vcombine.low %v19083_v59, %v19082_v13  ;;  %v7751_v29 = vcombine.low %v16792_v43, %v16795_v51  ;;  %v5361_v39 = vpop.f32.mrf.mxu1  ;;  %v19086_v51 = vld [vmem:[#allocation96_spill] sm:$0xff]  ;;  %v19087_v59 = vld [vmem:[#allocation95_spill] sm:$0xff] }
 0x377   : > { %v8536_v41 = vrot.slane %v11058_v35, %v13980_v53  ;;  %v8240_v20 = vrot.slane %v8212_v55, %v13980_v53  ;;  %v8527_v13 = vrot.slane %v8520_v9, %v13980_v53  ;;  %v16868_v37 = vsel %vm14186_vm10, %v7652_v12, %v7657_v38  ;;  %v19101_v9 = vld [vmem:[#allocation134_spill] sm:$0xff] }
 0x378   : > { %v8241_v8 = vcombine.low %v8219_v58, %v8226_v5  ;;  %v9812_v58 = vsel %vm5280_vm8, %v11100_v56, 0  ;;  %v7752_v5 = vcombine.low %v7743_v11, %v7750_v25  ;;  %v7770_v35 = vcombine.low %v19087_v59, %v19086_v51  ;;  %v19092_v51 = vld [vmem:[#allocation29_spill] sm:$0xff] }
 0x379   : > { %12117 = vmatmul.mubr.msk.bf16.gmra.mxu0 %vm5240_vm11, %v8511_v21  ;;  %v11922_v21 = vpop.f32.mrf.mxu0  ;;  %v16875_v19 = vadd.f32 %v16765_v36, %v5361_v39  ;;  %v8242_v11 = vcombine.low %v8233_v7, %v8240_v20  ;;  %v19089_v12 = vcombine.low %v16478_v63, %v16484_v3  ;;  %v7778_v56 = vrot.slane %v7768_v31, %v13980_v53  ;;  %v19090_v7 = vld [vmem:[#allocation17_spill] sm:$0xff] }
 0x37a   : > { %12120 = vmatprep.mubr.msk.bf16.mxu0 %vm12430_vm9, %v18660_v33  ;;  %12219 = vmatpush3.bf16.msra.mxu0 %v9812_v58  ;;  %v7785_v25 = vrot.slane %v7769_v18, %v13980_v53  ;;  %v7799_v38 = vrot.slane %v7771_v62, %v13980_v53  ;;  %v11865_v21 = vpop.f32.mrf.mxu1  ;;  %v8537_v20 = vcombine.low %v19090_v7, %v8536_v41  ;;  %v19091_v58 = vld [vmem:[#allocation4_spill] sm:$0xff]  ;;  %v19097_v36 = vld [vmem:[#allocation113_spill] sm:$0xff] }
 0x37b   : > { %19088 = vst [vmem:[#allocation196_spill] sm:$0xff] %v16875_v19  ;;  %v16877_v55 = vpop.f32.mrf.mxu0  ;;  %12059 = vmatmul.mubr.msk.bf16.vlgmr.msra.gmra.mxu1 %vm5240_vm11, %v19089_v12  ;;  %v16895_v3 = vrot.slane %v8241_v8, %v13980_v53  ;;  %v16898_v31 = vrot.slane %v8242_v11, %v13980_v53  ;;  %v7759_v62 = vrot.slane %v7751_v29, %v13980_v53  ;;  %v19094_v12 = vld [vmem:[#allocation112_spill] sm:$0xff]  ;;  %v19095_v21 = vld [vmem:[#allocation103_spill] sm:$0xff] }
 0x37c   : > { %12165 = vmatpush3.bf16.msra.mxu1 %v16775_v30  ;;  %12062 = vmatprep.mubr.msk.bf16.mxu1 %vm12430_vm9, %v18660_v33  ;;  %v7766_v18 = vrot.slane %v7752_v5, %v13980_v53  ;;  %v8528_v39 = vcombine.low %v19091_v58, %v8527_v13  ;;  %v19093_v30 = vld [vmem:[#allocation128_spill] sm:$0xff]  ;;  %v7792_v41 = vrot.slane %v7770_v35, %v13980_v53  ;;  %v19100_v29 = vld [vmem:[#allocation135_spill] sm:$0xff] }
 0x37d   : > { %v11923_v63 = vpop.f32.mrf.mxu0  ;;  %v8546_v59 = vcombine.low %v19093_v30, %v19092_v51  ;;  %12272 = vmatprep.subr.bf16.mxu1 %v18660_v33  ;;  %v7817_v8 = vcombine.low %v19095_v21, %v19094_v12  ;;  %v8956_v5 = vcombine.high %v16752_v10, %v16752_v10  ;;  %v8957_v13 = vcombine.high %v16770_v4, %v16770_v4  ;;  %v19098_v12 = vld [vmem:[#allocation119_spill] sm:$0xff]  ;;  %v19099_v21 = vld [vmem:[#allocation118_spill] sm:$0xff]  ;;  %v19103_v7 = vld [vmem:[#allocation136_spill] sm:$0xff] }
 0x37e   : > { %v19096_v63 = vld [vmem:[#allocation115_spill] sm:$0xff]  ;;  %v16919_v58 = vrot.slane %v16752_v10, %v13980_v53  ;;  %v16923_v35 = vrot.slane %v16770_v4, %v13980_v53  ;;  %v7801_v51 = vcombine.low %v7792_v41, %v7799_v38  ;;  %v8544_v30 = vrot.slane %v8537_v20, %v13980_v53  ;;  %v19102_v4 = vld [vmem:[#allocation137_spill] sm:$0xff]  ;;  %v5366_v20 = vpop.f32.mrf.mxu1 }
 0x37f   : > { %v7818_v11 = vcombine.low %v19097_v36, %v19096_v63  ;;  %v7800_v36 = vcombine.low %v7778_v56, %v7785_v25  ;;  %v7820_v63 = vcombine.low %v19099_v21, %v19098_v12  ;;  %v7767_v43 = vcombine.low %v7759_v62, %v7766_v18  ;;  %v19105_v56 = vld [vmem:[#allocation116_spill] sm:$0xff]  ;;  %v19111_v21 = vld [vmem:[#allocation130_spill] sm:$0xff] }
 0x380   : > { %v8553_v10 = vrot.slane %v8546_v59, %v13980_v53  ;;  %v7868_v19 = vcombine.low %v19101_v9, %v19100_v29  ;;  %v7869_v54 = vcombine.low %v19103_v7, %v19102_v4  ;;  %v7827_v38 = vrot.slane %v7817_v8, %v13980_v53  ;;  %v19108_v18 = vld [vmem:[#allocation132_spill] sm:$0xff]  ;;  %v19109_v59 = vld [vmem:[#allocation131_spill] sm:$0xff] }
 0x381   : > { %12121 = vmatmul.mubr.msk.bf16.gmra.mxu0 %vm5240_vm11, %v8528_v39  ;;  %v19104_v39 = vld [vmem:[#allocation117_spill] sm:$0xff]  ;;  %v7834_v41 = vrot.slane %v7818_v11, %v13980_v53  ;;  %v11059_v12 = vcombine.high %v19106_v27, %v18973_v34  ;;  %v16943_v62 = vrot.slane %v8956_v5, %v13980_v53  ;;  %v16947_v9 = vcombine.high %v16919_v58, %v16919_v58  ;;  %v16955_v11 = vpop.f32.mrf.mxu0  ;;  %v19110_v27 = vld [vmem:[#allocation114_spill] sm:$0xff]  ;;  %v19112_v4 = vld [vmem:[#allocation120_spill] sm:$0xff] }
 0x382   : > { %12124 = vmatprep.mubr.msk.bf16.mxu0 %vm12430_vm9, %v18660_v33  ;;  %v7819_v25 = vcombine.low %v19105_v56, %v19104_v39  ;;  %v16951_v7 = vadd.f32 %v16846_v47, %v5366_v20  ;;  %v7867_v8 = vcombine.low %v19109_v59, %v19108_v18  ;;  %v7815_v34 = vrot.slane %v7801_v51, %v13980_v53  ;;  %v11868_v39 = vpop.f32.mrf.mxu1  ;;  %v19113_v47 = vld [vmem:[#allocation124_spill] sm:$0xff] }
 0x383   : > { %12063 = vmatmul.mubr.msk.bf16.gmra.mxu1 %vm5240_vm11, %v7767_v43  ;;  %v8545_v29 = vcombine.low %v8544_v30, %v19110_v27  ;;  %v7848_v5 = vrot.slane %v7820_v63, %v13980_v53  ;;  %v7866_v43 = vcombine.low %v19112_v4, %v19111_v21  ;;  %v8554_v56 = vcombine.low %v19113_v47, %v8553_v10  ;;  %v11926_v59 = vpop.f32.mrf.mxu0  ;;  %v19117_v21 = vld [vmem:[#allocation150_spill] sm:$0xff]  ;;  %v19118_v4 = vld [vmem:[#allocation148_spill] sm:$0xff]  ;;  %v19121_v39 = vld [vmem:[#allocation151_spill] sm:$0xff] }
 0x384   : > { %19107 = vst [vmem:[#allocation90_spill] sm:$0xff] %v16951_v7  ;;  %12066 = vmatprep.mubr.msk.bf16.mxu1 %vm12430_vm9, %v18660_v33  ;;  %v7890_v20 = vrot.slane %v7868_v19, %v13980_v53  ;;  %v7897_v18 = vrot.slane %v7869_v54, %v13980_v53  ;;  %v19114_v7 = vld [vmem:[#allocation147_spill] sm:$0xff]  ;;  %v7808_v51 = vrot.slane %v7800_v36, %v13980_v53  ;;  %v5369_v6 = vpop.f32.mrf.mxu1  ;;  %v19119_v36 = vld [vmem:[#allocation144_spill] sm:$0xff] }
 0x385   : > { %v7915_v2 = vcombine.low %v19115_v46, %v19114_v7  ;;  %v7841_v30 = vrot.slane %v7819_v25, %v13980_v53  ;;  %v7849_v27 = vcombine.low %v7827_v38, %v7834_v41  ;;  %v8570_v63 = vrot.slane %v11059_v12, %v13980_v53  ;;  %v16977_v54 = vpop.f32.mrf.mxu0 }
 0x386   : > { %v7883_v10 = vrot.slane %v7867_v8, %v13980_v53  ;;  %v16975_v19 = vadd.f32 %v16877_v55, %v5369_v6  ;;  %v7916_v46 = vcombine.low %v19118_v4, %v19117_v21  ;;  %v8580_v7 = vcombine.low %v19119_v36, %v18980_v17  ;;  %v11869_v12 = vpop.f32.mrf.mxu1  ;;  %v19125_v36 = vld [vmem:[#allocation133_spill] sm:$0xff] }
 0x387   : > { %v7816_v25 = vcombine.low %v7808_v51, %v7815_v34  ;;  %v7850_v38 = vcombine.low %v7841_v30, %v7848_v5  ;;  %v7876_v41 = vrot.slane %v7866_v43, %v13980_v53  ;;  %v11060_v6 = vcombine.high %v14680_v61, %v18982_v60  ;;  %v11927_v17 = vpop.f32.mrf.mxu0  ;;  %v19122_v51 = vld [vmem:[#allocation143_spill] sm:$0xff]  ;;  %v19123_v60 = vld [vmem:[#allocation154_spill] sm:$0xff] }
 0x388   : > { %19116 = vst [vmem:[#allocation88_spill] sm:$0xff] %v16975_v19  ;;  %v8561_v55 = vrot.slane %v8554_v56, %v13980_v53  ;;  %v7899_v8 = vcombine.low %v7890_v20, %v7897_v18  ;;  %v7925_v21 = vrot.slane %v7915_v2, %v13980_v53  ;;  %v16993_v34 = vrot.slane %v8957_v13, %v13980_v53  ;;  %v19124_v56 = vld [vmem:[#allocation153_spill] sm:$0xff]  ;;  %v19126_v17 = vld [vmem:[#allocation162_spill] sm:$0xff] }
 0x389   : > { %12125 = vmatmul.mubr.msk.bf16.gmra.mxu0 %vm5240_vm11, %v8545_v29  ;;  %v19120_v29 = vld [vmem:[#allocation152_spill] sm:$0xff]  ;;  %v7857_v5 = vrot.slane %v7849_v27, %v13980_v53  ;;  %v8571_v43 = vcombine.low %v8570_v63, %v19122_v51  ;;  %v16999_v30 = vcombine.high %v16650_v24, %v16650_v24  ;;  %v7898_v61 = vcombine.low %v7876_v41, %v7883_v10  ;;  %v19133_v27 = vld [vmem:[#allocation149_spill] sm:$0xff] }
 0x38a   : > { %12128 = vmatprep.mubr.msk.bf16.mxu0 %vm12430_vm9, %v18660_v33  ;;  %v7917_v59 = vcombine.low %v19121_v39, %v19120_v29  ;;  %v7918_v20 = vcombine.low %v19124_v56, %v19123_v60  ;;  %v7932_v2 = vrot.slane %v7916_v46, %v13980_v53  ;;  %v8588_v18 = vrot.slane %v8580_v7, %v13980_v53  ;;  %v19127_v60 = vld [vmem:[#allocation166_spill] sm:$0xff]  ;;  %v19128_v56 = vld [vmem:[#allocation155_spill] sm:$0xff]  ;;  %v19135_v19 = vld [vmem:[#allocation169_spill] sm:$0xff] }
 0x38b   : > { %12067 = vmatmul.mubr.msk.bf16.gmra.mxu1 %vm5240_vm11, %v7816_v25  ;;  %v9447_v13 = vshrl.u32 %v16919_v58, 16  ;;  %v7864_v63 = vrot.slane %v7850_v38, %v13980_v53  ;;  %v8595_v4 = vrot.slane %v11060_v6, %v13980_v53  ;;  %v8562_v10 = vcombine.low %v8561_v55, %v19125_v36 }
 0x38c   : > { %12070 = vmatprep.mubr.msk.bf16.mxu1 %vm12430_vm9, %v18660_v33  ;;  %v17014_v25 = vrot.slane %v7899_v8, %v13980_v53  ;;  %v7939_v46 = vrot.slane %v7917_v59, %v13980_v53  ;;  %v7947_v41 = vcombine.low %v7925_v21, %v7932_v2  ;;  %v8578_v29 = vrot.slane %v8571_v43, %v13980_v53  ;;  %v5374_v6 = vpop.f32.mrf.mxu1  ;;  %v19130_v43 = vld [vmem:[#allocation164_spill] sm:$0xff] }
 0x38d   : > { %v7865_v12 = vcombine.low %v7857_v5, %v7864_v63  ;;  %v7665_v39 = vshll.u32 %v16999_v30, 16  ;;  %v7906_v38 = vrot.slane %v7898_v61, %v13980_v53  ;;  %v7946_v55 = vrot.slane %v7918_v20, %v13980_v53  ;;  %v6163_v5 = vpop.f32.mrf.mxu0 }
 0x38e   : > { %v8596_v8 = vcombine.low %v8588_v18, %v19126_v17  ;;  %v7964_v59 = vcombine.low %v19128_v56, %v19127_v60  ;;  %v17029_v21 = vadd.f32 %v16955_v11, %v5374_v6  ;;  %v8597_v2 = vcombine.low %v19130_v43, %v8595_v4  ;;  %v19131_v60 = vld [vmem:[#allocation168_spill] sm:$0xff]  ;;  %v19132_v56 = vld [vmem:[#allocation167_spill] sm:$0xff] }
 0x38f   : > { %v7660_v63 = vshrl.u32 %v16662_v0, 16  ;;  %v9452_v61 = vshll.u32 %v16943_v62, 16  ;;  %v7914_v20 = vcombine.low %v7906_v38, %v17014_v25  ;;  %v7948_v36 = vcombine.low %v7939_v46, %v7946_v55  ;;  %v11930_v6 = vpop.f32.mrf.mxu0  ;;  %v19137_v38 = vld [vmem:[#allocation171_spill] sm:$0xff] }
 0x390   : > { %19129 = vst [vmem:[#allocation228_spill] sm:$0xff] %v17029_v21  ;;  %v17036_v18 = vrot.slane %v7947_v41, %v13980_v53  ;;  %v7965_v7 = vcombine.low %v19132_v56, %v19131_v60  ;;  %v8579_v11 = vcombine.low %v8578_v29, %v19133_v27  ;;  %v19134_v21 = vld [vmem:[#allocation170_spill] sm:$0xff]  ;;  %v9675_v25 = vcombine.low %v16735_v28, %v16808_v52  ;;  %v19136_v41 = vld [vmem:[#allocation172_spill] sm:$0xff]  ;;  %v19138_v27 = vld [vmem:[#allocation43_spill] sm:$0xff] }
 0x391   : > { %12129 = vmatmul.mubr.msk.bf16.gmra.mxu0 %vm5240_vm11, %v8562_v10  ;;  %v11872_v10 = vpop.f32.mrf.mxu1  ;;  %v7966_v4 = vcombine.low %v19135_v19, %v19134_v21  ;;  %v17045_v17 = vsel %vm14186_vm10, %v7660_v63, %v7665_v39  ;;  %v7967_v55 = vcombine.low %v19137_v38, %v19136_v41  ;;  %v8613_v29 = vcombine.low %v19138_v27, %v18996_v45  ;;  %v6166_v39 = vpop.f32.mrf.mxu0 }
 0x392   : > { %12132 = vmatprep.mubr.msk.bf16.mxu0 %vm12430_vm9, %v18660_v33  ;;  %v17053_v10 = vrot.slane %v7964_v59, %v13980_v53  ;;  %v9676_v19 = vcombine.low %v16812_v23, %v16817_v15  ;;  %v8604_v28 = vrot.slane %v8596_v8, %v13980_v53  ;;  %v8611_v52 = vrot.slane %v8597_v2, %v13980_v53 }
 0x393   : > { %12071 = vmatmul.mubr.msk.bf16.gmra.mxu1 %vm5240_vm11, %v7865_v12  ;;  %v5377_v46 = vpop.f32.mrf.mxu1  ;;  %v9454_v59 = vsel %vm14186_vm10, %v9447_v13, %v9452_v61  ;;  %v17070_v63 = vrot.slane %v9675_v25, %v13980_v53  ;;  %v9455_v15 = vshrl.u32 %v16943_v62, 16  ;;  %v17077_v8 = vrot.slane %v7948_v36, %v13980_v53  ;;  %v11931_v13 = vpop.f32.mrf.mxu0 }
 0x394   : > { %12074 = vmatprep.mubr.msk.bf16.mxu1 %vm12430_vm9, %v18660_v33  ;;  %v17064_v12 = vadd.f32 %v16977_v54, %v5377_v46  ;;  %v9709_v45 = vcombine.low %v17045_v17, %v9454_v59  ;;  %v17073_v23 = vrot.slane %v9676_v19, %v13980_v53  ;;  %v17080_v54 = vrot.slane %v7965_v7, %v13980_v53 }
 0x395   : > { %v11873_v21 = vpop.f32.mrf.mxu1  ;;  %v17083_v2 = vrot.slane %v7966_v4, %v13980_v53  ;;  %v8988_v61 = vcombine.high %v16943_v62, %v16943_v62  ;;  %v17089_v60 = vrot.slane %v7967_v55, %v13980_v53  ;;  %v8620_v56 = vrot.slane %v8613_v29, %v13980_v53 }
 0x396   : > { %v9476_v7 = vshll.u32 %v16923_v35, 16  ;;  %v9479_v25 = vshrl.u32 %v16923_v35, 16  ;;  %v9484_v46 = vshll.u32 %v16993_v34, 16  ;;  %v19139_v41 = vshll.u32 %v16947_v9, 16 }
 0x397   : > { %v9468_v6 = vshll.u32 %v8988_v61, 16  ;;  %v9471_v4 = vshrl.u32 %v8988_v61, 16  ;;  %v19140_v55 = vcombine.low %v16838_v22, %v16868_v37  ;;  %v9725_v29 = vrot.slane %v9709_v45, %v13980_v53 }
 0x398   : > { %v9462_v38 = vsel %vm14186_vm10, %v9455_v15, %v19139_v41  ;;  %v19141_v19 = vshrl.u32 %v16947_v9, 16  ;;  %v9186_v21 = vcombine.low %v16662_v0, %v16919_v58  ;;  %v5382_v22 = vpop.f32.mrf.mxu1  ;;  %v11061_v45 = vcombine.high %v14831_v42, %v14930_v44 }
 0x399   : > { %12133 = vmatmul.mubr.msk.bf16.gmra.mxu0 %vm5240_vm11, %v8579_v11  ;;  %v8612_v11 = vcombine.low %v8604_v28, %v8611_v52  ;;  %v9718_v27 = vrot.slane %v19140_v55, %v13980_v53  ;;  %v9478_v28 = vsel %vm14186_vm10, %v9471_v4, %v9476_v7  ;;  %v9486_v52 = vsel %vm14186_vm10, %v9479_v25, %v9484_v46  ;;  %v6171_v0 = vpop.f32.mrf.mxu0  ;;  %v19143_v46 = vld [vmem:[#allocation177_spill] sm:$0xff] }
 0x39a   : > { %12136 = vmatprep.mubr.msk.bf16.mxu0 %vm12430_vm9, %v18660_v33  ;;  %v9470_v59 = vsel %vm14186_vm10, %v19141_v19, %v9468_v6  ;;  %v19142_v15 = vcombine.low %v16580_v26, %v16650_v24  ;;  %v9711_v7 = vcombine.low %v9478_v28, %v9486_v52  ;;  %v17129_v4 = vadd.f32 %v6163_v5, %v5382_v22  ;;  %v11876_v44 = vpop.f32.mrf.mxu1  ;;  %v19145_v28 = vld [vmem:[#allocation185_spill] sm:$0xff] }
 0x39b   : > { %12075 = vmatmul.mubr.msk.bf16.gmra.mxu1 %vm5240_vm11, %v7914_v20  ;;  %v9710_v6 = vcombine.low %v9462_v38, %v9470_v59  ;;  %v9740_v25 = vcombine.low %v9718_v27, %v9725_v29  ;;  %v9187_v20 = vcombine.low %v16943_v62, %v16947_v9  ;;  %v9188_v42 = vcombine.low %v8988_v61, %v16923_v35  ;;  %v11934_v29 = vpop.f32.mrf.mxu0  ;;  %v19144_v59 = vld [vmem:[#allocation186_spill] sm:$0xff] }
 0x39c   : > { %v17125_v13 = vrot.slane %v19142_v15, %v13980_v53  ;;  %12078 = vmatprep.mubr.msk.bf16.mxu1 %vm12430_vm9, %v18660_v33  ;;  %v8621_v41 = vcombine.low %v19143_v46, %v8620_v56  ;;  %v9739_v38 = vrot.slane %v9711_v7, %v13980_v53  ;;  %v9195_v19 = vrot.slane %v9186_v21, %v13980_v53  ;;  %v5385_v56 = vpop.f32.mrf.mxu1  ;;  %v19150_v29 = vld [vmem:[#allocation179_spill] sm:$0xff] }
 0x39d   : > { %v9732_v55 = vrot.slane %v9710_v6, %v13980_v53  ;;  %v7963_v5 = vcombine.low %v17036_v18, %v17077_v8  ;;  %v7996_v27 = vcombine.low %v17053_v10, %v17080_v54  ;;  %v9202_v9 = vrot.slane %v9187_v20, %v13980_v53  ;;  %v6174_v54 = vpop.f32.mrf.mxu0  ;;  %v19146_v20 = vld [vmem:[#allocation184_spill] sm:$0xff] }
 0x39e   : > { %v9209_v61 = vrot.slane %v9188_v42, %v13980_v53  ;;  %v8016_v52 = vcombine.low %v19145_v28, %v19144_v59  ;;  %v17148_v21 = vrot.slane %v9740_v25, %v13980_v53  ;;  %v9210_v18 = vcombine.low %v17125_v13, %v9195_v19  ;;  %v11877_v7 = vpop.f32.mrf.mxu1  ;;  %v19147_v25 = vld [vmem:[#allocation183_spill] sm:$0xff]  ;;  %v19153_v28 = vld [vmem:[#allocation213_spill] sm:$0xff] }
 0x39f   : > { %v9741_v22 = vcombine.low %v9732_v55, %v9739_v38  ;;  %v7997_v10 = vcombine.low %v17083_v2, %v17089_v60  ;;  %v17155_v8 = vadd.f32 %v6166_v39, %v5385_v56  ;;  %v8628_v6 = vrot.slane %v8621_v41, %v13980_v53  ;;  %v19148_v60 = vld [vmem:[#allocation182_spill] sm:$0xff]  ;;  %v19149_v55 = vld [vmem:[#allocation180_spill] sm:$0xff]  ;;  %v11935_v38 = vpop.f32.mrf.mxu0  ;;  %v19152_v56 = vld [vmem:[#allocation195_spill] sm:$0xff] }
 0x3a0   : > { %v9211_v15 = vcombine.low %v9202_v9, %v9209_v61  ;;  %v8015_v42 = vcombine.low %v19147_v25, %v19146_v20  ;;  %v17165_v2 = vrot.slane %v9210_v18, %v13980_v53  ;;  %v8014_v39 = vcombine.low %v19149_v55, %v19148_v60  ;;  %v19151_v9 = vld [vmem:[#allocation173_spill] sm:$0xff]  ;;  %v19156_v55 = vld [vmem:[#allocation187_spill] sm:$0xff] }
 0x3a1   : > { %12137 = vmatmul.mubr.msk.bf16.gmra.mxu0 %vm5240_vm11, %v8612_v11  ;;  %v8637_v11 = vrot.slane %v11061_v45, %v13980_v53  ;;  %v17162_v44 = vrot.slane %v9741_v22, %v13980_v53  ;;  %v8044_v45 = vrot.slane %v8016_v52, %v13980_v53  ;;  %v8013_v61 = vcombine.low %v19151_v9, %v19150_v29  ;;  %v19155_v60 = vld [vmem:[#allocation197_spill] sm:$0xff]  ;;  %v19158_v29 = vld [vmem:[#allocation199_spill] sm:$0xff] }
 0x3a2   : > { %12140 = vmatprep.mubr.msk.bf16.mxu0 %vm12430_vm9, %v18660_v33  ;;  %v17170_v19 = vrot.slane %v9211_v15, %v13980_v53  ;;  %v8647_v22 = vcombine.low %v19153_v28, %v15004_v48  ;;  %v8011_v52 = vrot.slane %v7997_v10, %v13980_v53  ;;  %v19154_v15 = vld [vmem:[#allocation181_spill] sm:$0xff]  ;;  %v8037_v20 = vrot.slane %v8015_v42, %v13980_v53  ;;  %v19159_v42 = vld [vmem:[#allocation202_spill] sm:$0xff] }
 0x3a3   : > { %12079 = vmatmul.mubr.msk.bf16.gmra.mxu1 %vm5240_vm11, %v7963_v5  ;;  %v8638_v59 = vcombine.low %v8637_v11, %v19152_v56  ;;  %v8004_v5 = vrot.slane %v7996_v27, %v13980_v53  ;;  %v8629_v7 = vcombine.low %v19154_v15, %v8628_v6  ;;  %v8030_v25 = vrot.slane %v8014_v39, %v13980_v53  ;;  %v19157_v11 = vld [vmem:[#allocation200_spill] sm:$0xff]  ;;  %v19160_v39 = vld [vmem:[#allocation201_spill] sm:$0xff] }
 0x3a4   : > { %12082 = vmatprep.mubr.msk.bf16.mxu1 %vm12430_vm9, %v18660_v33  ;;  %v8062_v38 = vcombine.low %v19156_v55, %v19155_v60  ;;  %v8063_v9 = vcombine.low %v19158_v29, %v19157_v11  ;;  %v11115_v48 = vcombine.high %v16919_v58, %v16943_v62  ;;  %v8046_v27 = vcombine.low %v8037_v20, %v8044_v45  ;;  %v19161_v45 = vld [vmem:[#allocation204_spill] sm:$0xff]  ;;  %v19162_v20 = vld [vmem:[#allocation203_spill] sm:$0xff] }
 0x3a5   : > { %v8023_v10 = vrot.slane %v8013_v61, %v13980_v53  ;;  %v8645_v6 = vrot.slane %v8638_v59, %v13980_v53  ;;  %v8064_v15 = vcombine.low %v19160_v39, %v19159_v42  ;;  %v8654_v60 = vrot.slane %v8647_v22, %v13980_v53 }
 0x3a6   : > { %v5390_v28 = vpop.f32.mrf.mxu1  ;;  %v8012_v55 = vcombine.low %v8004_v5, %v8011_v52  ;;  %v8065_v18 = vcombine.low %v19162_v20, %v19161_v45  ;;  %v8072_v61 = vrot.slane %v8062_v38, %v13980_v53  ;;  %v8079_v41 = vrot.slane %v8063_v9, %v13980_v53  ;;  %v19163_v52 = vld [vmem:[#allocation198_spill] sm:$0xff] }
 0x3a7   : > { %v17204_v11 = vadd.f32 %v6171_v0, %v5390_v28  ;;  %v8045_v58 = vcombine.low %v8023_v10, %v8030_v25  ;;  %v8060_v59 = vrot.slane %v8046_v27, %v13980_v53  ;;  %v10084_v22 = vcombine.low %v16999_v30, %v16943_v62  ;;  %v19164_v10 = vld [vmem:[#allocation212_spill] sm:$0xff] }
 0x3a8   : > { %v11880_v29 = vpop.f32.mrf.mxu1  ;;  %v10086_v0 = vcombine.low %v16923_v35, %v16993_v34  ;;  %v10100_v5 = vrot.slane %v11115_v48, %v13980_v53  ;;  %v8646_v25 = vcombine.low %v19163_v52, %v8645_v6  ;;  %v8086_v9 = vrot.slane %v8064_v15, %v13980_v53 }
 0x3a9   : > { %12141 = vmatmul.mubr.msk.bf16.gmra.mxu0 %vm5240_vm11, %v8629_v7  ;;  %v6179_v7 = vpop.f32.mrf.mxu0  ;;  %v8655_v42 = vcombine.low %v8654_v60, %v19164_v10  ;;  %v11062_v27 = vcombine.high %v15001_v14, %v19016_v50  ;;  %v10093_v30 = vrot.slane %v10084_v22, %v13980_v53  ;;  %v8053_v6 = vrot.slane %v8045_v58, %v13980_v53  ;;  %v19165_v22 = vld [vmem:[#allocation222_spill] sm:$0xff] }
 0x3aa   : > { %12144 = vmatprep.mubr.msk.bf16.mxu0 %vm12430_vm9, %v18660_v33  ;;  %v5393_v38 = vpop.f32.mrf.mxu1  ;;  %v10107_v48 = vrot.slane %v10086_v0, %v13980_v53  ;;  %v8093_v15 = vrot.slane %v8065_v18, %v13980_v53  ;;  %v19166_v0 = vld [vmem:[#allocation221_spill] sm:$0xff] }
 0x3ab   : > { %12083 = vmatmul.mubr.msk.bf16.gmra.mxu1 %vm5240_vm11, %v8012_v55  ;;  %v11938_v28 = vpop.f32.mrf.mxu0  ;;  %v17224_v62 = vadd.f32 %v6174_v54, %v5393_v38  ;;  %v10108_v60 = vcombine.low %v16690_v16, %v10093_v30  ;;  %v8061_v50 = vcombine.low %v8053_v6, %v8060_v59  ;;  %v8094_v54 = vcombine.low %v8072_v61, %v8079_v41  ;;  %v19169_v41 = vld [vmem:[#allocation215_spill] sm:$0xff]  ;;  %v19170_v61 = vld [vmem:[#allocation205_spill] sm:$0xff]  ;;  %v19173_v30 = vld [vmem:[#allocation218_spill] sm:$0xff] }
 0x3ac   : > { %12086 = vmatprep.mubr.msk.bf16.mxu1 %vm12430_vm9, %v18660_v33  ;;  %v11881_v55 = vpop.f32.mrf.mxu1  ;;  %v10109_v14 = vcombine.low %v10100_v5, %v10107_v48  ;;  %v8095_v45 = vcombine.low %v8086_v9, %v8093_v15  ;;  %v8114_v52 = vcombine.low %v19166_v0, %v19165_v22  ;;  %v8662_v58 = vrot.slane %v8655_v42, %v13980_v53  ;;  %v19171_v5 = vld [vmem:[#allocation220_spill] sm:$0xff]  ;;  %v19175_v15 = vld [vmem:[#allocation217_spill] sm:$0xff] }
 0x3ad   : > { %v6182_v29 = vpop.f32.mrf.mxu0  ;;  %v8671_v38 = vrot.slane %v11062_v27, %v13980_v53  ;;  %v17241_v18 = vrot.slane %v10108_v60, %v13980_v53  ;;  %v8111_v59 = vcombine.low %v19170_v61, %v19169_v41  ;;  %v8102_v42 = vrot.slane %v8094_v54, %v13980_v53  ;;  %v19174_v48 = vld [vmem:[#allocation216_spill] sm:$0xff] }
 0x3ae   : > { %v17244_v16 = vrot.slane %v10109_v14, %v13980_v53  ;;  %v8109_v27 = vrot.slane %v8095_v45, %v13980_v53  ;;  %v8112_v6 = vcombine.low %v19174_v48, %v19173_v30  ;;  %v8142_v55 = vrot.slane %v8114_v52, %v13980_v53  ;;  %v19176_v14 = vld [vmem:[#allocation227_spill] sm:$0xff] }
 0x3af   : > { %v11939_v20 = vpop.f32.mrf.mxu0  ;;  %19167 = vst [vmem:[#allocation15_spill] sm:$0xff] %v17241_v18  ;;  %v8663_v60 = vcombine.low %v19175_v15, %v8662_v58  ;;  %v11063_v0 = vcombine.high %v16547_v1, %v16535_v49  ;;  %v8121_v45 = vrot.slane %v8111_v59, %v13980_v53  ;;  %v19179_v30 = vld [vmem:[#allocation223_spill] sm:$0xff]  ;;  %v19180_v15 = vld [vmem:[#allocation236_spill] sm:$0xff] }
 0x3b0   : > { %19168 = vst [vmem:[#allocation34_spill] sm:$0xff] %v17244_v16  ;;  %v19177_v20 = vld [vmem:[#allocation244_spill] sm:$0xff]  ;;  %v19235_v16 = vld [vmem:[#allocation89_spill] sm:$0xff] }
 0x3b1   : > { %12145 = vmatmul.mubr.msk.bf16.gmra.mxu0 %vm5240_vm11, %v8646_v25  ;;  %v19172_v25 = vld [vmem:[#allocation219_spill] sm:$0xff]  ;;  %v8681_v22 = vcombine.low %v19177_v20, %v16535_v49 }
 0x3b2   : > { %12148 = vmatprep.mubr.msk.bf16.mxu0 %vm12430_vm9, %v18660_v33  ;;  %v8113_v28 = vcombine.low %v19172_v25, %v19171_v5  ;;  %v8110_v5 = vcombine.low %v8102_v42, %v8109_v27  ;;  %v19178_v25 = vld [vmem:[#allocation233_spill] sm:$0xff] }
 0x3b3   : > { %12087 = vmatmul.mubr.msk.bf16.gmra.mxu1 %vm5240_vm11, %v8061_v50  ;;  %v8672_v50 = vcombine.low %v19176_v14, %v8671_v38  ;;  %v8128_v38 = vrot.slane %v8112_v6, %v13980_v53  ;;  %v8160_v48 = vcombine.low %v19179_v30, %v19178_v25  ;;  %v8690_v59 = vrot.slane %v8681_v22, %v13980_v53  ;;  %v19182_v25 = vld [vmem:[#allocation240_spill] sm:$0xff]  ;;  %v19183_v30 = vld [vmem:[#allocation239_spill] sm:$0xff] }
 0x3b4   : > { %12090 = vmatprep.mubr.msk.bf16.mxu1 %vm12430_vm9, %v18660_v33  ;;  %v5398_v41 = vpop.f32.mrf.mxu1  ;;  %v8135_v52 = vrot.slane %v8113_v28, %v13980_v53  ;;  %v17281_v28 = vrot.slane %v11063_v0, %v13980_v53  ;;  %v8163_v9 = vcombine.low %v19183_v30, %v19182_v25 }
 0x3b5   : > { %v17266_v61 = vadd.f32 %v6179_v7, %v5398_v41  ;;  %v6187_v54 = vpop.f32.mrf.mxu0  ;;  %v19181_v7 = vld [vmem:[#allocation234_spill] sm:$0xff]  ;;  %v8170_v0 = vrot.slane %v8160_v48, %v13980_v53 }
 0x3b6   : > { %v11884_v58 = vpop.f32.mrf.mxu1  ;;  %v8161_v20 = vcombine.low %v19181_v7, %v19180_v15  ;;  %v8144_v39 = vcombine.low %v8135_v52, %v8142_v55  ;;  %v19184_v55 = vld [vmem:[#allocation238_spill] sm:$0xff]  ;;  %v19186_v7 = vld [vmem:[#allocation235_spill] sm:$0xff] }
 0x3b7   : > { %v11942_v41 = vpop.f32.mrf.mxu0  ;;  %v8143_v58 = vcombine.low %v8121_v45, %v8128_v38  ;;  %v19187_v45 = vld [vmem:[#allocation7_spill] sm:$0xff] }
 0x3b8   : > { %v5401_v42 = vpop.f32.mrf.mxu1  ;;  %v8177_v52 = vrot.slane %v8161_v20, %v13980_v53  ;;  %v8705_v38 = vcombine.low %v19187_v45, %v8690_v59 }
 0x3b9   : > { %12149 = vmatmul.mubr.msk.bf16.gmra.mxu0 %vm5240_vm11, %v8663_v60  ;;  %v8679_v60 = vrot.slane %v8672_v50, %v13980_v53  ;;  %v17284_v27 = vadd.f32 %v6182_v29, %v5401_v42  ;;  %v6190_v6 = vpop.f32.mrf.mxu0  ;;  %v19185_v50 = vld [vmem:[#allocation237_spill] sm:$0xff]  ;;  %v8706_v42 = vcombine.low %v17281_v28, %v17125_v13  ;;  %v8151_v25 = vrot.slane %v8143_v58, %v13980_v53 }
 0x3ba   : > { %12152 = vmatprep.mubr.msk.bf16.mxu0 %vm12430_vm9, %v18660_v33  ;;  %v11885_v15 = vpop.f32.mrf.mxu1  ;;  %v8162_v22 = vcombine.low %v19185_v50, %v19184_v55  ;;  %v8713_v59 = vrot.slane %v8705_v38, %v13980_v53 }
 0x3bb   : > { %12091 = vmatmul.mubr.msk.bf16.gmra.mxu1 %vm5240_vm11, %v8110_v5  ;;  %v8158_v5 = vrot.slane %v8144_v39, %v13980_v53  ;;  %v11943_v29 = vpop.f32.mrf.mxu0  ;;  %v8680_v41 = vcombine.low %v8679_v60, %v19186_v7  ;;  %v8191_v15 = vrot.slane %v8163_v9, %v13980_v53  ;;  %v8192_v60 = vcombine.low %v8170_v0, %v8177_v52 }
 0x3bc   : > { %12094 = vmatprep.mubr.msk.bf16.mxu1 %vm12430_vm9, %v18660_v33  ;;  %v8184_v48 = vrot.slane %v8162_v22, %v13980_v53  ;;  %v8720_v55 = vrot.slane %v8706_v42, %v13980_v53 }
 0x3bd   : > { %v8159_v39 = vcombine.low %v8151_v25, %v8158_v5  ;;  %v8200_v22 = vrot.slane %v8192_v60, %v13980_v53 }
 0x3be   : > { %v6195_v30 = vpop.f32.mrf.mxu0  ;;  %v8193_v50 = vcombine.low %v8184_v48, %v8191_v15  ;;  %v8721_v7 = vcombine.low %v8713_v59, %v8720_v55  ;;  %v19188_v15 = vcombine.high %v16580_v26, %v16650_v24 }
 0x3c0   : > { %v11946_v20 = vpop.f32.mrf.mxu0  ;;  %v8207_v52 = vrot.slane %v8193_v50, %v13980_v53  ;;  %v8729_v48 = vrot.slane %v19188_v15, %v13980_v53 }
 0x3c1   : > { %12153 = vmatmul.mubr.msk.bf16.gmra.mxu0 %vm5240_vm11, %v8680_v41 }
 0x3c2   : > { %12156 = vmatprep.mubr.msk.bf16.mxu0 %vm12430_vm9, %v18660_v33  ;;  %v5406_v13 = vpop.f32.mrf.mxu1  ;;  %v6198_v58 = vpop.f32.mrf.mxu0  ;;  %v8208_v42 = vcombine.low %v8200_v22, %v8207_v52  ;;  %v8736_v55 = vrot.slane %v8729_v48, %v13980_v53  ;;  %v19195_v48 = vld [vmem:[#allocation81_spill] sm:$0xff] }
 0x3c3   : > { %12095 = vmatmul.mubr.msk.bf16.gmra.mxu1 %vm5240_vm11, %v8159_v39  ;;  %v17308_v29 = vadd.f32 %v6187_v54, %v5406_v13 }
 0x3c4   : > { %12098 = vmatprep.mubr.msk.bf16.mxu1 %vm12430_vm9, %v18660_v33  ;;  %v11888_v9 = vpop.f32.mrf.mxu1  ;;  %v11947_v5 = vpop.f32.mrf.mxu0 }
 0x3c5   : > { %v19189_v9 = vcombine.low %v16895_v3, %v16898_v31  ;;  %v19192_v3 = vld [vmem:[#allocation97_spill] sm:$0xff] }
 0x3c6   : > { %v5409_v0 = vpop.f32.mrf.mxu1  ;;  %v19193_v31 = vcombine.low %v16731_v40, %v19192_v3 }
 0x3c7   : > { %v17315_v38 = vadd.f32 %v6190_v6, %v5409_v0 }
 0x3c8   : > { %v11889_v54 = vpop.f32.mrf.mxu1 }
 0x3c9   : > { %v7483_v41 = vpop.f32.mrf.mxu0  ;;  %12157 = vmatmul.mubr.msk.bf16.gmra.mxu0 %vm5240_vm11, %v8721_v7  ;;  %v19190_v54 = vld [vmem:[#allocation106_spill] sm:$0xff] }
 0x3ca   : > { %12160 = vmatprep.mubr.msk.bf16.mxu0 %vm12430_vm9, %v18660_v33 }
 0x3cb   : > { %v12006_v25 = vpop.f32.mrf.mxu0  ;;  %v5414_v39 = vpop.f32.mrf.mxu1  ;;  %12099 = vmatmul.mubr.msk.bf16.gmra.mxu1 %vm5240_vm11, %v8208_v42  ;;  %v19191_v42 = vld [vmem:[#allocation105_spill] sm:$0xff] }
 0x3cc   : > { %v17324_v60 = vadd.f32 %v6195_v30, %v5414_v39  ;;  %12102 = vmatprep.mubr.msk.bf16.mxu1 %vm12430_vm9, %v18660_v33  ;;  %v8258_v30 = vcombine.low %v16868_v37, %v17045_v17  ;;  %v9523_v25 = vcombine.low %v19191_v42, %v19190_v54  ;;  %v19199_v42 = vld [vmem:[#allocation108_spill] sm:$0xff] }
 0x3cd   : > { %v7486_v20 = vpop.f32.mrf.mxu0  ;;  %v11892_v6 = vpop.f32.mrf.mxu1 }
 0x3ce   : > { %v8265_v0 = vrot.slane %v8258_v30, %v13980_v53  ;;  %v19196_v6 = vld [vmem:[#allocation35_spill] sm:$0xff] }
 0x3cf   : > { %v12007_v59 = vpop.f32.mrf.mxu0  ;;  %v5417_v13 = vpop.f32.mrf.mxu1 }
 0x3d0   : > { %v8272_v13 = vrot.slane %v8265_v0, %v13980_v53  ;;  %v19198_v0 = vld [vmem:[#allocation121_spill] sm:$0xff] }
 0x3d1   : > { %v7491_v58 = vpop.f32.mrf.mxu0  ;;  %12161 = vmatmul.mubr.msk.bf16.gmra.mxu0 %vm5240_vm11, %v8736_v55  ;;  %v11893_v26 = vpop.f32.mrf.mxu1 }
 0x3d2   : > { %12220 = vmatprep.mubr.msk.bf16.mxu0 %vm12430_vm9, %v18660_v33  ;;  %v9537_v26 = vrot.slane %v9523_v25, %v13980_v53  ;;  %v19200_v25 = vld [vmem:[#allocation123_spill] sm:$0xff] }
 0x3d3   : > { %v12010_v24 = vpop.f32.mrf.mxu0  ;;  %v6882_v50 = vpop.f32.mrf.mxu1  ;;  %12103 = vmatmul.mubr.msk.bf16.gmra.mxu1 %vm5240_vm11, %v19189_v9  ;;  %v19197_v9 = vld [vmem:[#allocation39_spill] sm:$0xff] }
 0x3d4   : > { %v6984_v5 = vadd.f32 %v6882_v50, %v16424_v57  ;;  %12106 = vmatprep.mubr.msk.bf16.mxu1 %vm12430_vm9, %v18660_v33  ;;  %v19194_v57 = vld [vmem:[#allocation104_spill] sm:$0xff] }
 0x3d5   : > { %v7494_v22 = vpop.f32.mrf.mxu0  ;;  %v11952_v7 = vpop.f32.mrf.mxu1  ;;  %v9522_v39 = vcombine.low %v19195_v48, %v19194_v57 }
 0x3d6   : > { %v17344_v37 = vadd.f32 %v7483_v41, %v6984_v5 }
 0x3d7   : > { %v12011_v52 = vpop.f32.mrf.mxu0  ;;  %v6885_v17 = vpop.f32.mrf.mxu1  ;;  %v9530_v50 = vrot.slane %v9522_v39, %v13980_v53 }
 0x3d8   : > { %v6985_v59 = vadd.f32 %v6885_v17, %v19196_v6  ;;  %v9539_v17 = vcombine.low %v19199_v42, %v19198_v0  ;;  %v19202_v6 = vld [vmem:[#allocation37_spill] sm:$0xff] }
 0x3d9   : > { %v7499_v15 = vpop.f32.mrf.mxu0  ;;  %12221 = vmatmul.mubr.msk.bf16.vlgmr.msra.gmra.mxu0 %vm5240_vm11, %v19193_v31  ;;  %v11953_v55 = vpop.f32.mrf.mxu1  ;;  %v9538_v54 = vcombine.low %v9530_v50, %v9537_v26  ;;  %v11114_v31 = vld [vmem:[%s18005_s4 + $0x20] sm:$0xf]  ;;  %v19203_v26 = vld [vmem:[#allocation83_spill] sm:$0xff] }
 0x3da   : > { %12224 = vmatprep.mubr.msk.bf16.mxu0 %vm12430_vm9, %v18660_v33  ;;  %v17357_v24 = vadd.f32 %v7486_v20, %v6985_v59  ;;  %v19201_v20 = vld [vmem:[#allocation122_spill] sm:$0xff] }
 0x3db   : > { %v12014_v41 = vpop.f32.mrf.mxu0  ;;  %v6890_v30 = vpop.f32.mrf.mxu1  ;;  %12107 = vmatmul.mubr.msk.bf16.gmra.mxu1 %vm5240_vm11, %v8272_v13  ;;  %v9540_v3 = vcombine.low %v19201_v20, %v19200_v25  ;;  %v10180_v13 = vsel %vm5280_vm8, %v11114_v31, 0  ;;  %v19208_v25 = vld [vmem:[#allocation82_spill] sm:$0xff]  ;;  %v19209_v20 = vld [vmem:[#allocation64_spill] sm:$0xff] }
 0x3dc   : > { %v6986_v5 = vadd.f32 %v6890_v30, %v19197_v9  ;;  %12166 = vmatprep.mubr.msk.bf16.mxu1 %vm12430_vm9, %v18660_v33  ;;  %v19204_v30 = vld [vmem:[#allocation84_spill] sm:$0xff]  ;;  %v9547_v9 = vrot.slane %v9539_v17, %v13980_v53  ;;  %v9008_v31 = vcombine.low %v19209_v20, %v19208_v25  ;;  %v19215_v20 = vld [vmem:[#allocation66_spill] sm:$0xff] }
 0x3dd   : > { %v7502_v40 = vpop.f32.mrf.mxu0  ;;  %v11956_v7 = vpop.f32.mrf.mxu1  ;;  %v9009_v50 = vcombine.low %v19204_v30, %v19203_v26 }
 0x3de   : > { %v17371_v57 = vadd.f32 %v7491_v58, %v6986_v5  ;;  %v9554_v58 = vrot.slane %v9540_v3, %v13980_v53 }
 0x3df   : > { %v12015_v52 = vpop.f32.mrf.mxu0  ;;  %v6893_v48 = vpop.f32.mrf.mxu1 }
 0x3e0   : > { %v6987_v59 = vadd.f32 %v6893_v48, %v19202_v6  ;;  %v19205_v52 = vld [vmem:[#allocation57_spill] sm:$0xff]  ;;  %v19210_v48 = vld [vmem:[#allocation63_spill] sm:$0xff] }
 0x3e1   : > { %v7507_v39 = vpop.f32.mrf.mxu0  ;;  %12225 = vmatmul.mubr.msk.bf16.gmra.mxu0 %vm5240_vm11, %v9538_v54  ;;  %v11957_v55 = vpop.f32.mrf.mxu1  ;;  %v19206_v54 = vld [vmem:[#allocation72_spill] sm:$0xff] }
 0x3e2   : > { %12228 = vmatprep.mubr.msk.bf16.mxu0 %vm12430_vm9, %v18660_v33  ;;  %v17382_v5 = vadd.f32 %v7494_v22, %v6987_v59  ;;  %v19207_v0 = vcombine.low %v19205_v52, %v19206_v54  ;;  %v9023_v22 = vrot.slane %v9009_v50, %v13980_v53  ;;  %v9555_v59 = vcombine.low %v9547_v9, %v9554_v58  ;;  %v19211_v55 = vld [vmem:[#allocation141_spill] sm:$0xff] }
 0x3e3   : > { %v12018_v41 = vpop.f32.mrf.mxu0  ;;  %v6898_v7 = vpop.f32.mrf.mxu1  ;;  %v9016_v54 = vrot.slane %v9008_v31, %v13980_v53 }
 0x3e4   : > { %12167 = vmatmul.mubr.msk.bf16.vlgmr.msra.gmra.mxu1 %vm5240_vm11, %v19207_v0  ;;  %v6988_v6 = vadd.f32 %v6898_v7, %v19210_v48  ;;  %v19212_v41 = vld [vmem:[#allocation140_spill] sm:$0xff]  ;;  %v19214_v7 = vld [vmem:[#allocation126_spill] sm:$0xff] }
 0x3e5   : > { %v7510_v42 = vpop.f32.mrf.mxu0  ;;  %12273 = vmatpush3.bf16.msra.mxu1 %v10180_v13  ;;  %12170 = vmatprep.mubr.msk.bf16.mxu1 %vm12430_vm9, %v18660_v33  ;;  %v11960_v17 = vpop.f32.mrf.mxu1  ;;  %v9557_v26 = vcombine.low %v19212_v41, %v19211_v55  ;;  %v19213_v13 = vld [vmem:[#allocation139_spill] sm:$0xff]  ;;  %v9024_v9 = vcombine.low %v9016_v54, %v9023_v22  ;;  %v19219_v55 = vld [vmem:[#allocation110_spill] sm:$0xff] }
 0x3e6   : > { %v17396_v30 = vadd.f32 %v7499_v15, %v6988_v6  ;;  %v9556_v25 = vcombine.low %v19214_v7, %v19213_v13  ;;  %v19216_v17 = vld [vmem:[#allocation17_spill] sm:$0xff]  ;;  %v19220_v7 = vld [vmem:[#allocation92_spill] sm:$0xff] }
 0x3e7   : > { %v12019_v3 = vpop.f32.mrf.mxu0  ;;  %v6901_v52 = vpop.f32.mrf.mxu1  ;;  %v19217_v15 = vld [vmem:[#allocation85_spill] sm:$0xff]  ;;  %v9571_v41 = vrot.slane %v9557_v26, %v13980_v53 }
 0x3e8   : > { %v6989_v48 = vadd.f32 %v6901_v52, %v19215_v20  ;;  %v9025_v6 = vcombine.low %v19217_v15, %v19216_v17  ;;  %v19218_v3 = vld [vmem:[#allocation107_spill] sm:$0xff]  ;;  %v9564_v13 = vrot.slane %v9556_v25, %v13980_v53  ;;  %v19224_v25 = vld [vmem:[#allocation158_spill] sm:$0xff] }
 0x3e9   : > { %v7515_v0 = vpop.f32.mrf.mxu0  ;;  %12229 = vmatmul.mubr.msk.bf16.gmra.mxu0 %vm5240_vm11, %v9555_v59  ;;  %v11961_v50 = vpop.f32.mrf.mxu1  ;;  %v9026_v31 = vcombine.low %v19219_v55, %v19218_v3 }
 0x3ea   : > { %12232 = vmatprep.mubr.msk.bf16.mxu0 %vm12430_vm9, %v18660_v33  ;;  %v17410_v59 = vadd.f32 %v7502_v40, %v6989_v48  ;;  %v9033_v54 = vrot.slane %v9025_v6, %v13980_v53  ;;  %v9572_v26 = vcombine.low %v9564_v13, %v9571_v41  ;;  %v19221_v40 = vld [vmem:[#allocation156_spill] sm:$0xff]  ;;  %v19222_v48 = vld [vmem:[#allocation21_spill] sm:$0xff]  ;;  %v19226_v13 = vld [vmem:[#allocation127_spill] sm:$0xff] }
 0x3eb   : > { %v12022_v58 = vpop.f32.mrf.mxu0  ;;  %v6906_v36 = vpop.f32.mrf.mxu1  ;;  %v9040_v50 = vrot.slane %v9026_v31, %v13980_v53  ;;  %v9573_v17 = vcombine.low %v19222_v48, %v19221_v40 }
 0x3ec   : > { %12171 = vmatmul.mubr.msk.bf16.gmra.mxu1 %vm5240_vm11, %v9024_v9  ;;  %v6990_v20 = vadd.f32 %v6906_v36, %v19220_v7  ;;  %v19223_v36 = vld [vmem:[#allocation159_spill] sm:$0xff]  ;;  %v19225_v7 = vld [vmem:[#allocation49_spill] sm:$0xff] }
 0x3ed   : > { %v7518_v52 = vpop.f32.mrf.mxu0  ;;  %12174 = vmatprep.mubr.msk.bf16.mxu1 %vm12430_vm9, %v18660_v33  ;;  %v11964_v22 = vpop.f32.mrf.mxu1  ;;  %v9574_v55 = vcombine.low %v19224_v25, %v19223_v36  ;;  %v9041_v31 = vcombine.low %v9033_v54, %v9040_v50  ;;  %v19228_v36 = vld [vmem:[#allocation111_spill] sm:$0xff] }
 0x3ee   : > { %v17421_v15 = vadd.f32 %v7507_v39, %v6990_v20  ;;  %v9581_v39 = vrot.slane %v9573_v17, %v13980_v53 }
 0x3ef   : > { %v12023_v58 = vpop.f32.mrf.mxu0  ;;  %v6909_v9 = vpop.f32.mrf.mxu1  ;;  %v9588_v25 = vrot.slane %v9574_v55, %v13980_v53  ;;  %v19233_v55 = vld [vmem:[#allocation174_spill] sm:$0xff] }
 0x3f0   : > { %v6991_v22 = vadd.f32 %v6909_v9, %v19225_v7  ;;  %v19227_v58 = vld [vmem:[#allocation125_spill] sm:$0xff]  ;;  %v9042_v9 = vcombine.low %v19228_v36, %v19113_v47  ;;  %v19229_v7 = vld [vmem:[#allocation52_spill] sm:$0xff] }
 0x3f1   : > { %v7523_v3 = vpop.f32.mrf.mxu0  ;;  %12233 = vmatmul.mubr.msk.bf16.gmra.mxu0 %vm5240_vm11, %v9572_v26  ;;  %v11965_v6 = vpop.f32.mrf.mxu1  ;;  %v9043_v40 = vcombine.low %v19227_v58, %v19226_v13 }
 0x3f2   : > { %12236 = vmatprep.mubr.msk.bf16.mxu0 %vm12430_vm9, %v18660_v33  ;;  %v17432_v20 = vadd.f32 %v7510_v42, %v6991_v22  ;;  %v9589_v42 = vcombine.low %v9581_v39, %v9588_v25  ;;  %v19230_v22 = vld [vmem:[#allocation53_spill] sm:$0xff]  ;;  %v9050_v47 = vrot.slane %v9042_v9, %v13980_v53 }
 0x3f3   : > { %v12026_v41 = vpop.f32.mrf.mxu0  ;;  %v6914_v48 = vpop.f32.mrf.mxu1  ;;  %v9057_v50 = vrot.slane %v9043_v40, %v13980_v53 }
 0x3f4   : > { %12175 = vmatmul.mubr.msk.bf16.gmra.mxu1 %vm5240_vm11, %v9041_v31  ;;  %v6992_v6 = vadd.f32 %v6914_v48, %v19229_v7  ;;  %v19231_v41 = vld [vmem:[#allocation175_spill] sm:$0xff]  ;;  %v19234_v48 = vld [vmem:[#allocation161_spill] sm:$0xff] }
 0x3f5   : > { %v7526_v26 = vpop.f32.mrf.mxu0  ;;  %12178 = vmatprep.mubr.msk.bf16.mxu1 %vm12430_vm9, %v18660_v33  ;;  %v11968_v54 = vpop.f32.mrf.mxu1  ;;  %v9591_v13 = vcombine.low %v19231_v41, %v19230_v22  ;;  %v9590_v7 = vcombine.low %v19234_v48, %v19233_v55  ;;  %v9058_v39 = vcombine.low %v9050_v47, %v9057_v50  ;;  %v19238_v22 = vld [vmem:[#allocation145_spill] sm:$0xff]  ;;  %v19240_v55 = vld [vmem:[#allocation24_spill] sm:$0xff] }
 0x3f6   : > { %v17444_v31 = vadd.f32 %v7515_v0, %v6992_v6  ;;  %v19237_v0 = vld [vmem:[#allocation129_spill] sm:$0xff]  ;;  %v9060_v9 = vcombine.low %v19122_v51, %v19238_v22 }
 0x3f7   : > { %v12027_v17 = vpop.f32.mrf.mxu0  ;;  %v6917_v58 = vpop.f32.mrf.mxu1  ;;  %v9605_v41 = vrot.slane %v9591_v13, %v13980_v53 }
 0x3f8   : > { %19232 = vst [vmem:[#allocation36_spill] sm:$0xff] %v17444_v31  ;;  %v6993_v54 = vadd.f32 %v6917_v58, %v19235_v16  ;;  %v19236_v17 = vld [vmem:[#allocation142_spill] sm:$0xff]  ;;  %v9598_v58 = vrot.slane %v9590_v7, %v13980_v53  ;;  %v9074_v51 = vrot.slane %v9060_v9, %v13980_v53  ;;  %v19244_v7 = vld [vmem:[#allocation189_spill] sm:$0xff] }
 0x3f9   : > { %v7531_v36 = vpop.f32.mrf.mxu0  ;;  %12237 = vmatmul.mubr.msk.bf16.gmra.mxu0 %vm5240_vm11, %v9589_v42  ;;  %v11969_v40 = vpop.f32.mrf.mxu1  ;;  %v9059_v6 = vcombine.low %v19237_v0, %v19236_v17 }
 0x3fa   : > { %12240 = vmatprep.mubr.msk.bf16.mxu0 %vm12430_vm9, %v18660_v33  ;;  %v17458_v42 = vadd.f32 %v7518_v52, %v6993_v54  ;;  %v9606_v13 = vcombine.low %v9598_v58, %v9605_v41  ;;  %v19241_v52 = vld [vmem:[#allocation188_spill] sm:$0xff] }
 0x3fb   : > { %v12030_v25 = vpop.f32.mrf.mxu0  ;;  %v6922_v18 = vpop.f32.mrf.mxu1  ;;  %v9067_v47 = vrot.slane %v9059_v6, %v13980_v53  ;;  %v19242_v54 = vld [vmem:[#allocation56_spill] sm:$0xff]  ;;  %v19247_v6 = vld [vmem:[#allocation146_spill] sm:$0xff] }
 0x3fc   : > { %19239 = vst [vmem:[#allocation60_spill] sm:$0xff] %v17458_v42  ;;  %12179 = vmatmul.mubr.msk.bf16.gmra.mxu1 %vm5240_vm11, %v9058_v39  ;;  %v6994_v48 = vadd.f32 %v6922_v18, %v19240_v55  ;;  %v9607_v25 = vcombine.low %v19242_v54, %v19241_v52  ;;  %v19243_v18 = vld [vmem:[#allocation190_spill] sm:$0xff]  ;;  %v19245_v55 = vld [vmem:[#allocation196_spill] sm:$0xff] }
 0x3fd   : > { %v7534_v16 = vpop.f32.mrf.mxu0  ;;  %12182 = vmatprep.mubr.msk.bf16.mxu1 %vm12430_vm9, %v18660_v33  ;;  %v11972_v50 = vpop.f32.mrf.mxu1  ;;  %v9608_v22 = vcombine.low %v19244_v7, %v19243_v18  ;;  %v19246_v42 = vld [vmem:[#allocation160_spill] sm:$0xff]  ;;  %v9075_v41 = vcombine.low %v9067_v47, %v9074_v51 }
 0x3fe   : > { %v17469_v17 = vadd.f32 %v7523_v3, %v6994_v48  ;;  %v9076_v31 = vcombine.low %v19247_v6, %v19246_v42  ;;  %v19248_v3 = vld [vmem:[#allocation162_spill] sm:$0xff]  ;;  %v19253_v6 = vld [vmem:[#allocation208_spill] sm:$0xff] }
 0x3ff   : > { %v12031_v40 = vpop.f32.mrf.mxu0  ;;  %v6925_v39 = vpop.f32.mrf.mxu1  ;;  %v9077_v48 = vcombine.low %v19248_v3, %v19130_v43  ;;  %v19250_v42 = vld [vmem:[#allocation90_spill] sm:$0xff] }
 0x400   : > { %v6995_v50 = vadd.f32 %v6925_v39, %v19245_v55  ;;  %v9615_v40 = vrot.slane %v9607_v25, %v13980_v53  ;;  %v9622_v39 = vrot.slane %v9608_v22, %v13980_v53  ;;  %v9084_v47 = vrot.slane %v9076_v31, %v13980_v53  ;;  %v19252_v55 = vld [vmem:[#allocation191_spill] sm:$0xff]  ;;  %v19256_v31 = vld [vmem:[#allocation38_spill] sm:$0xff] }
 0x401   : > { %v7539_v0 = vpop.f32.mrf.mxu0  ;;  %12241 = vmatmul.mubr.msk.bf16.gmra.mxu0 %vm5240_vm11, %v9606_v13  ;;  %v11973_v9 = vpop.f32.mrf.mxu1  ;;  %v9091_v43 = vrot.slane %v9077_v48, %v13980_v53 }
 0x402   : > { %12244 = vmatprep.mubr.msk.bf16.mxu0 %vm12430_vm9, %v18660_v33  ;;  %v17482_v13 = vadd.f32 %v7526_v26, %v6995_v50  ;;  %v9623_v25 = vcombine.low %v9615_v40, %v9622_v39  ;;  %v19251_v26 = vld [vmem:[#allocation206_spill] sm:$0xff]  ;;  %v19254_v9 = vld [vmem:[#allocation207_spill] sm:$0xff] }
 0x403   : > { %v12034_v58 = vpop.f32.mrf.mxu0  ;;  %v6930_v52 = vpop.f32.mrf.mxu1  ;;  %v9624_v50 = vcombine.low %v19252_v55, %v19251_v26  ;;  %v9092_v40 = vcombine.low %v9084_v47, %v9091_v43 }
 0x404   : > { %19249 = vst [vmem:[#allocation5_spill] sm:$0xff] %v17482_v13  ;;  %12183 = vmatmul.mubr.msk.bf16.gmra.mxu1 %vm5240_vm11, %v9075_v41  ;;  %v6996_v18 = vadd.f32 %v6930_v52, %v19250_v42  ;;  %v9625_v41 = vcombine.low %v19254_v9, %v19253_v6  ;;  %v19255_v52 = vld [vmem:[#allocation88_spill] sm:$0xff] }
 0x405   : > { %v7542_v54 = vpop.f32.mrf.mxu0  ;;  %12186 = vmatprep.mubr.msk.bf16.mxu1 %vm12430_vm9, %v18660_v33  ;;  %v11976_v51 = vpop.f32.mrf.mxu1  ;;  %v19259_v9 = vld [vmem:[#allocation228_spill] sm:$0xff] }
 0x406   : > { %v17495_v58 = vadd.f32 %v7531_v36, %v6996_v18  ;;  %v19257_v51 = vld [vmem:[#allocation165_spill] sm:$0xff]  ;;  %v9632_v36 = vrot.slane %v9624_v50, %v13980_v53  ;;  %v9639_v18 = vrot.slane %v9625_v41, %v13980_v53 }
 0x407   : > { %v12035_v7 = vpop.f32.mrf.mxu0  ;;  %v6933_v22 = vpop.f32.mrf.mxu1  ;;  %v9093_v13 = vcombine.low %v19257_v51, %v19256_v31  ;;  %v19260_v31 = vld [vmem:[#allocation226_spill] sm:$0xff]  ;;  %v19261_v41 = vld [vmem:[#allocation225_spill] sm:$0xff] }
 0x408   : > { %v6997_v42 = vadd.f32 %v6933_v22, %v19255_v52  ;;  %v19258_v7 = vld [vmem:[#allocation176_spill] sm:$0xff]  ;;  %v9640_v50 = vcombine.low %v9632_v36, %v9639_v18 }
 0x409   : > { %v7547_v3 = vpop.f32.mrf.mxu0  ;;  %12245 = vmatmul.mubr.msk.bf16.gmra.mxu0 %vm5240_vm11, %v9623_v25  ;;  %v11977_v48 = vpop.f32.mrf.mxu1  ;;  %v9094_v26 = vcombine.low %v19258_v7, %v19143_v46  ;;  %v9101_v43 = vrot.slane %v9093_v13, %v13980_v53  ;;  %v19265_v13 = vld [vmem:[#allocation178_spill] sm:$0xff] }
 0x40a   : > { %12248 = vmatprep.mubr.msk.bf16.mxu0 %vm12430_vm9, %v18660_v33  ;;  %v17507_v55 = vadd.f32 %v7534_v16, %v6997_v42  ;;  %v9642_v16 = vcombine.low %v19261_v41, %v19260_v31 }
 0x40b   : > { %v12038_v39 = vpop.f32.mrf.mxu0  ;;  %v6938_v25 = vpop.f32.mrf.mxu1  ;;  %v9108_v46 = vrot.slane %v9094_v26, %v13980_v53 }
 0x40c   : > { %12187 = vmatmul.mubr.msk.bf16.gmra.mxu1 %vm5240_vm11, %v9092_v40  ;;  %v6998_v22 = vadd.f32 %v6938_v25, %v19259_v9  ;;  %v19262_v40 = vld [vmem:[#allocation224_spill] sm:$0xff]  ;;  %v19263_v39 = vld [vmem:[#allocation209_spill] sm:$0xff]  ;;  %v9656_v31 = vrot.slane %v9642_v16, %v13980_v53 }
 0x40d   : > { %v7550_v6 = vpop.f32.mrf.mxu0  ;;  %12190 = vmatprep.mubr.msk.bf16.mxu1 %vm12430_vm9, %v18660_v33  ;;  %v11980_v47 = vpop.f32.mrf.mxu1  ;;  %v9641_v7 = vcombine.low %v19263_v39, %v19262_v40  ;;  %v19264_v9 = vld [vmem:[#allocation192_spill] sm:$0xff]  ;;  %v9109_v36 = vcombine.low %v9101_v43, %v9108_v46 }
 0x40e   : > { %v17517_v42 = vadd.f32 %v7539_v0, %v6998_v22  ;;  %v9110_v47 = vcombine.low %v19265_v13, %v19264_v9  ;;  %v19266_v0 = vld [vmem:[#allocation194_spill] sm:$0xff]  ;;  %v19267_v22 = vld [vmem:[#allocation193_spill] sm:$0xff] }
 0x40f   : > { %v12039_v52 = vpop.f32.mrf.mxu0  ;;  %v6941_v51 = vpop.f32.mrf.mxu1 }
 0x410   : > { %v6999_v25 = vadd.f32 %v6941_v51, %v17064_v12  ;;  %v9111_v52 = vcombine.low %v19267_v22, %v19266_v0  ;;  %v9649_v51 = vrot.slane %v9641_v7, %v13980_v53  ;;  %v9118_v43 = vrot.slane %v9110_v47, %v13980_v53 }
 0x411   : > { %v7555_v48 = vpop.f32.mrf.mxu0  ;;  %12249 = vmatmul.mubr.msk.bf16.gmra.mxu0 %vm5240_vm11, %v9640_v50  ;;  %v11981_v26 = vpop.f32.mrf.mxu1 }
 0x412   : > { %12252 = vmatprep.mubr.msk.bf16.mxu0 %vm12430_vm9, %v18660_v33  ;;  %v17530_v50 = vadd.f32 %v7542_v54, %v6999_v25  ;;  %v9125_v39 = vrot.slane %v9111_v52, %v13980_v53  ;;  %v9657_v16 = vcombine.low %v9649_v51, %v9656_v31  ;;  %v19268_v54 = vld [vmem:[#allocation242_spill] sm:$0xff]  ;;  %v19269_v25 = vld [vmem:[#allocation229_spill] sm:$0xff] }
 0x413   : > { %v12042_v18 = vpop.f32.mrf.mxu0  ;;  %v6946_v41 = vpop.f32.mrf.mxu1  ;;  %v9658_v13 = vcombine.low %v19269_v25, %v19268_v54  ;;  %v19270_v26 = vld [vmem:[#allocation245_spill] sm:$0xff]  ;;  %v19273_v51 = vld [vmem:[#allocation214_spill] sm:$0xff] }
 0x414   : > { %12191 = vmatmul.mubr.msk.bf16.gmra.mxu1 %vm5240_vm11, %v9109_v36  ;;  %v7000_v40 = vadd.f32 %v6946_v41, %v17129_v4  ;;  %v19271_v36 = vld [vmem:[#allocation243_spill] sm:$0xff]  ;;  %v9126_v52 = vcombine.low %v9118_v43, %v9125_v39 }
 0x415   : > { %v7558_v12 = vpop.f32.mrf.mxu0  ;;  %12194 = vmatprep.mubr.msk.bf16.mxu1 %vm12430_vm9, %v18660_v33  ;;  %v11984_v46 = vpop.f32.mrf.mxu1  ;;  %v9659_v18 = vcombine.low %v19271_v36, %v19270_v26  ;;  %v19272_v41 = vld [vmem:[#allocation211_spill] sm:$0xff] }
 0x416   : > { %v17543_v0 = vadd.f32 %v7547_v3, %v7000_v40  ;;  %v9128_v46 = vcombine.low %v19273_v51, %v19272_v41 }
 0x417   : > { %v12043_v9 = vpop.f32.mrf.mxu0  ;;  %v6949_v7 = vpop.f32.mrf.mxu1  ;;  %v9673_v3 = vrot.slane %v9659_v18, %v13980_v53 }
 0x418   : > { %v7001_v22 = vadd.f32 %v6949_v7, %v17155_v8  ;;  %v9666_v9 = vrot.slane %v9658_v13, %v13980_v53  ;;  %v19274_v8 = vld [vmem:[#allocation210_spill] sm:$0xff]  ;;  %v9142_v39 = vrot.slane %v9128_v46, %v13980_v53  ;;  %v19277_v46 = vld [vmem:[#allocation231_spill] sm:$0xff] }
 0x419   : > { %v7563_v4 = vpop.f32.mrf.mxu0  ;;  %12253 = vmatmul.mubr.msk.bf16.gmra.mxu0 %vm5240_vm11, %v9657_v16  ;;  %v11985_v47 = vpop.f32.mrf.mxu1  ;;  %v9127_v25 = vcombine.low %v19152_v56, %v19274_v8  ;;  %v19276_v56 = vld [vmem:[#allocation12_spill] sm:$0xff] }
 0x41a   : > { %12256 = vmatprep.mubr.msk.bf16.mxu0 %vm12430_vm9, %v18660_v33  ;;  %v17553_v40 = vadd.f32 %v7550_v6, %v7001_v22  ;;  %v9674_v36 = vcombine.low %v9666_v9, %v9673_v3  ;;  %v19275_v47 = vld [vmem:[#allocation19_spill] sm:$0xff]  ;;  %v19278_v9 = vld [vmem:[#allocation230_spill] sm:$0xff] }
 0x41b   : > { %v12046_v31 = vpop.f32.mrf.mxu0  ;;  %v6954_v54 = vpop.f32.mrf.mxu1  ;;  %v9135_v7 = vrot.slane %v9127_v25, %v13980_v53  ;;  %v9145_v3 = vcombine.low %v19278_v9, %v19277_v46 }
 0x41c   : > { %12195 = vmatmul.mubr.msk.bf16.gmra.mxu1 %vm5240_vm11, %v9126_v52  ;;  %v7002_v26 = vadd.f32 %v6954_v54, %v17204_v11  ;;  %v9691_v52 = vcombine.low %v19276_v56, %v19275_v47  ;;  %v9144_v31 = vcombine.low %v19164_v10, %v19176_v14  ;;  %v19279_v54 = vcombine.low %v17070_v63, %v17073_v23 }
 0x41d   : > { %v7566_v16 = vpop.f32.mrf.mxu0  ;;  %12198 = vmatprep.mubr.msk.bf16.mxu1 %vm12430_vm9, %v18660_v33  ;;  %v11988_v43 = vpop.f32.mrf.mxu1  ;;  %v9445_v10 = vcombine.high %v16993_v34, %v16993_v34  ;;  %v17592_v63 = vcombine.high %v16923_v35, %v16923_v35  ;;  %v9159_v23 = vrot.slane %v9145_v3, %v13980_v53 }
 0x41e   : > { %v17562_v18 = vadd.f32 %v7555_v48, %v7002_v26  ;;  %v9143_v48 = vcombine.low %v9135_v7, %v9142_v39  ;;  %v9706_v8 = vrot.slane %v19279_v54, %v13980_v53  ;;  %v9699_v43 = vrot.slane %v9691_v52, %v13980_v53  ;;  %v19280_v54 = vld [vmem:[#allocation232_spill] sm:$0xff] }
 0x41f   : > { %v12047_v13 = vpop.f32.mrf.mxu0  ;;  %v6957_v6 = vpop.f32.mrf.mxu1  ;;  %v9487_v52 = vshrl.u32 %v16993_v34, 16 }
 0x420   : > { %v7003_v11 = vadd.f32 %v6957_v6, %v17224_v62  ;;  %v9161_v62 = vcombine.low %v16547_v1, %v16535_v49  ;;  %v9152_v1 = vrot.slane %v9144_v31, %v13980_v53  ;;  %v9707_v13 = vcombine.low %v9699_v43, %v9706_v8 }
 0x421   : > { %v7571_v22 = vpop.f32.mrf.mxu0  ;;  %12257 = vmatmul.mubr.msk.bf16.gmra.mxu0 %vm5240_vm11, %v9674_v36  ;;  %v11989_v41 = vpop.f32.mrf.mxu1  ;;  %v9500_v6 = vshll.u32 %v9445_v10, 16  ;;  %v9495_v31 = vshrl.u32 %v17592_v63, 16  ;;  %v9169_v8 = vcombine.low %v19280_v54, %v19187_v45  ;;  %v19281_v45 = vcombine.low %v17148_v21, %v17162_v44 }
 0x422   : > { %12260 = vmatprep.mubr.msk.bf16.mxu0 %vm12430_vm9, %v18660_v33  ;;  %v17583_v14 = vadd.f32 %v7558_v12, %v7003_v11  ;;  %v9168_v36 = vrot.slane %v9161_v62, %v13980_v53  ;;  %v9492_v11 = vshll.u32 %v17592_v63, 16 }
 0x423   : > { %v12050_v51 = vpop.f32.mrf.mxu0  ;;  %v6962_v25 = vpop.f32.mrf.mxu1  ;;  %v9502_v46 = vsel %vm14186_vm10, %v9495_v31, %v9500_v6 }
 0x424   : > { %12199 = vmatmul.mubr.msk.bf16.gmra.mxu1 %vm5240_vm11, %v9143_v48  ;;  %v7004_v39 = vadd.f32 %v6962_v25, %v17266_v61  ;;  %v9160_v48 = vcombine.low %v9152_v1, %v9159_v23  ;;  %v9177_v1 = vrot.slane %v9169_v8, %v13980_v53 }
 0x425   : > { %v7574_v26 = vpop.f32.mrf.mxu0  ;;  %12202 = vmatprep.mubr.msk.bf16.mxu1 %vm12430_vm9, %v18660_v33  ;;  %v11992_v49 = vpop.f32.mrf.mxu1 }
 0x426   : > { %v17597_v7 = vadd.f32 %v7563_v4, %v7004_v39  ;;  %v9170_v4 = vcombine.low %v9168_v36, %v17281_v28  ;;  %v9494_v28 = vsel %vm14186_vm10, %v9487_v52, %v9492_v11 }
 0x427   : > { %v12051_v12 = vpop.f32.mrf.mxu0  ;;  %v6965_v61 = vpop.f32.mrf.mxu1  ;;  %v9757_v43 = vcombine.low %v9494_v28, %v9502_v46 }
 0x428   : > { %v7005_v56 = vadd.f32 %v6965_v61, %v17284_v27  ;;  %v9184_v25 = vrot.slane %v9170_v4, %v13980_v53 }
 0x429   : > { %v7579_v47 = vpop.f32.mrf.mxu0  ;;  %12261 = vmatmul.mubr.msk.bf16.gmra.mxu0 %vm5240_vm11, %v9707_v13  ;;  %v11993_v41 = vpop.f32.mrf.mxu1 }
 0x42a   : > { %12264 = vmatprep.mubr.msk.bf16.mxu0 %vm12430_vm9, %v18660_v33  ;;  %v17609_v9 = vadd.f32 %v7566_v16, %v7005_v56  ;;  %v9185_v12 = vcombine.low %v9177_v1, %v9184_v25 }
 0x42b   : > { %v12054_v51 = vpop.f32.mrf.mxu0  ;;  %v6970_v27 = vpop.f32.mrf.mxu1 }
 0x42c   : > { %12203 = vmatmul.mubr.msk.bf16.gmra.mxu1 %vm5240_vm11, %v9160_v48  ;;  %v7006_v62 = vadd.f32 %v6970_v27, %v17308_v29  ;;  %v9227_v48 = vcombine.low %v16993_v34, %v17592_v63 }
 0x42d   : > { %v7582_v3 = vpop.f32.mrf.mxu0  ;;  %12206 = vmatprep.mubr.msk.bf16.mxu1 %vm12430_vm9, %v18660_v33  ;;  %v11996_v10 = vpop.f32.mrf.mxu1 }
 0x42e   : > { %v17620_v39 = vadd.f32 %v7571_v22, %v7006_v62  ;;  %v9764_v22 = vrot.slane %v9757_v43, %v13980_v53  ;;  %v9234_v27 = vrot.slane %v9227_v48, %v13980_v53 }
 0x42f   : > { %v12055_v16 = vpop.f32.mrf.mxu0  ;;  %v6973_v49 = vpop.f32.mrf.mxu1 }
 0x430   : > { %v7007_v29 = vadd.f32 %v6973_v49, %v17315_v38  ;;  %v9771_v56 = vrot.slane %v9764_v22, %v13980_v53 }
 0x431   : > { %v8813_v23 = vpop.f32.mrf.mxu0  ;;  %12265 = vmatmul.mubr.msk.bf16.gmra.mxu0 %vm5240_vm11, %v19281_v45  ;;  %v11997_v32 = vpop.f32.mrf.mxu1 }
 0x432   : > { %12268 = vmatprep.mubr.msk.bf16.mxu0 %vm12430_vm9, %v18660_v33  ;;  %v17631_v36 = vadd.f32 %v7574_v26, %v7007_v29 }
 0x433   : > { %v12114_v13 = vpop.f32.mrf.mxu0  ;;  %v6978_v6 = vpop.f32.mrf.mxu1 }
 0x434   : > { %12207 = vmatmul.mubr.msk.bf16.gmra.mxu1 %vm5240_vm11, %v9185_v12  ;;  %v7008_v21 = vadd.f32 %v6978_v6, %v17324_v60  ;;  %v19282_v60 = vcombine.low %v17165_v2, %v17170_v19  ;;  %v9241_v2 = vrot.slane %v9234_v27, %v13980_v53  ;;  %v19283_v12 = vld [vmem:[#allocation2_spill] sm:$0xff]  ;;  %v19284_v13 = vld [vmem:[#allocation59_spill] sm:$0xff] }
 0x435   : > { %v8816_v61 = vpop.f32.mrf.mxu0  ;;  %12210 = vmatprep.mubr.msk.bf16.mxu1 %vm12430_vm9, %v18660_v33  ;;  %v12000_v44 = vpop.f32.mrf.mxu1  ;;  %v9986_v22 = vcombine.low %v19284_v13, %v19283_v12  ;;  %v19289_v27 = vld [vmem:[#allocation14_spill] sm:$0xff]  ;;  %v19292_v13 = vld [vmem:[#allocation27_spill] sm:$0xff] }
 0x436   : > { %v17638_v52 = vadd.f32 %v7579_v47, %v7008_v21  ;;  %v19286_v21 = vld [vmem:[#allocation13_spill] sm:$0xff] }
 0x437   : > { %v12115_v38 = vpop.f32.mrf.mxu0  ;;  %v6981_v11 = vpop.f32.mrf.mxu1 }
 0x438   : > { %v9993_v11 = vrot.slane %v9986_v22, %v13980_v53  ;;  %v19293_v22 = vld [vmem:[#allocation30_spill] sm:$0xff] }
 0x439   : > { %v8821_v31 = vpop.f32.mrf.mxu0  ;;  %12269 = vmatmul.mubr.msk.bf16.gmra.mxu0 %vm5240_vm11, %v9771_v56  ;;  %v12001_v26 = vpop.f32.mrf.mxu1 }
 0x43b   : > { %v12118_v41 = vpop.f32.mrf.mxu0  ;;  %v8349_v51 = vpop.f32.mrf.mxu1 }
 0x43c   : > { %12211 = vmatmul.mubr.msk.bf16.gmra.mxu1 %vm5240_vm11, %v19282_v60  ;;  %v8451_v46 = vadd.f32 %v8349_v51, %v17344_v37 }
 0x43d   : > { %v8824_v4 = vpop.f32.mrf.mxu0  ;;  %12214 = vmatprep.mubr.msk.bf16.mxu1 %vm12430_vm9, %v18660_v33  ;;  %v12060_v47 = vpop.f32.mrf.mxu1 }
 0x43e   : > { %v17651_v54 = vadd.f32 %v8813_v23, %v8451_v46 }
 0x43f   : > { %v12119_v3 = vpop.f32.mrf.mxu0  ;;  %v8352_v8 = vpop.f32.mrf.mxu1 }
 0x440   : > { %v8452_v62 = vadd.f32 %v8352_v8, %v17357_v24  ;;  %v19290_v3 = vld [vmem:[#allocation32_spill] sm:$0xff] }
 0x441   : > { %v8829_v63 = vpop.f32.mrf.mxu0  ;;  %v12061_v28 = vpop.f32.mrf.mxu1 }
 0x442   : > { %v17655_v10 = vadd.f32 %v8816_v61, %v8452_v62 }
 0x443   : > { %v12122_v19 = vpop.f32.mrf.mxu0  ;;  %v8357_v37 = vpop.f32.mrf.mxu1 }
 0x444   : > { %12215 = vmatmul.mubr.msk.bf16.gmra.mxu1 %vm5240_vm11, %v9241_v2  ;;  %v8453_v16 = vadd.f32 %v8357_v37, %v17371_v57  ;;  %v19285_v57 = vld [vmem:[#allocation6_spill] sm:$0xff] }
 0x445   : > { %v8832_v25 = vpop.f32.mrf.mxu0  ;;  %12274 = vmatprep.mubr.msk.bf16.mxu1 %vm12430_vm9, %v18660_v33  ;;  %v12064_v43 = vpop.f32.mrf.mxu1  ;;  %v19287_v44 = vcombine.low %v19285_v57, %v19286_v21  ;;  %v19294_v57 = vld [vmem:[#allocation36_spill] sm:$0xff] }
 0x446   : > { %v17661_v1 = vadd.f32 %v8821_v31, %v8453_v16 }
 0x447   : > { %v12123_v49 = vpop.f32.mrf.mxu0  ;;  %v8360_v24 = vpop.f32.mrf.mxu1 }
 0x448   : > { %v8454_v45 = vadd.f32 %v8360_v24, %v17382_v5  ;;  %v19291_v24 = vld [vmem:[#allocation22_spill] sm:$0xff] }
 0x449   : > { %v8837_v23 = vpop.f32.mrf.mxu0  ;;  %v12065_v29 = vpop.f32.mrf.mxu1 }
 0x44a   : > { %v17666_v6 = vadd.f32 %v8824_v4, %v8454_v45  ;;  %v19288_v4 = vld [vmem:[#allocation10_spill] sm:$0xff] }
 0x44b   : > { %v12126_v32 = vpop.f32.mrf.mxu0  ;;  %v8365_v61 = vpop.f32.mrf.mxu1  ;;  %v9994_v46 = vcombine.low %v19288_v4, %v9993_v11  ;;  %v19295_v11 = vld [vmem:[#allocation60_spill] sm:$0xff] }
 0x44c   : > { %12275 = vmatmul.mubr.msk.bf16.vlgmr.msra.gmra.mxu1 %vm5240_vm11, %v19287_v44  ;;  %v8455_v56 = vadd.f32 %v8365_v61, %v17396_v30  ;;  %v9995_v30 = vcombine.low %v19290_v3, %v19289_v27  ;;  %v10004_v61 = vcombine.low %v19293_v22, %v19292_v13 }
 0x44d   : > { %v8840_v38 = vpop.f32.mrf.mxu0  ;;  %12278 = vmatprep.mubr.msk.bf16.mxu1 %vm12430_vm9, %v18660_v33  ;;  %v12068_v5 = vpop.f32.mrf.mxu1 }
 0x44e   : > { %v17676_v26 = vadd.f32 %v8829_v63, %v8455_v56 }
 0x44f   : > { %v12127_v31 = vpop.f32.mrf.mxu0  ;;  %v8368_v41 = vpop.f32.mrf.mxu1 }
 0x450   : > { %v8456_v51 = vadd.f32 %v8368_v41, %v17410_v59  ;;  %v10002_v59 = vrot.slane %v9995_v30, %v13980_v53 }
 0x451   : > { %v8845_v48 = vpop.f32.mrf.mxu0  ;;  %v12069_v60 = vpop.f32.mrf.mxu1 }
 0x452   : > { %v17682_v8 = vadd.f32 %v8832_v25, %v8456_v51  ;;  %v10003_v45 = vcombine.low %v19291_v24, %v10002_v59  ;;  %v19296_v51 = vld [vmem:[#allocation31_spill] sm:$0xff] }
 0x453   : > { %v12130_v47 = vpop.f32.mrf.mxu0  ;;  %v8373_v62 = vpop.f32.mrf.mxu1 }
 0x454   : > { %12279 = vmatmul.mubr.msk.bf16.gmra.mxu1 %vm5240_vm11, %v9994_v46  ;;  %v8457_v63 = vadd.f32 %v8373_v62, %v17421_v15  ;;  %v19297_v46 = vld [vmem:[#allocation102_spill] sm:$0xff]  ;;  %v19298_v47 = vld [vmem:[#allocation8_spill] sm:$0xff] }
 0x455   : > { %v8848_v28 = vpop.f32.mrf.mxu0  ;;  %12282 = vmatprep.mubr.msk.bf16.mxu1 %vm12430_vm9, %v18660_v33  ;;  %v12072_v2 = vpop.f32.mrf.mxu1  ;;  %v10013_v27 = vcombine.low %v19298_v47, %v19297_v46  ;;  %v19304_v46 = vld [vmem:[#allocation33_spill] sm:$0xff]  ;;  %v19305_v47 = vld [vmem:[#allocation47_spill] sm:$0xff] }
 0x456   : > { %v17689_v37 = vadd.f32 %v8837_v23, %v8457_v63 }
 0x457   : > { %v12131_v19 = vpop.f32.mrf.mxu0  ;;  %v8376_v16 = vpop.f32.mrf.mxu1  ;;  %v10020_v2 = vrot.slane %v10013_v27, %v13980_v53 }
 0x458   : > { %v8458_v25 = vadd.f32 %v8376_v16, %v17432_v20 }
 0x459   : > { %v8853_v43 = vpop.f32.mrf.mxu0  ;;  %v12073_v49 = vpop.f32.mrf.mxu1 }
 0x45a   : > { %v17693_v32 = vadd.f32 %v8840_v38, %v8458_v25  ;;  %v10011_v38 = vrot.slane %v10004_v61, %v13980_v53  ;;  %v19299_v49 = vld [vmem:[#allocation5_spill] sm:$0xff]  ;;  %v19301_v61 = vld [vmem:[#allocation23_spill] sm:$0xff] }
 0x45b   : > { %v12134_v29 = vpop.f32.mrf.mxu0  ;;  %v8381_v15 = vpop.f32.mrf.mxu1 }
 0x45c   : > { %12283 = vmatmul.mubr.msk.bf16.gmra.mxu1 %vm5240_vm11, %v10003_v45  ;;  %v8459_v23 = vadd.f32 %v8381_v15, %v19294_v57  ;;  %v10012_v60 = vcombine.low %v10011_v38, %v19296_v51  ;;  %v19300_v45 = vld [vmem:[#allocation67_spill] sm:$0xff]  ;;  %v19302_v57 = vld [vmem:[#allocation44_spill] sm:$0xff] }
 0x45d   : > { %v8856_v12 = vpop.f32.mrf.mxu0  ;;  %12286 = vmatprep.mubr.msk.bf16.mxu1 %vm12430_vm9, %v18660_v33  ;;  %v12076_v21 = vpop.f32.mrf.mxu1  ;;  %v10021_v29 = vcombine.low %v10020_v2, %v19300_v45  ;;  %v19303_v51 = vld [vmem:[#allocation28_spill] sm:$0xff] }
 0x45e   : > { %v17701_v44 = vadd.f32 %v8845_v48, %v8459_v23  ;;  %v10022_v23 = vcombine.low %v19302_v57, %v19301_v61  ;;  %v19308_v57 = vld [vmem:[#allocation40_spill] sm:$0xff] }
 0x45f   : > { %v12135_v20 = vpop.f32.mrf.mxu0  ;;  %v8384_v56 = vpop.f32.mrf.mxu1 }
 0x460   : > { %v8460_v31 = vadd.f32 %v8384_v56, %v19295_v11 }
 0x461   : > { %v8861_v5 = vpop.f32.mrf.mxu0  ;;  %v12077_v41 = vpop.f32.mrf.mxu1 }
 0x462   : > { %v17708_v3 = vadd.f32 %v8848_v28, %v8460_v31 }
 0x463   : > { %v12138_v4 = vpop.f32.mrf.mxu0  ;;  %v8389_v30 = vpop.f32.mrf.mxu1 }
 0x464   : > { %12287 = vmatmul.mubr.msk.bf16.gmra.mxu1 %vm5240_vm11, %v10012_v60  ;;  %v8461_v62 = vadd.f32 %v8389_v30, %v17469_v17 }
 0x465   : > { %v8864_v48 = vpop.f32.mrf.mxu0  ;;  %12290 = vmatprep.mubr.msk.bf16.mxu1 %vm12430_vm9, %v18660_v33  ;;  %v12080_v63 = vpop.f32.mrf.mxu1 }
 0x466   : > { %v17715_v19 = vadd.f32 %v8853_v43, %v8461_v62  ;;  %v19306_v62 = vld [vmem:[#allocation157_spill] sm:$0xff] }
 0x467   : > { %v12139_v59 = vpop.f32.mrf.mxu0  ;;  %v8392_v16 = vpop.f32.mrf.mxu1  ;;  %v19307_v63 = vld [vmem:[#allocation93_spill] sm:$0xff] }
 0x468   : > { %v8462_v28 = vadd.f32 %v8392_v16, %v19299_v49  ;;  %v10032_v2 = vcombine.low %v19307_v63, %v19306_v62 }
 0x469   : > { %v8869_v25 = vpop.f32.mrf.mxu0  ;;  %v12081_v24 = vpop.f32.mrf.mxu1 }
 0x46a   : > { %v17719_v13 = vadd.f32 %v8856_v12, %v8462_v28  ;;  %v10029_v12 = vrot.slane %v10022_v23, %v13980_v53  ;;  %v10046_v24 = vrot.slane %v10032_v2, %v13980_v53 }
 0x46b   : > { %v12142_v15 = vpop.f32.mrf.mxu0  ;;  %v8397_v17 = vpop.f32.mrf.mxu1 }
 0x46c   : > { %12291 = vmatmul.mubr.msk.bf16.gmra.mxu1 %vm5240_vm11, %v10021_v29  ;;  %v8463_v43 = vadd.f32 %v8397_v17, %v17495_v58  ;;  %v10030_v60 = vcombine.low %v10029_v12, %v19303_v51  ;;  %v10031_v58 = vcombine.low %v19305_v47, %v19304_v46 }
 0x46d   : > { %v8872_v22 = vpop.f32.mrf.mxu0  ;;  %12294 = vmatprep.mubr.msk.bf16.mxu1 %vm12430_vm9, %v18660_v33  ;;  %v12084_v21 = vpop.f32.mrf.mxu1 }
 0x46e   : > { %v17727_v56 = vadd.f32 %v8861_v5, %v8463_v43  ;;  %v10039_v16 = vrot.slane %v10031_v58, %v13980_v53  ;;  %v19311_v58 = vld [vmem:[#allocation109_spill] sm:$0xff] }
 0x46f   : > { %v12143_v20 = vpop.f32.mrf.mxu0  ;;  %v8400_v38 = vpop.f32.mrf.mxu1 }
 0x470   : > { %v8464_v31 = vadd.f32 %v8400_v38, %v17507_v55  ;;  %v10047_v17 = vcombine.low %v10039_v16, %v10046_v24 }
 0x471   : > { %v8877_v11 = vpop.f32.mrf.mxu0  ;;  %v12085_v41 = vpop.f32.mrf.mxu1 }
 0x472   : > { %v17734_v27 = vadd.f32 %v8864_v48, %v8464_v31 }
 0x473   : > { %v12146_v4 = vpop.f32.mrf.mxu0  ;;  %v8405_v30 = vpop.f32.mrf.mxu1 }
 0x474   : > { %12295 = vmatmul.mubr.msk.bf16.gmra.mxu1 %vm5240_vm11, %v10030_v60  ;;  %v8465_v59 = vadd.f32 %v8405_v30, %v17517_v42  ;;  %v19309_v42 = vld [vmem:[#allocation18_spill] sm:$0xff]  ;;  %v19312_v30 = vld [vmem:[#allocation80_spill] sm:$0xff] }
 0x475   : > { %v8880_v5 = vpop.f32.mrf.mxu0  ;;  %12298 = vmatprep.mubr.msk.bf16.mxu1 %vm12430_vm9, %v18660_v33  ;;  %v12088_v55 = vpop.f32.mrf.mxu1  ;;  %v10048_v23 = vcombine.low %v19309_v42, %v19308_v57  ;;  %v19310_v4 = vld [vmem:[#allocation42_spill] sm:$0xff]  ;;  %v19315_v57 = vld [vmem:[#allocation55_spill] sm:$0xff] }
 0x476   : > { %v17743_v28 = vadd.f32 %v8869_v25, %v8465_v59 }
 0x477   : > { %v12147_v49 = vpop.f32.mrf.mxu0  ;;  %v8408_v48 = vpop.f32.mrf.mxu1 }
 0x478   : > { %v8466_v29 = vadd.f32 %v8408_v48, %v17530_v50  ;;  %v10055_v50 = vrot.slane %v10048_v23, %v13980_v53 }
 0x479   : > { %v8885_v45 = vpop.f32.mrf.mxu0  ;;  %v12089_v15 = vpop.f32.mrf.mxu1 }
 0x47a   : > { %v17749_v43 = vadd.f32 %v8872_v22, %v8466_v29  ;;  %v10056_v46 = vcombine.low %v19310_v4, %v10055_v50  ;;  %v19313_v29 = vld [vmem:[#allocation54_spill] sm:$0xff] }
 0x47b   : > { %v12150_v61 = vpop.f32.mrf.mxu0  ;;  %v8413_v21 = vpop.f32.mrf.mxu1 }
 0x47c   : > { %12299 = vmatmul.mubr.msk.bf16.gmra.mxu1 %vm5240_vm11, %v10047_v17  ;;  %v8467_v25 = vadd.f32 %v8413_v21, %v17543_v0  ;;  %v10057_v0 = vcombine.low %v19312_v30, %v19311_v58  ;;  %v19314_v61 = vld [vmem:[#allocation11_spill] sm:$0xff]  ;;  %v19317_v30 = vld [vmem:[#allocation86_spill] sm:$0xff] }
 0x47d   : > { %v8888_v20 = vpop.f32.mrf.mxu0  ;;  %12302 = vmatprep.mubr.msk.bf16.mxu1 %vm12430_vm9, %v18660_v33  ;;  %v12092_v38 = vpop.f32.mrf.mxu1 }
 0x47e   : > { %v17756_v31 = vadd.f32 %v8877_v11, %v8467_v25 }
 0x47f   : > { %v12151_v12 = vpop.f32.mrf.mxu0  ;;  %v8416_v41 = vpop.f32.mrf.mxu1 }
 0x480   : > { %v8468_v22 = vadd.f32 %v8416_v41, %v17553_v40  ;;  %v10064_v40 = vrot.slane %v10057_v0, %v13980_v53  ;;  %v19318_v0 = vld [vmem:[#allocation45_spill] sm:$0xff] }
 0x481   : > { %v8893_v51 = vpop.f32.mrf.mxu0  ;;  %v12093_v60 = vpop.f32.mrf.mxu1 }
 0x482   : > { %v17762_v62 = vadd.f32 %v8880_v5, %v8468_v22  ;;  %v10065_v15 = vcombine.low %v19313_v29, %v10064_v40  ;;  %v19316_v60 = vld [vmem:[#allocation48_spill] sm:$0xff] }
 0x483   : > { %v12154_v47 = vpop.f32.mrf.mxu0  ;;  %v8421_v63 = vpop.f32.mrf.mxu1 }
 0x484   : > { %12303 = vmatmul.mubr.msk.bf16.gmra.mxu1 %vm5240_vm11, %v10056_v46  ;;  %v8469_v11 = vadd.f32 %v8421_v63, %v17562_v18  ;;  %v10066_v18 = vcombine.low %v19315_v57, %v19314_v61  ;;  %v10075_v63 = vcombine.low %v19318_v0, %v19317_v30 }
 0x485   : > { %v8896_v2 = vpop.f32.mrf.mxu0  ;;  %12306 = vmatprep.mubr.msk.bf16.mxu1 %vm12430_vm9, %v18660_v33  ;;  %v12096_v59 = vpop.f32.mrf.mxu1 }
 0x486   : > { %v17769_v16 = vadd.f32 %v8885_v45, %v8469_v11 }
 0x487   : > { %v12155_v55 = vpop.f32.mrf.mxu0  ;;  %v8424_v49 = vpop.f32.mrf.mxu1 }
 0x488   : > { %v8470_v5 = vadd.f32 %v8424_v49, %v17583_v14  ;;  %v10073_v14 = vrot.slane %v10066_v18, %v13980_v53 }
 0x489   : > { %v8901_v48 = vpop.f32.mrf.mxu0  ;;  %v12097_v24 = vpop.f32.mrf.mxu1 }
 0x48a   : > { %v17775_v42 = vadd.f32 %v8888_v20, %v8470_v5  ;;  %v10074_v4 = vcombine.low %v19316_v60, %v10073_v14  ;;  %v19319_v24 = vld [vmem:[#allocation163_spill] sm:$0xff] }
 0x48b   : > { %v12158_v17 = vpop.f32.mrf.mxu0  ;;  %v8429_v23 = vpop.f32.mrf.mxu1 }
 0x48c   : > { %12307 = vmatmul.mubr.msk.bf16.gmra.mxu1 %vm5240_vm11, %v10065_v15  ;;  %v8471_v45 = vadd.f32 %v8429_v23, %v17597_v7 }
 0x48d   : > { %v8904_v21 = vpop.f32.mrf.mxu0  ;;  %12310 = vmatprep.mubr.msk.bf16.mxu1 %vm12430_vm9, %v18660_v33  ;;  %v12100_v25 = vpop.f32.mrf.mxu1 }
 0x48e   : > { %v17782_v50 = vadd.f32 %v8893_v51, %v8471_v45 }
 0x48f   : > { %v12159_v38 = vpop.f32.mrf.mxu0  ;;  %v8432_v12 = vpop.f32.mrf.mxu1 }
 0x490   : > { %v8472_v20 = vadd.f32 %v8432_v12, %v17609_v9  ;;  %v19321_v12 = vld [vmem:[#allocation34_spill] sm:$0xff] }
 0x491   : > { %v8909_v41 = vpop.f32.mrf.mxu0  ;;  %v12101_v22 = vpop.f32.mrf.mxu1 }
 0x492   : > { %v17786_v47 = vadd.f32 %v8896_v2, %v8472_v20  ;;  %v10082_v2 = vrot.slane %v10075_v63, %v13980_v53 }
 0x493   : > { %v12162_v46 = vpop.f32.mrf.mxu0  ;;  %v8437_v7 = vpop.f32.mrf.mxu1 }
 0x494   : > { %12311 = vmatmul.mubr.msk.bf16.gmra.mxu1 %vm5240_vm11, %v10074_v4  ;;  %v8473_v51 = vadd.f32 %v8437_v7, %v17620_v39  ;;  %v10083_v29 = vcombine.low %v10082_v2, %v19319_v24 }
 0x495   : > { %v8912_v58 = vpop.f32.mrf.mxu0  ;;  %12314 = vmatprep.mubr.msk.bf16.mxu1 %vm12430_vm9, %v18660_v33  ;;  %v12104_v11 = vpop.f32.mrf.mxu1 }
 0x496   : > { %v17794_v59 = vadd.f32 %v8901_v48, %v8473_v51 }
 0x497   : > { %v12163_v9 = vpop.f32.mrf.mxu0  ;;  %v8440_v40 = vpop.f32.mrf.mxu1 }
 0x498   : > { %v8474_v49 = vadd.f32 %v8440_v40, %v17631_v36 }
 0x499   : > { %v9848_v55 = vpop.f32.mrf.mxu0  ;;  %v12105_v5 = vpop.f32.mrf.mxu1 }
 0x49a   : > { %v17799_v17 = vadd.f32 %v8904_v21, %v8474_v49  ;;  %v19320_v21 = vld [vmem:[#allocation15_spill] sm:$0xff] }
 0x49b   : > { %v12222_v15 = vpop.f32.mrf.mxu0  ;;  %v8445_v39 = vpop.f32.mrf.mxu1  ;;  %v19322_v20 = vcombine.low %v19320_v21, %v19321_v12 }
 0x49c   : > { %12315 = vmatmul.mubr.msk.bf16.gmra.mxu1 %vm5240_vm11, %v10083_v29  ;;  %v8475_v57 = vadd.f32 %v8445_v39, %v17638_v52 }
 0x49d   : > { %v9851_v61 = vpop.f32.mrf.mxu0  ;;  %12318 = vmatprep.mubr.msk.bf16.mxu1 %vm12430_vm9, %v18660_v33  ;;  %v12108_v48 = vpop.f32.mrf.mxu1 }
 0x49e   : > { %v17805_v23 = vadd.f32 %v8909_v41, %v8475_v57  ;;  %v19323_v41 = vcombine.high %v16923_v35, %v16993_v34 }
 0x49f   : > { %v12223_v18 = vpop.f32.mrf.mxu0  ;;  %v8448_v36 = vpop.f32.mrf.mxu1 }
 0x4a0   : > { %v10132_v4 = vrot.slane %v19323_v41, %v13980_v53 }
 0x4a1   : > { %v9856_v45 = vpop.f32.mrf.mxu0  ;;  %v12109_v25 = vpop.f32.mrf.mxu1 }
 0x4a2   : > { %v10139_v51 = vrot.slane %v10132_v4, %v13980_v53 }
 0x4a3   : > { %v12226_v14 = vpop.f32.mrf.mxu0 }
 0x4a4   : > { %v9318_v38 = vpop.f32.mrf.mxu1  ;;  %12319 = vmatmul.mubr.msk.bf16.gmra.mxu1 %vm5240_vm11, %v19322_v20 }
 0x4a5   : > { %v9859_v22 = vpop.f32.mrf.mxu0  ;;  %v9420_v52 = vadd.f32 %v9318_v38, %v17651_v54  ;;  %12322 = vmatprep.mubr.msk.bf16.mxu1 %vm12430_vm9, %v18660_v33 }
 0x4a6   : > { %v12168_v60 = vpop.f32.mrf.mxu1 }
 0x4a7   : > { %v12227_v46 = vpop.f32.mrf.mxu0  ;;  %v17818_v7 = vadd.f32 %v9848_v55, %v9420_v52 }
 0x4a8   : > { %v9321_v58 = vpop.f32.mrf.mxu1 }
 0x4a9   : > { %v9864_v30 = vpop.f32.mrf.mxu0  ;;  %v9421_v0 = vadd.f32 %v9321_v58, %v17655_v10 }
 0x4aa   : > { %v12169_v63 = vpop.f32.mrf.mxu1 }
 0x4ab   : > { %v12230_v54 = vpop.f32.mrf.mxu0  ;;  %v17822_v11 = vadd.f32 %v9851_v61, %v9421_v0 }
 0x4ac   : > { %v9326_v33 = vpop.f32.mrf.mxu1  ;;  %12323 = vmatmul.mubr.msk.bf16.gmra.mxu1 %vm5240_vm11, %v10139_v51 }
 0x4ad   : > { %v9867_v9 = vpop.f32.mrf.mxu0  ;;  %v9422_v35 = vadd.f32 %v9326_v33, %v17661_v1 }
 0x4ae   : > { %v12172_v34 = vpop.f32.mrf.mxu1 }
 0x4af   : > { %v12231_v40 = vpop.f32.mrf.mxu0  ;;  %v17826_v2 = vadd.f32 %v9856_v45, %v9422_v35 }
 0x4b0   : > { %v9329_v55 = vpop.f32.mrf.mxu1 }
 0x4b1   : > { %v9872_v49 = vpop.f32.mrf.mxu0  ;;  %v9423_v10 = vadd.f32 %v9329_v55, %v17666_v6 }
 0x4b2   : > { %v12173_v5 = vpop.f32.mrf.mxu1 }
 0x4b3   : > { %v12234_v24 = vpop.f32.mrf.mxu0  ;;  %v17829_v53 = vadd.f32 %v9859_v22, %v9423_v10 }
 0x4b4   : > { %v9334_v29 = vpop.f32.mrf.mxu1 }
 0x4b5   : > { %v9875_v15 = vpop.f32.mrf.mxu0  ;;  %v9424_v39 = vadd.f32 %v9334_v29, %v17676_v26 }
 0x4b6   : > { %v12176_v61 = vpop.f32.mrf.mxu1 }
 0x4b7   : > { %v12235_v57 = vpop.f32.mrf.mxu0  ;;  %v17832_v48 = vadd.f32 %v9864_v30, %v9424_v39 }
 0x4b8   : > { %v9337_v1 = vpop.f32.mrf.mxu1 }
 0x4b9   : > { %v9880_v18 = vpop.f32.mrf.mxu0  ;;  %v9425_v36 = vadd.f32 %v9337_v1, %v17682_v8 }
 0x4ba   : > { %v12177_v45 = vpop.f32.mrf.mxu1 }
 0x4bb   : > { %v12238_v25 = vpop.f32.mrf.mxu0  ;;  %v17835_v14 = vadd.f32 %v9867_v9, %v9425_v36 }
 0x4bc   : > { %v9342_v6 = vpop.f32.mrf.mxu1 }
 0x4bd   : > { %v9883_v38 = vpop.f32.mrf.mxu0  ;;  %v9426_v21 = vadd.f32 %v9342_v6, %v17689_v37 }
 0x4be   : > { %v12180_v12 = vpop.f32.mrf.mxu1 }
 0x4bf   : > { %v12239_v20 = vpop.f32.mrf.mxu0  ;;  %v17838_v22 = vadd.f32 %v9872_v49, %v9426_v21 }
 0x4c0   : > { %v9345_v26 = vpop.f32.mrf.mxu1 }
 0x4c1   : > { %v9888_v52 = vpop.f32.mrf.mxu0  ;;  %v9427_v60 = vadd.f32 %v9345_v26, %v17693_v32 }
 0x4c2   : > { %v12181_v41 = vpop.f32.mrf.mxu1 }
 0x4c3   : > { %v12242_v4 = vpop.f32.mrf.mxu0  ;;  %v17841_v46 = vadd.f32 %v9875_v15, %v9427_v60 }
 0x4c4   : > { %v9350_v8 = vpop.f32.mrf.mxu1 }
 0x4c5   : > { %v9891_v58 = vpop.f32.mrf.mxu0  ;;  %v9428_v30 = vadd.f32 %v9350_v8, %v17701_v44 }
 0x4c6   : > { %v12184_v0 = vpop.f32.mrf.mxu1 }
 0x4c7   : > { %v12243_v63 = vpop.f32.mrf.mxu0  ;;  %v17844_v51 = vadd.f32 %v9880_v18, %v9428_v30 }
 0x4c8   : > { %v9353_v37 = vpop.f32.mrf.mxu1 }
 0x4c9   : > { %v9896_v54 = vpop.f32.mrf.mxu0  ;;  %v9429_v33 = vadd.f32 %v9353_v37, %v17708_v3 }
 0x4ca   : > { %v12185_v9 = vpop.f32.mrf.mxu1 }
 0x4cb   : > { %v12246_v35 = vpop.f32.mrf.mxu0  ;;  %v17847_v34 = vadd.f32 %v9883_v38, %v9429_v33 }
 0x4cc   : > { %v9358_v32 = vpop.f32.mrf.mxu1 }
 0x4cd   : > { %v9899_v40 = vpop.f32.mrf.mxu0  ;;  %v9430_v55 = vadd.f32 %v9358_v32, %v17715_v19 }
 0x4ce   : > { %v12188_v49 = vpop.f32.mrf.mxu1 }
 0x4cf   : > { %v12247_v10 = vpop.f32.mrf.mxu0  ;;  %v17850_v5 = vadd.f32 %v9888_v52, %v9430_v55 }
 0x4d0   : > { %v9361_v44 = vpop.f32.mrf.mxu1 }
 0x4d1   : > { %v9904_v24 = vpop.f32.mrf.mxu0  ;;  %v9431_v29 = vadd.f32 %v9361_v44, %v17719_v13 }
 0x4d2   : > { %v12189_v15 = vpop.f32.mrf.mxu1 }
 0x4d3   : > { %v12250_v39 = vpop.f32.mrf.mxu0  ;;  %v17853_v61 = vadd.f32 %v9891_v58, %v9431_v29 }
 0x4d4   : > { %v9366_v3 = vpop.f32.mrf.mxu1 }
 0x4d5   : > { %v9907_v57 = vpop.f32.mrf.mxu0  ;;  %v9432_v1 = vadd.f32 %v9366_v3, %v17727_v56 }
 0x4d6   : > { %v12192_v18 = vpop.f32.mrf.mxu1 }
 0x4d7   : > { %v12251_v36 = vpop.f32.mrf.mxu0  ;;  %v17856_v45 = vadd.f32 %v9896_v54, %v9432_v1 }
 0x4d8   : > { %v9369_v19 = vpop.f32.mrf.mxu1 }
 0x4d9   : > { %v9912_v25 = vpop.f32.mrf.mxu0  ;;  %v9433_v6 = vadd.f32 %v9369_v19, %v17734_v27 }
 0x4da   : > { %v12193_v38 = vpop.f32.mrf.mxu1 }
 0x4db   : > { %v12254_v21 = vpop.f32.mrf.mxu0  ;;  %v17859_v12 = vadd.f32 %v9899_v40, %v9433_v6 }
 0x4dc   : > { %v9374_v13 = vpop.f32.mrf.mxu1 }
 0x4dd   : > { %v9915_v20 = vpop.f32.mrf.mxu0  ;;  %v9434_v26 = vadd.f32 %v9374_v13, %v17743_v28 }
 0x4de   : > { %v12196_v52 = vpop.f32.mrf.mxu1 }
 0x4df   : > { %v12255_v60 = vpop.f32.mrf.mxu0  ;;  %v17862_v41 = vadd.f32 %v9904_v24, %v9434_v26 }
 0x4e0   : > { %v9377_v56 = vpop.f32.mrf.mxu1 }
 0x4e1   : > { %v9920_v4 = vpop.f32.mrf.mxu0  ;;  %v9435_v8 = vadd.f32 %v9377_v56, %v17749_v43 }
 0x4e2   : > { %v12197_v58 = vpop.f32.mrf.mxu1 }
 0x4e3   : > { %v12258_v30 = vpop.f32.mrf.mxu0  ;;  %v17865_v0 = vadd.f32 %v9907_v57, %v9435_v8 }
 0x4e4   : > { %v9382_v27 = vpop.f32.mrf.mxu1 }
 0x4e5   : > { %v9923_v63 = vpop.f32.mrf.mxu0  ;;  %v9436_v37 = vadd.f32 %v9382_v27, %v17756_v31 }
 0x4e6   : > { %v12200_v54 = vpop.f32.mrf.mxu1 }
 0x4e7   : > { %v12259_v33 = vpop.f32.mrf.mxu0  ;;  %v17868_v9 = vadd.f32 %v9912_v25, %v9436_v37 }
 0x4e8   : > { %v9385_v28 = vpop.f32.mrf.mxu1 }
 0x4e9   : > { %v9928_v35 = vpop.f32.mrf.mxu0  ;;  %v9437_v32 = vadd.f32 %v9385_v28, %v17762_v62 }
 0x4ea   : > { %v12201_v40 = vpop.f32.mrf.mxu1 }
 0x4eb   : > { %v12262_v55 = vpop.f32.mrf.mxu0  ;;  %v17871_v49 = vadd.f32 %v9915_v20, %v9437_v32 }
 0x4ec   : > { %v9390_v43 = vpop.f32.mrf.mxu1 }
 0x4ed   : > { %v9931_v10 = vpop.f32.mrf.mxu0  ;;  %v9438_v44 = vadd.f32 %v9390_v43, %v17769_v16 }
 0x4ee   : > { %v12204_v24 = vpop.f32.mrf.mxu1 }
 0x4ef   : > { %v12263_v29 = vpop.f32.mrf.mxu0  ;;  %v17874_v15 = vadd.f32 %v9920_v4, %v9438_v44 }
 0x4f0   : > { %v9393_v31 = vpop.f32.mrf.mxu1 }
 0x4f1   : > { %v9936_v39 = vpop.f32.mrf.mxu0  ;;  %v9439_v3 = vadd.f32 %v9393_v31, %v17775_v42 }
 0x4f2   : > { %v12205_v57 = vpop.f32.mrf.mxu1 }
 0x4f3   : > { %v12266_v1 = vpop.f32.mrf.mxu0  ;;  %v17877_v18 = vadd.f32 %v9923_v63, %v9439_v3 }
 0x4f4   : > { %v9398_v62 = vpop.f32.mrf.mxu1 }
 0x4f5   : > { %v9939_v36 = vpop.f32.mrf.mxu0  ;;  %v9440_v19 = vadd.f32 %v9398_v62, %v17782_v50 }
 0x4f6   : > { %v12208_v25 = vpop.f32.mrf.mxu1 }
 0x4f7   : > { %v12267_v6 = vpop.f32.mrf.mxu0  ;;  %v17880_v38 = vadd.f32 %v9928_v35, %v9440_v19 }
 0x4f8   : > { %v9401_v16 = vpop.f32.mrf.mxu1 }
 0x4f9   : > { %v9944_v21 = vpop.f32.mrf.mxu0  ;;  %v9441_v13 = vadd.f32 %v9401_v16, %v17786_v47 }
 0x4fa   : > { %v12209_v20 = vpop.f32.mrf.mxu1 }
 0x4fb   : > { %v12270_v26 = vpop.f32.mrf.mxu0  ;;  %v17883_v52 = vadd.f32 %v9931_v10, %v9441_v13 }
 0x4fc   : > { %v9406_v42 = vpop.f32.mrf.mxu1 }
 0x4fd   : > { %v9947_v60 = vpop.f32.mrf.mxu0  ;;  %v9442_v56 = vadd.f32 %v9406_v42, %v17794_v59  ;;  %v17897_v59 = vld [vmem:[%s18006_s5] ss:$0 sm:$0xff] }
 0x4fe   : > { %v12212_v4 = vpop.f32.mrf.mxu1 }
 0x4ff   : > { %v12271_v8 = vpop.f32.mrf.mxu0  ;;  %v17886_v58 = vadd.f32 %v9936_v39, %v9442_v56 }
 0x500   : > { %v9409_v50 = vpop.f32.mrf.mxu1 }
 0x501   : > { %v9443_v30 = vadd.f32 %v9409_v50, %v17799_v17 }
 0x502   : > { %v12213_v27 = vpop.f32.mrf.mxu1 }
 0x503   : > { %v17889_v63 = vadd.f32 %v9939_v36, %v9443_v30 }
 0x504   : > { %v9414_v37 = vpop.f32.mrf.mxu1 }
 0x505   : > { %v9444_v47 = vadd.f32 %v9414_v37, %v17805_v23  ;;  %v17904_v23 = vld [vmem:[%s18007_s6] ss:$0 sm:$0xff] }
 0x506   : > { %v12216_v54 = vpop.f32.mrf.mxu1 }
 0x507   : > { %v17892_v33 = vadd.f32 %v9944_v21, %v9444_v47 }
 0x508   : > { %v9417_v28 = vpop.f32.mrf.mxu1 }
 0x50a   : > { %v12217_v35 = vpop.f32.mrf.mxu1 }
 0x50c   : > { %v10216_v32 = vpop.f32.mrf.mxu1 }
 0x50d   : > { %v10318_v40 = vadd.f32 %v10216_v32, %v17818_v7 }
 0x50e   : > { %v12276_v17 = vpop.f32.mrf.mxu1 }
 0x50f   : > { %v10350_v55 = vmul.f32 %v17897_v59, %v10318_v40 }
 0x510   : > { %v10219_v43 = vpop.f32.mrf.mxu1 }
 0x511   : > { %v10319_v10 = vadd.f32 %v10219_v43, %v17822_v11  ;;  %v10382_v44 = vadd.f32 %v17904_v23, %v10350_v55 }
 0x512   : > { %v12277_v24 = vpop.f32.mrf.mxu1 }
 0x513   : > { %v10351_v29 = vmul.f32 %v17897_v59, %v10319_v10  ;;  %12369 = vtanh.f32 %v10382_v44 }
 0x514   : > { %v10224_v31 = vpop.f32.mrf.mxu1 }
 0x515   : > { %v10383_v39 = vadd.f32 %v17904_v23, %v10351_v29  ;;  %v10320_v7 = vadd.f32 %v10224_v31, %v17826_v2 }
 0x516   : > { %v12280_v3 = vpop.f32.mrf.mxu1 }
 0x517   : > { %12371 = vtanh.f32 %v10383_v39  ;;  %v10352_v57 = vmul.f32 %v17897_v59, %v10320_v7 }
 0x518   : > { %v10227_v1 = vpop.f32.mrf.mxu1 }
 0x519   : > { %v10321_v62 = vadd.f32 %v10227_v1, %v17829_v53  ;;  %v10384_v11 = vadd.f32 %v17904_v23, %v10352_v57 }
 0x51a   : > { %v12281_v36 = vpop.f32.mrf.mxu1 }
 0x51b   : > { %v10353_v19 = vmul.f32 %v17897_v59, %v10321_v62  ;;  %12373 = vtanh.f32 %v10384_v11 }
 0x51c   : > { %v10232_v25 = vpop.f32.mrf.mxu1 }
 0x51d   : > { %v10385_v6 = vadd.f32 %v17904_v23, %v10353_v19  ;;  %v10322_v16 = vadd.f32 %v10232_v25, %v17832_v48 }
 0x51e   : > { %v12284_v2 = vpop.f32.mrf.mxu1 }
 0x51f   : > { %12375 = vtanh.f32 %v10385_v6  ;;  %v10354_v21 = vmul.f32 %v17897_v59, %v10322_v16 }
 0x520   : > { %v10235_v13 = vpop.f32.mrf.mxu1  ;;  %v12370_v42 = vpop.eup %12369 }
 0x521   : > { %v10323_v20 = vadd.f32 %v10235_v13, %v17835_v14  ;;  %v10386_v53 = vadd.f32 %v17904_v23, %v10354_v21 }
 0x522   : > { %v12285_v26 = vpop.f32.mrf.mxu1 }
 0x523   : > { %v10355_v60 = vmul.f32 %v17897_v59, %v10323_v20  ;;  %12377 = vtanh.f32 %v10386_v53 }
 0x524   : > { %v12372_v56 = vpop.eup %12371  ;;  %v10240_v48 = vpop.f32.mrf.mxu1 }
 0x525   : > { %v11187_v4 = vpack.c.bf16 %v12372_v56, %v12370_v42  ;;  %v10387_v8 = vadd.f32 %v17904_v23, %v10355_v60  ;;  %v10324_v50 = vadd.f32 %v10240_v48, %v17838_v22 }
 0x526   : > { %v12288_v14 = vpop.f32.mrf.mxu1 }
 0x527   : > { %11188 = vst [vmem:[%s17925_s16] sm:$0xff] %v11187_v4   ;;  %12379 = vtanh.f32 %v10387_v8  ;;  %v10356_v30 = vmul.f32 %v17897_v59, %v10324_v50 }
 0x528   : > { %v10243_v27 = vpop.f32.mrf.mxu1  ;;  %v12374_v28 = vpop.eup %12373 }
 0x529   : > { %v10325_v37 = vadd.f32 %v10243_v27, %v17841_v46  ;;  %v10388_v47 = vadd.f32 %v17904_v23, %v10356_v30 }
 0x52a   : > { %v12289_v54 = vpop.f32.mrf.mxu1 }
 0x52b   : > { %v10357_v35 = vmul.f32 %v17897_v59, %v10325_v37  ;;  %12381 = vtanh.f32 %v10388_v47 }
 0x52c   : > { %v12376_v32 = vpop.eup %12375  ;;  %v10248_v40 = vpop.f32.mrf.mxu1 }
 0x52d   : > { %v11192_v17 = vpack.c.bf16 %v12376_v32, %v12374_v28  ;;  %v10389_v22 = vadd.f32 %v17904_v23, %v10357_v35  ;;  %v10326_v55 = vadd.f32 %v10248_v40, %v17844_v51 }
 0x52e   : > { %v12292_v43 = vpop.f32.mrf.mxu1 }
 0x52f   : > { %11244 = vst [vmem:[%s17925_s16 + $0x8] sm:$0xff] %v11192_v17   ;;  %12383 = vtanh.f32 %v10389_v22  ;;  %v10358_v46 = vmul.f32 %v17897_v59, %v10326_v55 }
 0x530   : > { %v10251_v10 = vpop.f32.mrf.mxu1  ;;  %v12378_v31 = vpop.eup %12377 }
 0x531   : > { %v10327_v44 = vadd.f32 %v10251_v10, %v17847_v34  ;;  %v10390_v24 = vadd.f32 %v17904_v23, %v10358_v46 }
 0x532   : > { %v12293_v29 = vpop.f32.mrf.mxu1 }
 0x533   : > { %v10359_v39 = vmul.f32 %v17897_v59, %v10327_v44  ;;  %12385 = vtanh.f32 %v10390_v24 }
 0x534   : > { %v12380_v7 = vpop.eup %12379  ;;  %v10256_v3 = vpop.f32.mrf.mxu1 }
 0x535   : > { %v11197_v57 = vpack.c.bf16 %v12380_v7, %v12378_v31  ;;  %v10391_v51 = vadd.f32 %v17904_v23, %v10359_v39  ;;  %v10328_v1 = vadd.f32 %v10256_v3, %v17850_v5 }
 0x536   : > { %v12296_v62 = vpop.f32.mrf.mxu1 }
 0x537   : > { %11245 = vst [vmem:[%s17925_s16 + $0x10] sm:$0xff] %v11197_v57   ;;  %12387 = vtanh.f32 %v10391_v51  ;;  %v10360_v34 = vmul.f32 %v17897_v59, %v10328_v1 }
 0x538   : > { %v10259_v11 = vpop.f32.mrf.mxu1  ;;  %v12382_v6 = vpop.eup %12381 }
 0x539   : > { %v10329_v36 = vadd.f32 %v10259_v11, %v17853_v61  ;;  %v10392_v19 = vadd.f32 %v17904_v23, %v10360_v34 }
 0x53a   : > { %v12297_v25 = vpop.f32.mrf.mxu1 }
 0x53b   : > { %v10361_v16 = vmul.f32 %v17897_v59, %v10329_v36  ;;  %12389 = vtanh.f32 %v10392_v19 }
 0x53c   : > { %v12384_v2 = vpop.eup %12383  ;;  %v10264_v21 = vpop.f32.mrf.mxu1 }
 0x53d   : > { %v11202_v13 = vpack.c.bf16 %v12384_v2, %v12382_v6  ;;  %v10393_v5 = vadd.f32 %v17904_v23, %v10361_v16  ;;  %v10330_v20 = vadd.f32 %v10264_v21, %v17856_v45 }
 0x53e   : > { %v12300_v53 = vpop.f32.mrf.mxu1 }
 0x53f   : > { %11246 = vst [vmem:[%s17925_s16 + $0x18] sm:$0xff] %v11202_v13   ;;  %12391 = vtanh.f32 %v10393_v5  ;;  %v10362_v61 = vmul.f32 %v17897_v59, %v10330_v20 }
 0x540   : > { %v10267_v26 = vpop.f32.mrf.mxu1  ;;  %v12386_v48 = vpop.eup %12385 }
 0x541   : > { %v10331_v42 = vadd.f32 %v10267_v26, %v17859_v12  ;;  %v10394_v60 = vadd.f32 %v17904_v23, %v10362_v61 }
 0x542   : > { %v12301_v56 = vpop.f32.mrf.mxu1 }
 0x543   : > { %v10363_v4 = vmul.f32 %v17897_v59, %v10331_v42  ;;  %12393 = vtanh.f32 %v10394_v60 }
 0x544   : > { %v12388_v8 = vpop.eup %12387  ;;  %v10272_v50 = vpop.f32.mrf.mxu1 }
 0x545   : > { %v11207_v14 = vpack.c.bf16 %v12388_v8, %v12386_v48  ;;  %v10395_v45 = vadd.f32 %v17904_v23, %v10363_v4  ;;  %v10332_v30 = vadd.f32 %v10272_v50, %v17862_v41 }
 0x546   : > { %v12304_v27 = vpop.f32.mrf.mxu1 }
 0x547   : > { %11247 = vst [vmem:[%s17925_s16 + $0x20] sm:$0xff] %v11207_v14   ;;  %12395 = vtanh.f32 %v10395_v45  ;;  %v10364_v12 = vmul.f32 %v17897_v59, %v10332_v30 }
 0x548   : > { %v10275_v37 = vpop.f32.mrf.mxu1  ;;  %v12390_v35 = vpop.eup %12389 }
 0x549   : > { %v10333_v47 = vadd.f32 %v10275_v37, %v17865_v0  ;;  %v10396_v54 = vadd.f32 %v17904_v23, %v10364_v12 }
 0x54a   : > { %v12305_v28 = vpop.f32.mrf.mxu1 }
 0x54b   : > { %v10365_v32 = vmul.f32 %v17897_v59, %v10333_v47  ;;  %12397 = vtanh.f32 %v10396_v54 }
 0x54c   : > { %v12392_v40 = vpop.eup %12391  ;;  %v10280_v17 = vpop.f32.mrf.mxu1 }
 0x54d   : > { %v11212_v22 = vpack.c.bf16 %v12392_v40, %v12390_v35  ;;  %v10397_v41 = vadd.f32 %v17904_v23, %v10365_v32  ;;  %v10334_v55 = vadd.f32 %v10280_v17, %v17868_v9 }
 0x54e   : > { %v12308_v43 = vpop.f32.mrf.mxu1 }
 0x54f   : > { %11248 = vst [vmem:[%s17925_s16 + $0x28] sm:$0xff] %v11212_v22   ;;  %12399 = vtanh.f32 %v10397_v41  ;;  %v10366_v0 = vmul.f32 %v17897_v59, %v10334_v55 }
 0x550   : > { %v10283_v46 = vpop.f32.mrf.mxu1  ;;  %v12394_v29 = vpop.eup %12393 }
 0x551   : > { %v10335_v10 = vadd.f32 %v10283_v46, %v17871_v49  ;;  %v10398_v44 = vadd.f32 %v17904_v23, %v10366_v0 }
 0x552   : > { %v12309_v24 = vpop.f32.mrf.mxu1 }
 0x553   : > { %v10367_v31 = vmul.f32 %v17897_v59, %v10335_v10  ;;  %12401 = vtanh.f32 %v10398_v44 }
 0x554   : > { %v12396_v39 = vpop.eup %12395  ;;  %v10288_v7 = vpop.f32.mrf.mxu1 }
 0x555   : > { %v11217_v3 = vpack.c.bf16 %v12396_v39, %v12394_v29  ;;  %v10399_v9 = vadd.f32 %v17904_v23, %v10367_v31  ;;  %v10336_v57 = vadd.f32 %v10288_v7, %v17874_v15 }
 0x556   : > { %v12312_v51 = vpop.f32.mrf.mxu1 }
 0x557   : > { %11249 = vst [vmem:[%s17925_s16 + $0x30] sm:$0xff] %v11217_v3   ;;  %12403 = vtanh.f32 %v10399_v9  ;;  %v10368_v49 = vmul.f32 %v17897_v59, %v10336_v57 }
 0x558   : > { %v10291_v1 = vpop.f32.mrf.mxu1  ;;  %v12398_v36 = vpop.eup %12397 }
 0x559   : > { %v10337_v62 = vadd.f32 %v10291_v1, %v17877_v18  ;;  %v10400_v34 = vadd.f32 %v17904_v23, %v10368_v49 }
 0x55a   : > { %v12313_v11 = vpop.f32.mrf.mxu1 }
 0x55b   : > { %v10369_v19 = vmul.f32 %v17897_v59, %v10337_v62  ;;  %12405 = vtanh.f32 %v10400_v34 }
 0x55c   : > { %v12400_v25 = vpop.eup %12399  ;;  %v10296_v6 = vpop.f32.mrf.mxu1 }
 0x55d   : > { %v11222_v16 = vpack.c.bf16 %v12400_v25, %v12398_v36  ;;  %v10401_v15 = vadd.f32 %v17904_v23, %v10369_v19  ;;  %v10338_v2 = vadd.f32 %v10296_v6, %v17880_v38 }
 0x55e   : > { %v12316_v21 = vpop.f32.mrf.mxu1 }
 0x55f   : > { %11250 = vst [vmem:[%s17925_s16 + $0x38] sm:$0xff] %v11222_v16   ;;  %12407 = vtanh.f32 %v10401_v15  ;;  %v10370_v18 = vmul.f32 %v17897_v59, %v10338_v2 }
 0x560   : > { %v10299_v13 = vpop.f32.mrf.mxu1  ;;  %v12402_v61 = vpop.eup %12401 }
 0x561   : > { %v10339_v5 = vadd.f32 %v10299_v13, %v17883_v52  ;;  %v10402_v20 = vadd.f32 %v17904_v23, %v10370_v18 }
 0x562   : > { %v12317_v53 = vpop.f32.mrf.mxu1 }
 0x563   : > { %v10371_v26 = vmul.f32 %v17897_v59, %v10339_v5  ;;  %12409 = vtanh.f32 %v10402_v20 }
 0x564   : > { %v12404_v42 = vpop.eup %12403  ;;  %v10304_v60 = vpop.f32.mrf.mxu1 }
 0x565   : > { %v11227_v56 = vpack.c.bf16 %v12404_v42, %v12402_v61  ;;  %v10403_v38 = vadd.f32 %v17904_v23, %v10371_v26  ;;  %v10340_v48 = vadd.f32 %v10304_v60, %v17886_v58 }
 0x566   : > { %v12320_v4 = vpop.f32.mrf.mxu1 }
 0x567   : > { %11251 = vst [vmem:[%s17925_s16 + $0x40] sm:$0xff] %v11227_v56   ;;  %12411 = vtanh.f32 %v10403_v38  ;;  %v10372_v52 = vmul.f32 %v17897_v59, %v10340_v48 }
 0x568   : > { %v10307_v8 = vpop.f32.mrf.mxu1  ;;  %v12406_v30 = vpop.eup %12405 }
 0x569   : > { %v10341_v50 = vadd.f32 %v10307_v8, %v17889_v63  ;;  %v10404_v14 = vadd.f32 %v17904_v23, %v10372_v52 }
 0x56a   : > { %v12321_v45 = vpop.f32.mrf.mxu1 }
 0x56b   : > { %v10373_v27 = vmul.f32 %v17897_v59, %v10341_v50  ;;  %12413 = vtanh.f32 %v10404_v14 }
 0x56c   : > { %v12408_v12 = vpop.eup %12407  ;;  %v10312_v37 = vpop.f32.mrf.mxu1 }
 0x56d   : > { %v11232_v58 = vpack.c.bf16 %v12408_v12, %v12406_v30  ;;  %v10405_v47 = vadd.f32 %v17904_v23, %v10373_v27  ;;  %v10342_v54 = vadd.f32 %v10312_v37, %v17892_v33 }
 0x56e   : > { %v12324_v28 = vpop.f32.mrf.mxu1 }
 0x56f   : > { %11252 = vst [vmem:[%s17925_s16 + $0x48] sm:$0xff] %v11232_v58   ;;  %12415 = vtanh.f32 %v10405_v47  ;;  %v10374_v63 = vmul.f32 %v17897_v59, %v10342_v54 }
 0x570   : > { %v10315_v35 = vpop.f32.mrf.mxu1  ;;  %v12410_v17 = vpop.eup %12409 }
 0x571   : > { %v10406_v32 = vadd.f32 %v17904_v23, %v10374_v63 }
 0x572   : > { %v12325_v40 = vpop.f32.mrf.mxu1 }
 0x573   : > { %12417 = vtanh.f32 %v10406_v32 }
 0x574   : > { %v12412_v22 = vpop.eup %12411 }
 0x575   : > { %v11237_v41 = vpack.c.bf16 %v12412_v22, %v12410_v17 }
 0x577   : > { %11253 = vst [vmem:[%s17925_s16 + $0x50] sm:$0xff] %v11237_v41  }
 0x578   : > { %v12414_v55 = vpop.eup %12413 }
 0x57c   : > { %v12416_v43 = vpop.eup %12415 }
 0x57d   : > { %v11242_v33 = vpack.c.bf16 %v12416_v43, %v12414_v55 }
 0x57f   : > { %11254 = vst [vmem:[%s17925_s16 + $0x58] sm:$0xff] %v11242_v33  }
 0x580   : > { %v12418_v0 = vpop.eup %12417 }
 0x581   : > { %v11183_v46 = vpack.c.bf16 %v12418_v0, %v12418_v0 }
 0x583   : > { %10557 = vst [vmem:[%s17925_s16 + $0x60] sm:$0x3] %v11183_v46 }
 0x584 PF: > { %s17_s24 = sadd.s32 1, %s12427_s24  }
 0x585   : > { %p14_p4 = scmp.ge.s32.totalorder %s17_s24, 4  }
 0x587   :  { %16 = sbr.rel (!%p14_p4) target bundleno = 1 (0x1), region = 94 }

</bundles_post_ra>
